<compile_context>
chip_gen: v7x
topology: tpu7x:2x2x1
jax: 0.10.0
libtpu: 0.0.40
codegen_flags: <defaults>
</compile_context>

<pallas_src>
import functools
import math

import jax
import jax.numpy as jnp
from jax import lax
from jax.experimental import pallas as pl
from jax.experimental.pallas import tpu as pltpu

HIDDEN_SIZE = 768
INTERMEDIATE_SIZE = HIDDEN_SIZE * 4

_INV_SQRT2 = 1.0 / math.sqrt(2.0)
_SQRT_2_OVER_PI = math.sqrt(2.0 / math.pi)
_GELU_C = 0.044715


def _mlp_kernel(x_ref, w1_ref, b1_ref, w2_ref, b2_ref, o_ref, *, approximate):
    # x_ref  : (tm, H)  input token tile (f32; cast to bf16 here for the MXU)
    # w1_ref : (H, I)   bf16 fc1 weight, VMEM-resident (constant index_map)
    # b1_ref : (1, I)   f32 fc1 bias
    # w2_ref : (I, H)   bf16 fc2 weight, VMEM-resident
    # b2_ref : (1, H)   f32 fc2 bias
    # o_ref  : (tm, H)  output tile
    x = x_ref[...].astype(jnp.bfloat16)

    # fc1: (tm, H) @ (H, I) -> f32 (tm, I), accumulate in f32
    h = jnp.dot(x, w1_ref[...], preferred_element_type=jnp.float32)
    h = h + b1_ref[...]

    if approximate:
        # tanh GELU: tanh goes to the EUP (its own bundle slot), leaving the
        # VALU slot free -> the kernel stays MXU-bound on v6e/v7x.
        inner = _SQRT_2_OVER_PI * (h + _GELU_C * (h * h * h))
        h = 0.5 * h * (1.0 + jnp.tanh(inner))
    else:
        # exact erf GELU (matches torch.nn.functional.gelu default); the erf
        # polynomial is VALU-heavy, fine on v5e where the MXU dominates.
        h = 0.5 * h * (1.0 + lax.erf(h * _INV_SQRT2))

    # fc2: (tm, I) @ (I, H) -> f32 (tm, H), single matmul (no reduction axis)
    out = jnp.dot(h.astype(jnp.bfloat16), w2_ref[...],
                  preferred_element_type=jnp.float32)
    o_ref[...] = (out + b2_ref[...]).astype(o_ref.dtype)


def _round_up(a, b):
    return (a + b - 1) // b * b


def mlp_pallas(x, w1, b1, w2, b2, *, tile_m=None, approximate_gelu=True):
    """x: (B, S, H) -> (B, S, H). w1: (H, I), b1: (I,), w2: (I, H), b2: (H,).

    Weights are used by the MXU in bf16; pre-cast them once at the parameter
    store for best performance (the astype below is a no-op in that case).
    """
    B, S, H = x.shape
    I = w1.shape[1]
    M = B * S
    out_dtype = x.dtype

    w1_bf = w1 if w1.dtype == jnp.bfloat16 else w1.astype(jnp.bfloat16)
    w2_bf = w2 if w2.dtype == jnp.bfloat16 else w2.astype(jnp.bfloat16)
    b1_2d = b1.reshape(1, I).astype(jnp.float32)
    b2_2d = b2.reshape(1, H).astype(jnp.float32)

    # x stays in its input dtype; the bf16 cast happens per tile in-kernel
    # (avoids an extra full HBM read+write of the activations per call).
    x2d = x.reshape(M, H)

    if tile_m is None:
        # 256 is MXU-aligned; for tiny token counts round up to a multiple of
        # 16 (bf16 sublane packing).
        tile_m = 256 if M >= 256 else _round_up(M, 16)

    # Pad the token dimension instead of asserting divisibility.
    M_pad = _round_up(M, tile_m)
    if M_pad != M:
        x2d = jnp.pad(x2d, ((0, M_pad - M), (0, 0)))

    grid = (M_pad // tile_m,)
    kernel = functools.partial(_mlp_kernel, approximate=approximate_gelu)

    out = pl.pallas_call(
        kernel,
        out_shape=jax.ShapeDtypeStruct((M_pad, H), out_dtype),
        grid_spec=pltpu.PrefetchScalarGridSpec(
            num_scalar_prefetch=0,
            grid=grid,
            in_specs=[
                pl.BlockSpec((tile_m, H), lambda i: (i, 0)),  # x tile (streamed)
                pl.BlockSpec((H, I), lambda i: (0, 0)),       # w1: VMEM-resident
                pl.BlockSpec((1, I), lambda i: (0, 0)),       # b1: resident
                pl.BlockSpec((I, H), lambda i: (0, 0)),       # w2: VMEM-resident
                pl.BlockSpec((1, H), lambda i: (0, 0)),       # b2: resident
            ],
            out_specs=pl.BlockSpec((tile_m, H), lambda i: (i, 0)),
        ),
        compiler_params=pltpu.CompilerParams(
            # TODO(synk): on v7x, switch to pltpu.CORE_PARALLEL on the M axis
            # to shard tiles across both TensorCores; "parallel" is portable.
            dimension_semantics=("parallel",),
            vmem_limit_bytes=48 * 1024 * 1024,  # ~25 MiB used; < v7x's 64 MiB
        ),
    )(x2d, w1_bf, b1_2d, w2_bf, b2_2d)

    if M_pad != M:
        out = out[:M]
    return out.reshape(B, S, H)


def init_mlp_params(key, hidden=HIDDEN_SIZE, intermediate=INTERMEDIATE_SIZE,
                    dtype=jnp.float32):
    """Deterministic init mimicking nn.Linear default (uniform ±1/sqrt(fan_in))."""
    k1, k2, k3, k4 = jax.random.split(key, 4)
    bound1 = 1.0 / math.sqrt(hidden)
    bound2 = 1.0 / math.sqrt(intermediate)
    # PyTorch stores W as (out, in); we keep the transposed (in, out) layout.
    w1 = jax.random.uniform(k1, (hidden, intermediate), dtype, -bound1, bound1)
    b1 = jax.random.uniform(k2, (intermediate,), dtype, -bound1, bound1)
    w2 = jax.random.uniform(k3, (intermediate, hidden), dtype, -bound2, bound2)
    b2 = jax.random.uniform(k4, (hidden,), dtype, -bound2, bound2)
    return w1, b1, w2, b2


def mlp_reference(x, w1, b1, w2, b2):
    """Pure-JAX f32 reference (exact erf GELU), same math as the torch module."""
    h = x @ w1 + b1
    h = 0.5 * h * (1.0 + lax.erf(h * _INV_SQRT2))
    return h @ w2 + b2


if __name__ == "__main__":
    key = jax.random.PRNGKey(0)
    kx, kp = jax.random.split(key)

    batch, seq = 2, 8  # small token count; hidden size fixed by the module
    x = jax.random.normal(kx, (batch, seq, HIDDEN_SIZE), dtype=jnp.float32)
    w1, b1, w2, b2 = init_mlp_params(kp)

    # Pre-cast weights to bf16 once (parameter store) so the wrapper does no
    # per-call conversion passes.
    w1_bf = w1.astype(jnp.bfloat16)
    w2_bf = w2.astype(jnp.bfloat16)

    out = mlp_pallas(x, w1_bf, b1, w2_bf, b2)
    out = jax.block_until_ready(out)

    ref = mlp_reference(x, w1, b1, w2, b2)
    assert out.shape == (batch, seq, HIDDEN_SIZE)
    # bf16 MXU operands + tanh-approx GELU vs f32 erf reference -> ~1e-2 agreement.
    assert jnp.allclose(out, ref, atol=5e-2, rtol=5e-2), "mismatch vs reference"

    print("KERNEL_OK")
</pallas_src>

<mosaic_0001>
module attributes {stable_mosaic.version = 11 : i64} {
  func.func @_mlp_kernel(%arg0: i32, %arg1: memref<16x768xf32, #tpu.memory_space<vmem>>, %arg2: memref<768x3072xbf16, #tpu.memory_space<vmem>>, %arg3: memref<1x3072xf32, #tpu.memory_space<vmem>>, %arg4: memref<3072x768xbf16, #tpu.memory_space<vmem>>, %arg5: memref<1x768xf32, #tpu.memory_space<vmem>>, %arg6: memref<16x768xf32, #tpu.memory_space<vmem>>) attributes {dimension_semantics = [#tpu.dimension_semantics<parallel>], iteration_bounds = array<i64: 1>, scalar_prefetch = 0 : i64, scratch_operands = 0 : i64, tpu.core_type = #tpu.core_type<tc>, window_params = [{transform_indices = @transform_0, window_bounds = array<i64: 16, 768>}, {pipeline_mode = #tpu.pipeline_mode<synchronous>, transform_indices = @transform_1, window_bounds = array<i64: 768, 3072>}, {pipeline_mode = #tpu.pipeline_mode<synchronous>, transform_indices = @transform_2, window_bounds = array<i64: 1, 3072>}, {pipeline_mode = #tpu.pipeline_mode<synchronous>, transform_indices = @transform_3, window_bounds = array<i64: 3072, 768>}, {pipeline_mode = #tpu.pipeline_mode<synchronous>, transform_indices = @transform_4, window_bounds = array<i64: 1, 768>}, {transform_indices = @transform_5, window_bounds = array<i64: 16, 768>}]} {
    %c0 = arith.constant 0 : index
    %c0_0 = arith.constant 0 : index
    %0 = vector.load %arg1[%c0, %c0_0] : memref<16x768xf32, #tpu.memory_space<vmem>>, vector<16x768xf32>
    %1 = arith.truncf %0 : vector<16x768xf32> to vector<16x768xbf16>
    %c0_1 = arith.constant 0 : index
    %c0_2 = arith.constant 0 : index
    %2 = vector.load %arg2[%c0_1, %c0_2] : memref<768x3072xbf16, #tpu.memory_space<vmem>>, vector<768x3072xbf16>
    %cst = arith.constant dense<0.000000e+00> : vector<16x3072xf32>
    %3 = tpu.matmul %1, %2, %cst {dimension_numbers = #tpu.dot_dimension_numbers<[1], [0], [0], [1], [0, 0, 1, 1], [], []>} : vector<16x768xbf16>, vector<768x3072xbf16>, vector<16x3072xf32> -> vector<16x3072xf32>
    %c0_3 = arith.constant 0 : index
    %c0_4 = arith.constant 0 : index
    %4 = vector.load %arg3[%c0_3, %c0_4] : memref<1x3072xf32, #tpu.memory_space<vmem>>, vector<1x3072xf32>
    %5 = vector.broadcast %4 : vector<1x3072xf32> to vector<16x3072xf32>
    %6 = arith.addf %3, %5 : vector<16x3072xf32>
    %7 = arith.mulf %6, %6 : vector<16x3072xf32>
    %8 = arith.mulf %7, %6 : vector<16x3072xf32>
    %cst_5 = arith.constant 4.471500e-02 : f32
    %9 = vector.broadcast %cst_5 : f32 to vector<16x3072xf32>
    %10 = arith.mulf %9, %8 : vector<16x3072xf32>
    %11 = arith.addf %6, %10 : vector<16x3072xf32>
    %cst_6 = arith.constant 0.797884583 : f32
    %12 = vector.broadcast %cst_6 : f32 to vector<16x3072xf32>
    %13 = arith.mulf %12, %11 : vector<16x3072xf32>
    %cst_7 = arith.constant 5.000000e-01 : f32
    %14 = vector.broadcast %cst_7 : f32 to vector<16x3072xf32>
    %15 = arith.mulf %14, %6 : vector<16x3072xf32>
    %16 = math.tanh %13 : vector<16x3072xf32>
    %cst_8 = arith.constant 1.000000e+00 : f32
    %17 = vector.broadcast %cst_8 : f32 to vector<16x3072xf32>
    %18 = arith.addf %17, %16 : vector<16x3072xf32>
    %19 = arith.mulf %15, %18 : vector<16x3072xf32>
    %20 = arith.truncf %19 : vector<16x3072xf32> to vector<16x3072xbf16>
    %c0_9 = arith.constant 0 : index
    %c0_10 = arith.constant 0 : index
    %21 = vector.load %arg4[%c0_9, %c0_10] : memref<3072x768xbf16, #tpu.memory_space<vmem>>, vector<3072x768xbf16>
    %cst_11 = arith.constant dense<0.000000e+00> : vector<16x768xf32>
    %22 = tpu.matmul %20, %21, %cst_11 {dimension_numbers = #tpu.dot_dimension_numbers<[1], [0], [0], [1], [0, 0, 1, 1], [], []>} : vector<16x3072xbf16>, vector<3072x768xbf16>, vector<16x768xf32> -> vector<16x768xf32>
    %c0_12 = arith.constant 0 : index
    %c0_13 = arith.constant 0 : index
    %23 = vector.load %arg5[%c0_12, %c0_13] : memref<1x768xf32, #tpu.memory_space<vmem>>, vector<1x768xf32>
    %24 = vector.broadcast %23 : vector<1x768xf32> to vector<16x768xf32>
    %25 = arith.addf %22, %24 : vector<16x768xf32>
    %c0_14 = arith.constant 0 : index
    %c0_15 = arith.constant 0 : index
    %26 = vector.load %arg6[%c0_14, %c0_15] : memref<16x768xf32, #tpu.memory_space<vmem>>, vector<16x768xf32>
    tpu.vector_store %arg6[%c0_14, %c0_15], %25 {strides = array<i32>} : memref<16x768xf32, #tpu.memory_space<vmem>>, vector<16x768xf32>,
    return
  }
  func.func @transform_0(%arg0: i32) -> (i32, i32) {
    %c0_i32 = arith.constant 0 : i32
    %c0_i32_0 = arith.constant 0 : i32
    return %arg0, %c0_i32 : i32, i32
  }
  func.func @transform_1(%arg0: i32) -> (i32, i32) {
    %c0_i32 = arith.constant 0 : i32
    %c0_i32_0 = arith.constant 0 : i32
    %c0_i32_1 = arith.constant 0 : i32
    return %c0_i32, %c0_i32_0 : i32, i32
  }
  func.func @transform_2(%arg0: i32) -> (i32, i32) {
    %c0_i32 = arith.constant 0 : i32
    %c0_i32_0 = arith.constant 0 : i32
    %c0_i32_1 = arith.constant 0 : i32
    return %c0_i32, %c0_i32_0 : i32, i32
  }
  func.func @transform_3(%arg0: i32) -> (i32, i32) {
    %c0_i32 = arith.constant 0 : i32
    %c0_i32_0 = arith.constant 0 : i32
    %c0_i32_1 = arith.constant 0 : i32
    return %c0_i32, %c0_i32_0 : i32, i32
  }
  func.func @transform_4(%arg0: i32) -> (i32, i32) {
    %c0_i32 = arith.constant 0 : i32
    %c0_i32_0 = arith.constant 0 : i32
    %c0_i32_1 = arith.constant 0 : i32
    return %c0_i32, %c0_i32_0 : i32, i32
  }
  func.func @transform_5(%arg0: i32) -> (i32, i32) {
    %c0_i32 = arith.constant 0 : i32
    %c0_i32_0 = arith.constant 0 : i32
    return %arg0, %c0_i32 : i32, i32
  }
}

</mosaic_0001>

<bundles_post_ra>
// kernel: tpu_custom_call.1
= control target key start
LH: loop header
LB: loop body
LE: loop exit
PB: predicated region body
PF: predicated region fallthrough
CT: control target
= control target key end

     0   :  { %10 = vsyncpa [#allocation3], 0  ;;  %s23146_s0 = inlined_call_operand.hbm [shape: f32[16,768], index: 0, kind: input, shape index: {}]   ;;  %s23147_s1 = inlined_call_operand.hbm [shape: bf16[768,3072], index: 1, kind: input, shape index: {}]   ;;  %s23148_s2 = inlined_call_operand.hbm [shape: f32[1,3072], index: 2, kind: input, shape index: {}]   ;;  %s23149_s3 = inlined_call_operand.hbm [shape: bf16[3072,768], index: 3, kind: input, shape index: {}]   ;;  %s23150_s4 = inlined_call_operand.hbm [shape: f32[1,768], index: 4, kind: input, shape index: {}]   ;;  %s23151_s5 = inlined_call_operand.hbm [shape: f32[16,768], index: 5, kind: output, shape index: {}]  }
   0x1   :  { %11 = vsyncpa [#allocation6], 0 }
   0x2   :  { %12 = vsyncpa [#allocation9], 0 }
   0x3   :  { %13 = vsyncpa [#allocation4], 0  ;;  %s22244_s18 = smov [#allocation5]   ;;  %s22104_s22 = scalar_lea.hbm %s23147_s1, 147456 }
   0x4   :  { %s31_s19 = sshll.u32 %s22244_s18, 4  ;;  %p22105_p0 = scmp.ne.s32.totalorder %s23147_s1, %s22104_s22  ;;  %s32_s19 = int_to_ptr.vmem [resolvable:$true] %s31_s19 }
   0x5   :  { %p22108_p1 = scmp.lt.u32.totalorder %s22104_s22, %s23147_s1 }
   0x7   :  { %p22110_p2 = pnand %p22108_p1, %p22105_p0 }
   0x9   :  { %22113 = shalt.err (!%p22110_p2)
}
   0xa   :  { %s22114_s27 = scalar_lea.vmem %s32_s19, 147456  ;;  %p22119_p4 = scmp.lt.s32.totalorder %s32_s19, %s32_s19 }
   0xb   :  { %p22115_p3 = scmp.ne.s32.totalorder %s32_s19, %s22114_s27  ;;  %p22120_p5 = scmp.lt.s32.totalorder %s22114_s27, %s22114_s27 }
   0xd   :  { %p22121_p6 = por %p22120_p5, %p22119_p4 }
   0xf   :  { %p22122_p7 = pnand %p22121_p6, %p22115_p3 }
  0x11   :  { %22125 = shalt.err (!%p22122_p7)
}
  0x12   :  { %s22245_s28 = smov 1536   ;;  %s22246_s29 = smov 96  }
  0x13   :  { %37 = dma.hbm_to_vmem [thread:$0]  %s23147_s1, 147456, %s32_s19, [#allocation6], %s22245_s28, %s22245_s28, %s22246_s29  }
  0x14   :  { %s22247_s7 = smov [#allocation8]   ;;  %s22126_s11 = scalar_lea.hbm %s23149_s3, 147456 }
  0x15   :  { %s53_s8 = sshll.u32 %s22247_s7, 4  ;;  %p22127_p8 = scmp.ne.s32.totalorder %s23149_s3, %s22126_s11  ;;  %s54_s8 = int_to_ptr.vmem [resolvable:$true] %s53_s8 }
  0x16   :  { %p22130_p9 = scmp.lt.u32.totalorder %s22126_s11, %s23149_s3 }
  0x18   :  { %p22132_p10 = pnand %p22130_p9, %p22127_p8 }
  0x1a   :  { %22135 = shalt.err (!%p22132_p10)
}
  0x1b   :  { %s22136_s16 = scalar_lea.vmem %s54_s8, 147456  ;;  %p22141_p12 = scmp.lt.s32.totalorder %s54_s8, %s54_s8 }
  0x1c   :  { %p22137_p11 = scmp.ne.s32.totalorder %s54_s8, %s22136_s16  ;;  %p22142_p13 = scmp.lt.s32.totalorder %s22136_s16, %s22136_s16 }
  0x1e   :  { %p22143_p0 = por %p22142_p13, %p22141_p12 }
  0x20   :  { %p22144_p1 = pnand %p22143_p0, %p22137_p11 }
  0x22   :  { %22147 = shalt.err (!%p22144_p1)
}
  0x23   :  { %s22248_s1 = smov 384   ;;  %s22249_s17 = smov 24  }
  0x24   :  { %59 = dma.hbm_to_vmem [thread:$0]  %s23149_s3, 147456, %s54_s8, [#allocation9], %s22248_s1, %s22248_s1, %s22249_s17  }
  0x25   :  { %s22250_s20 = smov [#allocation2]   ;;  %s22148_s24 = scalar_lea.hbm %s23146_s0, 1536 }
  0x26   :  { %s19_s21 = sshll.u32 %s22250_s20, 4  ;;  %p22149_p2 = scmp.ne.s32.totalorder %s23146_s0, %s22148_s24  ;;  %s20_s21 = int_to_ptr.vmem [resolvable:$true] %s19_s21 }
  0x27   :  { %p22152_p3 = scmp.lt.u32.totalorder %s22148_s24, %s23146_s0 }
  0x29   :  { %p22154_p4 = pnand %p22152_p3, %p22149_p2 }
  0x2b   :  { %22157 = shalt.err (!%p22154_p4)
}
  0x2c   :  { %s22158_s29 = scalar_lea.vmem %s20_s21, 1536  ;;  %p22163_p6 = scmp.lt.s32.totalorder %s20_s21, %s20_s21 }
  0x2d   :  { %p22159_p5 = scmp.ne.s32.totalorder %s20_s21, %s22158_s29  ;;  %p22164_p7 = scmp.lt.s32.totalorder %s22158_s29, %s22158_s29 }
  0x2f   :  { %p22165_p8 = por %p22164_p7, %p22163_p6 }
  0x31   :  { %p22166_p9 = pnand %p22165_p8, %p22159_p5 }
  0x33   :  { %22169 = shalt.err (!%p22166_p9)
}
  0x34   :  { %s22251_s3 = smov 768   ;;  %s22252_s30 = smov 48  }
  0x35   :  { %25 = dma.hbm_to_vmem [thread:$0]  %s23146_s0, 1536, %s20_s21, [#allocation3], %s22251_s3, %s22251_s3, %s22252_s30  }
  0x36   :  { %s22253_s8 = smov [#allocation7]   ;;  %s22254_s10 = smov [#allocation10]  }
  0x37   :  { %s44_s9 = sshll.u32 %s22253_s8, 4  ;;  %s66_s11 = sshll.u32 %s22254_s10, 4  ;;  %s45_s9 = int_to_ptr.vmem [resolvable:$true] %s44_s9  ;;  %s67_s11 = int_to_ptr.vmem [resolvable:$true] %s66_s11 }
  0x38   :  { %s22170_s14 = scalar_lea.hbm %s23148_s2, 384 }
  0x39   :  { %p22171_p10 = scmp.ne.s32.totalorder %s23148_s2, %s22170_s14  ;;  %p22174_p11 = scmp.lt.u32.totalorder %s22170_s14, %s23148_s2 }
  0x3b   :  { %p22176_p12 = pnand %p22174_p11, %p22171_p10 }
  0x3d   :  { %22179 = shalt.err (!%p22176_p12)
}
  0x3e   :  { %s22180_s0 = scalar_lea.vmem %s45_s9, 384  ;;  %p22185_p0 = scmp.lt.s32.totalorder %s45_s9, %s45_s9 }
  0x3f   :  { %p22181_p13 = scmp.ne.s32.totalorder %s45_s9, %s22180_s0  ;;  %p22186_p1 = scmp.lt.s32.totalorder %s22180_s0, %s22180_s0 }
  0x41   :  { %p22187_p2 = por %p22186_p1, %p22185_p0 }
  0x43   :  { %p22188_p3 = pnand %p22187_p2, %p22181_p13 }
  0x45   :  { %22191 = shalt.err (!%p22188_p3)
}
  0x46   :  { %47 = dma.hbm_to_vmem [thread:$0]  %s23148_s2, 384, %s45_s9, [#allocation6]  }
  0x47   :  { %s22192_s22 = scalar_lea.hbm %s23150_s4, 96 }
  0x48   :  { %p22193_p4 = scmp.ne.s32.totalorder %s23150_s4, %s22192_s22  ;;  %p22196_p5 = scmp.lt.u32.totalorder %s22192_s22, %s23150_s4 }
  0x4a   :  { %p22198_p6 = pnand %p22196_p5, %p22193_p4 }
  0x4c   :  { %22201 = shalt.err (!%p22198_p6)
}
  0x4d   :  { %s22202_s27 = scalar_lea.vmem %s67_s11, 96  ;;  %p22207_p8 = scmp.lt.s32.totalorder %s67_s11, %s67_s11 }
  0x4e   :  { %p22203_p7 = scmp.ne.s32.totalorder %s67_s11, %s22202_s27  ;;  %p22208_p9 = scmp.lt.s32.totalorder %s22202_s27, %s22202_s27 }
  0x50   :  { %p22209_p10 = por %p22208_p9, %p22207_p8 }
  0x52   :  { %p22210_p11 = pnand %p22209_p10, %p22203_p7 }
  0x54   :  { %22213 = shalt.err (!%p22210_p11)
}
  0x55   :  { %69 = dma.hbm_to_vmem [thread:$0]  %s23150_s4, 96, %s67_s11, [#allocation9]  }
  0x56   :  { %22236 = dma.done.wait [#allocation3], 1536  }
  0x57   :  { %22237 = vsyncadd [#allocation3], 4294965760 }
  0x58   :  { %22238 = dma.done.wait [#allocation6], 147840  }
  0x59   :  { %22239 = vsyncadd [#allocation6], 4294819456 }
  0x5a   :  { %22240 = dma.done.wait [#allocation9], 147552  }
  0x5b   :  { %22241 = vsyncadd [#allocation9], 4294819744  ;;  %v103_v0 = vld [vmem:[#allocation5] sm:$0xff]  ;;  %v86_v53 = vld [vmem:[#allocation2 + $0x8] sm:$0xff]  ;;  %s22255_s4 = smov [#allocation11]  }
  0x5c   :  { %v115_v1 = vld [vmem:[#allocation5 + $0x60] sm:$0xff]  ;;  %v92_v54 = vld [vmem:[#allocation2 + $0x38] sm:$0xff]  ;;  %s17654_s29 = sshll.u32 %s22255_s4, 4  ;;  %s17655_s29 = int_to_ptr.vmem [resolvable:$true] %s17654_s29 }
  0x5d   :  { %v107_v2 = vld [vmem:[#allocation5 + $0x20] sm:$0xff]  ;;  %v17669_v3 = vcombine.high %v103_v0, %v115_v1  ;;  %v17668_v5 = vcombine.low %v103_v0, %v115_v1  ;;  %v22349_v58 = vpack.c.bf16 %v92_v54, %v86_v53  ;;  %s22214_s6 = scalar_lea.vmem %s17655_s29, 1536  ;;  %p22219_p13 = scmp.lt.s32.totalorder %s17655_s29, %s17655_s29 }
  0x5e   :  { %v119_v4 = vld [vmem:[#allocation5 + $0x80] sm:$0xff]  ;;  %p22215_p12 = scmp.ne.s32.totalorder %s17655_s29, %s22214_s6  ;;  %p22220_p0 = scmp.lt.s32.totalorder %s22214_s6, %s22214_s6 }
  0x5f   :  { %v127_v6 = vld [vmem:[#allocation5 + $0xc0] sm:$0xff]  ;;  %v17677_v8 = vcombine.high %v107_v2, %v119_v4  ;;  %v17676_v9 = vcombine.low %v107_v2, %v119_v4  ;;  %7141 = vmatprep.subr.bf16.mxu1 %v17669_v3  ;;  %7173 = vmatprep.mubr.bf16.mxu1 %v22349_v58 }
  0x60   :  { %v139_v7 = vld [vmem:[#allocation5 + $0x120] sm:$0xff]  ;;  %7142 = vmatpush1.bf16.msra.mxu1 %v17668_v5  ;;  %7689 = vmatprep.mubr.bf16.mxu0 %v22349_v58  ;;  %p22221_p1 = por %p22220_p0, %p22219_p13 }
  0x61   :  { %v17693_v10 = vcombine.high %v127_v6, %v139_v7  ;;  %v131_v11 = vld [vmem:[#allocation5 + $0xe0] sm:$0xff]  ;;  %7657 = vmatprep.subr.bf16.mxu0 %v17677_v8  ;;  %v17692_v18 = vcombine.low %v127_v6, %v139_v7 }
  0x62   :  { %v143_v12 = vld [vmem:[#allocation5 + $0x140] sm:$0xff]  ;;  %7658 = vmatpush1.bf16.msra.mxu0 %v17676_v9  ;;  %p22222_p2 = pnand %p22221_p1, %p22215_p12 }
  0x63   :  { %v151_v13 = vld [vmem:[#allocation5 + $0x180] sm:$0xff]  ;;  %v17701_v14 = vcombine.high %v131_v11, %v143_v12  ;;  %7143 = vmatprep.subr.bf16.mxu1 %v17693_v10  ;;  %v17700_v19 = vcombine.low %v131_v11, %v143_v12 }
  0x64   :  { %v163_v15 = vld [vmem:[#allocation5 + $0x1e0] sm:$0xff]  ;;  %7144 = vmatpush1.bf16.msra.mxu1 %v17692_v18 }
  0x65   :  { %v155_v16 = vld [vmem:[#allocation5 + $0x1a0] sm:$0xff]  ;;  %v17717_v20 = vcombine.high %v151_v13, %v163_v15  ;;  %7659 = vmatprep.subr.bf16.mxu0 %v17701_v14  ;;  %v17716_v26 = vcombine.low %v151_v13, %v163_v15 }
  0x66   :  { %v167_v17 = vld [vmem:[#allocation5 + $0x200] sm:$0xff]  ;;  %7660 = vmatpush1.bf16.msra.mxu0 %v17700_v19 }
  0x67   :  { %v17725_v21 = vcombine.high %v155_v16, %v167_v17  ;;  %v175_v22 = vld [vmem:[#allocation5 + $0x240] sm:$0xff]  ;;  %7145 = vmatprep.subr.bf16.mxu1 %v17717_v20  ;;  %v17724_v27 = vcombine.low %v155_v16, %v167_v17 }
  0x68   :  { %v187_v23 = vld [vmem:[#allocation5 + $0x2a0] sm:$0xff]  ;;  %7146 = vmatpush1.bf16.msra.mxu1 %v17716_v26 }
  0x69   :  { %v179_v24 = vld [vmem:[#allocation5 + $0x260] sm:$0xff]  ;;  %v17741_v28 = vcombine.high %v175_v22, %v187_v23  ;;  %7661 = vmatprep.subr.bf16.mxu0 %v17725_v21  ;;  %v17740_v34 = vcombine.low %v175_v22, %v187_v23 }
  0x6a   :  { %v191_v25 = vld [vmem:[#allocation5 + $0x2c0] sm:$0xff]  ;;  %7662 = vmatpush1.bf16.msra.mxu0 %v17724_v27 }
  0x6b   :  { %v17749_v29 = vcombine.high %v179_v24, %v191_v25  ;;  %v199_v30 = vld [vmem:[#allocation5 + $0x300] sm:$0xff]  ;;  %7147 = vmatprep.subr.bf16.mxu1 %v17741_v28  ;;  %v17748_v35 = vcombine.low %v179_v24, %v191_v25 }
  0x6c   :  { %v211_v31 = vld [vmem:[#allocation5 + $0x360] sm:$0xff]  ;;  %7148 = vmatpush1.bf16.msra.mxu1 %v17740_v34 }
  0x6d   :  { %v203_v32 = vld [vmem:[#allocation5 + $0x320] sm:$0xff]  ;;  %v17765_v36 = vcombine.high %v199_v30, %v211_v31  ;;  %7663 = vmatprep.subr.bf16.mxu0 %v17749_v29  ;;  %v17764_v42 = vcombine.low %v199_v30, %v211_v31 }
  0x6e   :  { %v215_v33 = vld [vmem:[#allocation5 + $0x380] sm:$0xff]  ;;  %7664 = vmatpush1.bf16.msra.mxu0 %v17748_v35 }
  0x6f   :  { %v17773_v37 = vcombine.high %v203_v32, %v215_v33  ;;  %v223_v38 = vld [vmem:[#allocation5 + $0x3c0] sm:$0xff]  ;;  %7149 = vmatprep.subr.bf16.mxu1 %v17765_v36  ;;  %v17772_v43 = vcombine.low %v203_v32, %v215_v33 }
  0x70   :  { %v235_v39 = vld [vmem:[#allocation5 + $0x420] sm:$0xff]  ;;  %7150 = vmatpush1.bf16.msra.mxu1 %v17764_v42 }
  0x71   :  { %v227_v40 = vld [vmem:[#allocation5 + $0x3e0] sm:$0xff]  ;;  %v17789_v44 = vcombine.high %v223_v38, %v235_v39  ;;  %7665 = vmatprep.subr.bf16.mxu0 %v17773_v37  ;;  %v17788_v50 = vcombine.low %v223_v38, %v235_v39 }
  0x72   :  { %v239_v41 = vld [vmem:[#allocation5 + $0x440] sm:$0xff]  ;;  %7666 = vmatpush1.bf16.msra.mxu0 %v17772_v43 }
  0x73   :  { %v17797_v45 = vcombine.high %v227_v40, %v239_v41  ;;  %v247_v46 = vld [vmem:[#allocation5 + $0x480] sm:$0xff]  ;;  %7151 = vmatprep.subr.bf16.mxu1 %v17789_v44  ;;  %v17796_v51 = vcombine.low %v227_v40, %v239_v41 }
  0x74   :  { %v259_v47 = vld [vmem:[#allocation5 + $0x4e0] sm:$0xff]  ;;  %7152 = vmatpush1.bf16.msra.mxu1 %v17788_v50 }
  0x75   :  { %v251_v48 = vld [vmem:[#allocation5 + $0x4a0] sm:$0xff]  ;;  %v17813_v52 = vcombine.high %v247_v46, %v259_v47  ;;  %7667 = vmatprep.subr.bf16.mxu0 %v17797_v45  ;;  %v17812_v61 = vcombine.low %v247_v46, %v259_v47 }
  0x76   :  { %v263_v49 = vld [vmem:[#allocation5 + $0x500] sm:$0xff]  ;;  %7668 = vmatpush1.bf16.msra.mxu0 %v17796_v51 }
  0x77   :  { %v17821_v55 = vcombine.high %v251_v48, %v263_v49  ;;  %v271_v56 = vld [vmem:[#allocation5 + $0x540] sm:$0xff]  ;;  %7153 = vmatprep.subr.bf16.mxu1 %v17813_v52  ;;  %v17820_v62 = vcombine.low %v251_v48, %v263_v49 }
  0x78   :  { %v283_v57 = vld [vmem:[#allocation5 + $0x5a0] sm:$0xff]  ;;  %7154 = vmatpush1.bf16.msra.mxu1 %v17812_v61 }
  0x79   :  { %v275_v59 = vld [vmem:[#allocation5 + $0x560] sm:$0xff]  ;;  %v17837_v63 = vcombine.high %v271_v56, %v283_v57  ;;  %7669 = vmatprep.subr.bf16.mxu0 %v17821_v55  ;;  %v17836_v5 = vcombine.low %v271_v56, %v283_v57 }
  0x7a   :  { %v287_v60 = vld [vmem:[#allocation5 + $0x5c0] sm:$0xff]  ;;  %7670 = vmatpush1.bf16.msra.mxu0 %v17820_v62 }
  0x7b   :  { %v17845_v0 = vcombine.high %v275_v59, %v287_v60  ;;  %v295_v1 = vld [vmem:[#allocation5 + $0x600] sm:$0xff]  ;;  %7155 = vmatprep.subr.bf16.mxu1 %v17837_v63  ;;  %v17844_v6 = vcombine.low %v275_v59, %v287_v60 }
  0x7c   :  { %v307_v2 = vld [vmem:[#allocation5 + $0x660] sm:$0xff]  ;;  %7156 = vmatpush1.bf16.msra.mxu1 %v17836_v5 }
  0x7d   :  { %v299_v3 = vld [vmem:[#allocation5 + $0x620] sm:$0xff]  ;;  %v17861_v7 = vcombine.high %v295_v1, %v307_v2  ;;  %7671 = vmatprep.subr.bf16.mxu0 %v17845_v0  ;;  %v17860_v13 = vcombine.low %v295_v1, %v307_v2 }
  0x7e   :  { %v311_v4 = vld [vmem:[#allocation5 + $0x680] sm:$0xff]  ;;  %7672 = vmatpush1.bf16.msra.mxu0 %v17844_v6 }
  0x7f   :  { %v17869_v8 = vcombine.high %v299_v3, %v311_v4  ;;  %v319_v9 = vld [vmem:[#allocation5 + $0x6c0] sm:$0xff]  ;;  %7157 = vmatprep.subr.bf16.mxu1 %v17861_v7  ;;  %v17868_v14 = vcombine.low %v299_v3, %v311_v4 }
  0x80   :  { %v331_v10 = vld [vmem:[#allocation5 + $0x720] sm:$0xff]  ;;  %7158 = vmatpush1.bf16.msra.mxu1 %v17860_v13 }
  0x81   :  { %v323_v11 = vld [vmem:[#allocation5 + $0x6e0] sm:$0xff]  ;;  %v17885_v15 = vcombine.high %v319_v9, %v331_v10  ;;  %7673 = vmatprep.subr.bf16.mxu0 %v17869_v8  ;;  %v17884_v21 = vcombine.low %v319_v9, %v331_v10  ;;  %v91_v8 = vld [vmem:[#allocation2 + $0x30] sm:$0xff] }
  0x82   :  { %v335_v12 = vld [vmem:[#allocation5 + $0x740] sm:$0xff]  ;;  %7674 = vmatpush1.bf16.msra.mxu0 %v17868_v14 }
  0x83   :  { %v17893_v16 = vcombine.high %v323_v11, %v335_v12  ;;  %v343_v17 = vld [vmem:[#allocation5 + $0x780] sm:$0xff]  ;;  %7159 = vmatprep.subr.bf16.mxu1 %v17885_v15  ;;  %v17892_v22 = vcombine.low %v323_v11, %v335_v12 }
  0x84   :  { %v355_v18 = vld [vmem:[#allocation5 + $0x7e0] sm:$0xff]  ;;  %7160 = vmatpush1.bf16.msra.mxu1 %v17884_v21 }
  0x85   :  { %v347_v19 = vld [vmem:[#allocation5 + $0x7a0] sm:$0xff]  ;;  %v17909_v23 = vcombine.high %v343_v17, %v355_v18  ;;  %7675 = vmatprep.subr.bf16.mxu0 %v17893_v16  ;;  %v17908_v29 = vcombine.low %v343_v17, %v355_v18  ;;  %v88_v17 = vld [vmem:[#allocation2 + $0x18] sm:$0xff]  ;;  %v94_v18 = vld [vmem:[#allocation2 + $0x48] sm:$0xff] }
  0x86   :  { %v359_v20 = vld [vmem:[#allocation5 + $0x800] sm:$0xff]  ;;  %7676 = vmatpush1.bf16.msra.mxu0 %v17892_v22 }
  0x87   :  { %v17917_v24 = vcombine.high %v347_v19, %v359_v20  ;;  %v367_v25 = vld [vmem:[#allocation5 + $0x840] sm:$0xff]  ;;  %7161 = vmatprep.subr.bf16.mxu1 %v17909_v23  ;;  %v17916_v30 = vcombine.low %v347_v19, %v359_v20 }
  0x88   :  { %v379_v26 = vld [vmem:[#allocation5 + $0x8a0] sm:$0xff]  ;;  %7162 = vmatpush1.bf16.msra.mxu1 %v17908_v29 }
  0x89   :  { %v371_v27 = vld [vmem:[#allocation5 + $0x860] sm:$0xff]  ;;  %v17933_v31 = vcombine.high %v367_v25, %v379_v26  ;;  %7677 = vmatprep.subr.bf16.mxu0 %v17917_v24  ;;  %v17932_v37 = vcombine.low %v367_v25, %v379_v26  ;;  %v22355_v25 = vpack.c.bf16 %v94_v18, %v88_v17 }
  0x8a   :  { %v383_v28 = vld [vmem:[#allocation5 + $0x8c0] sm:$0xff]  ;;  %7678 = vmatpush1.bf16.msra.mxu0 %v17916_v30 }
  0x8b   :  { %v17941_v32 = vcombine.high %v371_v27, %v383_v28  ;;  %v391_v33 = vld [vmem:[#allocation5 + $0x900] sm:$0xff]  ;;  %7163 = vmatprep.subr.bf16.mxu1 %v17933_v31  ;;  %v17940_v38 = vcombine.low %v371_v27, %v383_v28 }
  0x8c   :  { %v403_v34 = vld [vmem:[#allocation5 + $0x960] sm:$0xff]  ;;  %7164 = vmatpush1.bf16.msra.mxu1 %v17932_v37 }
  0x8d   :  { %v395_v35 = vld [vmem:[#allocation5 + $0x920] sm:$0xff]  ;;  %v17957_v39 = vcombine.high %v391_v33, %v403_v34  ;;  %7679 = vmatprep.subr.bf16.mxu0 %v17941_v32  ;;  %v17956_v45 = vcombine.low %v391_v33, %v403_v34 }
  0x8e   :  { %v407_v36 = vld [vmem:[#allocation5 + $0x980] sm:$0xff]  ;;  %7680 = vmatpush1.bf16.msra.mxu0 %v17940_v38 }
  0x8f   :  { %v17965_v40 = vcombine.high %v395_v35, %v407_v36  ;;  %v415_v41 = vld [vmem:[#allocation5 + $0x9c0] sm:$0xff]  ;;  %7165 = vmatprep.subr.bf16.mxu1 %v17957_v39  ;;  %v17964_v46 = vcombine.low %v395_v35, %v407_v36 }
  0x90   :  { %v427_v42 = vld [vmem:[#allocation5 + $0xa20] sm:$0xff]  ;;  %7166 = vmatpush1.bf16.msra.mxu1 %v17956_v45 }
  0x91   :  { %v419_v43 = vld [vmem:[#allocation5 + $0x9e0] sm:$0xff]  ;;  %v17981_v47 = vcombine.high %v415_v41, %v427_v42  ;;  %7681 = vmatprep.subr.bf16.mxu0 %v17965_v40  ;;  %v17980_v53 = vcombine.low %v415_v41, %v427_v42 }
  0x92   :  { %v431_v44 = vld [vmem:[#allocation5 + $0xa40] sm:$0xff]  ;;  %7682 = vmatpush1.bf16.msra.mxu0 %v17964_v46 }
  0x93   :  { %v17989_v48 = vcombine.high %v419_v43, %v431_v44  ;;  %v439_v49 = vld [vmem:[#allocation5 + $0xa80] sm:$0xff]  ;;  %7167 = vmatprep.subr.bf16.mxu1 %v17981_v47  ;;  %v17988_v54 = vcombine.low %v419_v43, %v431_v44 }
  0x94   :  { %v451_v50 = vld [vmem:[#allocation5 + $0xae0] sm:$0xff]  ;;  %7168 = vmatpush1.bf16.msra.mxu1 %v17980_v53 }
  0x95   :  { %v443_v51 = vld [vmem:[#allocation5 + $0xaa0] sm:$0xff]  ;;  %v18005_v55 = vcombine.high %v439_v49, %v451_v50  ;;  %7683 = vmatprep.subr.bf16.mxu0 %v17989_v48  ;;  %v18004_v62 = vcombine.low %v439_v49, %v451_v50 }
  0x96   :  { %v455_v52 = vld [vmem:[#allocation5 + $0xb00] sm:$0xff]  ;;  %7684 = vmatpush1.bf16.msra.mxu0 %v17988_v54 }
  0x97   :  { %v18013_v56 = vcombine.high %v443_v51, %v455_v52  ;;  %v463_v57 = vld [vmem:[#allocation5 + $0xb40] sm:$0xff]  ;;  %7169 = vmatprep.subr.bf16.mxu1 %v18005_v55  ;;  %v18012_v63 = vcombine.low %v443_v51, %v455_v52 }
  0x98   :  { %v475_v59 = vld [vmem:[#allocation5 + $0xba0] sm:$0xff]  ;;  %7170 = vmatpush1.bf16.msra.mxu1 %v18004_v62 }
  0x99   :  { %v467_v60 = vld [vmem:[#allocation5 + $0xb60] sm:$0xff]  ;;  %v18029_v0 = vcombine.high %v463_v57, %v475_v59  ;;  %7685 = vmatprep.subr.bf16.mxu0 %v18013_v56  ;;  %v18028_v6 = vcombine.low %v463_v57, %v475_v59 }
  0x9a   :  { %v479_v61 = vld [vmem:[#allocation5 + $0xbc0] sm:$0xff]  ;;  %7686 = vmatpush1.bf16.msra.mxu0 %v18012_v63 }
  0x9b   :  { %v18037_v1 = vcombine.high %v467_v60, %v479_v61  ;;  %v487_v2 = vld [vmem:[#allocation5 + $0xc00] sm:$0xff]  ;;  %7171 = vmatprep.subr.bf16.mxu1 %v18029_v0  ;;  %v18036_v9 = vcombine.low %v467_v60, %v479_v61 }
  0x9c   :  { %v499_v3 = vld [vmem:[#allocation5 + $0xc60] sm:$0xff]  ;;  %7172 = vmatpush1.bf16.msra.mxu1 %v18028_v6 }
  0x9d   :  { %v491_v4 = vld [vmem:[#allocation5 + $0xc20] sm:$0xff]  ;;  %v18053_v10 = vcombine.high %v487_v2, %v499_v3  ;;  %7687 = vmatprep.subr.bf16.mxu0 %v18037_v1  ;;  %v18052_v19 = vcombine.low %v487_v2, %v499_v3 }
  0x9e   :  { %v503_v5 = vld [vmem:[#allocation5 + $0xc80] sm:$0xff]  ;;  %7688 = vmatpush1.bf16.msra.mxu0 %v18036_v9 }
  0x9f   :  { %v85_v7 = vld [vmem:[#allocation2] sm:$0xff]  ;;  %v18061_v11 = vcombine.high %v491_v4, %v503_v5  ;;  %7184 = vmatprep.subr.bf16.mxu1 %v18053_v10  ;;  %v18060_v20 = vcombine.low %v491_v4, %v503_v5 }
  0xa0   :  { %v511_v12 = vld [vmem:[#allocation5 + $0xcc0] sm:$0xff]  ;;  %v22353_v15 = vpack.c.bf16 %v91_v8, %v85_v7 }
  0xa1   :  { %v523_v13 = vld [vmem:[#allocation5 + $0xd20] sm:$0xff]  ;;  %7700 = vmatprep.subr.bf16.mxu0 %v18061_v11 }
  0xa2   :  { %v515_v14 = vld [vmem:[#allocation5 + $0xce0] sm:$0xff]  ;;  %v18077_v21 = vcombine.high %v511_v12, %v523_v13  ;;  %7174 = vmatmul.mubr.bf16.vlgmr.msra.gmra.mrb[0].mxu1 %v22353_v15  ;;  %7690 = vmatmul.mubr.bf16.vlgmr.msra.gmra.mrb[0].mxu0 %v22353_v15  ;;  %v18076_v28 = vcombine.low %v511_v12, %v523_v13 }
  0xa3   :  { %v527_v16 = vld [vmem:[#allocation5 + $0xd40] sm:$0xff]  ;;  %7185 = vmatpush1.bf16.msra.mxu1 %v18052_v19  ;;  %7701 = vmatpush1.bf16.msra.mxu0 %v18060_v20 }
  0xa4   :  { %v18085_v22 = vcombine.high %v515_v14, %v527_v16  ;;  %v535_v23 = vld [vmem:[#allocation5 + $0xd80] sm:$0xff]  ;;  %7186 = vmatprep.subr.bf16.mxu1 %v18077_v21  ;;  %v18084_v29 = vcombine.low %v515_v14, %v527_v16  ;;  %7216 = vmatprep.mubr.bf16.mxu1 %v22355_v25 }
  0xa5   :  { %v547_v24 = vld [vmem:[#allocation5 + $0xde0] sm:$0xff]  ;;  %7732 = vmatprep.mubr.bf16.mxu0 %v22355_v25 }
  0xa6   :  { %v539_v26 = vld [vmem:[#allocation5 + $0xda0] sm:$0xff]  ;;  %v18101_v30 = vcombine.high %v535_v23, %v547_v24  ;;  %7702 = vmatprep.subr.bf16.mxu0 %v18085_v22  ;;  %v18100_v36 = vcombine.low %v535_v23, %v547_v24 }
  0xa7   :  { %v551_v27 = vld [vmem:[#allocation5 + $0xe00] sm:$0xff]  ;;  %7187 = vmatpush1.bf16.msra.mxu1 %v18076_v28  ;;  %7703 = vmatpush1.bf16.msra.mxu0 %v18084_v29 }
  0xa8   :  { %v559_v31 = vld [vmem:[#allocation5 + $0xe40] sm:$0xff]  ;;  %v18109_v33 = vcombine.high %v539_v26, %v551_v27  ;;  %7188 = vmatprep.subr.bf16.mxu1 %v18101_v30  ;;  %v18108_v37 = vcombine.low %v539_v26, %v551_v27 }
  0xa9   :  { %v571_v32 = vld [vmem:[#allocation5 + $0xea0] sm:$0xff] }
  0xaa   :  { %v563_v34 = vld [vmem:[#allocation5 + $0xe60] sm:$0xff]  ;;  %v18125_v38 = vcombine.high %v559_v31, %v571_v32  ;;  %7704 = vmatprep.subr.bf16.mxu0 %v18109_v33  ;;  %v18124_v44 = vcombine.low %v559_v31, %v571_v32 }
  0xab   :  { %v575_v35 = vld [vmem:[#allocation5 + $0xec0] sm:$0xff]  ;;  %7189 = vmatpush1.bf16.msra.mxu1 %v18100_v36  ;;  %7705 = vmatpush1.bf16.msra.mxu0 %v18108_v37 }
  0xac   :  { %v583_v39 = vld [vmem:[#allocation5 + $0xf00] sm:$0xff]  ;;  %v18133_v42 = vcombine.high %v563_v34, %v575_v35  ;;  %7190 = vmatprep.subr.bf16.mxu1 %v18125_v38  ;;  %v18132_v45 = vcombine.low %v563_v34, %v575_v35 }
  0xad   :  { %v595_v40 = vld [vmem:[#allocation5 + $0xf60] sm:$0xff] }
  0xae   :  { %v587_v41 = vld [vmem:[#allocation5 + $0xf20] sm:$0xff]  ;;  %v18149_v46 = vcombine.high %v583_v39, %v595_v40  ;;  %7706 = vmatprep.subr.bf16.mxu0 %v18133_v42  ;;  %v18148_v52 = vcombine.low %v583_v39, %v595_v40 }
  0xaf   :  { %v599_v43 = vld [vmem:[#allocation5 + $0xf80] sm:$0xff]  ;;  %7191 = vmatpush1.bf16.msra.mxu1 %v18124_v44  ;;  %7707 = vmatpush1.bf16.msra.mxu0 %v18132_v45 }
  0xb0   :  { %v607_v47 = vld [vmem:[#allocation5 + $0xfc0] sm:$0xff]  ;;  %v18157_v50 = vcombine.high %v587_v41, %v599_v43  ;;  %7192 = vmatprep.subr.bf16.mxu1 %v18149_v46  ;;  %v18156_v53 = vcombine.low %v587_v41, %v599_v43 }
  0xb1   :  { %v619_v48 = vld [vmem:[#allocation5 + $0x1020] sm:$0xff] }
  0xb2   :  { %v611_v49 = vld [vmem:[#allocation5 + $0xfe0] sm:$0xff]  ;;  %v18173_v54 = vcombine.high %v607_v47, %v619_v48  ;;  %7708 = vmatprep.subr.bf16.mxu0 %v18157_v50  ;;  %v18172_v61 = vcombine.low %v607_v47, %v619_v48 }
  0xb3   :  { %v623_v51 = vld [vmem:[#allocation5 + $0x1040] sm:$0xff]  ;;  %7193 = vmatpush1.bf16.msra.mxu1 %v18148_v52  ;;  %7709 = vmatpush1.bf16.msra.mxu0 %v18156_v53 }
  0xb4   :  { %v631_v55 = vld [vmem:[#allocation5 + $0x1080] sm:$0xff]  ;;  %v18181_v59 = vcombine.high %v611_v49, %v623_v51  ;;  %7194 = vmatprep.subr.bf16.mxu1 %v18173_v54  ;;  %v18180_v62 = vcombine.low %v611_v49, %v623_v51 }
  0xb5   :  { %v643_v56 = vld [vmem:[#allocation5 + $0x10e0] sm:$0xff] }
  0xb6   :  { %v635_v57 = vld [vmem:[#allocation5 + $0x10a0] sm:$0xff]  ;;  %v18197_v63 = vcombine.high %v631_v55, %v643_v56  ;;  %7710 = vmatprep.subr.bf16.mxu0 %v18181_v59  ;;  %v18196_v5 = vcombine.low %v631_v55, %v643_v56 }
  0xb7   :  { %v647_v60 = vld [vmem:[#allocation5 + $0x1100] sm:$0xff]  ;;  %7195 = vmatpush1.bf16.msra.mxu1 %v18172_v61  ;;  %7711 = vmatpush1.bf16.msra.mxu0 %v18180_v62 }
  0xb8   :  { %v655_v0 = vld [vmem:[#allocation5 + $0x1140] sm:$0xff]  ;;  %v18205_v3 = vcombine.high %v635_v57, %v647_v60  ;;  %7196 = vmatprep.subr.bf16.mxu1 %v18197_v63  ;;  %v18204_v6 = vcombine.low %v635_v57, %v647_v60 }
  0xb9   :  { %v667_v1 = vld [vmem:[#allocation5 + $0x11a0] sm:$0xff] }
  0xba   :  { %v659_v2 = vld [vmem:[#allocation5 + $0x1160] sm:$0xff]  ;;  %v18221_v7 = vcombine.high %v655_v0, %v667_v1  ;;  %7712 = vmatprep.subr.bf16.mxu0 %v18205_v3  ;;  %v18220_v13 = vcombine.low %v655_v0, %v667_v1 }
  0xbb   :  { %v671_v4 = vld [vmem:[#allocation5 + $0x11c0] sm:$0xff]  ;;  %7197 = vmatpush1.bf16.msra.mxu1 %v18196_v5  ;;  %7713 = vmatpush1.bf16.msra.mxu0 %v18204_v6 }
  0xbc   :  { %v679_v8 = vld [vmem:[#allocation5 + $0x1200] sm:$0xff]  ;;  %v18229_v11 = vcombine.high %v659_v2, %v671_v4  ;;  %7198 = vmatprep.subr.bf16.mxu1 %v18221_v7  ;;  %v18228_v14 = vcombine.low %v659_v2, %v671_v4 }
  0xbd   :  { %v691_v9 = vld [vmem:[#allocation5 + $0x1260] sm:$0xff] }
  0xbe   :  { %v683_v10 = vld [vmem:[#allocation5 + $0x1220] sm:$0xff]  ;;  %v18245_v16 = vcombine.high %v679_v8, %v691_v9  ;;  %7714 = vmatprep.subr.bf16.mxu0 %v18229_v11  ;;  %v18244_v22 = vcombine.low %v679_v8, %v691_v9 }
  0xbf   :  { %v695_v12 = vld [vmem:[#allocation5 + $0x1280] sm:$0xff]  ;;  %7199 = vmatpush1.bf16.msra.mxu1 %v18220_v13  ;;  %7715 = vmatpush1.bf16.msra.mxu0 %v18228_v14 }
  0xc0   :  { %v703_v17 = vld [vmem:[#allocation5 + $0x12c0] sm:$0xff]  ;;  %v18253_v20 = vcombine.high %v683_v10, %v695_v12  ;;  %7200 = vmatprep.subr.bf16.mxu1 %v18245_v16  ;;  %v18252_v23 = vcombine.low %v683_v10, %v695_v12 }
  0xc1   :  { %v715_v18 = vld [vmem:[#allocation5 + $0x1320] sm:$0xff] }
  0xc2   :  { %v707_v19 = vld [vmem:[#allocation5 + $0x12e0] sm:$0xff]  ;;  %v18269_v24 = vcombine.high %v703_v17, %v715_v18  ;;  %7716 = vmatprep.subr.bf16.mxu0 %v18253_v20  ;;  %v18268_v31 = vcombine.low %v703_v17, %v715_v18  ;;  %v87_v17 = vld [vmem:[#allocation2 + $0x10] sm:$0xff] }
  0xc3   :  { %v719_v21 = vld [vmem:[#allocation5 + $0x1340] sm:$0xff]  ;;  %7201 = vmatpush1.bf16.msra.mxu1 %v18244_v22  ;;  %7717 = vmatpush1.bf16.msra.mxu0 %v18252_v23 }
  0xc4   :  { %v727_v26 = vld [vmem:[#allocation5 + $0x1380] sm:$0xff]  ;;  %v18277_v29 = vcombine.high %v707_v19, %v719_v21  ;;  %7202 = vmatprep.subr.bf16.mxu1 %v18269_v24  ;;  %v18276_v32 = vcombine.low %v707_v19, %v719_v21 }
  0xc5   :  { %v739_v27 = vld [vmem:[#allocation5 + $0x13e0] sm:$0xff] }
  0xc6   :  { %v731_v28 = vld [vmem:[#allocation5 + $0x13a0] sm:$0xff]  ;;  %v18293_v33 = vcombine.high %v727_v26, %v739_v27  ;;  %7718 = vmatprep.subr.bf16.mxu0 %v18277_v29  ;;  %v18292_v39 = vcombine.low %v727_v26, %v739_v27  ;;  %v90_v27 = vld [vmem:[#allocation2 + $0x28] sm:$0xff]  ;;  %v96_v29 = vld [vmem:[#allocation2 + $0x58] sm:$0xff] }
  0xc7   :  { %v743_v30 = vld [vmem:[#allocation5 + $0x1400] sm:$0xff]  ;;  %7203 = vmatpush1.bf16.msra.mxu1 %v18268_v31  ;;  %7719 = vmatpush1.bf16.msra.mxu0 %v18276_v32 }
  0xc8   :  { %v751_v34 = vld [vmem:[#allocation5 + $0x1440] sm:$0xff]  ;;  %v18301_v37 = vcombine.high %v731_v28, %v743_v30  ;;  %7204 = vmatprep.subr.bf16.mxu1 %v18293_v33  ;;  %v18300_v40 = vcombine.low %v731_v28, %v743_v30 }
  0xc9   :  { %v763_v35 = vld [vmem:[#allocation5 + $0x14a0] sm:$0xff] }
  0xca   :  { %v755_v36 = vld [vmem:[#allocation5 + $0x1460] sm:$0xff]  ;;  %v18317_v41 = vcombine.high %v751_v34, %v763_v35  ;;  %7720 = vmatprep.subr.bf16.mxu0 %v18301_v37  ;;  %v18316_v47 = vcombine.low %v751_v34, %v763_v35 }
  0xcb   :  { %v767_v38 = vld [vmem:[#allocation5 + $0x14c0] sm:$0xff]  ;;  %7205 = vmatpush1.bf16.msra.mxu1 %v18292_v39  ;;  %7721 = vmatpush1.bf16.msra.mxu0 %v18300_v40  ;;  %v22363_v39 = vpack.c.bf16 %v96_v29, %v90_v27 }
  0xcc   :  { %v775_v42 = vld [vmem:[#allocation5 + $0x1500] sm:$0xff]  ;;  %v18325_v45 = vcombine.high %v755_v36, %v767_v38  ;;  %7206 = vmatprep.subr.bf16.mxu1 %v18317_v41  ;;  %v18324_v48 = vcombine.low %v755_v36, %v767_v38 }
  0xcd   :  { %v787_v43 = vld [vmem:[#allocation5 + $0x1560] sm:$0xff] }
  0xce   :  { %v779_v44 = vld [vmem:[#allocation5 + $0x1520] sm:$0xff]  ;;  %v18341_v49 = vcombine.high %v775_v42, %v787_v43  ;;  %7722 = vmatprep.subr.bf16.mxu0 %v18325_v45  ;;  %v18340_v55 = vcombine.low %v775_v42, %v787_v43 }
  0xcf   :  { %v791_v46 = vld [vmem:[#allocation5 + $0x1580] sm:$0xff]  ;;  %7207 = vmatpush1.bf16.msra.mxu1 %v18316_v47  ;;  %7723 = vmatpush1.bf16.msra.mxu0 %v18324_v48 }
  0xd0   :  { %v799_v50 = vld [vmem:[#allocation5 + $0x15c0] sm:$0xff]  ;;  %v18349_v53 = vcombine.high %v779_v44, %v791_v46  ;;  %7208 = vmatprep.subr.bf16.mxu1 %v18341_v49  ;;  %v18348_v56 = vcombine.low %v779_v44, %v791_v46 }
  0xd1   :  { %v811_v51 = vld [vmem:[#allocation5 + $0x1620] sm:$0xff] }
  0xd2   :  { %v803_v52 = vld [vmem:[#allocation5 + $0x15e0] sm:$0xff]  ;;  %v18365_v57 = vcombine.high %v799_v50, %v811_v51  ;;  %7724 = vmatprep.subr.bf16.mxu0 %v18349_v53  ;;  %v18364_v0 = vcombine.low %v799_v50, %v811_v51 }
  0xd3   :  { %v815_v54 = vld [vmem:[#allocation5 + $0x1640] sm:$0xff]  ;;  %7209 = vmatpush1.bf16.msra.mxu1 %v18340_v55  ;;  %7725 = vmatpush1.bf16.msra.mxu0 %v18348_v56 }
  0xd4   :  { %v823_v59 = vld [vmem:[#allocation5 + $0x1680] sm:$0xff]  ;;  %v18373_v62 = vcombine.high %v803_v52, %v815_v54  ;;  %7210 = vmatprep.subr.bf16.mxu1 %v18365_v57  ;;  %v18372_v1 = vcombine.low %v803_v52, %v815_v54 }
  0xd5   :  { %v835_v60 = vld [vmem:[#allocation5 + $0x16e0] sm:$0xff] }
  0xd6   :  { %v827_v61 = vld [vmem:[#allocation5 + $0x16a0] sm:$0xff]  ;;  %v18389_v2 = vcombine.high %v823_v59, %v835_v60  ;;  %7726 = vmatprep.subr.bf16.mxu0 %v18373_v62  ;;  %v18388_v8 = vcombine.low %v823_v59, %v835_v60 }
  0xd7   :  { %v839_v63 = vld [vmem:[#allocation5 + $0x1700] sm:$0xff]  ;;  %7211 = vmatpush1.bf16.msra.mxu1 %v18364_v0  ;;  %7727 = vmatpush1.bf16.msra.mxu0 %v18372_v1 }
  0xd8   :  { %v847_v3 = vld [vmem:[#allocation5 + $0x1740] sm:$0xff]  ;;  %v18397_v6 = vcombine.high %v827_v61, %v839_v63  ;;  %7212 = vmatprep.subr.bf16.mxu1 %v18389_v2  ;;  %v18396_v10 = vcombine.low %v827_v61, %v839_v63 }
  0xd9   :  { %v859_v4 = vld [vmem:[#allocation5 + $0x17a0] sm:$0xff] }
  0xda   :  { %v851_v5 = vld [vmem:[#allocation5 + $0x1760] sm:$0xff]  ;;  %v18413_v11 = vcombine.high %v847_v3, %v859_v4  ;;  %7728 = vmatprep.subr.bf16.mxu0 %v18397_v6  ;;  %v18412_v19 = vcombine.low %v847_v3, %v859_v4 }
  0xdb   :  { %v863_v7 = vld [vmem:[#allocation5 + $0x17c0] sm:$0xff]  ;;  %7213 = vmatpush1.bf16.msra.mxu1 %v18388_v8  ;;  %7729 = vmatpush1.bf16.msra.mxu0 %v18396_v10 }
  0xdc   :  { %v871_v9 = vld [vmem:[#allocation5 + $0x1800] sm:$0xff]  ;;  %v18421_v16 = vcombine.high %v851_v5, %v863_v7  ;;  %7214 = vmatprep.subr.bf16.mxu1 %v18413_v11  ;;  %v18420_v22 = vcombine.low %v851_v5, %v863_v7 }
  0xdd   :  { %v883_v12 = vld [vmem:[#allocation5 + $0x1860] sm:$0xff] }
  0xde   :  { %v875_v13 = vld [vmem:[#allocation5 + $0x1820] sm:$0xff]  ;;  %v18437_v23 = vcombine.high %v871_v9, %v883_v12  ;;  %7730 = vmatprep.subr.bf16.mxu0 %v18421_v16  ;;  %v18436_v31 = vcombine.low %v871_v9, %v883_v12 }
  0xdf   :  { %v887_v14 = vld [vmem:[#allocation5 + $0x1880] sm:$0xff]  ;;  %7215 = vmatpush1.bf16.msra.mxu1 %v18412_v19  ;;  %7731 = vmatpush1.bf16.msra.mxu0 %v18420_v22 }
  0xe0   :  { %v93_v18 = vld [vmem:[#allocation2 + $0x40] sm:$0xff]  ;;  %v18445_v28 = vcombine.high %v875_v13, %v887_v14  ;;  %7227 = vmatprep.subr.bf16.mxu1 %v18437_v23  ;;  %v18444_v32 = vcombine.low %v875_v13, %v887_v14 }
  0xe1   :  { %v895_v20 = vld [vmem:[#allocation5 + $0x18c0] sm:$0xff]  ;;  %v22361_v30 = vpack.c.bf16 %v93_v18, %v87_v17 }
  0xe2   :  { %v907_v21 = vld [vmem:[#allocation5 + $0x1920] sm:$0xff]  ;;  %7743 = vmatprep.subr.bf16.mxu0 %v18445_v28 }
  0xe3   :  { %v899_v24 = vld [vmem:[#allocation5 + $0x18e0] sm:$0xff]  ;;  %v18461_v33 = vcombine.high %v895_v20, %v907_v21  ;;  %7217 = vmatmul.mubr.bf16.vlgmr.msra.gmra.mrb[0].mxu1 %v22361_v30  ;;  %7733 = vmatmul.mubr.bf16.vlgmr.msra.gmra.mrb[0].mxu0 %v22361_v30  ;;  %v18460_v40 = vcombine.low %v895_v20, %v907_v21 }
  0xe4   :  { %v911_v26 = vld [vmem:[#allocation5 + $0x1940] sm:$0xff]  ;;  %7228 = vmatpush1.bf16.msra.mxu1 %v18436_v31  ;;  %7744 = vmatpush1.bf16.msra.mxu0 %v18444_v32 }
  0xe5   :  { %v919_v34 = vld [vmem:[#allocation5 + $0x1980] sm:$0xff]  ;;  %v18469_v37 = vcombine.high %v899_v24, %v911_v26  ;;  %7229 = vmatprep.subr.bf16.mxu1 %v18461_v33  ;;  %v18468_v41 = vcombine.low %v899_v24, %v911_v26  ;;  %7259 = vmatprep.mubr.bf16.mxu1 %v22363_v39 }
  0xe6   :  { %v931_v35 = vld [vmem:[#allocation5 + $0x19e0] sm:$0xff]  ;;  %7775 = vmatprep.mubr.bf16.mxu0 %v22363_v39 }
  0xe7   :  { %v923_v36 = vld [vmem:[#allocation5 + $0x19a0] sm:$0xff]  ;;  %v18485_v42 = vcombine.high %v919_v34, %v931_v35  ;;  %7745 = vmatprep.subr.bf16.mxu0 %v18469_v37  ;;  %v18484_v48 = vcombine.low %v919_v34, %v931_v35 }
  0xe8   :  { %v935_v38 = vld [vmem:[#allocation5 + $0x1a00] sm:$0xff]  ;;  %7230 = vmatpush1.bf16.msra.mxu1 %v18460_v40  ;;  %7746 = vmatpush1.bf16.msra.mxu0 %v18468_v41 }
  0xe9   :  { %v943_v43 = vld [vmem:[#allocation5 + $0x1a40] sm:$0xff]  ;;  %v18493_v46 = vcombine.high %v923_v36, %v935_v38  ;;  %7231 = vmatprep.subr.bf16.mxu1 %v18485_v42  ;;  %v18492_v49 = vcombine.low %v923_v36, %v935_v38 }
  0xea   :  { %v955_v44 = vld [vmem:[#allocation5 + $0x1aa0] sm:$0xff] }
  0xeb   :  { %v947_v45 = vld [vmem:[#allocation5 + $0x1a60] sm:$0xff]  ;;  %v18509_v50 = vcombine.high %v943_v43, %v955_v44  ;;  %7747 = vmatprep.subr.bf16.mxu0 %v18493_v46  ;;  %v18508_v56 = vcombine.low %v943_v43, %v955_v44 }
  0xec   :  { %v959_v47 = vld [vmem:[#allocation5 + $0x1ac0] sm:$0xff]  ;;  %7232 = vmatpush1.bf16.msra.mxu1 %v18484_v48  ;;  %7748 = vmatpush1.bf16.msra.mxu0 %v18492_v49 }
  0xed   :  { %v967_v51 = vld [vmem:[#allocation5 + $0x1b00] sm:$0xff]  ;;  %v18517_v54 = vcombine.high %v947_v45, %v959_v47  ;;  %7233 = vmatprep.subr.bf16.mxu1 %v18509_v50  ;;  %v18516_v57 = vcombine.low %v947_v45, %v959_v47 }
  0xee   :  { %v979_v52 = vld [vmem:[#allocation5 + $0x1b60] sm:$0xff] }
  0xef   :  { %v971_v53 = vld [vmem:[#allocation5 + $0x1b20] sm:$0xff]  ;;  %v18533_v59 = vcombine.high %v967_v51, %v979_v52  ;;  %7749 = vmatprep.subr.bf16.mxu0 %v18517_v54  ;;  %v18532_v1 = vcombine.low %v967_v51, %v979_v52 }
  0xf0   :  { %v983_v55 = vld [vmem:[#allocation5 + $0x1b80] sm:$0xff]  ;;  %7234 = vmatpush1.bf16.msra.mxu1 %v18508_v56  ;;  %7750 = vmatpush1.bf16.msra.mxu0 %v18516_v57 }
  0xf1   :  { %v991_v60 = vld [vmem:[#allocation5 + $0x1bc0] sm:$0xff]  ;;  %v18541_v63 = vcombine.high %v971_v53, %v983_v55  ;;  %7235 = vmatprep.subr.bf16.mxu1 %v18533_v59  ;;  %v18540_v2 = vcombine.low %v971_v53, %v983_v55 }
  0xf2   :  { %v1003_v61 = vld [vmem:[#allocation5 + $0x1c20] sm:$0xff] }
  0xf3   :  { %v995_v62 = vld [vmem:[#allocation5 + $0x1be0] sm:$0xff]  ;;  %v18557_v3 = vcombine.high %v991_v60, %v1003_v61  ;;  %7751 = vmatprep.subr.bf16.mxu0 %v18541_v63  ;;  %v18556_v9 = vcombine.low %v991_v60, %v1003_v61 }
  0xf4   :  { %v1007_v0 = vld [vmem:[#allocation5 + $0x1c40] sm:$0xff]  ;;  %7236 = vmatpush1.bf16.msra.mxu1 %v18532_v1  ;;  %7752 = vmatpush1.bf16.msra.mxu0 %v18540_v2 }
  0xf5   :  { %v1015_v4 = vld [vmem:[#allocation5 + $0x1c80] sm:$0xff]  ;;  %v18565_v7 = vcombine.high %v995_v62, %v1007_v0  ;;  %7237 = vmatprep.subr.bf16.mxu1 %v18557_v3  ;;  %v18564_v10 = vcombine.low %v995_v62, %v1007_v0 }
  0xf6   :  { %v1027_v5 = vld [vmem:[#allocation5 + $0x1ce0] sm:$0xff] }
  0xf7   :  { %v1019_v6 = vld [vmem:[#allocation5 + $0x1ca0] sm:$0xff]  ;;  %v18581_v11 = vcombine.high %v1015_v4, %v1027_v5  ;;  %7753 = vmatprep.subr.bf16.mxu0 %v18565_v7  ;;  %v18580_v18 = vcombine.low %v1015_v4, %v1027_v5 }
  0xf8   :  { %v1031_v8 = vld [vmem:[#allocation5 + $0x1d00] sm:$0xff]  ;;  %7238 = vmatpush1.bf16.msra.mxu1 %v18556_v9  ;;  %7754 = vmatpush1.bf16.msra.mxu0 %v18564_v10 }
  0xf9   :  { %v1039_v12 = vld [vmem:[#allocation5 + $0x1d40] sm:$0xff]  ;;  %v18589_v16 = vcombine.high %v1019_v6, %v1031_v8  ;;  %7239 = vmatprep.subr.bf16.mxu1 %v18581_v11  ;;  %v18588_v19 = vcombine.low %v1019_v6, %v1031_v8 }
  0xfa   :  { %v1051_v13 = vld [vmem:[#allocation5 + $0x1da0] sm:$0xff] }
  0xfb   :  { %v1043_v14 = vld [vmem:[#allocation5 + $0x1d60] sm:$0xff]  ;;  %v18605_v20 = vcombine.high %v1039_v12, %v1051_v13  ;;  %7755 = vmatprep.subr.bf16.mxu0 %v18589_v16  ;;  %v18604_v27 = vcombine.low %v1039_v12, %v1051_v13 }
  0xfc   :  { %v1055_v17 = vld [vmem:[#allocation5 + $0x1dc0] sm:$0xff]  ;;  %7240 = vmatpush1.bf16.msra.mxu1 %v18580_v18  ;;  %7756 = vmatpush1.bf16.msra.mxu0 %v18588_v19 }
  0xfd   :  { %v1063_v21 = vld [vmem:[#allocation5 + $0x1e00] sm:$0xff]  ;;  %v18613_v24 = vcombine.high %v1043_v14, %v1055_v17  ;;  %7241 = vmatprep.subr.bf16.mxu1 %v18605_v20  ;;  %v18612_v28 = vcombine.low %v1043_v14, %v1055_v17 }
  0xfe   :  { %v1075_v22 = vld [vmem:[#allocation5 + $0x1e60] sm:$0xff] }
  0xff   :  { %v1067_v23 = vld [vmem:[#allocation5 + $0x1e20] sm:$0xff]  ;;  %v18629_v29 = vcombine.high %v1063_v21, %v1075_v22  ;;  %7757 = vmatprep.subr.bf16.mxu0 %v18613_v24  ;;  %v18628_v36 = vcombine.low %v1063_v21, %v1075_v22 }
 0x100   :  { %v1079_v26 = vld [vmem:[#allocation5 + $0x1e80] sm:$0xff]  ;;  %7242 = vmatpush1.bf16.msra.mxu1 %v18604_v27  ;;  %7758 = vmatpush1.bf16.msra.mxu0 %v18612_v28  ;;  %v104_v27 = vld [vmem:[#allocation5 + $0x8] sm:$0xff] }
 0x101   :  { %v1087_v31 = vld [vmem:[#allocation5 + $0x1ec0] sm:$0xff]  ;;  %v18637_v34 = vcombine.high %v1067_v23, %v1079_v26  ;;  %7243 = vmatprep.subr.bf16.mxu1 %v18629_v29  ;;  %v18636_v37 = vcombine.low %v1067_v23, %v1079_v26  ;;  %v116_v28 = vld [vmem:[#allocation5 + $0x68] sm:$0xff]  ;;  %v109_v29 = vld [vmem:[#allocation5 + $0x30] sm:$0xff] }
 0x102   :  { %v1099_v32 = vld [vmem:[#allocation5 + $0x1f20] sm:$0xff] }
 0x103   :  { %v1091_v33 = vld [vmem:[#allocation5 + $0x1ee0] sm:$0xff]  ;;  %v18653_v38 = vcombine.high %v1087_v31, %v1099_v32  ;;  %7759 = vmatprep.subr.bf16.mxu0 %v18637_v34  ;;  %v18652_v45 = vcombine.low %v1087_v31, %v1099_v32  ;;  %v121_v34 = vld [vmem:[#allocation5 + $0x90] sm:$0xff] }
 0x104   :  { %v1103_v35 = vld [vmem:[#allocation5 + $0x1f40] sm:$0xff]  ;;  %7244 = vmatpush1.bf16.msra.mxu1 %v18628_v36  ;;  %7760 = vmatpush1.bf16.msra.mxu0 %v18636_v37  ;;  %v17671_v37 = vcombine.high %v104_v27, %v116_v28 }
 0x105   :  { %v1111_v40 = vld [vmem:[#allocation5 + $0x1f80] sm:$0xff]  ;;  %v18661_v43 = vcombine.high %v1091_v33, %v1103_v35  ;;  %7245 = vmatprep.subr.bf16.mxu1 %v18653_v38  ;;  %v18660_v46 = vcombine.low %v1091_v33, %v1103_v35  ;;  %v95_v33 = vld [vmem:[#allocation2 + $0x50] sm:$0xff]  ;;  %v128_v38 = vld [vmem:[#allocation5 + $0xc8] sm:$0xff] }
 0x106   :  { %v1123_v41 = vld [vmem:[#allocation5 + $0x1fe0] sm:$0xff] }
 0x107   :  { %v1115_v42 = vld [vmem:[#allocation5 + $0x1fa0] sm:$0xff]  ;;  %v18677_v47 = vcombine.high %v1111_v40, %v1123_v41  ;;  %7761 = vmatprep.subr.bf16.mxu0 %v18661_v43  ;;  %v18676_v53 = vcombine.low %v1111_v40, %v1123_v41  ;;  %v140_v40 = vld [vmem:[#allocation5 + $0x128] sm:$0xff]  ;;  %v133_v41 = vld [vmem:[#allocation5 + $0xf0] sm:$0xff] }
 0x108   :  { %v1127_v44 = vld [vmem:[#allocation5 + $0x2000] sm:$0xff]  ;;  %7246 = vmatpush1.bf16.msra.mxu1 %v18652_v45  ;;  %7762 = vmatpush1.bf16.msra.mxu0 %v18660_v46  ;;  %v145_v43 = vld [vmem:[#allocation5 + $0x150] sm:$0xff]  ;;  %v17670_v45 = vcombine.low %v104_v27, %v116_v28  ;;  %v17680_v46 = vcombine.low %v109_v29, %v121_v34  ;;  %v272_v27 = vld [vmem:[#allocation5 + $0x548] sm:$0xff] }
 0x109   :  { %v1135_v48 = vld [vmem:[#allocation5 + $0x2040] sm:$0xff]  ;;  %v18685_v51 = vcombine.high %v1115_v42, %v1127_v44  ;;  %7247 = vmatprep.subr.bf16.mxu1 %v18677_v47  ;;  %v18684_v54 = vcombine.low %v1115_v42, %v1127_v44  ;;  %v17681_v42 = vcombine.high %v109_v29, %v121_v34  ;;  %v17695_v47 = vcombine.high %v128_v38, %v140_v40  ;;  %v284_v28 = vld [vmem:[#allocation5 + $0x5a8] sm:$0xff]  ;;  %v277_v29 = vld [vmem:[#allocation5 + $0x570] sm:$0xff] }
 0x10a   :  { %v1147_v49 = vld [vmem:[#allocation5 + $0x20a0] sm:$0xff] }
 0x10b   :  { %v1139_v50 = vld [vmem:[#allocation5 + $0x2060] sm:$0xff]  ;;  %v18701_v55 = vcombine.high %v1135_v48, %v1147_v49  ;;  %7763 = vmatprep.subr.bf16.mxu0 %v18685_v51  ;;  %v18700_v62 = vcombine.low %v1135_v48, %v1147_v49  ;;  %v152_v48 = vld [vmem:[#allocation5 + $0x188] sm:$0xff]  ;;  %v17705_v51 = vcombine.high %v133_v41, %v145_v43 }
 0x10c   :  { %v1151_v52 = vld [vmem:[#allocation5 + $0x20c0] sm:$0xff]  ;;  %7248 = vmatpush1.bf16.msra.mxu1 %v18676_v53  ;;  %7764 = vmatpush1.bf16.msra.mxu0 %v18684_v54  ;;  %v164_v49 = vld [vmem:[#allocation5 + $0x1e8] sm:$0xff]  ;;  %v17694_v53 = vcombine.low %v128_v38, %v140_v40  ;;  %v17704_v54 = vcombine.low %v133_v41, %v145_v43  ;;  %v301_v38 = vld [vmem:[#allocation5 + $0x630] sm:$0xff] }
 0x10d   :  { %v1159_v56 = vld [vmem:[#allocation5 + $0x2100] sm:$0xff]  ;;  %v18709_v60 = vcombine.high %v1139_v50, %v1151_v52  ;;  %7249 = vmatprep.subr.bf16.mxu1 %v18701_v55  ;;  %v18708_v63 = vcombine.low %v1139_v50, %v1151_v52  ;;  %v157_v50 = vld [vmem:[#allocation5 + $0x1b0] sm:$0xff]  ;;  %v17719_v55 = vcombine.high %v152_v48, %v164_v49 }
 0x10e   :  { %v1171_v57 = vld [vmem:[#allocation5 + $0x2160] sm:$0xff]  ;;  %v169_v52 = vld [vmem:[#allocation5 + $0x210] sm:$0xff] }
 0x10f   :  { %v1163_v59 = vld [vmem:[#allocation5 + $0x2120] sm:$0xff]  ;;  %v18725_v0 = vcombine.high %v1159_v56, %v1171_v57  ;;  %7765 = vmatprep.subr.bf16.mxu0 %v18709_v60  ;;  %v18724_v6 = vcombine.low %v1159_v56, %v1171_v57  ;;  %v176_v56 = vld [vmem:[#allocation5 + $0x248] sm:$0xff]  ;;  %v17729_v60 = vcombine.high %v157_v50, %v169_v52  ;;  %v313_v41 = vld [vmem:[#allocation5 + $0x690] sm:$0xff] }
 0x110   :  { %v1175_v61 = vld [vmem:[#allocation5 + $0x2180] sm:$0xff]  ;;  %7250 = vmatpush1.bf16.msra.mxu1 %v18700_v62  ;;  %7766 = vmatpush1.bf16.msra.mxu0 %v18708_v63  ;;  %v188_v57 = vld [vmem:[#allocation5 + $0x2a8] sm:$0xff]  ;;  %v17718_v62 = vcombine.low %v152_v48, %v164_v49  ;;  %v17728_v63 = vcombine.low %v157_v50, %v169_v52  ;;  %v325_v48 = vld [vmem:[#allocation5 + $0x6f0] sm:$0xff]  ;;  %v17873_v49 = vcombine.high %v301_v38, %v313_v41 }
 0x111   :  { %v1183_v1 = vld [vmem:[#allocation5 + $0x21c0] sm:$0xff]  ;;  %v18733_v4 = vcombine.high %v1163_v59, %v1175_v61  ;;  %7251 = vmatprep.subr.bf16.mxu1 %v18725_v0  ;;  %v18732_v7 = vcombine.low %v1163_v59, %v1175_v61  ;;  %v181_v59 = vld [vmem:[#allocation5 + $0x270] sm:$0xff]  ;;  %v17743_v0 = vcombine.high %v176_v56, %v188_v57  ;;  %v17872_v52 = vcombine.low %v301_v38, %v313_v41 }
 0x112   :  { %v1195_v2 = vld [vmem:[#allocation5 + $0x2220] sm:$0xff]  ;;  %v193_v61 = vld [vmem:[#allocation5 + $0x2d0] sm:$0xff] }
 0x113   :  { %v1187_v3 = vld [vmem:[#allocation5 + $0x21e0] sm:$0xff]  ;;  %v18749_v8 = vcombine.high %v1183_v1, %v1195_v2  ;;  %7767 = vmatprep.subr.bf16.mxu0 %v18733_v4  ;;  %v18748_v14 = vcombine.low %v1183_v1, %v1195_v2  ;;  %v200_v1 = vld [vmem:[#allocation5 + $0x308] sm:$0xff]  ;;  %v17753_v4 = vcombine.high %v181_v59, %v193_v61  ;;  %v337_v50 = vld [vmem:[#allocation5 + $0x750] sm:$0xff] }
 0x114   :  { %v1199_v5 = vld [vmem:[#allocation5 + $0x2240] sm:$0xff]  ;;  %7252 = vmatpush1.bf16.msra.mxu1 %v18724_v6  ;;  %7768 = vmatpush1.bf16.msra.mxu0 %v18732_v7  ;;  %v212_v2 = vld [vmem:[#allocation5 + $0x368] sm:$0xff]  ;;  %v17742_v6 = vcombine.low %v176_v56, %v188_v57  ;;  %v17752_v7 = vcombine.low %v181_v59, %v193_v61  ;;  %v349_v56 = vld [vmem:[#allocation5 + $0x7b0] sm:$0xff]  ;;  %v17897_v57 = vcombine.high %v325_v48, %v337_v50 }
 0x115   :  { %v1207_v9 = vld [vmem:[#allocation5 + $0x2280] sm:$0xff]  ;;  %v18757_v12 = vcombine.high %v1187_v3, %v1199_v5  ;;  %7253 = vmatprep.subr.bf16.mxu1 %v18749_v8  ;;  %v18756_v16 = vcombine.low %v1187_v3, %v1199_v5  ;;  %v205_v3 = vld [vmem:[#allocation5 + $0x330] sm:$0xff]  ;;  %v17767_v8 = vcombine.high %v200_v1, %v212_v2  ;;  %v17896_v61 = vcombine.low %v325_v48, %v337_v50 }
 0x116   :  { %v1219_v10 = vld [vmem:[#allocation5 + $0x22e0] sm:$0xff]  ;;  %v217_v5 = vld [vmem:[#allocation5 + $0x390] sm:$0xff] }
 0x117   :  { %v1211_v11 = vld [vmem:[#allocation5 + $0x22a0] sm:$0xff]  ;;  %v18773_v17 = vcombine.high %v1207_v9, %v1219_v10  ;;  %7769 = vmatprep.subr.bf16.mxu0 %v18757_v12  ;;  %v18772_v23 = vcombine.low %v1207_v9, %v1219_v10  ;;  %v224_v9 = vld [vmem:[#allocation5 + $0x3c8] sm:$0xff]  ;;  %v17777_v12 = vcombine.high %v205_v3, %v217_v5  ;;  %v361_v59 = vld [vmem:[#allocation5 + $0x810] sm:$0xff] }
 0x118   :  { %v1223_v13 = vld [vmem:[#allocation5 + $0x2300] sm:$0xff]  ;;  %7254 = vmatpush1.bf16.msra.mxu1 %v18748_v14  ;;  %7770 = vmatpush1.bf16.msra.mxu0 %v18756_v16  ;;  %v236_v10 = vld [vmem:[#allocation5 + $0x428] sm:$0xff]  ;;  %v17766_v14 = vcombine.low %v200_v1, %v212_v2  ;;  %v17776_v16 = vcombine.low %v205_v3, %v217_v5  ;;  %v373_v1 = vld [vmem:[#allocation5 + $0x870] sm:$0xff]  ;;  %v17921_v2 = vcombine.high %v349_v56, %v361_v59 }
 0x119   :  { %v1231_v18 = vld [vmem:[#allocation5 + $0x2340] sm:$0xff]  ;;  %v18781_v21 = vcombine.high %v1211_v11, %v1223_v13  ;;  %7255 = vmatprep.subr.bf16.mxu1 %v18773_v17  ;;  %v18780_v24 = vcombine.low %v1211_v11, %v1223_v13  ;;  %v229_v11 = vld [vmem:[#allocation5 + $0x3f0] sm:$0xff]  ;;  %v17791_v17 = vcombine.high %v224_v9, %v236_v10  ;;  %v17920_v5 = vcombine.low %v349_v56, %v361_v59 }
 0x11a   :  { %v1243_v19 = vld [vmem:[#allocation5 + $0x23a0] sm:$0xff]  ;;  %v241_v13 = vld [vmem:[#allocation5 + $0x450] sm:$0xff] }
 0x11b   :  { %v1235_v20 = vld [vmem:[#allocation5 + $0x2360] sm:$0xff]  ;;  %v18797_v26 = vcombine.high %v1231_v18, %v1243_v19  ;;  %7771 = vmatprep.subr.bf16.mxu0 %v18781_v21  ;;  %v18796_v35 = vcombine.low %v1231_v18, %v1243_v19  ;;  %v248_v18 = vld [vmem:[#allocation5 + $0x488] sm:$0xff]  ;;  %v17801_v21 = vcombine.high %v229_v11, %v241_v13  ;;  %v385_v3 = vld [vmem:[#allocation5 + $0x8d0] sm:$0xff] }
 0x11c   :  { %v1247_v22 = vld [vmem:[#allocation5 + $0x23c0] sm:$0xff]  ;;  %7256 = vmatpush1.bf16.msra.mxu1 %v18772_v23  ;;  %7772 = vmatpush1.bf16.msra.mxu0 %v18780_v24  ;;  %v260_v19 = vld [vmem:[#allocation5 + $0x4e8] sm:$0xff]  ;;  %v17790_v23 = vcombine.low %v224_v9, %v236_v10  ;;  %v17800_v24 = vcombine.low %v229_v11, %v241_v13  ;;  %v397_v9 = vld [vmem:[#allocation5 + $0x930] sm:$0xff]  ;;  %v17945_v10 = vcombine.high %v373_v1, %v385_v3 }
 0x11d   :  { %v18805_v31 = vcombine.high %v1235_v20, %v1247_v22  ;;  %v89_v32 = vld [vmem:[#allocation2 + $0x20] sm:$0xff]  ;;  %7257 = vmatprep.subr.bf16.mxu1 %v18797_v26  ;;  %v18804_v36 = vcombine.low %v1235_v20, %v1247_v22  ;;  %v253_v20 = vld [vmem:[#allocation5 + $0x4b0] sm:$0xff]  ;;  %v17815_v26 = vcombine.high %v248_v18, %v260_v19  ;;  %v17944_v13 = vcombine.low %v373_v1, %v385_v3 }
 0x11e   :  { %v22369_v44 = vpack.c.bf16 %v95_v33, %v89_v32  ;;  %v265_v22 = vld [vmem:[#allocation5 + $0x510] sm:$0xff]  ;;  %v17814_v33 = vcombine.low %v248_v18, %v260_v19 }
 0x11f   :  { %7773 = vmatprep.subr.bf16.mxu0 %v18805_v31  ;;  %v17825_v31 = vcombine.high %v253_v20, %v265_v22  ;;  %v289_v32 = vld [vmem:[#allocation5 + $0x5d0] sm:$0xff]  ;;  %v17824_v34 = vcombine.low %v253_v20, %v265_v22 }
 0x120   :  { %7258 = vmatpush1.bf16.msra.mxu1 %v18796_v35  ;;  %7774 = vmatpush1.bf16.msra.mxu0 %v18804_v36  ;;  %v17839_v35 = vcombine.high %v272_v27, %v284_v28  ;;  %v296_v36 = vld [vmem:[#allocation5 + $0x608] sm:$0xff]  ;;  %v17849_v40 = vcombine.high %v277_v29, %v289_v32  ;;  %v17848_v43 = vcombine.low %v277_v29, %v289_v32  ;;  %v409_v11 = vld [vmem:[#allocation5 + $0x990] sm:$0xff] }
 0x121   :  { %7270 = vmatprep.subr.bf16.mxu1 %v17671_v37  ;;  %7915 = vmatprep.subr.bf16.mxu0 %v17681_v42  ;;  %v308_v37 = vld [vmem:[#allocation5 + $0x668] sm:$0xff]  ;;  %v17838_v42 = vcombine.low %v272_v27, %v284_v28  ;;  %v421_v18 = vld [vmem:[#allocation5 + $0x9f0] sm:$0xff]  ;;  %v17969_v19 = vcombine.high %v397_v9, %v409_v11  ;;  %v17968_v22 = vcombine.low %v397_v9, %v409_v11 }
 0x122   :  { %v433_v20 = vld [vmem:[#allocation5 + $0xa50] sm:$0xff] }
 0x123   :  { %7260 = vmatmul.mubr.bf16.vlgmr.msra.gmra.mrb[0].mxu1 %v22369_v44  ;;  %7776 = vmatmul.mubr.bf16.vlgmr.msra.gmra.mrb[0].mxu0 %v22369_v44  ;;  %v445_v27 = vld [vmem:[#allocation5 + $0xab0] sm:$0xff]  ;;  %v17993_v28 = vcombine.high %v421_v18, %v433_v20  ;;  %v17992_v32 = vcombine.low %v421_v18, %v433_v20 }
 0x124   :  { %7271 = vmatpush1.bf16.msra.mxu1 %v17670_v45  ;;  %7916 = vmatpush1.bf16.msra.mxu0 %v17680_v46  ;;  %v17863_v45 = vcombine.high %v296_v36, %v308_v37  ;;  %v320_v46 = vld [vmem:[#allocation5 + $0x6c8] sm:$0xff]  ;;  %v457_v29 = vld [vmem:[#allocation5 + $0xb10] sm:$0xff] }
 0x125   :  { %7272 = vmatprep.subr.bf16.mxu1 %v17695_v47  ;;  %7917 = vmatprep.subr.bf16.mxu0 %v17705_v51  ;;  %v332_v47 = vld [vmem:[#allocation5 + $0x728] sm:$0xff]  ;;  %v17862_v51 = vcombine.low %v296_v36, %v308_v37  ;;  %v469_v36 = vld [vmem:[#allocation5 + $0xb70] sm:$0xff]  ;;  %v18017_v37 = vcombine.high %v445_v27, %v457_v29  ;;  %v18016_v41 = vcombine.low %v445_v27, %v457_v29 }
 0x126   :  { %7302 = vmatprep.mubr.bf16.mxu1 %v22349_v58  ;;  %7947 = vmatprep.mubr.bf16.mxu0 %v22349_v58  ;;  %v481_v38 = vld [vmem:[#allocation5 + $0xbd0] sm:$0xff] }
 0x127   :  { %v505_v48 = vld [vmem:[#allocation5 + $0xc90] sm:$0xff]  ;;  %v18040_v50 = vcombine.low %v469_v36, %v481_v38 }
 0x128   :  { %7273 = vmatpush1.bf16.msra.mxu1 %v17694_v53  ;;  %7918 = vmatpush1.bf16.msra.mxu0 %v17704_v54  ;;  %v17887_v53 = vcombine.high %v320_v46, %v332_v47  ;;  %v344_v54 = vld [vmem:[#allocation5 + $0x788] sm:$0xff]  ;;  %v529_v56 = vld [vmem:[#allocation5 + $0xd50] sm:$0xff] }
 0x129   :  { %7274 = vmatprep.subr.bf16.mxu1 %v17719_v55  ;;  %7919 = vmatprep.subr.bf16.mxu0 %v17729_v60  ;;  %v356_v55 = vld [vmem:[#allocation5 + $0x7e8] sm:$0xff]  ;;  %v17886_v60 = vcombine.low %v320_v46, %v332_v47  ;;  %v493_v46 = vld [vmem:[#allocation5 + $0xc30] sm:$0xff]  ;;  %v18041_v47 = vcombine.high %v469_v36, %v481_v38 }
 0x12a   :  { %v18064_v59 = vcombine.low %v493_v46, %v505_v48  ;;  %v553_v1 = vld [vmem:[#allocation5 + $0xe10] sm:$0xff] }
 0x12b   :  { %v577_v9 = vld [vmem:[#allocation5 + $0xed0] sm:$0xff] }
 0x12c   :  { %7275 = vmatpush1.bf16.msra.mxu1 %v17718_v62  ;;  %7920 = vmatpush1.bf16.msra.mxu0 %v17728_v63  ;;  %v17911_v62 = vcombine.high %v344_v54, %v356_v55  ;;  %v368_v63 = vld [vmem:[#allocation5 + $0x848] sm:$0xff]  ;;  %v601_v18 = vld [vmem:[#allocation5 + $0xf90] sm:$0xff] }
 0x12d   :  { %7276 = vmatprep.subr.bf16.mxu1 %v17743_v0  ;;  %7921 = vmatprep.subr.bf16.mxu0 %v17753_v4  ;;  %v380_v0 = vld [vmem:[#allocation5 + $0x8a8] sm:$0xff]  ;;  %v17910_v4 = vcombine.low %v344_v54, %v356_v55  ;;  %v517_v54 = vld [vmem:[#allocation5 + $0xcf0] sm:$0xff]  ;;  %v18065_v55 = vcombine.high %v493_v46, %v505_v48 }
 0x12e   :  { %v18088_v3 = vcombine.low %v517_v54, %v529_v56  ;;  %v625_v27 = vld [vmem:[#allocation5 + $0x1050] sm:$0xff] }
 0x12f   :  { %v649_v36 = vld [vmem:[#allocation5 + $0x1110] sm:$0xff] }
 0x130   :  { %7277 = vmatpush1.bf16.msra.mxu1 %v17742_v6  ;;  %7922 = vmatpush1.bf16.msra.mxu0 %v17752_v7  ;;  %v17935_v6 = vcombine.high %v368_v63, %v380_v0  ;;  %v392_v7 = vld [vmem:[#allocation5 + $0x908] sm:$0xff]  ;;  %v673_v46 = vld [vmem:[#allocation5 + $0x11d0] sm:$0xff] }
 0x131   :  { %7278 = vmatprep.subr.bf16.mxu1 %v17767_v8  ;;  %7923 = vmatprep.subr.bf16.mxu0 %v17777_v12  ;;  %v404_v8 = vld [vmem:[#allocation5 + $0x968] sm:$0xff]  ;;  %v17934_v12 = vcombine.low %v368_v63, %v380_v0  ;;  %v541_v63 = vld [vmem:[#allocation5 + $0xdb0] sm:$0xff]  ;;  %v18089_v0 = vcombine.high %v517_v54, %v529_v56 }
 0x132   :  { %v18112_v11 = vcombine.low %v541_v63, %v553_v1  ;;  %v697_v54 = vld [vmem:[#allocation5 + $0x1290] sm:$0xff] }
 0x134   :  { %7279 = vmatpush1.bf16.msra.mxu1 %v17766_v14  ;;  %7924 = vmatpush1.bf16.msra.mxu0 %v17776_v16  ;;  %v17959_v14 = vcombine.high %v392_v7, %v404_v8  ;;  %v416_v16 = vld [vmem:[#allocation5 + $0x9c8] sm:$0xff] }
 0x135   :  { %7280 = vmatprep.subr.bf16.mxu1 %v17791_v17  ;;  %7925 = vmatprep.subr.bf16.mxu0 %v17801_v21  ;;  %v428_v17 = vld [vmem:[#allocation5 + $0xa28] sm:$0xff]  ;;  %v17958_v21 = vcombine.low %v392_v7, %v404_v8  ;;  %v565_v7 = vld [vmem:[#allocation5 + $0xe70] sm:$0xff]  ;;  %v18113_v8 = vcombine.high %v541_v63, %v553_v1 }
 0x136   :  { %v18136_v20 = vcombine.low %v565_v7, %v577_v9  ;;  %v721_v63 = vld [vmem:[#allocation5 + $0x1350] sm:$0xff] }
 0x138   :  { %7281 = vmatpush1.bf16.msra.mxu1 %v17790_v23  ;;  %7926 = vmatpush1.bf16.msra.mxu0 %v17800_v24  ;;  %v17983_v23 = vcombine.high %v416_v16, %v428_v17  ;;  %v440_v24 = vld [vmem:[#allocation5 + $0xa88] sm:$0xff] }
 0x139   :  { %7282 = vmatprep.subr.bf16.mxu1 %v17815_v26  ;;  %7927 = vmatprep.subr.bf16.mxu0 %v17825_v31  ;;  %v452_v26 = vld [vmem:[#allocation5 + $0xae8] sm:$0xff]  ;;  %v17982_v31 = vcombine.low %v416_v16, %v428_v17  ;;  %v589_v16 = vld [vmem:[#allocation5 + $0xf30] sm:$0xff]  ;;  %v18137_v17 = vcombine.high %v565_v7, %v577_v9 }
 0x13a   :  { %v18160_v29 = vcombine.low %v589_v16, %v601_v18  ;;  %v745_v7 = vld [vmem:[#allocation5 + $0x1410] sm:$0xff] }
 0x13c   :  { %7283 = vmatpush1.bf16.msra.mxu1 %v17814_v33  ;;  %7928 = vmatpush1.bf16.msra.mxu0 %v17824_v34  ;;  %v18007_v33 = vcombine.high %v440_v24, %v452_v26  ;;  %v464_v34 = vld [vmem:[#allocation5 + $0xb48] sm:$0xff] }
 0x13d   :  { %7284 = vmatprep.subr.bf16.mxu1 %v17839_v35  ;;  %7929 = vmatprep.subr.bf16.mxu0 %v17849_v40  ;;  %v476_v35 = vld [vmem:[#allocation5 + $0xba8] sm:$0xff]  ;;  %v18006_v40 = vcombine.low %v440_v24, %v452_v26  ;;  %v613_v24 = vld [vmem:[#allocation5 + $0xff0] sm:$0xff]  ;;  %v18161_v26 = vcombine.high %v589_v16, %v601_v18 }
 0x13e   :  { %v18184_v38 = vcombine.low %v613_v24, %v625_v27  ;;  %v769_v16 = vld [vmem:[#allocation5 + $0x14d0] sm:$0xff] }
 0x140   :  { %7285 = vmatpush1.bf16.msra.mxu1 %v17838_v42  ;;  %7930 = vmatpush1.bf16.msra.mxu0 %v17848_v43  ;;  %v18031_v42 = vcombine.high %v464_v34, %v476_v35  ;;  %v488_v43 = vld [vmem:[#allocation5 + $0xc08] sm:$0xff] }
 0x141   :  { %7286 = vmatprep.subr.bf16.mxu1 %v17863_v45  ;;  %7931 = vmatprep.subr.bf16.mxu0 %v17873_v49  ;;  %v500_v45 = vld [vmem:[#allocation5 + $0xc68] sm:$0xff]  ;;  %v18030_v49 = vcombine.low %v464_v34, %v476_v35  ;;  %v637_v34 = vld [vmem:[#allocation5 + $0x10b0] sm:$0xff]  ;;  %v18185_v35 = vcombine.high %v613_v24, %v625_v27 }
 0x142   :  { %v18208_v48 = vcombine.low %v637_v34, %v649_v36  ;;  %v793_v24 = vld [vmem:[#allocation5 + $0x1590] sm:$0xff] }
 0x144   :  { %7287 = vmatpush1.bf16.msra.mxu1 %v17862_v51  ;;  %7932 = vmatpush1.bf16.msra.mxu0 %v17872_v52  ;;  %v18055_v51 = vcombine.high %v488_v43, %v500_v45  ;;  %v512_v52 = vld [vmem:[#allocation5 + $0xcc8] sm:$0xff] }
 0x145   :  { %7288 = vmatprep.subr.bf16.mxu1 %v17887_v53  ;;  %7933 = vmatprep.subr.bf16.mxu0 %v17897_v57  ;;  %v524_v53 = vld [vmem:[#allocation5 + $0xd28] sm:$0xff]  ;;  %v18054_v57 = vcombine.low %v488_v43, %v500_v45  ;;  %v18209_v43 = vcombine.high %v637_v34, %v649_v36  ;;  %v661_v45 = vld [vmem:[#allocation5 + $0x1170] sm:$0xff] }
 0x146   :  { %v18232_v56 = vcombine.low %v661_v45, %v673_v46  ;;  %v817_v34 = vld [vmem:[#allocation5 + $0x1650] sm:$0xff] }
 0x148   :  { %7289 = vmatpush1.bf16.msra.mxu1 %v17886_v60  ;;  %7934 = vmatpush1.bf16.msra.mxu0 %v17896_v61  ;;  %v18079_v60 = vcombine.high %v512_v52, %v524_v53  ;;  %v536_v61 = vld [vmem:[#allocation5 + $0xd88] sm:$0xff] }
 0x149   :  { %7290 = vmatprep.subr.bf16.mxu1 %v17911_v62  ;;  %7935 = vmatprep.subr.bf16.mxu0 %v17921_v2  ;;  %v548_v62 = vld [vmem:[#allocation5 + $0xde8] sm:$0xff]  ;;  %v18078_v2 = vcombine.low %v512_v52, %v524_v53  ;;  %v685_v52 = vld [vmem:[#allocation5 + $0x1230] sm:$0xff]  ;;  %v18233_v53 = vcombine.high %v661_v45, %v673_v46 }
 0x14a   :  { %v18256_v1 = vcombine.low %v685_v52, %v697_v54 }
 0x14c   :  { %7291 = vmatpush1.bf16.msra.mxu1 %v17910_v4  ;;  %7936 = vmatpush1.bf16.msra.mxu0 %v17920_v5  ;;  %v18103_v4 = vcombine.high %v536_v61, %v548_v62  ;;  %v560_v5 = vld [vmem:[#allocation5 + $0xe48] sm:$0xff] }
 0x14d   :  { %7292 = vmatprep.subr.bf16.mxu1 %v17935_v6  ;;  %7937 = vmatprep.subr.bf16.mxu0 %v17945_v10  ;;  %v572_v6 = vld [vmem:[#allocation5 + $0xea8] sm:$0xff]  ;;  %v18102_v10 = vcombine.low %v536_v61, %v548_v62  ;;  %v709_v61 = vld [vmem:[#allocation5 + $0x12f0] sm:$0xff]  ;;  %v18257_v62 = vcombine.high %v685_v52, %v697_v54 }
 0x14e   :  { %v18280_v9 = vcombine.low %v709_v61, %v721_v63  ;;  %v865_v52 = vld [vmem:[#allocation5 + $0x17d0] sm:$0xff] }
 0x150   :  { %7293 = vmatpush1.bf16.msra.mxu1 %v17934_v12  ;;  %7938 = vmatpush1.bf16.msra.mxu0 %v17944_v13  ;;  %v18127_v12 = vcombine.high %v560_v5, %v572_v6  ;;  %v584_v13 = vld [vmem:[#allocation5 + $0xf08] sm:$0xff] }
 0x151   :  { %7294 = vmatprep.subr.bf16.mxu1 %v17959_v14  ;;  %7939 = vmatprep.subr.bf16.mxu0 %v17969_v19  ;;  %v596_v14 = vld [vmem:[#allocation5 + $0xf68] sm:$0xff]  ;;  %v18126_v19 = vcombine.low %v560_v5, %v572_v6  ;;  %v733_v5 = vld [vmem:[#allocation5 + $0x13b0] sm:$0xff]  ;;  %v18281_v6 = vcombine.high %v709_v61, %v721_v63 }
 0x152   :  { %v18304_v18 = vcombine.low %v733_v5, %v745_v7  ;;  %v889_v61 = vld [vmem:[#allocation5 + $0x1890] sm:$0xff] }
 0x154   :  { %7295 = vmatpush1.bf16.msra.mxu1 %v17958_v21  ;;  %7940 = vmatpush1.bf16.msra.mxu0 %v17968_v22  ;;  %v18151_v21 = vcombine.high %v584_v13, %v596_v14  ;;  %v608_v22 = vld [vmem:[#allocation5 + $0xfc8] sm:$0xff] }
 0x155   :  { %7296 = vmatprep.subr.bf16.mxu1 %v17983_v23  ;;  %7941 = vmatprep.subr.bf16.mxu0 %v17993_v28  ;;  %v620_v23 = vld [vmem:[#allocation5 + $0x1028] sm:$0xff]  ;;  %v18150_v28 = vcombine.low %v584_v13, %v596_v14  ;;  %v757_v13 = vld [vmem:[#allocation5 + $0x1470] sm:$0xff]  ;;  %v18305_v14 = vcombine.high %v733_v5, %v745_v7 }
 0x156   :  { %v18328_v27 = vcombine.low %v757_v13, %v769_v16  ;;  %v913_v5 = vld [vmem:[#allocation5 + $0x1950] sm:$0xff] }
 0x158   :  { %7297 = vmatpush1.bf16.msra.mxu1 %v17982_v31  ;;  %7942 = vmatpush1.bf16.msra.mxu0 %v17992_v32  ;;  %v18175_v31 = vcombine.high %v608_v22, %v620_v23  ;;  %v632_v32 = vld [vmem:[#allocation5 + $0x1088] sm:$0xff] }
 0x159   :  { %7298 = vmatprep.subr.bf16.mxu1 %v18007_v33  ;;  %7943 = vmatprep.subr.bf16.mxu0 %v18017_v37  ;;  %v644_v33 = vld [vmem:[#allocation5 + $0x10e8] sm:$0xff]  ;;  %v18174_v37 = vcombine.low %v608_v22, %v620_v23  ;;  %v781_v22 = vld [vmem:[#allocation5 + $0x1530] sm:$0xff]  ;;  %v18329_v23 = vcombine.high %v757_v13, %v769_v16 }
 0x15a   :  { %v18352_v36 = vcombine.low %v781_v22, %v793_v24  ;;  %v937_v13 = vld [vmem:[#allocation5 + $0x1a10] sm:$0xff] }
 0x15c   :  { %7299 = vmatpush1.bf16.msra.mxu1 %v18006_v40  ;;  %7944 = vmatpush1.bf16.msra.mxu0 %v18016_v41  ;;  %v18199_v40 = vcombine.high %v632_v32, %v644_v33  ;;  %v656_v41 = vld [vmem:[#allocation5 + $0x1148] sm:$0xff] }
 0x15d   :  { %7300 = vmatprep.subr.bf16.mxu1 %v18031_v42  ;;  %7945 = vmatprep.subr.bf16.mxu0 %v18041_v47  ;;  %v668_v42 = vld [vmem:[#allocation5 + $0x11a8] sm:$0xff]  ;;  %v18198_v47 = vcombine.low %v632_v32, %v644_v33  ;;  %v805_v32 = vld [vmem:[#allocation5 + $0x15f0] sm:$0xff]  ;;  %v18353_v33 = vcombine.high %v781_v22, %v793_v24 }
 0x15e   :  { %v18376_v46 = vcombine.low %v805_v32, %v817_v34  ;;  %v961_v22 = vld [vmem:[#allocation5 + $0x1ad0] sm:$0xff] }
 0x160   :  { %7301 = vmatpush1.bf16.msra.mxu1 %v18030_v49  ;;  %7946 = vmatpush1.bf16.msra.mxu0 %v18040_v50  ;;  %v18223_v49 = vcombine.high %v656_v41, %v668_v42  ;;  %v680_v50 = vld [vmem:[#allocation5 + $0x1208] sm:$0xff] }
 0x161   :  { %7313 = vmatprep.subr.bf16.mxu1 %v18055_v51  ;;  %7958 = vmatprep.subr.bf16.mxu0 %v18065_v55  ;;  %v692_v51 = vld [vmem:[#allocation5 + $0x1268] sm:$0xff]  ;;  %v18222_v55 = vcombine.low %v656_v41, %v668_v42  ;;  %v829_v41 = vld [vmem:[#allocation5 + $0x16b0] sm:$0xff]  ;;  %v18377_v42 = vcombine.high %v805_v32, %v817_v34 }
 0x162   :  { %v985_v32 = vld [vmem:[#allocation5 + $0x1b90] sm:$0xff] }
 0x163   :  { %7303 = vmatmul.mubr.bf16.vlgmr.msra.gmra.mrb[4].mxu1 %v22353_v15  ;;  %7948 = vmatmul.mubr.bf16.vlgmr.msra.gmra.mrb[4].mxu0 %v22353_v15 }
 0x164   :  { %7314 = vmatpush1.bf16.msra.mxu1 %v18054_v57  ;;  %7959 = vmatpush1.bf16.msra.mxu0 %v18064_v59  ;;  %v18247_v57 = vcombine.high %v680_v50, %v692_v51  ;;  %v704_v59 = vld [vmem:[#allocation5 + $0x12c8] sm:$0xff] }
 0x165   :  { %7315 = vmatprep.subr.bf16.mxu1 %v18079_v60  ;;  %7960 = vmatprep.subr.bf16.mxu0 %v18089_v0  ;;  %v716_v60 = vld [vmem:[#allocation5 + $0x1328] sm:$0xff]  ;;  %v18246_v0 = vcombine.low %v680_v50, %v692_v51  ;;  %v853_v50 = vld [vmem:[#allocation5 + $0x1770] sm:$0xff] }
 0x166   :  { %7345 = vmatprep.mubr.bf16.mxu1 %v22355_v25  ;;  %7990 = vmatprep.mubr.bf16.mxu0 %v22355_v25  ;;  %v18424_v63 = vcombine.low %v853_v50, %v865_v52 }
 0x168   :  { %7316 = vmatpush1.bf16.msra.mxu1 %v18078_v2  ;;  %7961 = vmatpush1.bf16.msra.mxu0 %v18088_v3  ;;  %v18271_v2 = vcombine.high %v704_v59, %v716_v60  ;;  %v728_v3 = vld [vmem:[#allocation5 + $0x1388] sm:$0xff] }
 0x169   :  { %7317 = vmatprep.subr.bf16.mxu1 %v18103_v4  ;;  %7962 = vmatprep.subr.bf16.mxu0 %v18113_v8  ;;  %v740_v4 = vld [vmem:[#allocation5 + $0x13e8] sm:$0xff]  ;;  %v18270_v8 = vcombine.low %v704_v59, %v716_v60  ;;  %v877_v59 = vld [vmem:[#allocation5 + $0x1830] sm:$0xff]  ;;  %v18425_v60 = vcombine.high %v853_v50, %v865_v52 }
 0x16a   :  { %v18448_v7 = vcombine.low %v877_v59, %v889_v61  ;;  %v1033_v50 = vld [vmem:[#allocation5 + $0x1d10] sm:$0xff] }
 0x16c   :  { %7318 = vmatpush1.bf16.msra.mxu1 %v18102_v10  ;;  %7963 = vmatpush1.bf16.msra.mxu0 %v18112_v11  ;;  %v18295_v10 = vcombine.high %v728_v3, %v740_v4  ;;  %v752_v11 = vld [vmem:[#allocation5 + $0x1448] sm:$0xff] }
 0x16d   :  { %7319 = vmatprep.subr.bf16.mxu1 %v18127_v12  ;;  %7964 = vmatprep.subr.bf16.mxu0 %v18137_v17  ;;  %v764_v12 = vld [vmem:[#allocation5 + $0x14a8] sm:$0xff]  ;;  %v18294_v17 = vcombine.low %v728_v3, %v740_v4  ;;  %v901_v3 = vld [vmem:[#allocation5 + $0x18f0] sm:$0xff]  ;;  %v18449_v4 = vcombine.high %v877_v59, %v889_v61 }
 0x16e   :  { %v18472_v16 = vcombine.low %v901_v3, %v913_v5  ;;  %v1057_v59 = vld [vmem:[#allocation5 + $0x1dd0] sm:$0xff] }
 0x170   :  { %7320 = vmatpush1.bf16.msra.mxu1 %v18126_v19  ;;  %7965 = vmatpush1.bf16.msra.mxu0 %v18136_v20  ;;  %v18319_v19 = vcombine.high %v752_v11, %v764_v12  ;;  %v776_v20 = vld [vmem:[#allocation5 + $0x1508] sm:$0xff] }
 0x171   :  { %7321 = vmatprep.subr.bf16.mxu1 %v18151_v21  ;;  %7966 = vmatprep.subr.bf16.mxu0 %v18161_v26  ;;  %v788_v21 = vld [vmem:[#allocation5 + $0x1568] sm:$0xff]  ;;  %v18318_v26 = vcombine.low %v752_v11, %v764_v12  ;;  %v925_v11 = vld [vmem:[#allocation5 + $0x19b0] sm:$0xff]  ;;  %v18473_v12 = vcombine.high %v901_v3, %v913_v5 }
 0x172   :  { %v18496_v24 = vcombine.low %v925_v11, %v937_v13  ;;  %v1081_v3 = vld [vmem:[#allocation5 + $0x1e90] sm:$0xff] }
 0x174   :  { %7322 = vmatpush1.bf16.msra.mxu1 %v18150_v28  ;;  %7967 = vmatpush1.bf16.msra.mxu0 %v18160_v29  ;;  %v18343_v28 = vcombine.high %v776_v20, %v788_v21  ;;  %v800_v29 = vld [vmem:[#allocation5 + $0x15c8] sm:$0xff] }
 0x175   :  { %7323 = vmatprep.subr.bf16.mxu1 %v18175_v31  ;;  %7968 = vmatprep.subr.bf16.mxu0 %v18185_v35  ;;  %v812_v31 = vld [vmem:[#allocation5 + $0x1628] sm:$0xff]  ;;  %v18342_v35 = vcombine.low %v776_v20, %v788_v21  ;;  %v949_v20 = vld [vmem:[#allocation5 + $0x1a70] sm:$0xff]  ;;  %v18497_v21 = vcombine.high %v925_v11, %v937_v13 }
 0x176   :  { %v18366_v45 = vcombine.low %v800_v29, %v812_v31  ;;  %v18520_v34 = vcombine.low %v949_v20, %v961_v22  ;;  %v1105_v11 = vld [vmem:[#allocation5 + $0x1f50] sm:$0xff] }
 0x178   :  { %7324 = vmatpush1.bf16.msra.mxu1 %v18174_v37  ;;  %7969 = vmatpush1.bf16.msra.mxu0 %v18184_v38  ;;  %v18367_v37 = vcombine.high %v800_v29, %v812_v31  ;;  %v824_v38 = vld [vmem:[#allocation5 + $0x1688] sm:$0xff]  ;;  %v973_v29 = vld [vmem:[#allocation5 + $0x1b30] sm:$0xff]  ;;  %v18521_v31 = vcombine.high %v949_v20, %v961_v22 }
 0x179   :  { %7325 = vmatprep.subr.bf16.mxu1 %v18199_v40  ;;  %7970 = vmatprep.subr.bf16.mxu0 %v18209_v43  ;;  %v836_v40 = vld [vmem:[#allocation5 + $0x16e8] sm:$0xff]  ;;  %v841_v43 = vld [vmem:[#allocation5 + $0x1710] sm:$0xff] }
 0x17a   :  { %v18401_v51 = vcombine.high %v829_v41, %v841_v43  ;;  %v18400_v54 = vcombine.low %v829_v41, %v841_v43  ;;  %v1009_v41 = vld [vmem:[#allocation5 + $0x1c50] sm:$0xff]  ;;  %v18544_v43 = vcombine.low %v973_v29, %v985_v32 }
 0x17b   :  { %v1129_v20 = vld [vmem:[#allocation5 + $0x2010] sm:$0xff] }
 0x17c   :  { %7326 = vmatpush1.bf16.msra.mxu1 %v18198_v47  ;;  %7971 = vmatpush1.bf16.msra.mxu0 %v18208_v48  ;;  %v18391_v47 = vcombine.high %v824_v38, %v836_v40  ;;  %v848_v48 = vld [vmem:[#allocation5 + $0x1748] sm:$0xff] }
 0x17d   :  { %7327 = vmatprep.subr.bf16.mxu1 %v18223_v49  ;;  %7972 = vmatprep.subr.bf16.mxu0 %v18233_v53  ;;  %v860_v49 = vld [vmem:[#allocation5 + $0x17a8] sm:$0xff]  ;;  %v18390_v53 = vcombine.low %v824_v38, %v836_v40  ;;  %v997_v38 = vld [vmem:[#allocation5 + $0x1bf0] sm:$0xff]  ;;  %v18545_v40 = vcombine.high %v973_v29, %v985_v32 }
 0x17e   :  { %v18568_v52 = vcombine.low %v997_v38, %v1009_v41  ;;  %v1153_v29 = vld [vmem:[#allocation5 + $0x20d0] sm:$0xff] }
 0x180   :  { %7328 = vmatpush1.bf16.msra.mxu1 %v18222_v55  ;;  %7973 = vmatpush1.bf16.msra.mxu0 %v18232_v56  ;;  %v18415_v55 = vcombine.high %v848_v48, %v860_v49  ;;  %v872_v56 = vld [vmem:[#allocation5 + $0x1808] sm:$0xff] }
 0x181   :  { %7329 = vmatprep.subr.bf16.mxu1 %v18247_v57  ;;  %7974 = vmatprep.subr.bf16.mxu0 %v18257_v62  ;;  %v884_v57 = vld [vmem:[#allocation5 + $0x1868] sm:$0xff]  ;;  %v18414_v62 = vcombine.low %v848_v48, %v860_v49  ;;  %v1021_v48 = vld [vmem:[#allocation5 + $0x1cb0] sm:$0xff]  ;;  %v18569_v49 = vcombine.high %v997_v38, %v1009_v41 }
 0x182   :  { %v18592_v61 = vcombine.low %v1021_v48, %v1033_v50  ;;  %v1177_v38 = vld [vmem:[#allocation5 + $0x2190] sm:$0xff] }
 0x184   :  { %7330 = vmatpush1.bf16.msra.mxu1 %v18246_v0  ;;  %7975 = vmatpush1.bf16.msra.mxu0 %v18256_v1  ;;  %v18439_v0 = vcombine.high %v872_v56, %v884_v57  ;;  %v896_v1 = vld [vmem:[#allocation5 + $0x18c8] sm:$0xff] }
 0x185   :  { %7331 = vmatprep.subr.bf16.mxu1 %v18271_v2  ;;  %7976 = vmatprep.subr.bf16.mxu0 %v18281_v6  ;;  %v908_v2 = vld [vmem:[#allocation5 + $0x1928] sm:$0xff]  ;;  %v18438_v6 = vcombine.low %v872_v56, %v884_v57  ;;  %v1045_v56 = vld [vmem:[#allocation5 + $0x1d70] sm:$0xff]  ;;  %v18593_v57 = vcombine.high %v1021_v48, %v1033_v50 }
 0x186   :  { %v18616_v5 = vcombine.low %v1045_v56, %v1057_v59  ;;  %v1201_v48 = vld [vmem:[#allocation5 + $0x2250] sm:$0xff] }
 0x188   :  { %7332 = vmatpush1.bf16.msra.mxu1 %v18270_v8  ;;  %7977 = vmatpush1.bf16.msra.mxu0 %v18280_v9  ;;  %v18463_v8 = vcombine.high %v896_v1, %v908_v2  ;;  %v920_v9 = vld [vmem:[#allocation5 + $0x1988] sm:$0xff] }
 0x189   :  { %7333 = vmatprep.subr.bf16.mxu1 %v18295_v10  ;;  %7978 = vmatprep.subr.bf16.mxu0 %v18305_v14  ;;  %v932_v10 = vld [vmem:[#allocation5 + $0x19e8] sm:$0xff]  ;;  %v18462_v14 = vcombine.low %v896_v1, %v908_v2  ;;  %v1069_v1 = vld [vmem:[#allocation5 + $0x1e30] sm:$0xff]  ;;  %v18617_v2 = vcombine.high %v1045_v56, %v1057_v59 }
 0x18a   :  { %v18640_v13 = vcombine.low %v1069_v1, %v1081_v3  ;;  %v1225_v56 = vld [vmem:[#allocation5 + $0x2310] sm:$0xff] }
 0x18c   :  { %7334 = vmatpush1.bf16.msra.mxu1 %v18294_v17  ;;  %7979 = vmatpush1.bf16.msra.mxu0 %v18304_v18  ;;  %v18487_v17 = vcombine.high %v920_v9, %v932_v10  ;;  %v944_v18 = vld [vmem:[#allocation5 + $0x1a48] sm:$0xff] }
 0x18d   :  { %7335 = vmatprep.subr.bf16.mxu1 %v18319_v19  ;;  %7980 = vmatprep.subr.bf16.mxu0 %v18329_v23  ;;  %v956_v19 = vld [vmem:[#allocation5 + $0x1aa8] sm:$0xff]  ;;  %v18486_v23 = vcombine.low %v920_v9, %v932_v10  ;;  %v1093_v9 = vld [vmem:[#allocation5 + $0x1ef0] sm:$0xff]  ;;  %v18641_v10 = vcombine.high %v1069_v1, %v1081_v3 }
 0x18e   :  { %v18664_v22 = vcombine.low %v1093_v9, %v1105_v11  ;;  %v1249_v1 = vld [vmem:[#allocation5 + $0x23d0] sm:$0xff] }
 0x190   :  { %7336 = vmatpush1.bf16.msra.mxu1 %v18318_v26  ;;  %7981 = vmatpush1.bf16.msra.mxu0 %v18328_v27  ;;  %v18511_v26 = vcombine.high %v944_v18, %v956_v19  ;;  %v968_v27 = vld [vmem:[#allocation5 + $0x1b08] sm:$0xff] }
 0x191   :  { %7337 = vmatprep.subr.bf16.mxu1 %v18343_v28  ;;  %7982 = vmatprep.subr.bf16.mxu0 %v18353_v33  ;;  %v980_v28 = vld [vmem:[#allocation5 + $0x1b68] sm:$0xff]  ;;  %v18510_v33 = vcombine.low %v944_v18, %v956_v19  ;;  %v1117_v18 = vld [vmem:[#allocation5 + $0x1fb0] sm:$0xff]  ;;  %v18665_v19 = vcombine.high %v1093_v9, %v1105_v11  ;;  %v123_v9 = vld [vmem:[#allocation5 + $0xa0] sm:$0xff] }
 0x192   :  { %v18688_v32 = vcombine.low %v1117_v18, %v1129_v20 }
 0x194   :  { %7338 = vmatpush1.bf16.msra.mxu1 %v18342_v35  ;;  %7983 = vmatpush1.bf16.msra.mxu0 %v18352_v36  ;;  %v18535_v35 = vcombine.high %v968_v27, %v980_v28  ;;  %v992_v36 = vld [vmem:[#allocation5 + $0x1bc8] sm:$0xff] }
 0x195   :  { %7339 = vmatprep.subr.bf16.mxu1 %v18367_v37  ;;  %7984 = vmatprep.subr.bf16.mxu0 %v18377_v42  ;;  %v1004_v37 = vld [vmem:[#allocation5 + $0x1c28] sm:$0xff]  ;;  %v18534_v42 = vcombine.low %v968_v27, %v980_v28  ;;  %v1141_v27 = vld [vmem:[#allocation5 + $0x2070] sm:$0xff]  ;;  %v18689_v28 = vcombine.high %v1117_v18, %v1129_v20  ;;  %v147_v18 = vld [vmem:[#allocation5 + $0x160] sm:$0xff] }
 0x196   :  { %v18712_v41 = vcombine.low %v1141_v27, %v1153_v29 }
 0x198   :  { %7340 = vmatpush1.bf16.msra.mxu1 %v18366_v45  ;;  %7985 = vmatpush1.bf16.msra.mxu0 %v18376_v46  ;;  %v18559_v45 = vcombine.high %v992_v36, %v1004_v37  ;;  %v1016_v46 = vld [vmem:[#allocation5 + $0x1c88] sm:$0xff] }
 0x199   :  { %7341 = vmatprep.subr.bf16.mxu1 %v18391_v47  ;;  %7986 = vmatprep.subr.bf16.mxu0 %v18401_v51  ;;  %v1028_v47 = vld [vmem:[#allocation5 + $0x1ce8] sm:$0xff]  ;;  %v18558_v51 = vcombine.low %v992_v36, %v1004_v37  ;;  %v1165_v36 = vld [vmem:[#allocation5 + $0x2130] sm:$0xff]  ;;  %v18713_v37 = vcombine.high %v1141_v27, %v1153_v29  ;;  %v171_v27 = vld [vmem:[#allocation5 + $0x220] sm:$0xff] }
 0x19a   :  { %v18736_v50 = vcombine.low %v1165_v36, %v1177_v38 }
 0x19c   :  { %7342 = vmatpush1.bf16.msra.mxu1 %v18390_v53  ;;  %7987 = vmatpush1.bf16.msra.mxu0 %v18400_v54  ;;  %v18583_v53 = vcombine.high %v1016_v46, %v1028_v47  ;;  %v1040_v54 = vld [vmem:[#allocation5 + $0x1d48] sm:$0xff] }
 0x19d   :  { %7343 = vmatprep.subr.bf16.mxu1 %v18415_v55  ;;  %7988 = vmatprep.subr.bf16.mxu0 %v18425_v60  ;;  %v1052_v55 = vld [vmem:[#allocation5 + $0x1da8] sm:$0xff]  ;;  %v18582_v60 = vcombine.low %v1016_v46, %v1028_v47  ;;  %v1189_v46 = vld [vmem:[#allocation5 + $0x21f0] sm:$0xff]  ;;  %v18737_v47 = vcombine.high %v1165_v36, %v1177_v38  ;;  %v195_v36 = vld [vmem:[#allocation5 + $0x2e0] sm:$0xff] }
 0x19e   :  { %v18760_v59 = vcombine.low %v1189_v46, %v1201_v48 }
 0x1a0   :  { %7344 = vmatpush1.bf16.msra.mxu1 %v18414_v62  ;;  %7989 = vmatpush1.bf16.msra.mxu0 %v18424_v63  ;;  %v18607_v62 = vcombine.high %v1040_v54, %v1052_v55  ;;  %v1064_v63 = vld [vmem:[#allocation5 + $0x1e08] sm:$0xff] }
 0x1a1   :  { %7356 = vmatprep.subr.bf16.mxu1 %v18439_v0  ;;  %8001 = vmatprep.subr.bf16.mxu0 %v18449_v4  ;;  %v1076_v0 = vld [vmem:[#allocation5 + $0x1e68] sm:$0xff]  ;;  %v18606_v4 = vcombine.low %v1040_v54, %v1052_v55  ;;  %v18761_v54 = vcombine.high %v1189_v46, %v1201_v48  ;;  %v1213_v55 = vld [vmem:[#allocation5 + $0x22b0] sm:$0xff] }
 0x1a2   :  { %v18784_v3 = vcombine.low %v1213_v55, %v1225_v56 }
 0x1a3   :  { %7346 = vmatmul.mubr.bf16.vlgmr.msra.gmra.mrb[4].mxu1 %v22361_v30  ;;  %7991 = vmatmul.mubr.bf16.vlgmr.msra.gmra.mrb[4].mxu0 %v22361_v30 }
 0x1a4   :  { %7357 = vmatpush1.bf16.msra.mxu1 %v18438_v6  ;;  %8002 = vmatpush1.bf16.msra.mxu0 %v18448_v7  ;;  %v18631_v6 = vcombine.high %v1064_v63, %v1076_v0  ;;  %v1088_v7 = vld [vmem:[#allocation5 + $0x1ec8] sm:$0xff] }
 0x1a5   :  { %7358 = vmatprep.subr.bf16.mxu1 %v18463_v8  ;;  %8003 = vmatprep.subr.bf16.mxu0 %v18473_v12  ;;  %v1100_v8 = vld [vmem:[#allocation5 + $0x1f28] sm:$0xff]  ;;  %v18630_v12 = vcombine.low %v1064_v63, %v1076_v0  ;;  %v1237_v63 = vld [vmem:[#allocation5 + $0x2370] sm:$0xff]  ;;  %v18785_v0 = vcombine.high %v1213_v55, %v1225_v56  ;;  %v1255_v56 = vld [vmem:[#allocation7] sm:$0xff] }
 0x1a6   :  { %7388 = vmatprep.mubr.bf16.mxu1 %v22363_v39  ;;  %8033 = vmatprep.mubr.bf16.mxu0 %v22363_v39  ;;  %v18808_v11 = vcombine.low %v1237_v63, %v1249_v1 }
 0x1a8   :  { %7359 = vmatpush1.bf16.msra.mxu1 %v18462_v14  ;;  %8004 = vmatpush1.bf16.msra.mxu0 %v18472_v16  ;;  %v18655_v14 = vcombine.high %v1088_v7, %v1100_v8  ;;  %v1112_v16 = vld [vmem:[#allocation5 + $0x1f88] sm:$0xff] }
 0x1a9   :  { %7360 = vmatprep.subr.bf16.mxu1 %v18487_v17  ;;  %8005 = vmatprep.subr.bf16.mxu0 %v18497_v21  ;;  %v1124_v17 = vld [vmem:[#allocation5 + $0x1fe8] sm:$0xff]  ;;  %v18654_v21 = vcombine.low %v1088_v7, %v1100_v8  ;;  %v111_v7 = vld [vmem:[#allocation5 + $0x40] sm:$0xff]  ;;  %v18809_v8 = vcombine.high %v1237_v63, %v1249_v1  ;;  %v22397_v63 = vld [vmem:[#allocation5 + $0x4f0] sm:$0xff] }
 0x1aa   :  { %v17684_v20 = vcombine.low %v111_v7, %v123_v9 }
 0x1ac   :  { %7361 = vmatpush1.bf16.msra.mxu1 %v18486_v23  ;;  %8006 = vmatpush1.bf16.msra.mxu0 %v18496_v24  ;;  %v18679_v23 = vcombine.high %v1112_v16, %v1124_v17  ;;  %v1136_v24 = vld [vmem:[#allocation5 + $0x2048] sm:$0xff] }
 0x1ad   :  { %7362 = vmatprep.subr.bf16.mxu1 %v18511_v26  ;;  %8007 = vmatprep.subr.bf16.mxu0 %v18521_v31  ;;  %v1148_v26 = vld [vmem:[#allocation5 + $0x20a8] sm:$0xff]  ;;  %v18678_v31 = vcombine.low %v1112_v16, %v1124_v17  ;;  %v135_v16 = vld [vmem:[#allocation5 + $0x100] sm:$0xff]  ;;  %v17685_v17 = vcombine.high %v111_v7, %v123_v9 }
 0x1ae   :  { %v17708_v29 = vcombine.low %v135_v16, %v147_v18  ;;  %v22409_v9 = vld [vmem:[#allocation5 + $0x5e0] sm:$0xff] }
 0x1b0   :  { %7363 = vmatpush1.bf16.msra.mxu1 %v18510_v33  ;;  %8008 = vmatpush1.bf16.msra.mxu0 %v18520_v34  ;;  %v18703_v33 = vcombine.high %v1136_v24, %v1148_v26  ;;  %v1160_v34 = vld [vmem:[#allocation5 + $0x2108] sm:$0xff] }
 0x1b1   :  { %7364 = vmatprep.subr.bf16.mxu1 %v18535_v35  ;;  %8009 = vmatprep.subr.bf16.mxu0 %v18545_v40  ;;  %v1172_v35 = vld [vmem:[#allocation5 + $0x2168] sm:$0xff]  ;;  %v18702_v40 = vcombine.low %v1136_v24, %v1148_v26  ;;  %v159_v24 = vld [vmem:[#allocation5 + $0x1c0] sm:$0xff]  ;;  %v17709_v26 = vcombine.high %v135_v16, %v147_v18 }
 0x1b4   :  { %7365 = vmatpush1.bf16.msra.mxu1 %v18534_v42  ;;  %8010 = vmatpush1.bf16.msra.mxu0 %v18544_v43  ;;  %v18727_v42 = vcombine.high %v1160_v34, %v1172_v35  ;;  %v1184_v43 = vld [vmem:[#allocation5 + $0x21c8] sm:$0xff] }
 0x1b5   :  { %7366 = vmatprep.subr.bf16.mxu1 %v18559_v45  ;;  %8011 = vmatprep.subr.bf16.mxu0 %v18569_v49  ;;  %v1196_v45 = vld [vmem:[#allocation5 + $0x2228] sm:$0xff]  ;;  %v18726_v49 = vcombine.low %v1160_v34, %v1172_v35  ;;  %v183_v34 = vld [vmem:[#allocation5 + $0x280] sm:$0xff]  ;;  %v17733_v35 = vcombine.high %v159_v24, %v171_v27 }
 0x1b6   :  { %v17757_v46 = vcombine.high %v183_v34, %v195_v36 }
 0x1b8   :  { %7367 = vmatpush1.bf16.msra.mxu1 %v18558_v51  ;;  %8012 = vmatpush1.bf16.msra.mxu0 %v18568_v52  ;;  %v18751_v51 = vcombine.high %v1184_v43, %v1196_v45  ;;  %v1208_v52 = vld [vmem:[#allocation5 + $0x2288] sm:$0xff] }
 0x1b9   :  { %7368 = vmatprep.subr.bf16.mxu1 %v18583_v53  ;;  %8013 = vmatprep.subr.bf16.mxu0 %v18593_v57  ;;  %v1220_v53 = vld [vmem:[#allocation5 + $0x22e8] sm:$0xff]  ;;  %v18750_v57 = vcombine.low %v1184_v43, %v1196_v45  ;;  %v213_v43 = vld [vmem:[#allocation5 + $0x370] sm:$0xff]  ;;  %v207_v45 = vld [vmem:[#allocation5 + $0x340] sm:$0xff] }
 0x1bc   :  { %7369 = vmatpush1.bf16.msra.mxu1 %v18582_v60  ;;  %8014 = vmatpush1.bf16.msra.mxu0 %v18592_v61  ;;  %v18775_v60 = vcombine.high %v1208_v52, %v1220_v53  ;;  %v1232_v61 = vld [vmem:[#allocation5 + $0x2348] sm:$0xff] }
 0x1bd   :  { %7370 = vmatprep.subr.bf16.mxu1 %v18607_v62  ;;  %8015 = vmatprep.subr.bf16.mxu0 %v18617_v2  ;;  %v1244_v62 = vld [vmem:[#allocation5 + $0x23a8] sm:$0xff]  ;;  %v18774_v2 = vcombine.low %v1208_v52, %v1220_v53  ;;  %v225_v52 = vld [vmem:[#allocation5 + $0x3d0] sm:$0xff] }
 0x1be   :  { %v237_v53 = vld [vmem:[#allocation5 + $0x430] sm:$0xff] }
 0x1bf   :  { %v17793_v1 = vcombine.high %v225_v52, %v237_v53 }
 0x1c0   :  { %7371 = vmatpush1.bf16.msra.mxu1 %v18606_v4  ;;  %8016 = vmatpush1.bf16.msra.mxu0 %v18616_v5  ;;  %v18799_v4 = vcombine.high %v1232_v61, %v1244_v62  ;;  %v105_v5 = vld [vmem:[#allocation5 + $0x10] sm:$0xff] }
 0x1c1   :  { %7372 = vmatprep.subr.bf16.mxu1 %v18631_v6  ;;  %8017 = vmatprep.subr.bf16.mxu0 %v18641_v10  ;;  %v117_v6 = vld [vmem:[#allocation5 + $0x70] sm:$0xff]  ;;  %v18798_v10 = vcombine.low %v1232_v61, %v1244_v62 }
 0x1c2   :  { %v22395_v62 = vld [vmem:[#allocation5 + $0x490] sm:$0xff] }
 0x1c3   :  { %v17816_v18 = vcombine.low %v22395_v62, %v22397_v63 }
 0x1c4   :  { %7373 = vmatpush1.bf16.msra.mxu1 %v18630_v12  ;;  %8018 = vmatpush1.bf16.msra.mxu0 %v18640_v13  ;;  %v17673_v12 = vcombine.high %v105_v5, %v117_v6  ;;  %v129_v13 = vld [vmem:[#allocation5 + $0xd0] sm:$0xff] }
 0x1c5   :  { %7374 = vmatprep.subr.bf16.mxu1 %v18655_v14  ;;  %8019 = vmatprep.subr.bf16.mxu0 %v18665_v19  ;;  %v141_v14 = vld [vmem:[#allocation5 + $0x130] sm:$0xff]  ;;  %v17672_v19 = vcombine.low %v105_v5, %v117_v6  ;;  %v1256_v6 = vld [vmem:[#allocation7 + $0x8] sm:$0xff] }
 0x1c6   :  { %v22405_v5 = vld [vmem:[#allocation5 + $0x5b0] sm:$0xff] }
 0x1c8   :  { %7375 = vmatpush1.bf16.msra.mxu1 %v18654_v21  ;;  %8020 = vmatpush1.bf16.msra.mxu0 %v18664_v22  ;;  %v17697_v21 = vcombine.high %v129_v13, %v141_v14  ;;  %v153_v22 = vld [vmem:[#allocation5 + $0x190] sm:$0xff] }
 0x1c9   :  { %7376 = vmatprep.subr.bf16.mxu1 %v18679_v23  ;;  %8021 = vmatprep.subr.bf16.mxu0 %v18689_v28  ;;  %v165_v23 = vld [vmem:[#allocation5 + $0x1f0] sm:$0xff]  ;;  %v17696_v28 = vcombine.low %v129_v13, %v141_v14  ;;  %v17792_v14 = vcombine.low %v225_v52, %v237_v53 }
 0x1ca   :  { %v17720_v38 = vcombine.low %v153_v22, %v165_v23 }
 0x1cc   :  { %7377 = vmatpush1.bf16.msra.mxu1 %v18678_v31  ;;  %8022 = vmatpush1.bf16.msra.mxu0 %v18688_v32  ;;  %v17721_v31 = vcombine.high %v153_v22, %v165_v23  ;;  %v177_v32 = vld [vmem:[#allocation5 + $0x250] sm:$0xff] }
 0x1cd   :  { %7378 = vmatprep.subr.bf16.mxu1 %v18703_v33  ;;  %8023 = vmatprep.subr.bf16.mxu0 %v18713_v37  ;;  %v189_v33 = vld [vmem:[#allocation5 + $0x2b0] sm:$0xff]  ;;  %v1261_v37 = vlaneseq }
 0x1cf   :  { %v22387_v48 = vshrl.u32 %v1261_v37, 7 }
 0x1d0   :  { %7379 = vmatpush1.bf16.msra.mxu1 %v18702_v40  ;;  %8024 = vmatpush1.bf16.msra.mxu0 %v18712_v41  ;;  %v17732_v40 = vcombine.low %v159_v24, %v171_v27  ;;  %v17745_v41 = vcombine.high %v177_v32, %v189_v33 }
 0x1d1   :  { %7380 = vmatprep.subr.bf16.mxu1 %v18727_v42  ;;  %8025 = vmatprep.subr.bf16.mxu0 %v18737_v47  ;;  %v201_v42 = vld [vmem:[#allocation5 + $0x310] sm:$0xff]  ;;  %v219_v47 = vld [vmem:[#allocation5 + $0x3a0] sm:$0xff]  ;;  %v22393_v61 = vsub.s32 1, %v22387_v48 }
 0x1d2   :  { %v17781_v55 = vcombine.high %v207_v45, %v219_v47 }
 0x1d3   :  { %v1268_v13 = vrot.slane %v1255_v56, %v22393_v61  ;;  %v1300_v22 = vrot.slane %v1256_v6, %v22393_v61 }
 0x1d4   :  { %7381 = vmatpush1.bf16.msra.mxu1 %v18726_v49  ;;  %8026 = vmatpush1.bf16.msra.mxu0 %v18736_v50  ;;  %v17744_v49 = vcombine.low %v177_v32, %v189_v33  ;;  %v17756_v50 = vcombine.low %v183_v34, %v195_v36 }
 0x1d5   :  { %7382 = vmatprep.subr.bf16.mxu1 %v18751_v51  ;;  %8027 = vmatprep.subr.bf16.mxu0 %v18761_v54  ;;  %v17769_v51 = vcombine.high %v201_v42, %v213_v43  ;;  %v231_v54 = vld [vmem:[#allocation5 + $0x400] sm:$0xff] }
 0x1d8   :  { %7383 = vmatpush1.bf16.msra.mxu1 %v18750_v57  ;;  %8028 = vmatpush1.bf16.msra.mxu0 %v18760_v59  ;;  %v243_v57 = vld [vmem:[#allocation5 + $0x460] sm:$0xff]  ;;  %v22390_v59 = vsub.s32 0, %v22387_v48 }
 0x1d9   :  { %7384 = vmatprep.subr.bf16.mxu1 %v18775_v60  ;;  %8029 = vmatprep.subr.bf16.mxu0 %v18785_v0  ;;  %v17768_v60 = vcombine.low %v201_v42, %v213_v43  ;;  %v17780_v0 = vcombine.low %v207_v45, %v219_v47  ;;  %v17805_v7 = vcombine.high %v231_v54, %v243_v57 }
 0x1da   :  { %v17804_v16 = vcombine.low %v231_v54, %v243_v57 }
 0x1dc   :  { %7385 = vmatpush1.bf16.msra.mxu1 %v18774_v2  ;;  %8030 = vmatpush1.bf16.msra.mxu0 %v18784_v3  ;;  %v22399_v2 = vld [vmem:[#allocation5 + $0x4c0] sm:$0xff] }
 0x1dd   :  { %7386 = vmatprep.subr.bf16.mxu1 %v18799_v4  ;;  %8031 = vmatprep.subr.bf16.mxu0 %v18809_v8  ;;  %v22401_v3 = vld [vmem:[#allocation5 + $0x520] sm:$0xff]  ;;  %v22403_v4 = vld [vmem:[#allocation5 + $0x550] sm:$0xff] }
 0x1de   :  { %v22407_v8 = vld [vmem:[#allocation5 + $0x580] sm:$0xff]  ;;  %v17828_v24 = vcombine.low %v22399_v2, %v22401_v3  ;;  %v17840_v27 = vcombine.low %v22403_v4, %v22405_v5 }
 0x1df   :  { %v17852_v34 = vcombine.low %v22407_v8, %v22409_v9 }
 0x1e0   :  { %7387 = vmatpush1.bf16.msra.mxu1 %v18798_v10  ;;  %8032 = vmatpush1.bf16.msra.mxu0 %v18808_v11  ;;  %v22411_v10 = vld [vmem:[#allocation5 + $0x610] sm:$0xff] }
 0x1e1   :  { %7399 = vmatprep.subr.bf16.mxu1 %v17673_v12  ;;  %8173 = vmatprep.subr.bf16.mxu0 %v17685_v17  ;;  %v22413_v11 = vld [vmem:[#allocation5 + $0x670] sm:$0xff]  ;;  %v1264_v12 = vrot.slane %v1255_v56, %v22390_v59  ;;  %v1296_v17 = vrot.slane %v1256_v6, %v22390_v59  ;;  %v22469_v56 = vld [vmem:[#allocation5 + $0x760] sm:$0xff] }
 0x1e2   :  { %v17865_v36 = vcombine.high %v22411_v10, %v22413_v11 }
 0x1e3   :  { %7389 = vmatmul.mubr.bf16.vlgmr.msra.gmra.mrb[4].mxu1 %v22369_v44  ;;  %8034 = vmatmul.mubr.bf16.vlgmr.msra.gmra.mrb[4].mxu0 %v22369_v44 }
 0x1e4   :  { %7400 = vmatpush1.bf16.msra.mxu1 %v17672_v19  ;;  %8174 = vmatpush1.bf16.msra.mxu0 %v17684_v20  ;;  %v17817_v19 = vcombine.high %v22395_v62, %v22397_v63  ;;  %v22422_v20 = vld [vmem:[#allocation5 + $0x640] sm:$0xff] }
 0x1e5   :  { %7401 = vmatprep.subr.bf16.mxu1 %v17697_v21  ;;  %8175 = vmatprep.subr.bf16.mxu0 %v17709_v26  ;;  %v22424_v21 = vld [vmem:[#allocation5 + $0x6a0] sm:$0xff]  ;;  %v17829_v26 = vcombine.high %v22399_v2, %v22401_v3 }
 0x1e6   :  { %7431 = vmatprep.mubr.bf16.mxu1 %v22349_v58  ;;  %8205 = vmatprep.mubr.bf16.mxu0 %v22349_v58  ;;  %v17876_v42 = vcombine.low %v22422_v20, %v22424_v21  ;;  %v17877_v54 = vcombine.high %v22422_v20, %v22424_v21  ;;  %v22517_v21 = vld [vmem:[#allocation5 + $0x910] sm:$0xff] }
 0x1e8   :  { %7402 = vmatpush1.bf16.msra.mxu1 %v17696_v28  ;;  %8176 = vmatpush1.bf16.msra.mxu0 %v17708_v29  ;;  %v17841_v28 = vcombine.high %v22403_v4, %v22405_v5  ;;  %v22435_v29 = vld [vmem:[#allocation5 + $0x6d0] sm:$0xff] }
 0x1e9   :  { %7403 = vmatprep.subr.bf16.mxu1 %v17721_v31  ;;  %8177 = vmatprep.subr.bf16.mxu0 %v17733_v35  ;;  %v22437_v31 = vld [vmem:[#allocation5 + $0x730] sm:$0xff]  ;;  %v17853_v35 = vcombine.high %v22407_v8, %v22409_v9 }
 0x1ec   :  { %7404 = vmatpush1.bf16.msra.mxu1 %v17720_v38  ;;  %8178 = vmatpush1.bf16.msra.mxu0 %v17732_v40 }
 0x1ed   :  { %7405 = vmatprep.subr.bf16.mxu1 %v17745_v41  ;;  %8179 = vmatprep.subr.bf16.mxu0 %v17757_v46  ;;  %v17864_v41 = vcombine.low %v22411_v10, %v22413_v11 }
 0x1f0   :  { %7406 = vmatpush1.bf16.msra.mxu1 %v17744_v49  ;;  %8180 = vmatpush1.bf16.msra.mxu0 %v17756_v50 }
 0x1f1   :  { %7407 = vmatprep.subr.bf16.mxu1 %v17769_v51  ;;  %8181 = vmatprep.subr.bf16.mxu0 %v17781_v55  ;;  %v22467_v55 = vld [vmem:[#allocation5 + $0x700] sm:$0xff] }
 0x1f4   :  { %7408 = vmatpush1.bf16.msra.mxu1 %v17768_v60  ;;  %8182 = vmatpush1.bf16.msra.mxu0 %v17780_v0  ;;  %v17889_v0 = vcombine.high %v22435_v29, %v22437_v31 }
 0x1f5   :  { %7409 = vmatprep.subr.bf16.mxu1 %v17793_v1  ;;  %8183 = vmatprep.subr.bf16.mxu0 %v17805_v7 }
 0x1f6   :  { %v7261_v23 = vpop.f32.mrb[0].mxu1  ;;  %v7777_v37 = vpop.f32.mrb[0].mxu0 }
 0x1f7   :  { %v22439_v32 = vadd.f32 %v7261_v23, %v1264_v12  ;;  %v7263_v33 = vpop.f32.mrb[1].mxu1  ;;  %v22453_v43 = vadd.f32 %v7777_v37, %v1296_v17  ;;  %v7779_v45 = vpop.f32.mrb[1].mxu0  ;;  %v345_v37 = vld [vmem:[#allocation5 + $0x790] sm:$0xff] }
 0x1f8   :  { %v22447_v38 = vadd.f32 %v7263_v33, %v1268_v13  ;;  %v7265_v40 = vpop.f32.mrb[2].mxu1  ;;  %7410 = vmatpush1.bf16.msra.mxu1 %v17792_v14  ;;  %8184 = vmatpush1.bf16.msra.mxu0 %v17804_v16  ;;  %v22459_v50 = vadd.f32 %v7779_v45, %v1300_v22  ;;  %v7781_v51 = vpop.f32.mrb[2].mxu0  ;;  %v351_v45 = vld [vmem:[#allocation5 + $0x7c0] sm:$0xff] }
 0x1f9   :  { %v8689_v46 = vmul.f32 %v22439_v32, %v22439_v32  ;;  %v22457_v47 = vadd.f32 %v7265_v40, %v1264_v12  ;;  %v7267_v49 = vpop.f32.mrb[3].mxu1  ;;  %7411 = vmatprep.subr.bf16.mxu1 %v17817_v19  ;;  %8185 = vmatprep.subr.bf16.mxu0 %v17829_v26  ;;  %v8697_v57 = vmul.f32 %v22453_v43, %v22453_v43  ;;  %v7783_v60 = vpop.f32.mrb[3].mxu0  ;;  %v357_v40 = vld [vmem:[#allocation5 + $0x7f0] sm:$0xff] }
 0x1fa   :  { %v8690_v52 = vmul.f32 %v22447_v38, %v22447_v38  ;;  %v22463_v53 = vadd.f32 %v7267_v49, %v1268_v13  ;;  %v8698_v1 = vmul.f32 %v22459_v50, %v22459_v50  ;;  %v22484_v5 = vadd.f32 %v7781_v51, %v1296_v17 }
 0x1fb   :  { %v8737_v62 = vmul.f32 %v22439_v32, %v8689_v46  ;;  %v8713_v63 = vmul.f32 %v22457_v47, %v22457_v47  ;;  %v8745_v4 = vmul.f32 %v22453_v43, %v8697_v57  ;;  %v22488_v9 = vadd.f32 %v7783_v60, %v1300_v22 }
 0x1fc   :  { %v8738_v2 = vmul.f32 %v22447_v38, %v8690_v52  ;;  %v8714_v3 = vmul.f32 %v22463_v53, %v22463_v53  ;;  %7412 = vmatpush1.bf16.msra.mxu1 %v17816_v18  ;;  %8186 = vmatpush1.bf16.msra.mxu0 %v17828_v24  ;;  %v8746_v8 = vmul.f32 %v22459_v50, %v8698_v1 }
 0x1fd   :  { %v8785_v6 = vmul.f32 0.044715, %v8737_v62  ;;  %v8761_v7 = vmul.f32 %v22457_v47, %v8713_v63  ;;  %7413 = vmatprep.subr.bf16.mxu1 %v17841_v28  ;;  %8187 = vmatprep.subr.bf16.mxu0 %v17853_v35  ;;  %v8793_v14 = vmul.f32 0.044715, %v8745_v4  ;;  %v8721_v16 = vmul.f32 %v22484_v5, %v22484_v5  ;;  %v363_v62 = vld [vmem:[#allocation5 + $0x820] sm:$0xff]  ;;  %v369_v4 = vld [vmem:[#allocation5 + $0x850] sm:$0xff] }
 0x1fe   :  { %v8786_v12 = vmul.f32 0.044715, %v8738_v2  ;;  %v8762_v13 = vmul.f32 %v22463_v53, %v8714_v3  ;;  %v17901_v19 = vcombine.high %v22467_v55, %v22469_v56  ;;  %v8794_v23 = vmul.f32 0.044715, %v8746_v8  ;;  %v411_v8 = vld [vmem:[#allocation5 + $0x9a0] sm:$0xff] }
 0x1ff   :  { %v8833_v17 = vadd.f32 %v22439_v32, %v8785_v6  ;;  %v8809_v18 = vmul.f32 0.044715, %v8761_v7  ;;  %v8841_v22 = vadd.f32 %v22453_v43, %v8793_v14  ;;  %v8769_v28 = vmul.f32 %v22484_v5, %v8721_v16  ;;  %v381_v6 = vld [vmem:[#allocation5 + $0x8b0] sm:$0xff]  ;;  %v375_v7 = vld [vmem:[#allocation5 + $0x880] sm:$0xff] }
 0x200   :  { %v8834_v24 = vadd.f32 %v22447_v38, %v8786_v12  ;;  %v8810_v26 = vmul.f32 0.044715, %v8762_v13  ;;  %7414 = vmatpush1.bf16.msra.mxu1 %v17840_v27  ;;  %8188 = vmatpush1.bf16.msra.mxu0 %v17852_v34  ;;  %v8842_v46 = vadd.f32 %v22459_v50, %v8794_v23  ;;  %v8722_v49 = vmul.f32 %v22488_v9, %v22488_v9  ;;  %v22519_v14 = vld [vmem:[#allocation5 + $0x9d0] sm:$0xff] }
 0x201   :  { %v8881_v33 = vmul.f32 0.7978846, %v8833_v17  ;;  %v8857_v35 = vadd.f32 %v22457_v47, %v8809_v18  ;;  %7415 = vmatprep.subr.bf16.mxu1 %v17865_v36  ;;  %8189 = vmatprep.subr.bf16.mxu0 %v17877_v54  ;;  %v8889_v52 = vmul.f32 0.7978846, %v8841_v22  ;;  %v8817_v57 = vmul.f32 0.044715, %v8769_v28 }
 0x202   :  { %v8882_v51 = vmul.f32 0.7978846, %v8834_v24  ;;  %v8858_v27 = vadd.f32 %v22463_v53, %v8810_v26  ;;  %v8890_v63 = vmul.f32 0.7978846, %v8842_v46  ;;  %v8770_v34 = vmul.f32 %v22488_v9, %v8722_v49  ;;  %v22521_v16 = vld [vmem:[#allocation5 + $0xa30] sm:$0xff]  ;;  %v22524_v24 = vld [vmem:[#allocation5 + $0xa00] sm:$0xff] }
 0x203   :  { %22000 = vtanh.f32 %v8881_v33  ;;  %v8905_v60 = vmul.f32 0.7978846, %v8857_v35  ;;  %v17888_v1 = vcombine.low %v22435_v29, %v22437_v31  ;;  %v8865_v2 = vadd.f32 %v22484_v5, %v8817_v57  ;;  %v387_v29 = vld [vmem:[#allocation5 + $0x8e0] sm:$0xff]  ;;  %v441_v57 = vld [vmem:[#allocation5 + $0xa90] sm:$0xff] }
 0x204   :  { %22002 = vtanh.f32 %v8882_v51  ;;  %v8906_v36 = vmul.f32 0.7978846, %v8858_v27  ;;  %7416 = vmatpush1.bf16.msra.mxu1 %v17864_v41  ;;  %8190 = vmatpush1.bf16.msra.mxu0 %v17876_v42  ;;  %v17900_v54 = vcombine.low %v22467_v55, %v22469_v56  ;;  %v17913_v3 = vcombine.high %v345_v37, %v357_v40  ;;  %v405_v56 = vld [vmem:[#allocation5 + $0x970] sm:$0xff]  ;;  %v22526_v26 = vld [vmem:[#allocation5 + $0xa60] sm:$0xff] }
 0x205   :  { %22004 = vtanh.f32 %v8905_v60  ;;  %7417 = vmatprep.subr.bf16.mxu1 %v17889_v0  ;;  %v8818_v10 = vmul.f32 0.044715, %v8770_v34  ;;  %8191 = vmatprep.subr.bf16.mxu0 %v17901_v19  ;;  %v17925_v11 = vcombine.high %v351_v45, %v363_v62  ;;  %v8913_v31 = vmul.f32 0.7978846, %v8865_v2  ;;  %v399_v0 = vld [vmem:[#allocation5 + $0x940] sm:$0xff] }
 0x206   :  { %22006 = vtanh.f32 %v8906_v36  ;;  %v17912_v20 = vcombine.low %v345_v37, %v357_v40  ;;  %v17924_v42 = vcombine.low %v351_v45, %v363_v62  ;;  %v17937_v55 = vcombine.high %v369_v4, %v381_v6  ;;  %v447_v34 = vld [vmem:[#allocation5 + $0xac0] sm:$0xff] }
 0x207   :  { %22008 = vtanh.f32 %v8889_v52  ;;  %v8866_v41 = vadd.f32 %v22488_v9, %v8818_v10  ;;  %v17949_v13 = vcombine.high %v375_v7, %v387_v29  ;;  %v17936_v17 = vcombine.low %v369_v4, %v381_v6 }
 0x208   :  { %7418 = vmatpush1.bf16.msra.mxu1 %v17888_v1  ;;  %22010 = vtanh.f32 %v8890_v63  ;;  %8192 = vmatpush1.bf16.msra.mxu0 %v17900_v54  ;;  %v17948_v19 = vcombine.low %v375_v7, %v387_v29  ;;  %v17961_v23 = vcombine.high %v22517_v21, %v405_v56  ;;  %v17960_v28 = vcombine.low %v22517_v21, %v405_v56  ;;  %v477_v56 = vld [vmem:[#allocation5 + $0xbb0] sm:$0xff] }
 0x209   :  { %7419 = vmatprep.subr.bf16.mxu1 %v17913_v3  ;;  %22012 = vtanh.f32 %v8913_v31  ;;  %v8914_v12 = vmul.f32 0.7978846, %v8866_v41  ;;  %8193 = vmatprep.subr.bf16.mxu0 %v17925_v11  ;;  %v17973_v33 = vcombine.high %v399_v0, %v411_v8  ;;  %v8929_v40 = vmul.f32 0.5, %v22439_v32  ;;  %v453_v32 = vld [vmem:[#allocation5 + $0xaf0] sm:$0xff]  ;;  %v459_v3 = vld [vmem:[#allocation5 + $0xb20] sm:$0xff] }
 0x20a   :  { %v17972_v45 = vcombine.low %v399_v0, %v411_v8  ;;  %v17985_v46 = vcombine.high %v22519_v14, %v22521_v16  ;;  %v8953_v27 = vmul.f32 0.5, %v22457_v47  ;;  %v17997_v52 = vcombine.high %v22524_v24, %v22526_v26  ;;  %v471_v0 = vld [vmem:[#allocation5 + $0xb80] sm:$0xff] }
 0x20b   :  { %22014 = vtanh.f32 %v8914_v12  ;;  %v8937_v60 = vmul.f32 0.5, %v22453_v43  ;;  %v8961_v36 = vmul.f32 0.5, %v22484_v5  ;;  %v8930_v1 = vmul.f32 0.5, %v22447_v38 }
 0x20c   :  { %7420 = vmatpush1.bf16.msra.mxu1 %v17912_v20  ;;  %8194 = vmatpush1.bf16.msra.mxu0 %v17924_v42  ;;  %v8954_v2 = vmul.f32 0.5, %v22463_v53  ;;  %v8938_v43 = vmul.f32 0.5, %v22459_v50  ;;  %v17984_v11 = vcombine.low %v22519_v14, %v22521_v16  ;;  %v8962_v53 = vmul.f32 0.5, %v22488_v9 }
 0x20d   :  { %v22001_v18 = vpop.eup %22000  ;;  %7421 = vmatprep.subr.bf16.mxu1 %v17937_v55  ;;  %8195 = vmatprep.subr.bf16.mxu0 %v17949_v13  ;;  %v17996_v50 = vcombine.low %v22524_v24, %v22526_v26  ;;  %v18009_v42 = vcombine.high %v441_v57, %v453_v32  ;;  %v465_v55 = vld [vmem:[#allocation5 + $0xb50] sm:$0xff]  ;;  %v18021_v12 = vcombine.high %v447_v34, %v459_v3  ;;  %v483_v13 = vld [vmem:[#allocation5 + $0xbe0] sm:$0xff] }
 0x20e   :  { %v22003_v22 = vpop.eup %22002  ;;  %v9025_v35 = vadd.f32 1.0, %v22001_v18  ;;  %v18033_v24 = vcombine.high %v465_v55, %v477_v56  ;;  %v489_v26 = vld [vmem:[#allocation5 + $0xc10] sm:$0xff] }
 0x20f   :  { %v22005_v37 = vpop.eup %22004  ;;  %v9026_v49 = vadd.f32 1.0, %v22003_v22  ;;  %v501_v22 = vld [vmem:[#allocation5 + $0xc70] sm:$0xff] }
 0x210   :  { %v22007_v51 = vpop.eup %22006  ;;  %7422 = vmatpush1.bf16.msra.mxu1 %v17936_v17  ;;  %v9049_v62 = vadd.f32 1.0, %v22005_v37  ;;  %8196 = vmatpush1.bf16.msra.mxu0 %v17948_v19  ;;  %v9073_v4 = vmul.f32 %v9025_v35, %v8929_v40  ;;  %v18008_v17 = vcombine.low %v441_v57, %v453_v32  ;;  %v507_v35 = vld [vmem:[#allocation5 + $0xca0] sm:$0xff]  ;;  %v18032_v40 = vcombine.low %v465_v55, %v477_v56  ;;  %v537_v32 = vld [vmem:[#allocation5 + $0xd90] sm:$0xff] }
 0x211   :  { %v22009_v63 = vpop.eup %22008  ;;  %7423 = vmatprep.subr.bf16.mxu1 %v17961_v23  ;;  %v9050_v47 = vadd.f32 1.0, %v22007_v51  ;;  %8197 = vmatprep.subr.bf16.mxu0 %v17973_v33  ;;  %v9074_v29 = vmul.f32 %v9026_v49, %v8930_v1  ;;  %v18020_v23 = vcombine.low %v447_v34, %v459_v3  ;;  %v18045_v33 = vcombine.high %v471_v0, %v483_v13  ;;  %v513_v49 = vld [vmem:[#allocation5 + $0xcd0] sm:$0xff]  ;;  %v531_v57 = vld [vmem:[#allocation5 + $0xd60] sm:$0xff] }
 0x212   :  { %v22011_v54 = vpop.eup %22010  ;;  %v9097_v6 = vmul.f32 %v9049_v62, %v8953_v27  ;;  %v9033_v7 = vadd.f32 1.0, %v22009_v63  ;;  %v525_v51 = vld [vmem:[#allocation5 + $0xd30] sm:$0xff]  ;;  %v519_v27 = vld [vmem:[#allocation5 + $0xd00] sm:$0xff] }
 0x213   :  { %v22013_v10 = vpop.eup %22012  ;;  %v9098_v31 = vmul.f32 %v9050_v47, %v8954_v2  ;;  %v9034_v5 = vadd.f32 1.0, %v22011_v54  ;;  %v18081_v63 = vcombine.high %v513_v49, %v525_v51  ;;  %v549_v34 = vld [vmem:[#allocation5 + $0xdf0] sm:$0xff]  ;;  %v18093_v1 = vcombine.high %v519_v27, %v531_v57  ;;  %v555_v2 = vld [vmem:[#allocation5 + $0xe20] sm:$0xff] }
 0x214   :  { %7424 = vmatpush1.bf16.msra.mxu1 %v17960_v28  ;;  %v22542_v38 = vpack.c.bf16 %v9097_v6, %v9073_v4  ;;  %v9057_v41 = vadd.f32 1.0, %v22013_v10  ;;  %v9081_v20 = vmul.f32 %v9033_v7, %v8937_v60  ;;  %8198 = vmatpush1.bf16.msra.mxu0 %v17972_v45  ;;  %v495_v28 = vld [vmem:[#allocation5 + $0xc40] sm:$0xff]  ;;  %v18044_v45 = vcombine.low %v471_v0, %v483_v13  ;;  %v561_v4 = vld [vmem:[#allocation5 + $0xe50] sm:$0xff] }
 0x215   :  { %v22015_v21 = vpop.eup %22014  ;;  %7425 = vmatprep.subr.bf16.mxu1 %v17985_v46  ;;  %v22547_v8 = vpack.c.bf16 %v9098_v31, %v9074_v29  ;;  %8199 = vmatprep.subr.bf16.mxu0 %v17997_v52  ;;  %v9082_v16 = vmul.f32 %v9034_v5, %v8938_v43  ;;  %v18057_v46 = vcombine.high %v489_v26, %v501_v22  ;;  %v573_v6 = vld [vmem:[#allocation5 + $0xeb0] sm:$0xff]  ;;  %v567_v43 = vld [vmem:[#allocation5 + $0xe80] sm:$0xff] }
 0x216   :  { %v9058_v14 = vadd.f32 1.0, %v22015_v21  ;;  %v9105_v9 = vmul.f32 %v9057_v41, %v8961_v36  ;;  %v18069_v52 = vcombine.high %v495_v28, %v507_v35  ;;  %v18056_v60 = vcombine.low %v489_v26, %v501_v22  ;;  %v543_v36 = vld [vmem:[#allocation5 + $0xdc0] sm:$0xff]  ;;  %v585_v5 = vld [vmem:[#allocation5 + $0xf10] sm:$0xff] }
 0x217   :  { %v18068_v62 = vcombine.low %v495_v28, %v507_v35  ;;  %v18080_v47 = vcombine.low %v513_v49, %v525_v51  ;;  %v18092_v54 = vcombine.low %v519_v27, %v531_v57  ;;  %v18105_v3 = vcombine.high %v537_v32, %v549_v34  ;;  %v579_v10 = vld [vmem:[#allocation5 + $0xee0] sm:$0xff]  ;;  %v609_v56 = vld [vmem:[#allocation5 + $0xfd0] sm:$0xff] }
 0x218   :  { %7426 = vmatpush1.bf16.msra.mxu1 %v17984_v11  ;;  %v9106_v18 = vmul.f32 %v9058_v14, %v8962_v53  ;;  %v22549_v19 = vpack.c.bf16 %v9105_v9, %v9081_v20  ;;  %8200 = vmatpush1.bf16.msra.mxu0 %v17996_v50  ;;  %v18117_v7 = vcombine.high %v543_v36, %v555_v2  ;;  %v597_v53 = vld [vmem:[#allocation5 + $0xf70] sm:$0xff]  ;;  %v591_v41 = vld [vmem:[#allocation5 + $0xf40] sm:$0xff] }
 0x219   :  { %7427 = vmatprep.subr.bf16.mxu1 %v18009_v42  ;;  %8201 = vmatprep.subr.bf16.mxu0 %v18021_v12  ;;  %v18104_v11 = vcombine.low %v537_v32, %v549_v34  ;;  %v18116_v29 = vcombine.low %v543_v36, %v555_v2  ;;  %v18129_v31 = vcombine.high %v561_v4, %v573_v6  ;;  %v603_v21 = vld [vmem:[#allocation5 + $0xfa0] sm:$0xff]  ;;  %v621_v0 = vld [vmem:[#allocation5 + $0x1030] sm:$0xff] }
 0x21a   :  { %v22551_v37 = vpack.c.bf16 %v9106_v18, %v9082_v16  ;;  %v18141_v20 = vcombine.high %v567_v43, %v579_v10  ;;  %v18128_v50 = vcombine.low %v561_v4, %v573_v6  ;;  %v18140_v42 = vcombine.low %v567_v43, %v579_v10  ;;  %v615_v12 = vld [vmem:[#allocation5 + $0x1000] sm:$0xff]  ;;  %v633_v18 = vld [vmem:[#allocation5 + $0x1090] sm:$0xff] }
 0x21b   :  { %v18153_v55 = vcombine.high %v585_v5, %v597_v53  ;;  %v18165_v13 = vcombine.high %v591_v41, %v603_v21  ;;  %v627_v14 = vld [vmem:[#allocation5 + $0x1060] sm:$0xff]  ;;  %v18152_v16 = vcombine.low %v585_v5, %v597_v53  ;;  %v18164_v9 = vcombine.low %v591_v41, %v603_v21 }
 0x21c   :  { %7428 = vmatpush1.bf16.msra.mxu1 %v18008_v17  ;;  %8202 = vmatpush1.bf16.msra.mxu0 %v18020_v23  ;;  %v18177_v17 = vcombine.high %v609_v56, %v621_v0  ;;  %v645_v23 = vld [vmem:[#allocation5 + $0x10f0] sm:$0xff]  ;;  %v18189_v26 = vcombine.high %v615_v12, %v627_v14  ;;  %v651_v22 = vld [vmem:[#allocation5 + $0x1120] sm:$0xff]  ;;  %v18176_v28 = vcombine.low %v609_v56, %v621_v0 }
 0x21d   :  { %7429 = vmatprep.subr.bf16.mxu1 %v18033_v24  ;;  %8203 = vmatprep.subr.bf16.mxu0 %v18045_v33  ;;  %v639_v24 = vld [vmem:[#allocation5 + $0x10c0] sm:$0xff]  ;;  %v18188_v33 = vcombine.low %v615_v12, %v627_v14  ;;  %v18201_v35 = vcombine.high %v633_v18, %v645_v23  ;;  %v18200_v27 = vcombine.low %v633_v18, %v645_v23 }
 0x21e   :  { %v18213_v49 = vcombine.high %v639_v24, %v651_v22  ;;  %v675_v51 = vld [vmem:[#allocation5 + $0x11e0] sm:$0xff] }
 0x21f   :  { %v699_v34 = vld [vmem:[#allocation5 + $0x12a0] sm:$0xff] }
 0x220   :  { %7430 = vmatpush1.bf16.msra.mxu1 %v18032_v40  ;;  %8204 = vmatpush1.bf16.msra.mxu0 %v18044_v45  ;;  %v657_v40 = vld [vmem:[#allocation5 + $0x1150] sm:$0xff]  ;;  %v723_v6 = vld [vmem:[#allocation5 + $0x1360] sm:$0xff] }
 0x221   :  { %7442 = vmatprep.subr.bf16.mxu1 %v18057_v46  ;;  %8216 = vmatprep.subr.bf16.mxu0 %v18069_v52  ;;  %v669_v45 = vld [vmem:[#allocation5 + $0x11b0] sm:$0xff]  ;;  %v663_v46 = vld [vmem:[#allocation5 + $0x1180] sm:$0xff]  ;;  %v18212_v52 = vcombine.low %v639_v24, %v651_v22 }
 0x222   :  { %v18225_v57 = vcombine.high %v657_v40, %v669_v45  ;;  %v18237_v32 = vcombine.high %v663_v46, %v675_v51  ;;  %v18224_v36 = vcombine.low %v657_v40, %v669_v45  ;;  %v747_v53 = vld [vmem:[#allocation5 + $0x1420] sm:$0xff] }
 0x223   :  { %7432 = vmatmul.mubr.bf16.vlgmr.msra.gmra.mrb[8].mxu1 %v22353_v15  ;;  %8206 = vmatmul.mubr.bf16.vlgmr.msra.gmra.mrb[8].mxu0 %v22353_v15  ;;  %v771_v0 = vld [vmem:[#allocation5 + $0x14e0] sm:$0xff] }
 0x224   :  { %7443 = vmatpush1.bf16.msra.mxu1 %v18056_v60  ;;  %8217 = vmatpush1.bf16.msra.mxu0 %v18068_v62  ;;  %v681_v60 = vld [vmem:[#allocation5 + $0x1210] sm:$0xff]  ;;  %v795_v23 = vld [vmem:[#allocation5 + $0x15a0] sm:$0xff] }
 0x225   :  { %7444 = vmatprep.subr.bf16.mxu1 %v18081_v63  ;;  %8218 = vmatprep.subr.bf16.mxu0 %v18093_v1  ;;  %v693_v62 = vld [vmem:[#allocation5 + $0x1270] sm:$0xff]  ;;  %v687_v63 = vld [vmem:[#allocation5 + $0x1240] sm:$0xff]  ;;  %v18236_v1 = vcombine.low %v663_v46, %v675_v51 }
 0x226   :  { %7474 = vmatprep.mubr.bf16.mxu1 %v22355_v25  ;;  %8248 = vmatprep.mubr.bf16.mxu0 %v22355_v25  ;;  %v18249_v2 = vcombine.high %v681_v60, %v693_v62  ;;  %v18261_v4 = vcombine.high %v687_v63, %v699_v34  ;;  %v18248_v43 = vcombine.low %v681_v60, %v693_v62  ;;  %v819_v45 = vld [vmem:[#allocation5 + $0x1660] sm:$0xff] }
 0x227   :  { %v843_v62 = vld [vmem:[#allocation5 + $0x1720] sm:$0xff] }
 0x228   :  { %7445 = vmatpush1.bf16.msra.mxu1 %v18080_v47  ;;  %8219 = vmatpush1.bf16.msra.mxu0 %v18092_v54  ;;  %v705_v47 = vld [vmem:[#allocation5 + $0x12d0] sm:$0xff] }
 0x229   :  { %7446 = vmatprep.subr.bf16.mxu1 %v18105_v3  ;;  %8220 = vmatprep.subr.bf16.mxu0 %v18117_v7  ;;  %v717_v54 = vld [vmem:[#allocation5 + $0x1330] sm:$0xff]  ;;  %v711_v3 = vld [vmem:[#allocation5 + $0x1300] sm:$0xff]  ;;  %v18260_v7 = vcombine.low %v687_v63, %v699_v34 }
 0x22a   :  { %v18273_v10 = vcombine.high %v705_v47, %v717_v54  ;;  %v18285_v5 = vcombine.high %v711_v3, %v723_v6  ;;  %v18272_v41 = vcombine.low %v705_v47, %v717_v54  ;;  %v867_v54 = vld [vmem:[#allocation5 + $0x17e0] sm:$0xff] }
 0x22c   :  { %7447 = vmatpush1.bf16.msra.mxu1 %v18104_v11  ;;  %8221 = vmatpush1.bf16.msra.mxu0 %v18116_v29  ;;  %v729_v11 = vld [vmem:[#allocation5 + $0x1390] sm:$0xff] }
 0x22d   :  { %7448 = vmatprep.subr.bf16.mxu1 %v18129_v31  ;;  %8222 = vmatprep.subr.bf16.mxu0 %v18141_v20  ;;  %v741_v29 = vld [vmem:[#allocation5 + $0x13f0] sm:$0xff]  ;;  %v735_v31 = vld [vmem:[#allocation5 + $0x13c0] sm:$0xff]  ;;  %v18284_v20 = vcombine.low %v711_v3, %v723_v6 }
 0x22e   :  { %v18297_v21 = vcombine.high %v729_v11, %v741_v29  ;;  %v18309_v56 = vcombine.high %v735_v31, %v747_v53  ;;  %v18296_v12 = vcombine.low %v729_v11, %v741_v29  ;;  %v891_v29 = vld [vmem:[#allocation5 + $0x18a0] sm:$0xff] }
 0x230   :  { %7449 = vmatpush1.bf16.msra.mxu1 %v18128_v50  ;;  %8223 = vmatpush1.bf16.msra.mxu0 %v18140_v42  ;;  %v753_v50 = vld [vmem:[#allocation5 + $0x1450] sm:$0xff] }
 0x231   :  { %7450 = vmatprep.subr.bf16.mxu1 %v18153_v55  ;;  %8224 = vmatprep.subr.bf16.mxu0 %v18165_v13  ;;  %v765_v42 = vld [vmem:[#allocation5 + $0x14b0] sm:$0xff]  ;;  %v759_v55 = vld [vmem:[#allocation5 + $0x1480] sm:$0xff]  ;;  %v18308_v13 = vcombine.low %v735_v31, %v747_v53 }
 0x232   :  { %v18321_v14 = vcombine.high %v753_v50, %v765_v42  ;;  %v18333_v18 = vcombine.high %v759_v55, %v771_v0  ;;  %v18320_v24 = vcombine.low %v753_v50, %v765_v42  ;;  %v915_v42 = vld [vmem:[#allocation5 + $0x1960] sm:$0xff] }
 0x234   :  { %7451 = vmatpush1.bf16.msra.mxu1 %v18152_v16  ;;  %8225 = vmatpush1.bf16.msra.mxu0 %v18164_v9  ;;  %v777_v16 = vld [vmem:[#allocation5 + $0x1510] sm:$0xff] }
 0x235   :  { %7452 = vmatprep.subr.bf16.mxu1 %v18177_v17  ;;  %8226 = vmatprep.subr.bf16.mxu0 %v18189_v26  ;;  %v789_v9 = vld [vmem:[#allocation5 + $0x1570] sm:$0xff]  ;;  %v783_v17 = vld [vmem:[#allocation5 + $0x1540] sm:$0xff]  ;;  %v18332_v26 = vcombine.low %v759_v55, %v771_v0 }
 0x236   :  { %v18345_v22 = vcombine.high %v777_v16, %v789_v9  ;;  %v18357_v40 = vcombine.high %v783_v17, %v795_v23  ;;  %v18344_v46 = vcombine.low %v777_v16, %v789_v9  ;;  %v939_v9 = vld [vmem:[#allocation5 + $0x1a20] sm:$0xff] }
 0x238   :  { %7453 = vmatpush1.bf16.msra.mxu1 %v18176_v28  ;;  %8227 = vmatpush1.bf16.msra.mxu0 %v18188_v33  ;;  %v801_v28 = vld [vmem:[#allocation5 + $0x15d0] sm:$0xff] }
 0x239   :  { %7454 = vmatprep.subr.bf16.mxu1 %v18201_v35  ;;  %8228 = vmatprep.subr.bf16.mxu0 %v18213_v49  ;;  %v813_v33 = vld [vmem:[#allocation5 + $0x1630] sm:$0xff]  ;;  %v807_v35 = vld [vmem:[#allocation5 + $0x1600] sm:$0xff]  ;;  %v18356_v49 = vcombine.low %v783_v17, %v795_v23 }
 0x23a   :  { %v18369_v51 = vcombine.high %v801_v28, %v813_v33  ;;  %v18381_v60 = vcombine.high %v807_v35, %v819_v45  ;;  %v18368_v63 = vcombine.low %v801_v28, %v813_v33  ;;  %v963_v33 = vld [vmem:[#allocation5 + $0x1ae0] sm:$0xff] }
 0x23c   :  { %7455 = vmatpush1.bf16.msra.mxu1 %v18200_v27  ;;  %8229 = vmatpush1.bf16.msra.mxu0 %v18212_v52  ;;  %v825_v27 = vld [vmem:[#allocation5 + $0x1690] sm:$0xff] }
 0x23d   :  { %7456 = vmatprep.subr.bf16.mxu1 %v18225_v57  ;;  %8230 = vmatprep.subr.bf16.mxu0 %v18237_v32  ;;  %v837_v52 = vld [vmem:[#allocation5 + $0x16f0] sm:$0xff]  ;;  %v831_v57 = vld [vmem:[#allocation5 + $0x16c0] sm:$0xff]  ;;  %v18380_v32 = vcombine.low %v807_v35, %v819_v45 }
 0x23e   :  { %v18393_v34 = vcombine.high %v825_v27, %v837_v52  ;;  %v18405_v47 = vcombine.high %v831_v57, %v843_v62  ;;  %v18392_v3 = vcombine.low %v825_v27, %v837_v52  ;;  %v987_v52 = vld [vmem:[#allocation5 + $0x1ba0] sm:$0xff] }
 0x240   :  { %7457 = vmatpush1.bf16.msra.mxu1 %v18224_v36  ;;  %8231 = vmatpush1.bf16.msra.mxu0 %v18236_v1  ;;  %v849_v36 = vld [vmem:[#allocation5 + $0x1750] sm:$0xff] }
 0x241   :  { %7458 = vmatprep.subr.bf16.mxu1 %v18249_v2  ;;  %8232 = vmatprep.subr.bf16.mxu0 %v18261_v4  ;;  %v861_v1 = vld [vmem:[#allocation5 + $0x17b0] sm:$0xff]  ;;  %v855_v2 = vld [vmem:[#allocation5 + $0x1780] sm:$0xff]  ;;  %v18404_v4 = vcombine.low %v831_v57, %v843_v62 }
 0x242   :  { %v18417_v6 = vcombine.high %v849_v36, %v861_v1  ;;  %v18429_v11 = vcombine.high %v855_v2, %v867_v54  ;;  %v18416_v31 = vcombine.low %v849_v36, %v861_v1  ;;  %v1011_v1 = vld [vmem:[#allocation5 + $0x1c60] sm:$0xff] }
 0x244   :  { %7459 = vmatpush1.bf16.msra.mxu1 %v18248_v43  ;;  %8233 = vmatpush1.bf16.msra.mxu0 %v18260_v7  ;;  %v873_v43 = vld [vmem:[#allocation5 + $0x1810] sm:$0xff] }
 0x245   :  { %7460 = vmatprep.subr.bf16.mxu1 %v18273_v10  ;;  %8234 = vmatprep.subr.bf16.mxu0 %v18285_v5  ;;  %v885_v7 = vld [vmem:[#allocation5 + $0x1870] sm:$0xff]  ;;  %v879_v10 = vld [vmem:[#allocation5 + $0x1840] sm:$0xff]  ;;  %v18428_v5 = vcombine.low %v855_v2, %v867_v54 }
 0x246   :  { %v18441_v53 = vcombine.high %v873_v43, %v885_v7  ;;  %v18453_v50 = vcombine.high %v879_v10, %v891_v29  ;;  %v18440_v55 = vcombine.low %v873_v43, %v885_v7  ;;  %v1035_v7 = vld [vmem:[#allocation5 + $0x1d20] sm:$0xff] }
 0x248   :  { %7461 = vmatpush1.bf16.msra.mxu1 %v18272_v41  ;;  %8235 = vmatpush1.bf16.msra.mxu0 %v18284_v20  ;;  %v897_v41 = vld [vmem:[#allocation5 + $0x18d0] sm:$0xff] }
 0x249   :  { %7462 = vmatprep.subr.bf16.mxu1 %v18297_v21  ;;  %8236 = vmatprep.subr.bf16.mxu0 %v18309_v56  ;;  %v909_v20 = vld [vmem:[#allocation5 + $0x1930] sm:$0xff]  ;;  %v903_v21 = vld [vmem:[#allocation5 + $0x1900] sm:$0xff]  ;;  %v18452_v56 = vcombine.low %v879_v10, %v891_v29 }
 0x24a   :  { %v18465_v0 = vcombine.high %v897_v41, %v909_v20  ;;  %v18477_v16 = vcombine.high %v903_v21, %v915_v42  ;;  %v18464_v17 = vcombine.low %v897_v41, %v909_v20  ;;  %v1059_v20 = vld [vmem:[#allocation5 + $0x1de0] sm:$0xff] }
 0x24c   :  { %7463 = vmatpush1.bf16.msra.mxu1 %v18296_v12  ;;  %8237 = vmatpush1.bf16.msra.mxu0 %v18308_v13  ;;  %v921_v12 = vld [vmem:[#allocation5 + $0x1990] sm:$0xff] }
 0x24d   :  { %7464 = vmatprep.subr.bf16.mxu1 %v18321_v14  ;;  %8238 = vmatprep.subr.bf16.mxu0 %v18333_v18  ;;  %v933_v13 = vld [vmem:[#allocation5 + $0x19f0] sm:$0xff]  ;;  %v927_v14 = vld [vmem:[#allocation5 + $0x19c0] sm:$0xff]  ;;  %v18476_v18 = vcombine.low %v903_v21, %v915_v42 }
 0x24e   :  { %v18489_v23 = vcombine.high %v921_v12, %v933_v13  ;;  %v18501_v28 = vcombine.high %v927_v14, %v939_v9  ;;  %v18488_v35 = vcombine.low %v921_v12, %v933_v13  ;;  %v1083_v13 = vld [vmem:[#allocation5 + $0x1ea0] sm:$0xff] }
 0x250   :  { %7465 = vmatpush1.bf16.msra.mxu1 %v18320_v24  ;;  %8239 = vmatpush1.bf16.msra.mxu0 %v18332_v26  ;;  %v945_v24 = vld [vmem:[#allocation5 + $0x1a50] sm:$0xff] }
 0x251   :  { %7466 = vmatprep.subr.bf16.mxu1 %v18345_v22  ;;  %8240 = vmatprep.subr.bf16.mxu0 %v18357_v40  ;;  %v957_v26 = vld [vmem:[#allocation5 + $0x1ab0] sm:$0xff]  ;;  %v951_v22 = vld [vmem:[#allocation5 + $0x1a80] sm:$0xff]  ;;  %v18500_v40 = vcombine.low %v927_v14, %v939_v9 }
 0x252   :  { %v18513_v45 = vcombine.high %v945_v24, %v957_v26  ;;  %v18525_v27 = vcombine.high %v951_v22, %v963_v33  ;;  %v18512_v57 = vcombine.low %v945_v24, %v957_v26  ;;  %v1107_v26 = vld [vmem:[#allocation5 + $0x1f60] sm:$0xff] }
 0x254   :  { %7467 = vmatpush1.bf16.msra.mxu1 %v18344_v46  ;;  %8241 = vmatpush1.bf16.msra.mxu0 %v18356_v49  ;;  %v969_v46 = vld [vmem:[#allocation5 + $0x1b10] sm:$0xff] }
 0x255   :  { %7468 = vmatprep.subr.bf16.mxu1 %v18369_v51  ;;  %8242 = vmatprep.subr.bf16.mxu0 %v18381_v60  ;;  %v981_v49 = vld [vmem:[#allocation5 + $0x1b70] sm:$0xff]  ;;  %v975_v51 = vld [vmem:[#allocation5 + $0x1b40] sm:$0xff]  ;;  %v18524_v60 = vcombine.low %v951_v22, %v963_v33 }
 0x256   :  { %v18537_v62 = vcombine.high %v969_v46, %v981_v49  ;;  %v18549_v36 = vcombine.high %v975_v51, %v987_v52  ;;  %v18536_v2 = vcombine.low %v969_v46, %v981_v49  ;;  %v1131_v49 = vld [vmem:[#allocation5 + $0x2020] sm:$0xff] }
 0x258   :  { %7469 = vmatpush1.bf16.msra.mxu1 %v18368_v63  ;;  %8243 = vmatpush1.bf16.msra.mxu0 %v18380_v32  ;;  %v993_v63 = vld [vmem:[#allocation5 + $0x1bd0] sm:$0xff] }
 0x259   :  { %7470 = vmatprep.subr.bf16.mxu1 %v18393_v34  ;;  %8244 = vmatprep.subr.bf16.mxu0 %v18405_v47  ;;  %v1005_v32 = vld [vmem:[#allocation5 + $0x1c30] sm:$0xff]  ;;  %v999_v34 = vld [vmem:[#allocation5 + $0x1c00] sm:$0xff]  ;;  %v18548_v47 = vcombine.low %v975_v51, %v987_v52 }
 0x25a   :  { %v18561_v54 = vcombine.high %v993_v63, %v1005_v32  ;;  %v18573_v43 = vcombine.high %v999_v34, %v1011_v1  ;;  %v18560_v10 = vcombine.low %v993_v63, %v1005_v32  ;;  %v1155_v32 = vld [vmem:[#allocation5 + $0x20e0] sm:$0xff] }
 0x25c   :  { %7471 = vmatpush1.bf16.msra.mxu1 %v18392_v3  ;;  %8245 = vmatpush1.bf16.msra.mxu0 %v18404_v4  ;;  %v1017_v3 = vld [vmem:[#allocation5 + $0x1c90] sm:$0xff] }
 0x25d   :  { %7472 = vmatprep.subr.bf16.mxu1 %v18417_v6  ;;  %8246 = vmatprep.subr.bf16.mxu0 %v18429_v11  ;;  %v1029_v4 = vld [vmem:[#allocation5 + $0x1cf0] sm:$0xff]  ;;  %v1023_v6 = vld [vmem:[#allocation5 + $0x1cc0] sm:$0xff]  ;;  %v18572_v11 = vcombine.low %v999_v34, %v1011_v1 }
 0x25e   :  { %v18585_v29 = vcombine.high %v1017_v3, %v1029_v4  ;;  %v18597_v41 = vcombine.high %v1023_v6, %v1035_v7  ;;  %v18584_v21 = vcombine.low %v1017_v3, %v1029_v4  ;;  %v1179_v4 = vld [vmem:[#allocation5 + $0x21a0] sm:$0xff] }
 0x260   :  { %7473 = vmatpush1.bf16.msra.mxu1 %v18416_v31  ;;  %8247 = vmatpush1.bf16.msra.mxu0 %v18428_v5  ;;  %v1041_v31 = vld [vmem:[#allocation5 + $0x1d50] sm:$0xff] }
 0x261   :  { %7485 = vmatprep.subr.bf16.mxu1 %v18441_v53  ;;  %8259 = vmatprep.subr.bf16.mxu0 %v18453_v50  ;;  %v1053_v5 = vld [vmem:[#allocation5 + $0x1db0] sm:$0xff]  ;;  %v1047_v53 = vld [vmem:[#allocation5 + $0x1d80] sm:$0xff]  ;;  %v18596_v50 = vcombine.low %v1023_v6, %v1035_v7 }
 0x262   :  { %v18609_v42 = vcombine.high %v1041_v31, %v1053_v5  ;;  %v18621_v12 = vcombine.high %v1047_v53, %v1059_v20  ;;  %v18608_v14 = vcombine.low %v1041_v31, %v1053_v5  ;;  %v1203_v5 = vld [vmem:[#allocation5 + $0x2260] sm:$0xff] }
 0x263   :  { %7475 = vmatmul.mubr.bf16.vlgmr.msra.gmra.mrb[8].mxu1 %v22361_v30  ;;  %8249 = vmatmul.mubr.bf16.vlgmr.msra.gmra.mrb[8].mxu0 %v22361_v30 }
 0x264   :  { %7486 = vmatpush1.bf16.msra.mxu1 %v18440_v55  ;;  %8260 = vmatpush1.bf16.msra.mxu0 %v18452_v56  ;;  %v1065_v55 = vld [vmem:[#allocation5 + $0x1e10] sm:$0xff] }
 0x265   :  { %7487 = vmatprep.subr.bf16.mxu1 %v18465_v0  ;;  %8261 = vmatprep.subr.bf16.mxu0 %v18477_v16  ;;  %v1077_v56 = vld [vmem:[#allocation5 + $0x1e70] sm:$0xff]  ;;  %v1071_v0 = vld [vmem:[#allocation5 + $0x1e40] sm:$0xff]  ;;  %v18620_v16 = vcombine.low %v1047_v53, %v1059_v20 }
 0x266   :  { %7517 = vmatprep.mubr.bf16.mxu1 %v22363_v39  ;;  %8291 = vmatprep.mubr.bf16.mxu0 %v22363_v39  ;;  %v18633_v9 = vcombine.high %v1065_v55, %v1077_v56  ;;  %v18645_v24 = vcombine.high %v1071_v0, %v1083_v13  ;;  %v18632_v22 = vcombine.low %v1065_v55, %v1077_v56  ;;  %v1227_v56 = vld [vmem:[#allocation5 + $0x2320] sm:$0xff] }
 0x268   :  { %7488 = vmatpush1.bf16.msra.mxu1 %v18464_v17  ;;  %8262 = vmatpush1.bf16.msra.mxu0 %v18476_v18  ;;  %v1089_v17 = vld [vmem:[#allocation5 + $0x1ed0] sm:$0xff] }
 0x269   :  { %7489 = vmatprep.subr.bf16.mxu1 %v18489_v23  ;;  %8263 = vmatprep.subr.bf16.mxu0 %v18501_v28  ;;  %v1101_v18 = vld [vmem:[#allocation5 + $0x1f30] sm:$0xff]  ;;  %v1095_v23 = vld [vmem:[#allocation5 + $0x1f00] sm:$0xff]  ;;  %v18644_v28 = vcombine.low %v1071_v0, %v1083_v13 }
 0x26a   :  { %v18657_v33 = vcombine.high %v1089_v17, %v1101_v18  ;;  %v18669_v46 = vcombine.high %v1095_v23, %v1107_v26  ;;  %v18656_v51 = vcombine.low %v1089_v17, %v1101_v18  ;;  %v1251_v18 = vld [vmem:[#allocation5 + $0x23e0] sm:$0xff] }
 0x26c   :  { %7490 = vmatpush1.bf16.msra.mxu1 %v18488_v35  ;;  %8264 = vmatpush1.bf16.msra.mxu0 %v18500_v40  ;;  %v1113_v35 = vld [vmem:[#allocation5 + $0x1f90] sm:$0xff] }
 0x26d   :  { %7491 = vmatprep.subr.bf16.mxu1 %v18513_v45  ;;  %8265 = vmatprep.subr.bf16.mxu0 %v18525_v27  ;;  %v1125_v40 = vld [vmem:[#allocation5 + $0x1ff0] sm:$0xff]  ;;  %v1119_v45 = vld [vmem:[#allocation5 + $0x1fc0] sm:$0xff]  ;;  %v18668_v27 = vcombine.low %v1095_v23, %v1107_v26 }
 0x26e   :  { %v18681_v52 = vcombine.high %v1113_v35, %v1125_v40  ;;  %v18693_v63 = vcombine.high %v1119_v45, %v1131_v49  ;;  %v18680_v34 = vcombine.low %v1113_v35, %v1125_v40  ;;  %v125_v40 = vld [vmem:[#allocation5 + $0xb0] sm:$0xff] }
 0x270   :  { %7492 = vmatpush1.bf16.msra.mxu1 %v18512_v57  ;;  %8266 = vmatpush1.bf16.msra.mxu0 %v18524_v60  ;;  %v1137_v57 = vld [vmem:[#allocation5 + $0x2050] sm:$0xff] }
 0x271   :  { %7493 = vmatprep.subr.bf16.mxu1 %v18537_v62  ;;  %8267 = vmatprep.subr.bf16.mxu0 %v18549_v36  ;;  %v1149_v60 = vld [vmem:[#allocation5 + $0x20b0] sm:$0xff]  ;;  %v1143_v62 = vld [vmem:[#allocation5 + $0x2080] sm:$0xff]  ;;  %v18692_v36 = vcombine.low %v1119_v45, %v1131_v49 }
 0x272   :  { %v18705_v1 = vcombine.high %v1137_v57, %v1149_v60  ;;  %v18717_v3 = vcombine.high %v1143_v62, %v1155_v32  ;;  %v18704_v6 = vcombine.low %v1137_v57, %v1149_v60  ;;  %v149_v60 = vld [vmem:[#allocation5 + $0x170] sm:$0xff] }
 0x274   :  { %7494 = vmatpush1.bf16.msra.mxu1 %v18536_v2  ;;  %8268 = vmatpush1.bf16.msra.mxu0 %v18548_v47  ;;  %v1161_v2 = vld [vmem:[#allocation5 + $0x2110] sm:$0xff] }
 0x275   :  { %7495 = vmatprep.subr.bf16.mxu1 %v18561_v54  ;;  %8269 = vmatprep.subr.bf16.mxu0 %v18573_v43  ;;  %v1173_v47 = vld [vmem:[#allocation5 + $0x2170] sm:$0xff]  ;;  %v1167_v54 = vld [vmem:[#allocation5 + $0x2140] sm:$0xff]  ;;  %v18716_v43 = vcombine.low %v1143_v62, %v1155_v32 }
 0x276   :  { %v18729_v7 = vcombine.high %v1161_v2, %v1173_v47  ;;  %v18741_v31 = vcombine.high %v1167_v54, %v1179_v4  ;;  %v18728_v53 = vcombine.low %v1161_v2, %v1173_v47  ;;  %v173_v47 = vld [vmem:[#allocation5 + $0x230] sm:$0xff] }
 0x278   :  { %7496 = vmatpush1.bf16.msra.mxu1 %v18560_v10  ;;  %8270 = vmatpush1.bf16.msra.mxu0 %v18572_v11  ;;  %v1185_v10 = vld [vmem:[#allocation5 + $0x21d0] sm:$0xff] }
 0x279   :  { %7497 = vmatprep.subr.bf16.mxu1 %v18585_v29  ;;  %8271 = vmatprep.subr.bf16.mxu0 %v18597_v41  ;;  %v1197_v11 = vld [vmem:[#allocation5 + $0x2230] sm:$0xff]  ;;  %v1191_v29 = vld [vmem:[#allocation5 + $0x2200] sm:$0xff]  ;;  %v18740_v41 = vcombine.low %v1167_v54, %v1179_v4 }
 0x27a   :  { %v18753_v20 = vcombine.high %v1185_v10, %v1197_v11  ;;  %v18765_v55 = vcombine.high %v1191_v29, %v1203_v5  ;;  %v18752_v0 = vcombine.low %v1185_v10, %v1197_v11  ;;  %v197_v11 = vld [vmem:[#allocation5 + $0x2f0] sm:$0xff] }
 0x27c   :  { %7498 = vmatpush1.bf16.msra.mxu1 %v18584_v21  ;;  %8272 = vmatpush1.bf16.msra.mxu0 %v18596_v50  ;;  %v1209_v21 = vld [vmem:[#allocation5 + $0x2290] sm:$0xff] }
 0x27d   :  { %7499 = vmatprep.subr.bf16.mxu1 %v18609_v42  ;;  %8273 = vmatprep.subr.bf16.mxu0 %v18621_v12  ;;  %v1221_v50 = vld [vmem:[#allocation5 + $0x22f0] sm:$0xff]  ;;  %v1215_v42 = vld [vmem:[#allocation5 + $0x22c0] sm:$0xff]  ;;  %v18764_v12 = vcombine.low %v1191_v29, %v1203_v5 }
 0x27e   :  { %v18777_v13 = vcombine.high %v1209_v21, %v1221_v50  ;;  %v18789_v17 = vcombine.high %v1215_v42, %v1227_v56  ;;  %v18776_v23 = vcombine.low %v1209_v21, %v1221_v50  ;;  %v221_v50 = vld [vmem:[#allocation5 + $0x3b0] sm:$0xff] }
 0x280   :  { %7500 = vmatpush1.bf16.msra.mxu1 %v18608_v14  ;;  %8274 = vmatpush1.bf16.msra.mxu0 %v18620_v16  ;;  %v1233_v14 = vld [vmem:[#allocation5 + $0x2350] sm:$0xff] }
 0x281   :  { %7501 = vmatprep.subr.bf16.mxu1 %v18633_v9  ;;  %8275 = vmatprep.subr.bf16.mxu0 %v18645_v24  ;;  %v1245_v16 = vld [vmem:[#allocation5 + $0x23b0] sm:$0xff]  ;;  %v1239_v9 = vld [vmem:[#allocation5 + $0x2380] sm:$0xff]  ;;  %v18788_v24 = vcombine.low %v1215_v42, %v1227_v56 }
 0x282   :  { %v18801_v26 = vcombine.high %v1233_v14, %v1245_v16  ;;  %v18813_v35 = vcombine.high %v1239_v9, %v1251_v18  ;;  %v18800_v45 = vcombine.low %v1233_v14, %v1245_v16  ;;  %v245_v16 = vld [vmem:[#allocation5 + $0x470] sm:$0xff] }
 0x284   :  { %7502 = vmatpush1.bf16.msra.mxu1 %v18632_v22  ;;  %8276 = vmatpush1.bf16.msra.mxu0 %v18644_v28  ;;  %v106_v22 = vld [vmem:[#allocation5 + $0x18] sm:$0xff] }
 0x285   :  { %7503 = vmatprep.subr.bf16.mxu1 %v18657_v33  ;;  %8277 = vmatprep.subr.bf16.mxu0 %v18669_v46  ;;  %v118_v28 = vld [vmem:[#allocation5 + $0x78] sm:$0xff]  ;;  %v113_v33 = vld [vmem:[#allocation5 + $0x50] sm:$0xff]  ;;  %v18812_v46 = vcombine.low %v1239_v9, %v1251_v18  ;;  %v22568_v9 = vsub.s32 2, %v22387_v48  ;;  %v22571_v18 = vsub.s32 3, %v22387_v48 }
 0x286   :  { %v17675_v49 = vcombine.high %v106_v22, %v118_v28  ;;  %v17689_v57 = vcombine.high %v113_v33, %v125_v40  ;;  %v17674_v62 = vcombine.low %v106_v22, %v118_v28 }
 0x288   :  { %7504 = vmatpush1.bf16.msra.mxu1 %v18656_v51  ;;  %8278 = vmatpush1.bf16.msra.mxu0 %v18668_v27  ;;  %v130_v51 = vld [vmem:[#allocation5 + $0xd8] sm:$0xff] }
 0x289   :  { %7505 = vmatprep.subr.bf16.mxu1 %v18681_v52  ;;  %8279 = vmatprep.subr.bf16.mxu0 %v18693_v63  ;;  %v142_v27 = vld [vmem:[#allocation5 + $0x138] sm:$0xff]  ;;  %v137_v52 = vld [vmem:[#allocation5 + $0x110] sm:$0xff]  ;;  %v17688_v63 = vcombine.low %v113_v33, %v125_v40 }
 0x28a   :  { %v17699_v32 = vcombine.high %v130_v51, %v142_v27  ;;  %v17713_v2 = vcombine.high %v137_v52, %v149_v60  ;;  %v17698_v54 = vcombine.low %v130_v51, %v142_v27  ;;  %v22580_v33 = vld [vmem:[#allocation5 + $0x4d0] sm:$0xff]  ;;  %v22584_v40 = vld [vmem:[#allocation5 + $0x558] sm:$0xff] }
 0x28b   :  { %v22592_v51 = vld [vmem:[#allocation5 + $0x590] sm:$0xff] }
 0x28c   :  { %7506 = vmatpush1.bf16.msra.mxu1 %v18680_v34  ;;  %8280 = vmatpush1.bf16.msra.mxu0 %v18692_v36  ;;  %v154_v34 = vld [vmem:[#allocation5 + $0x198] sm:$0xff]  ;;  %v22594_v27 = vld [vmem:[#allocation5 + $0x5f0] sm:$0xff] }
 0x28d   :  { %7507 = vmatprep.subr.bf16.mxu1 %v18705_v1  ;;  %8281 = vmatprep.subr.bf16.mxu0 %v18717_v3  ;;  %v166_v36 = vld [vmem:[#allocation5 + $0x1f8] sm:$0xff]  ;;  %v161_v1 = vld [vmem:[#allocation5 + $0x1d0] sm:$0xff]  ;;  %v17712_v3 = vcombine.low %v137_v52, %v149_v60  ;;  %v22096_v60 = vld [vmem:[#allocation7] sm:$0xff] }
 0x28e   :  { %v17723_v4 = vcombine.high %v154_v34, %v166_v36  ;;  %v17737_v10 = vcombine.high %v161_v1, %v173_v47  ;;  %v17722_v29 = vcombine.low %v154_v34, %v166_v36  ;;  %v22596_v52 = vld [vmem:[#allocation5 + $0x618] sm:$0xff]  ;;  %v22097_v36 = vld [vmem:[#allocation7 + $0x8] sm:$0xff] }
 0x290   :  { %7508 = vmatpush1.bf16.msra.mxu1 %v18704_v6  ;;  %8282 = vmatpush1.bf16.msra.mxu0 %v18716_v43  ;;  %v178_v6 = vld [vmem:[#allocation5 + $0x258] sm:$0xff] }
 0x291   :  { %7509 = vmatprep.subr.bf16.mxu1 %v18729_v7  ;;  %8283 = vmatprep.subr.bf16.mxu0 %v18741_v31  ;;  %v190_v43 = vld [vmem:[#allocation5 + $0x2b8] sm:$0xff]  ;;  %v185_v7 = vld [vmem:[#allocation5 + $0x290] sm:$0xff]  ;;  %v17736_v31 = vcombine.low %v161_v1, %v173_v47 }
 0x292   :  { %v17747_v5 = vcombine.high %v178_v6, %v190_v43  ;;  %v17761_v21 = vcombine.high %v185_v7, %v197_v11  ;;  %v17746_v42 = vcombine.low %v178_v6, %v190_v43 }
 0x294   :  { %7510 = vmatpush1.bf16.msra.mxu1 %v18728_v53  ;;  %8284 = vmatpush1.bf16.msra.mxu0 %v18740_v41  ;;  %v202_v53 = vld [vmem:[#allocation5 + $0x318] sm:$0xff] }
 0x295   :  { %7511 = vmatprep.subr.bf16.mxu1 %v18753_v20  ;;  %8285 = vmatprep.subr.bf16.mxu0 %v18765_v55  ;;  %v214_v41 = vld [vmem:[#allocation5 + $0x378] sm:$0xff]  ;;  %v209_v20 = vld [vmem:[#allocation5 + $0x350] sm:$0xff]  ;;  %v17760_v55 = vcombine.low %v185_v7, %v197_v11 }
 0x296   :  { %v17771_v56 = vcombine.high %v202_v53, %v214_v41  ;;  %v17785_v14 = vcombine.high %v209_v20, %v221_v50  ;;  %v17784_v22 = vcombine.low %v209_v20, %v221_v50  ;;  %v17857_v20 = vcombine.high %v22592_v51, %v22594_v27 }
 0x298   :  { %7512 = vmatpush1.bf16.msra.mxu1 %v18752_v0  ;;  %8286 = vmatpush1.bf16.msra.mxu0 %v18764_v12  ;;  %v226_v0 = vld [vmem:[#allocation5 + $0x3d8] sm:$0xff] }
 0x299   :  { %7513 = vmatprep.subr.bf16.mxu1 %v18777_v13  ;;  %8287 = vmatprep.subr.bf16.mxu0 %v18789_v17  ;;  %v238_v12 = vld [vmem:[#allocation5 + $0x438] sm:$0xff]  ;;  %v22565_v13 = vld [vmem:[#allocation5 + $0x410] sm:$0xff]  ;;  %v17770_v17 = vcombine.low %v202_v53, %v214_v41  ;;  %v17856_v41 = vcombine.low %v22592_v51, %v22594_v27 }
 0x29a   :  { %v17795_v28 = vcombine.high %v226_v0, %v238_v12  ;;  %v17808_v34 = vcombine.low %v22565_v13, %v245_v16 }
 0x29c   :  { %7514 = vmatpush1.bf16.msra.mxu1 %v18776_v23  ;;  %8288 = vmatpush1.bf16.msra.mxu0 %v18788_v24  ;;  %v22573_v23 = vld [vmem:[#allocation5 + $0x498] sm:$0xff] }
 0x29d   :  { %7515 = vmatprep.subr.bf16.mxu1 %v18801_v26  ;;  %8289 = vmatprep.subr.bf16.mxu0 %v18813_v35  ;;  %v22575_v24 = vld [vmem:[#allocation5 + $0x4f8] sm:$0xff]  ;;  %v22578_v26 = vsub.s32 4, %v22387_v48  ;;  %v22582_v35 = vld [vmem:[#allocation5 + $0x530] sm:$0xff] }
 0x29e   :  { %v17819_v47 = vcombine.high %v22573_v23, %v22575_v24  ;;  %v17832_v43 = vcombine.low %v22580_v33, %v22582_v35  ;;  %v17833_v7 = vcombine.high %v22580_v33, %v22582_v35  ;;  %v22653_v35 = vld [vmem:[#allocation5 + $0x710] sm:$0xff] }
 0x29f   :  { %v1312_v1 = vrot.slane %v22097_v36, %v22578_v26 }
 0x2a0   :  { %7516 = vmatpush1.bf16.msra.mxu1 %v18800_v45  ;;  %8290 = vmatpush1.bf16.msra.mxu0 %v18812_v46  ;;  %v22586_v45 = vld [vmem:[#allocation5 + $0x5b8] sm:$0xff]  ;;  %v22589_v46 = vsub.s32 5, %v22387_v48 }
 0x2a1   :  { %7528 = vmatprep.subr.bf16.mxu1 %v17675_v49  ;;  %8431 = vmatprep.subr.bf16.mxu0 %v17689_v57  ;;  %v17809_v49 = vcombine.high %v22565_v13, %v245_v16  ;;  %v22598_v57 = vld [vmem:[#allocation5 + $0x678] sm:$0xff]  ;;  %v17843_v11 = vcombine.high %v22584_v40, %v22586_v45 }
 0x2a3   :  { %7518 = vmatmul.mubr.bf16.vlgmr.msra.gmra.mrb[8].mxu1 %v22369_v44  ;;  %8292 = vmatmul.mubr.bf16.vlgmr.msra.gmra.mrb[8].mxu0 %v22369_v44 }
 0x2a4   :  { %7529 = vmatpush1.bf16.msra.mxu1 %v17674_v62  ;;  %8432 = vmatpush1.bf16.msra.mxu0 %v17688_v63  ;;  %v1272_v62 = vrot.slane %v22096_v60, %v22568_v9  ;;  %v1276_v63 = vrot.slane %v22096_v60, %v22571_v18 }
 0x2a5   :  { %7530 = vmatprep.subr.bf16.mxu1 %v17699_v32  ;;  %8433 = vmatprep.subr.bf16.mxu0 %v17713_v2  ;;  %v17794_v32 = vcombine.low %v226_v0, %v238_v12  ;;  %v17818_v2 = vcombine.low %v22573_v23, %v22575_v24 }
 0x2a6   :  { %7560 = vmatprep.mubr.bf16.mxu1 %v22349_v58  ;;  %8463 = vmatprep.mubr.bf16.mxu0 %v22349_v58 }
 0x2a8   :  { %7531 = vmatpush1.bf16.msra.mxu1 %v17698_v54  ;;  %8434 = vmatpush1.bf16.msra.mxu0 %v17712_v3  ;;  %v22608_v54 = vld [vmem:[#allocation5 + $0x650] sm:$0xff] }
 0x2a9   :  { %7532 = vmatprep.subr.bf16.mxu1 %v17723_v4  ;;  %8435 = vmatprep.subr.bf16.mxu0 %v17737_v10  ;;  %v22610_v3 = vld [vmem:[#allocation5 + $0x6b0] sm:$0xff]  ;;  %v1316_v4 = vrot.slane %v22097_v36, %v22589_v46  ;;  %v17842_v10 = vcombine.low %v22584_v40, %v22586_v45 }
 0x2aa   :  { %v17880_v0 = vcombine.low %v22608_v54, %v22610_v3  ;;  %v17881_v33 = vcombine.high %v22608_v54, %v22610_v3  ;;  %v22655_v40 = vld [vmem:[#allocation5 + $0x770] sm:$0xff]  ;;  %v22703_v3 = vld [vmem:[#allocation5 + $0x918] sm:$0xff] }
 0x2ac   :  { %7533 = vmatpush1.bf16.msra.mxu1 %v17722_v29  ;;  %8436 = vmatpush1.bf16.msra.mxu0 %v17736_v31  ;;  %v22621_v29 = vld [vmem:[#allocation5 + $0x6d8] sm:$0xff] }
 0x2ad   :  { %7534 = vmatprep.subr.bf16.mxu1 %v17747_v5  ;;  %8437 = vmatprep.subr.bf16.mxu0 %v17761_v21  ;;  %v22623_v31 = vld [vmem:[#allocation5 + $0x738] sm:$0xff]  ;;  %v17867_v21 = vcombine.high %v22596_v52, %v22598_v57 }
 0x2ae   :  { %v17891_v60 = vcombine.high %v22621_v29, %v22623_v31 }
 0x2b0   :  { %7535 = vmatpush1.bf16.msra.mxu1 %v17746_v42  ;;  %8438 = vmatpush1.bf16.msra.mxu0 %v17760_v55 }
 0x2b1   :  { %7536 = vmatprep.subr.bf16.mxu1 %v17771_v56  ;;  %8439 = vmatprep.subr.bf16.mxu0 %v17785_v14  ;;  %v17866_v56 = vcombine.low %v22596_v52, %v22598_v57 }
 0x2b4   :  { %7537 = vmatpush1.bf16.msra.mxu1 %v17770_v17  ;;  %8440 = vmatpush1.bf16.msra.mxu0 %v17784_v22 }
 0x2b5   :  { %7538 = vmatprep.subr.bf16.mxu1 %v17795_v28  ;;  %8441 = vmatprep.subr.bf16.mxu0 %v17809_v49 }
 0x2b6   :  { %v7390_v6 = vpop.f32.mrb[4].mxu1  ;;  %v8035_v50 = vpop.f32.mrb[4].mxu0 }
 0x2b7   :  { %v22625_v5 = vadd.f32 %v7390_v6, %v1272_v62  ;;  %v7392_v53 = vpop.f32.mrb[5].mxu1  ;;  %v22639_v12 = vadd.f32 %v8035_v50, %v1312_v1  ;;  %v8037_v13 = vpop.f32.mrb[5].mxu0 }
 0x2b8   :  { %v22633_v42 = vadd.f32 %v7392_v53, %v1276_v63  ;;  %v7394_v55 = vpop.f32.mrb[6].mxu1  ;;  %7539 = vmatpush1.bf16.msra.mxu1 %v17794_v32  ;;  %8442 = vmatpush1.bf16.msra.mxu0 %v17808_v34  ;;  %v22645_v23 = vadd.f32 %v8037_v13, %v1316_v4  ;;  %v8039_v24 = vpop.f32.mrb[6].mxu0 }
 0x2b9   :  { %v8691_v14 = vmul.f32 %v22625_v5, %v22625_v5  ;;  %v22643_v16 = vadd.f32 %v7394_v55, %v1272_v62  ;;  %v7396_v17 = vpop.f32.mrb[7].mxu1  ;;  %7540 = vmatprep.subr.bf16.mxu1 %v17819_v47  ;;  %8443 = vmatprep.subr.bf16.mxu0 %v17833_v7  ;;  %v8701_v45 = vmul.f32 %v22639_v12, %v22639_v12  ;;  %v8041_v49 = vpop.f32.mrb[7].mxu0 }
 0x2ba   :  { %v8692_v22 = vmul.f32 %v22633_v42, %v22633_v42  ;;  %v22649_v28 = vadd.f32 %v7396_v17, %v1276_v63  ;;  %v8702_v62 = vmul.f32 %v22645_v23, %v22645_v23  ;;  %v22670_v36 = vadd.f32 %v8039_v24, %v1312_v1 }
 0x2bb   :  { %v8739_v51 = vmul.f32 %v22625_v5, %v8691_v14  ;;  %v8715_v27 = vmul.f32 %v22643_v16, %v22643_v16  ;;  %v8749_v34 = vmul.f32 %v22639_v12, %v8701_v45  ;;  %v22674_v53 = vadd.f32 %v8041_v49, %v1316_v4  ;;  %v346_v49 = vld [vmem:[#allocation5 + $0x798] sm:$0xff] }
 0x2bc   :  { %v8740_v63 = vmul.f32 %v22633_v42, %v8692_v22  ;;  %v8716_v32 = vmul.f32 %v22649_v28, %v22649_v28  ;;  %7541 = vmatpush1.bf16.msra.mxu1 %v17818_v2  ;;  %8444 = vmatpush1.bf16.msra.mxu0 %v17832_v43  ;;  %v8750_v7 = vmul.f32 %v22645_v23, %v8702_v62 }
 0x2bd   :  { %v8787_v47 = vmul.f32 0.044715, %v8739_v51  ;;  %v8763_v6 = vmul.f32 %v22643_v16, %v8715_v27  ;;  %7542 = vmatprep.subr.bf16.mxu1 %v17843_v11  ;;  %8445 = vmatprep.subr.bf16.mxu0 %v17857_v20  ;;  %v8797_v13 = vmul.f32 0.044715, %v8749_v34  ;;  %v8725_v2 = vmul.f32 %v22670_v36, %v22670_v36  ;;  %v358_v51 = vld [vmem:[#allocation5 + $0x7f8] sm:$0xff]  ;;  %v353_v27 = vld [vmem:[#allocation5 + $0x7d0] sm:$0xff] }
 0x2be   :  { %v8788_v50 = vmul.f32 0.044715, %v8740_v63  ;;  %v8764_v55 = vmul.f32 %v22649_v28, %v8716_v32  ;;  %v17905_v17 = vcombine.high %v22653_v35, %v22655_v40  ;;  %v8798_v43 = vmul.f32 0.044715, %v8750_v7  ;;  %v365_v7 = vld [vmem:[#allocation5 + $0x830] sm:$0xff] }
 0x2bf   :  { %v8835_v1 = vadd.f32 %v22625_v5, %v8787_v47  ;;  %v8811_v14 = vmul.f32 0.044715, %v8763_v6  ;;  %v8845_v4 = vadd.f32 %v22639_v12, %v8797_v13  ;;  %v8773_v22 = vmul.f32 %v22670_v36, %v8725_v2 }
 0x2c0   :  { %v8836_v11 = vadd.f32 %v22633_v42, %v8788_v50  ;;  %v8812_v24 = vmul.f32 0.044715, %v8764_v55  ;;  %7543 = vmatpush1.bf16.msra.mxu1 %v17842_v10  ;;  %8446 = vmatpush1.bf16.msra.mxu0 %v17856_v41  ;;  %v8846_v62 = vadd.f32 %v22645_v23, %v8798_v43  ;;  %v8726_v63 = vmul.f32 %v22674_v53, %v22674_v53  ;;  %v377_v43 = vld [vmem:[#allocation5 + $0x890] sm:$0xff] }
 0x2c1   :  { %v8883_v20 = vmul.f32 0.7978846, %v8835_v1  ;;  %v8859_v45 = vadd.f32 %v22643_v16, %v8811_v14  ;;  %7544 = vmatprep.subr.bf16.mxu1 %v17867_v21  ;;  %8447 = vmatprep.subr.bf16.mxu0 %v17881_v33  ;;  %v8893_v34 = vmul.f32 0.7978846, %v8845_v4  ;;  %v8821_v47 = vmul.f32 0.044715, %v8773_v22 }
 0x2c2   :  { %v8884_v32 = vmul.f32 0.7978846, %v8836_v11  ;;  %v8860_v10 = vadd.f32 %v22649_v28, %v8812_v24  ;;  %v8894_v50 = vmul.f32 0.7978846, %v8846_v62  ;;  %v8774_v41 = vmul.f32 %v22674_v53, %v8726_v63  ;;  %v370_v1 = vld [vmem:[#allocation5 + $0x858] sm:$0xff]  ;;  %v413_v11 = vld [vmem:[#allocation5 + $0x9b0] sm:$0xff] }
 0x2c3   :  { %22016 = vtanh.f32 %v8883_v20  ;;  %v8907_v6 = vmul.f32 0.7978846, %v8859_v45  ;;  %v17890_v55 = vcombine.low %v22621_v29, %v22623_v31  ;;  %v8869_v13 = vadd.f32 %v22670_v36, %v8821_v47  ;;  %v382_v14 = vld [vmem:[#allocation5 + $0x8b8] sm:$0xff]  ;;  %v389_v29 = vld [vmem:[#allocation5 + $0x8f0] sm:$0xff] }
 0x2c4   :  { %22018 = vtanh.f32 %v8884_v32  ;;  %v8908_v21 = vmul.f32 0.7978846, %v8860_v10  ;;  %7545 = vmatpush1.bf16.msra.mxu1 %v17866_v56  ;;  %8448 = vmatpush1.bf16.msra.mxu0 %v17880_v0  ;;  %v17904_v33 = vcombine.low %v22653_v35, %v22655_v40  ;;  %v17915_v2 = vcombine.high %v346_v49, %v358_v51  ;;  %v406_v40 = vld [vmem:[#allocation5 + $0x978] sm:$0xff]  ;;  %v22712_v62 = vld [vmem:[#allocation5 + $0xa70] sm:$0xff] }
 0x2c5   :  { %22020 = vtanh.f32 %v8907_v6  ;;  %7546 = vmatprep.subr.bf16.mxu1 %v17891_v60  ;;  %v8822_v52 = vmul.f32 0.044715, %v8774_v41  ;;  %8449 = vmatprep.subr.bf16.mxu0 %v17905_v17  ;;  %v17929_v57 = vcombine.high %v353_v27, %v365_v7  ;;  %v8917_v31 = vmul.f32 0.7978846, %v8869_v13  ;;  %v401_v60 = vld [vmem:[#allocation5 + $0x950] sm:$0xff]  ;;  %v22705_v4 = vld [vmem:[#allocation5 + $0x9d8] sm:$0xff] }
 0x2c6   :  { %22022 = vtanh.f32 %v8908_v21  ;;  %v17914_v54 = vcombine.low %v346_v49, %v358_v51  ;;  %v17928_v0 = vcombine.low %v353_v27, %v365_v7  ;;  %v17939_v35 = vcombine.high %v370_v1, %v382_v14  ;;  %v22707_v22 = vld [vmem:[#allocation5 + $0xa38] sm:$0xff]  ;;  %v22710_v27 = vld [vmem:[#allocation5 + $0xa10] sm:$0xff] }
 0x2c7   :  { %22024 = vtanh.f32 %v8893_v34  ;;  %v8870_v56 = vadd.f32 %v22674_v53, %v8822_v52  ;;  %v17953_v24 = vcombine.high %v377_v43, %v389_v29  ;;  %v17938_v20 = vcombine.low %v370_v1, %v382_v14 }
 0x2c8   :  { %7547 = vmatpush1.bf16.msra.mxu1 %v17890_v55  ;;  %22026 = vtanh.f32 %v8894_v50  ;;  %8450 = vmatpush1.bf16.msra.mxu0 %v17904_v33  ;;  %v17952_v49 = vcombine.low %v377_v43, %v389_v29  ;;  %v17963_v51 = vcombine.high %v22703_v3, %v406_v40  ;;  %v17962_v32 = vcombine.low %v22703_v3, %v406_v40  ;;  %v442_v33 = vld [vmem:[#allocation5 + $0xa98] sm:$0xff]  ;;  %v449_v43 = vld [vmem:[#allocation5 + $0xad0] sm:$0xff] }
 0x2c9   :  { %7548 = vmatprep.subr.bf16.mxu1 %v17915_v2  ;;  %22028 = vtanh.f32 %v8917_v31  ;;  %v8918_v17 = vmul.f32 0.7978846, %v8870_v56  ;;  %8451 = vmatprep.subr.bf16.mxu0 %v17929_v57  ;;  %v17977_v10 = vcombine.high %v401_v60, %v413_v11  ;;  %v8931_v6 = vmul.f32 0.5, %v22625_v5  ;;  %v454_v5 = vld [vmem:[#allocation5 + $0xaf8] sm:$0xff]  ;;  %v461_v56 = vld [vmem:[#allocation5 + $0xb30] sm:$0xff] }
 0x2ca   :  { %v17976_v7 = vcombine.low %v401_v60, %v413_v11  ;;  %v17987_v50 = vcombine.high %v22705_v4, %v22707_v22  ;;  %v8955_v55 = vmul.f32 0.5, %v22643_v16  ;;  %v18001_v13 = vcombine.high %v22710_v27, %v22712_v62 }
 0x2cb   :  { %22030 = vtanh.f32 %v8918_v17  ;;  %v8941_v2 = vmul.f32 0.5, %v22639_v12  ;;  %v8965_v52 = vmul.f32 0.5, %v22670_v36  ;;  %v8932_v57 = vmul.f32 0.5, %v22633_v42 }
 0x2cc   :  { %7549 = vmatpush1.bf16.msra.mxu1 %v17914_v54  ;;  %8452 = vmatpush1.bf16.msra.mxu0 %v17928_v0  ;;  %v8956_v29 = vmul.f32 0.5, %v22649_v28  ;;  %v8942_v12 = vmul.f32 0.5, %v22645_v23  ;;  %v17986_v40 = vcombine.low %v22705_v4, %v22707_v22  ;;  %v8966_v28 = vmul.f32 0.5, %v22674_v53  ;;  %v473_v4 = vld [vmem:[#allocation5 + $0xb90] sm:$0xff] }
 0x2cd   :  { %v22017_v45 = vpop.eup %22016  ;;  %7550 = vmatprep.subr.bf16.mxu1 %v17939_v35  ;;  %8453 = vmatprep.subr.bf16.mxu0 %v17953_v24  ;;  %v18000_v23 = vcombine.low %v22710_v27, %v22712_v62  ;;  %v18024_v27 = vcombine.low %v449_v43, %v461_v56 }
 0x2ce   :  { %v22019_v63 = vpop.eup %22018  ;;  %v9027_v34 = vadd.f32 1.0, %v22017_v45  ;;  %v18011_v45 = vcombine.high %v442_v33, %v454_v5 }
 0x2cf   :  { %v22021_v47 = vpop.eup %22020  ;;  %v9028_v41 = vadd.f32 1.0, %v22019_v63  ;;  %v18025_v63 = vcombine.high %v449_v43, %v461_v56 }
 0x2d0   :  { %v22023_v21 = vpop.eup %22022  ;;  %7551 = vmatpush1.bf16.msra.mxu1 %v17938_v20  ;;  %v9051_v1 = vadd.f32 1.0, %v22021_v47  ;;  %8454 = vmatpush1.bf16.msra.mxu0 %v17952_v49  ;;  %v9075_v54 = vmul.f32 %v9027_v34, %v8931_v6  ;;  %v466_v49 = vld [vmem:[#allocation5 + $0xb58] sm:$0xff]  ;;  %v18010_v47 = vcombine.low %v442_v33, %v454_v5 }
 0x2d1   :  { %v22025_v14 = vpop.eup %22024  ;;  %7552 = vmatprep.subr.bf16.mxu1 %v17963_v51  ;;  %v9052_v16 = vadd.f32 1.0, %v22023_v21  ;;  %8455 = vmatprep.subr.bf16.mxu0 %v17977_v10  ;;  %v9076_v60 = vmul.f32 %v9028_v41, %v8932_v57  ;;  %v478_v51 = vld [vmem:[#allocation5 + $0xbb8] sm:$0xff]  ;;  %v497_v21 = vld [vmem:[#allocation5 + $0xc50] sm:$0xff] }
 0x2d2   :  { %v22027_v31 = vpop.eup %22026  ;;  %v9099_v3 = vmul.f32 %v9051_v1, %v8955_v55  ;;  %v9037_v0 = vadd.f32 1.0, %v22025_v14  ;;  %v18035_v62 = vcombine.high %v466_v49, %v478_v51  ;;  %v502_v41 = vld [vmem:[#allocation5 + $0xc78] sm:$0xff]  ;;  %v18034_v1 = vcombine.low %v466_v49, %v478_v51  ;;  %v521_v57 = vld [vmem:[#allocation5 + $0xd10] sm:$0xff] }
 0x2d3   :  { %v22029_v35 = vpop.eup %22028  ;;  %v9100_v11 = vmul.f32 %v9052_v16, %v8956_v29  ;;  %v9038_v36 = vadd.f32 1.0, %v22027_v31  ;;  %v514_v5 = vld [vmem:[#allocation5 + $0xcd8] sm:$0xff]  ;;  %v533_v29 = vld [vmem:[#allocation5 + $0xd70] sm:$0xff] }
 0x2d4   :  { %7553 = vmatpush1.bf16.msra.mxu1 %v17962_v32  ;;  %v22728_v42 = vpack.c.bf16 %v9099_v3, %v9075_v54  ;;  %v9061_v17 = vadd.f32 1.0, %v22029_v35  ;;  %v9085_v24 = vmul.f32 %v9037_v0, %v8941_v2  ;;  %8456 = vmatpush1.bf16.msra.mxu0 %v17976_v7  ;;  %v485_v32 = vld [vmem:[#allocation5 + $0xbf0] sm:$0xff]  ;;  %v538_v54 = vld [vmem:[#allocation5 + $0xd98] sm:$0xff] }
 0x2d5   :  { %v22031_v20 = vpop.eup %22030  ;;  %7554 = vmatprep.subr.bf16.mxu1 %v17987_v50  ;;  %v22733_v22 = vpack.c.bf16 %v9100_v11, %v9076_v60  ;;  %8457 = vmatprep.subr.bf16.mxu0 %v18001_v13  ;;  %v9086_v34 = vmul.f32 %v9038_v36, %v8942_v12  ;;  %v490_v50 = vld [vmem:[#allocation5 + $0xc18] sm:$0xff]  ;;  %v18049_v55 = vcombine.high %v473_v4, %v485_v32  ;;  %v509_v13 = vld [vmem:[#allocation5 + $0xcb0] sm:$0xff] }
 0x2d6   :  { %v9062_v10 = vadd.f32 1.0, %v22031_v20  ;;  %v9109_v53 = vmul.f32 %v9061_v17, %v8965_v52  ;;  %v18048_v33 = vcombine.low %v473_v4, %v485_v32  ;;  %v18059_v14 = vcombine.high %v490_v50, %v502_v41  ;;  %v526_v52 = vld [vmem:[#allocation5 + $0xd38] sm:$0xff]  ;;  %v545_v0 = vld [vmem:[#allocation5 + $0xdd0] sm:$0xff] }
 0x2d7   :  { %v18073_v43 = vcombine.high %v497_v21, %v509_v13  ;;  %v18058_v16 = vcombine.low %v490_v50, %v502_v41  ;;  %v18072_v31 = vcombine.low %v497_v21, %v509_v13  ;;  %v18083_v56 = vcombine.high %v514_v5, %v526_v52  ;;  %v550_v3 = vld [vmem:[#allocation5 + $0xdf8] sm:$0xff]  ;;  %v557_v35 = vld [vmem:[#allocation5 + $0xe30] sm:$0xff] }
 0x2d8   :  { %7555 = vmatpush1.bf16.msra.mxu1 %v17986_v40  ;;  %v9110_v6 = vmul.f32 %v9062_v10, %v8966_v28  ;;  %v22735_v7 = vpack.c.bf16 %v9109_v53, %v9085_v24  ;;  %8458 = vmatpush1.bf16.msra.mxu0 %v18000_v23  ;;  %v18097_v12 = vcombine.high %v521_v57, %v533_v29  ;;  %v562_v36 = vld [vmem:[#allocation5 + $0xe58] sm:$0xff]  ;;  %v569_v24 = vld [vmem:[#allocation5 + $0xe90] sm:$0xff] }
 0x2d9   :  { %7556 = vmatprep.subr.bf16.mxu1 %v18011_v45  ;;  %8459 = vmatprep.subr.bf16.mxu0 %v18025_v63  ;;  %v18082_v40 = vcombine.low %v514_v5, %v526_v52  ;;  %v18096_v60 = vcombine.low %v521_v57, %v533_v29  ;;  %v18107_v11 = vcombine.high %v538_v54, %v550_v3  ;;  %v574_v28 = vld [vmem:[#allocation5 + $0xeb8] sm:$0xff]  ;;  %v581_v20 = vld [vmem:[#allocation5 + $0xef0] sm:$0xff] }
 0x2da   :  { %v22737_v2 = vpack.c.bf16 %v9110_v6, %v9086_v34  ;;  %v18121_v17 = vcombine.high %v545_v0, %v557_v35  ;;  %v18106_v23 = vcombine.low %v538_v54, %v550_v3  ;;  %v18120_v45 = vcombine.low %v545_v0, %v557_v35  ;;  %v586_v51 = vld [vmem:[#allocation5 + $0xf18] sm:$0xff]  ;;  %v593_v63 = vld [vmem:[#allocation5 + $0xf50] sm:$0xff] }
 0x2db   :  { %v18131_v49 = vcombine.high %v562_v36, %v574_v28  ;;  %v598_v4 = vld [vmem:[#allocation5 + $0xf78] sm:$0xff]  ;;  %v18145_v32 = vcombine.high %v569_v24, %v581_v20  ;;  %v605_v10 = vld [vmem:[#allocation5 + $0xfb0] sm:$0xff]  ;;  %v18130_v34 = vcombine.low %v562_v36, %v574_v28  ;;  %v18144_v53 = vcombine.low %v569_v24, %v581_v20 }
 0x2dc   :  { %7557 = vmatpush1.bf16.msra.mxu1 %v18010_v47  ;;  %8460 = vmatpush1.bf16.msra.mxu0 %v18024_v27  ;;  %v18155_v47 = vcombine.high %v586_v51, %v598_v4  ;;  %v18169_v6 = vcombine.high %v593_v63, %v605_v10  ;;  %v610_v27 = vld [vmem:[#allocation5 + $0xfd8] sm:$0xff]  ;;  %v617_v50 = vld [vmem:[#allocation5 + $0x1010] sm:$0xff]  ;;  %v18154_v21 = vcombine.low %v586_v51, %v598_v4 }
 0x2dd   :  { %7558 = vmatprep.subr.bf16.mxu1 %v18035_v62  ;;  %8461 = vmatprep.subr.bf16.mxu0 %v18049_v55  ;;  %v622_v62 = vld [vmem:[#allocation5 + $0x1038] sm:$0xff]  ;;  %v629_v41 = vld [vmem:[#allocation5 + $0x1070] sm:$0xff]  ;;  %v18168_v55 = vcombine.low %v593_v63, %v605_v10 }
 0x2de   :  { %v18179_v13 = vcombine.high %v610_v27, %v622_v62  ;;  %v641_v5 = vld [vmem:[#allocation5 + $0x10d0] sm:$0xff]  ;;  %v18178_v57 = vcombine.low %v610_v27, %v622_v62 }
 0x2df   :  { %v653_v52 = vld [vmem:[#allocation5 + $0x1130] sm:$0xff] }
 0x2e0   :  { %7559 = vmatpush1.bf16.msra.mxu1 %v18034_v1  ;;  %8462 = vmatpush1.bf16.msra.mxu0 %v18048_v33  ;;  %v18193_v1 = vcombine.high %v617_v50, %v629_v41  ;;  %v634_v33 = vld [vmem:[#allocation5 + $0x1098] sm:$0xff]  ;;  %v665_v54 = vld [vmem:[#allocation5 + $0x1190] sm:$0xff]  ;;  %v18216_v0 = vcombine.low %v641_v5, %v653_v52 }
 0x2e1   :  { %7571 = vmatprep.subr.bf16.mxu1 %v18059_v14  ;;  %8474 = vmatprep.subr.bf16.mxu0 %v18073_v43  ;;  %v646_v14 = vld [vmem:[#allocation5 + $0x10f8] sm:$0xff]  ;;  %v18192_v43 = vcombine.low %v617_v50, %v629_v41  ;;  %v677_v3 = vld [vmem:[#allocation5 + $0x11f0] sm:$0xff] }
 0x2e2   :  { %v18203_v29 = vcombine.high %v634_v33, %v646_v14  ;;  %v689_v36 = vld [vmem:[#allocation5 + $0x1250] sm:$0xff]  ;;  %v18240_v24 = vcombine.low %v665_v54, %v677_v3 }
 0x2e3   :  { %7561 = vmatmul.mubr.bf16.vlgmr.msra.gmra.mrb[12].mxu1 %v22353_v15  ;;  %8464 = vmatmul.mubr.bf16.vlgmr.msra.gmra.mrb[12].mxu0 %v22353_v15  ;;  %v701_v28 = vld [vmem:[#allocation5 + $0x12b0] sm:$0xff] }
 0x2e4   :  { %7572 = vmatpush1.bf16.msra.mxu1 %v18058_v16  ;;  %8475 = vmatpush1.bf16.msra.mxu0 %v18072_v31  ;;  %v18217_v16 = vcombine.high %v641_v5, %v653_v52  ;;  %v658_v31 = vld [vmem:[#allocation5 + $0x1158] sm:$0xff]  ;;  %v713_v51 = vld [vmem:[#allocation5 + $0x1310] sm:$0xff] }
 0x2e5   :  { %7573 = vmatprep.subr.bf16.mxu1 %v18083_v56  ;;  %8476 = vmatprep.subr.bf16.mxu0 %v18097_v12  ;;  %v670_v56 = vld [vmem:[#allocation5 + $0x11b8] sm:$0xff]  ;;  %v18202_v12 = vcombine.low %v634_v33, %v646_v14  ;;  %v725_v4 = vld [vmem:[#allocation5 + $0x1370] sm:$0xff] }
 0x2e6   :  { %7603 = vmatprep.mubr.bf16.mxu1 %v22355_v25  ;;  %8506 = vmatprep.mubr.bf16.mxu0 %v22355_v25  ;;  %v18227_v35 = vcombine.high %v658_v31, %v670_v56  ;;  %v749_v27 = vld [vmem:[#allocation5 + $0x1430] sm:$0xff]  ;;  %v18288_v50 = vcombine.low %v713_v51, %v725_v4 }
 0x2e7   :  { %v773_v33 = vld [vmem:[#allocation5 + $0x14f0] sm:$0xff] }
 0x2e8   :  { %7574 = vmatpush1.bf16.msra.mxu1 %v18082_v40  ;;  %8477 = vmatpush1.bf16.msra.mxu0 %v18096_v60  ;;  %v18241_v40 = vcombine.high %v665_v54, %v677_v3  ;;  %v682_v60 = vld [vmem:[#allocation5 + $0x1218] sm:$0xff] }
 0x2e9   :  { %7575 = vmatprep.subr.bf16.mxu1 %v18107_v11  ;;  %8478 = vmatprep.subr.bf16.mxu0 %v18121_v17  ;;  %v694_v11 = vld [vmem:[#allocation5 + $0x1278] sm:$0xff]  ;;  %v18226_v17 = vcombine.low %v658_v31, %v670_v56  ;;  %v797_v31 = vld [vmem:[#allocation5 + $0x15b0] sm:$0xff] }
 0x2ea   :  { %v18251_v20 = vcombine.high %v682_v60, %v694_v11  ;;  %v18250_v63 = vcombine.low %v682_v60, %v694_v11  ;;  %v821_v60 = vld [vmem:[#allocation5 + $0x1670] sm:$0xff] }
 0x2ec   :  { %7576 = vmatpush1.bf16.msra.mxu1 %v18106_v23  ;;  %8479 = vmatpush1.bf16.msra.mxu0 %v18120_v45  ;;  %v18265_v23 = vcombine.high %v689_v36, %v701_v28  ;;  %v706_v45 = vld [vmem:[#allocation5 + $0x12d8] sm:$0xff] }
 0x2ed   :  { %7577 = vmatprep.subr.bf16.mxu1 %v18131_v49  ;;  %8480 = vmatprep.subr.bf16.mxu0 %v18145_v32  ;;  %v718_v49 = vld [vmem:[#allocation5 + $0x1338] sm:$0xff]  ;;  %v18264_v32 = vcombine.low %v689_v36, %v701_v28 }
 0x2ee   :  { %v18275_v10 = vcombine.high %v706_v45, %v718_v49  ;;  %v18274_v62 = vcombine.low %v706_v45, %v718_v49  ;;  %v845_v45 = vld [vmem:[#allocation5 + $0x1730] sm:$0xff] }
 0x2f0   :  { %7578 = vmatpush1.bf16.msra.mxu1 %v18130_v34  ;;  %8481 = vmatpush1.bf16.msra.mxu0 %v18144_v53  ;;  %v18289_v34 = vcombine.high %v713_v51, %v725_v4  ;;  %v730_v53 = vld [vmem:[#allocation5 + $0x1398] sm:$0xff] }
 0x2f1   :  { %7579 = vmatprep.subr.bf16.mxu1 %v18155_v47  ;;  %8482 = vmatprep.subr.bf16.mxu0 %v18169_v6  ;;  %v742_v47 = vld [vmem:[#allocation5 + $0x13f8] sm:$0xff]  ;;  %v737_v6 = vld [vmem:[#allocation5 + $0x13d0] sm:$0xff] }
 0x2f2   :  { %v18299_v41 = vcombine.high %v730_v53, %v742_v47  ;;  %v18298_v14 = vcombine.low %v730_v53, %v742_v47  ;;  %v18312_v5 = vcombine.low %v737_v6, %v749_v27  ;;  %v869_v53 = vld [vmem:[#allocation5 + $0x17f0] sm:$0xff] }
 0x2f4   :  { %7580 = vmatpush1.bf16.msra.mxu1 %v18154_v21  ;;  %8483 = vmatpush1.bf16.msra.mxu0 %v18168_v55  ;;  %v18313_v21 = vcombine.high %v737_v6, %v749_v27  ;;  %v754_v55 = vld [vmem:[#allocation5 + $0x1458] sm:$0xff] }
 0x2f5   :  { %7581 = vmatprep.subr.bf16.mxu1 %v18179_v13  ;;  %8484 = vmatprep.subr.bf16.mxu0 %v18193_v1  ;;  %v766_v13 = vld [vmem:[#allocation5 + $0x14b8] sm:$0xff]  ;;  %v761_v1 = vld [vmem:[#allocation5 + $0x1490] sm:$0xff] }
 0x2f6   :  { %v18323_v52 = vcombine.high %v754_v55, %v766_v13  ;;  %v18322_v56 = vcombine.low %v754_v55, %v766_v13  ;;  %v18336_v54 = vcombine.low %v761_v1, %v773_v33  ;;  %v893_v55 = vld [vmem:[#allocation5 + $0x18b0] sm:$0xff] }
 0x2f8   :  { %7582 = vmatpush1.bf16.msra.mxu1 %v18178_v57  ;;  %8485 = vmatpush1.bf16.msra.mxu0 %v18192_v43  ;;  %v18337_v57 = vcombine.high %v761_v1, %v773_v33  ;;  %v778_v43 = vld [vmem:[#allocation5 + $0x1518] sm:$0xff] }
 0x2f9   :  { %7583 = vmatprep.subr.bf16.mxu1 %v18203_v29  ;;  %8486 = vmatprep.subr.bf16.mxu0 %v18217_v16  ;;  %v790_v29 = vld [vmem:[#allocation5 + $0x1578] sm:$0xff]  ;;  %v785_v16 = vld [vmem:[#allocation5 + $0x1550] sm:$0xff] }
 0x2fa   :  { %v18347_v3 = vcombine.high %v778_v43, %v790_v29  ;;  %v18346_v11 = vcombine.low %v778_v43, %v790_v29  ;;  %v18360_v36 = vcombine.low %v785_v16, %v797_v31  ;;  %v917_v43 = vld [vmem:[#allocation5 + $0x1970] sm:$0xff] }
 0x2fc   :  { %7584 = vmatpush1.bf16.msra.mxu1 %v18202_v12  ;;  %8487 = vmatpush1.bf16.msra.mxu0 %v18216_v0  ;;  %v18361_v12 = vcombine.high %v785_v16, %v797_v31  ;;  %v802_v0 = vld [vmem:[#allocation5 + $0x15d8] sm:$0xff] }
 0x2fd   :  { %7585 = vmatprep.subr.bf16.mxu1 %v18227_v35  ;;  %8488 = vmatprep.subr.bf16.mxu0 %v18241_v40  ;;  %v814_v35 = vld [vmem:[#allocation5 + $0x1638] sm:$0xff]  ;;  %v809_v40 = vld [vmem:[#allocation5 + $0x1610] sm:$0xff] }
 0x2fe   :  { %v18371_v28 = vcombine.high %v802_v0, %v814_v35  ;;  %v18370_v49 = vcombine.low %v802_v0, %v814_v35  ;;  %v18384_v51 = vcombine.low %v809_v40, %v821_v60  ;;  %v941_v0 = vld [vmem:[#allocation5 + $0x1a30] sm:$0xff] }
 0x300   :  { %7586 = vmatpush1.bf16.msra.mxu1 %v18226_v17  ;;  %8489 = vmatpush1.bf16.msra.mxu0 %v18240_v24  ;;  %v18385_v17 = vcombine.high %v809_v40, %v821_v60  ;;  %v826_v24 = vld [vmem:[#allocation5 + $0x1698] sm:$0xff] }
 0x301   :  { %7587 = vmatprep.subr.bf16.mxu1 %v18251_v20  ;;  %8490 = vmatprep.subr.bf16.mxu0 %v18265_v23  ;;  %v838_v20 = vld [vmem:[#allocation5 + $0x16f8] sm:$0xff]  ;;  %v833_v23 = vld [vmem:[#allocation5 + $0x16d0] sm:$0xff] }
 0x302   :  { %v18395_v4 = vcombine.high %v826_v24, %v838_v20  ;;  %v18394_v47 = vcombine.low %v826_v24, %v838_v20  ;;  %v18408_v6 = vcombine.low %v833_v23, %v845_v45  ;;  %v965_v24 = vld [vmem:[#allocation5 + $0x1af0] sm:$0xff] }
 0x304   :  { %7588 = vmatpush1.bf16.msra.mxu1 %v18250_v63  ;;  %8491 = vmatpush1.bf16.msra.mxu0 %v18264_v32  ;;  %v18409_v63 = vcombine.high %v833_v23, %v845_v45  ;;  %v850_v32 = vld [vmem:[#allocation5 + $0x1758] sm:$0xff] }
 0x305   :  { %7589 = vmatprep.subr.bf16.mxu1 %v18275_v10  ;;  %8492 = vmatprep.subr.bf16.mxu0 %v18289_v34  ;;  %v862_v10 = vld [vmem:[#allocation5 + $0x17b8] sm:$0xff]  ;;  %v857_v34 = vld [vmem:[#allocation5 + $0x1790] sm:$0xff] }
 0x306   :  { %v18419_v27 = vcombine.high %v850_v32, %v862_v10  ;;  %v18418_v13 = vcombine.low %v850_v32, %v862_v10  ;;  %v18432_v1 = vcombine.low %v857_v34, %v869_v53  ;;  %v989_v32 = vld [vmem:[#allocation5 + $0x1bb0] sm:$0xff] }
 0x308   :  { %7590 = vmatpush1.bf16.msra.mxu1 %v18274_v62  ;;  %8493 = vmatpush1.bf16.msra.mxu0 %v18288_v50  ;;  %v18433_v62 = vcombine.high %v857_v34, %v869_v53  ;;  %v874_v50 = vld [vmem:[#allocation5 + $0x1818] sm:$0xff] }
 0x309   :  { %7591 = vmatprep.subr.bf16.mxu1 %v18299_v41  ;;  %8494 = vmatprep.subr.bf16.mxu0 %v18313_v21  ;;  %v886_v41 = vld [vmem:[#allocation5 + $0x1878] sm:$0xff]  ;;  %v881_v21 = vld [vmem:[#allocation5 + $0x1850] sm:$0xff] }
 0x30a   :  { %v18443_v33 = vcombine.high %v874_v50, %v886_v41  ;;  %v18442_v29 = vcombine.low %v874_v50, %v886_v41  ;;  %v18456_v16 = vcombine.low %v881_v21, %v893_v55  ;;  %v1013_v50 = vld [vmem:[#allocation5 + $0x1c70] sm:$0xff] }
 0x30c   :  { %7592 = vmatpush1.bf16.msra.mxu1 %v18298_v14  ;;  %8495 = vmatpush1.bf16.msra.mxu0 %v18312_v5  ;;  %v18457_v14 = vcombine.high %v881_v21, %v893_v55  ;;  %v898_v5 = vld [vmem:[#allocation5 + $0x18d8] sm:$0xff] }
 0x30d   :  { %7593 = vmatprep.subr.bf16.mxu1 %v18323_v52  ;;  %8496 = vmatprep.subr.bf16.mxu0 %v18337_v57  ;;  %v910_v52 = vld [vmem:[#allocation5 + $0x1938] sm:$0xff]  ;;  %v905_v57 = vld [vmem:[#allocation5 + $0x1910] sm:$0xff] }
 0x30e   :  { %v18467_v31 = vcombine.high %v898_v5, %v910_v52  ;;  %v18466_v35 = vcombine.low %v898_v5, %v910_v52  ;;  %v18480_v40 = vcombine.low %v905_v57, %v917_v43  ;;  %v1037_v5 = vld [vmem:[#allocation5 + $0x1d30] sm:$0xff] }
 0x310   :  { %7594 = vmatpush1.bf16.msra.mxu1 %v18322_v56  ;;  %8497 = vmatpush1.bf16.msra.mxu0 %v18336_v54  ;;  %v18481_v56 = vcombine.high %v905_v57, %v917_v43  ;;  %v922_v54 = vld [vmem:[#allocation5 + $0x1998] sm:$0xff] }
 0x311   :  { %7595 = vmatprep.subr.bf16.mxu1 %v18347_v3  ;;  %8498 = vmatprep.subr.bf16.mxu0 %v18361_v12  ;;  %v934_v3 = vld [vmem:[#allocation5 + $0x19f8] sm:$0xff]  ;;  %v929_v12 = vld [vmem:[#allocation5 + $0x19d0] sm:$0xff] }
 0x312   :  { %v18491_v60 = vcombine.high %v922_v54, %v934_v3  ;;  %v18490_v20 = vcombine.low %v922_v54, %v934_v3  ;;  %v18504_v23 = vcombine.low %v929_v12, %v941_v0  ;;  %v1061_v54 = vld [vmem:[#allocation5 + $0x1df0] sm:$0xff] }
 0x314   :  { %7596 = vmatpush1.bf16.msra.mxu1 %v18346_v11  ;;  %8499 = vmatpush1.bf16.msra.mxu0 %v18360_v36  ;;  %v18505_v11 = vcombine.high %v929_v12, %v941_v0  ;;  %v946_v36 = vld [vmem:[#allocation5 + $0x1a58] sm:$0xff] }
 0x315   :  { %7597 = vmatprep.subr.bf16.mxu1 %v18371_v28  ;;  %8500 = vmatprep.subr.bf16.mxu0 %v18385_v17  ;;  %v958_v28 = vld [vmem:[#allocation5 + $0x1ab8] sm:$0xff]  ;;  %v953_v17 = vld [vmem:[#allocation5 + $0x1a90] sm:$0xff] }
 0x316   :  { %v18515_v45 = vcombine.high %v946_v36, %v958_v28  ;;  %v18514_v10 = vcombine.low %v946_v36, %v958_v28  ;;  %v18528_v34 = vcombine.low %v953_v17, %v965_v24  ;;  %v1085_v36 = vld [vmem:[#allocation5 + $0x1eb0] sm:$0xff] }
 0x318   :  { %7598 = vmatpush1.bf16.msra.mxu1 %v18370_v49  ;;  %8501 = vmatpush1.bf16.msra.mxu0 %v18384_v51  ;;  %v18529_v49 = vcombine.high %v953_v17, %v965_v24  ;;  %v970_v51 = vld [vmem:[#allocation5 + $0x1b18] sm:$0xff] }
 0x319   :  { %7599 = vmatprep.subr.bf16.mxu1 %v18395_v4  ;;  %8502 = vmatprep.subr.bf16.mxu0 %v18409_v63  ;;  %v982_v4 = vld [vmem:[#allocation5 + $0x1b78] sm:$0xff]  ;;  %v977_v63 = vld [vmem:[#allocation5 + $0x1b50] sm:$0xff] }
 0x31a   :  { %v18539_v53 = vcombine.high %v970_v51, %v982_v4  ;;  %v18538_v41 = vcombine.low %v970_v51, %v982_v4  ;;  %v18552_v21 = vcombine.low %v977_v63, %v989_v32  ;;  %v1109_v51 = vld [vmem:[#allocation5 + $0x1f70] sm:$0xff] }
 0x31c   :  { %7600 = vmatpush1.bf16.msra.mxu1 %v18394_v47  ;;  %8503 = vmatpush1.bf16.msra.mxu0 %v18408_v6  ;;  %v18553_v47 = vcombine.high %v977_v63, %v989_v32  ;;  %v994_v6 = vld [vmem:[#allocation5 + $0x1bd8] sm:$0xff] }
 0x31d   :  { %7601 = vmatprep.subr.bf16.mxu1 %v18419_v27  ;;  %8504 = vmatprep.subr.bf16.mxu0 %v18433_v62  ;;  %v1006_v27 = vld [vmem:[#allocation5 + $0x1c38] sm:$0xff]  ;;  %v1001_v62 = vld [vmem:[#allocation5 + $0x1c10] sm:$0xff] }
 0x31e   :  { %v18563_v55 = vcombine.high %v994_v6, %v1006_v27  ;;  %v18562_v52 = vcombine.low %v994_v6, %v1006_v27  ;;  %v18576_v57 = vcombine.low %v1001_v62, %v1013_v50  ;;  %v1133_v6 = vld [vmem:[#allocation5 + $0x2030] sm:$0xff] }
 0x320   :  { %7602 = vmatpush1.bf16.msra.mxu1 %v18418_v13  ;;  %8505 = vmatpush1.bf16.msra.mxu0 %v18432_v1  ;;  %v18577_v13 = vcombine.high %v1001_v62, %v1013_v50  ;;  %v1018_v1 = vld [vmem:[#allocation5 + $0x1c98] sm:$0xff] }
 0x321   :  { %7614 = vmatprep.subr.bf16.mxu1 %v18443_v33  ;;  %8517 = vmatprep.subr.bf16.mxu0 %v18457_v14  ;;  %v1030_v33 = vld [vmem:[#allocation5 + $0x1cf8] sm:$0xff]  ;;  %v1025_v14 = vld [vmem:[#allocation5 + $0x1cd0] sm:$0xff] }
 0x322   :  { %v18587_v43 = vcombine.high %v1018_v1, %v1030_v33  ;;  %v18586_v3 = vcombine.low %v1018_v1, %v1030_v33  ;;  %v18600_v12 = vcombine.low %v1025_v14, %v1037_v5  ;;  %v1157_v1 = vld [vmem:[#allocation5 + $0x20f0] sm:$0xff] }
 0x323   :  { %7604 = vmatmul.mubr.bf16.vlgmr.msra.gmra.mrb[12].mxu1 %v22361_v30  ;;  %8507 = vmatmul.mubr.bf16.vlgmr.msra.gmra.mrb[12].mxu0 %v22361_v30 }
 0x324   :  { %7615 = vmatpush1.bf16.msra.mxu1 %v18442_v29  ;;  %8518 = vmatpush1.bf16.msra.mxu0 %v18456_v16  ;;  %v18601_v29 = vcombine.high %v1025_v14, %v1037_v5  ;;  %v1042_v16 = vld [vmem:[#allocation5 + $0x1d58] sm:$0xff] }
 0x325   :  { %7616 = vmatprep.subr.bf16.mxu1 %v18467_v31  ;;  %8519 = vmatprep.subr.bf16.mxu0 %v18481_v56  ;;  %v1054_v31 = vld [vmem:[#allocation5 + $0x1db8] sm:$0xff]  ;;  %v1049_v56 = vld [vmem:[#allocation5 + $0x1d90] sm:$0xff] }
 0x326   :  { %7646 = vmatprep.mubr.bf16.mxu1 %v22363_v39  ;;  %8549 = vmatprep.mubr.bf16.mxu0 %v22363_v39  ;;  %v18611_v0 = vcombine.high %v1042_v16, %v1054_v31  ;;  %v18610_v28 = vcombine.low %v1042_v16, %v1054_v31  ;;  %v18624_v17 = vcombine.low %v1049_v56, %v1061_v54  ;;  %v1181_v16 = vld [vmem:[#allocation5 + $0x21b0] sm:$0xff] }
 0x328   :  { %7617 = vmatpush1.bf16.msra.mxu1 %v18466_v35  ;;  %8520 = vmatpush1.bf16.msra.mxu0 %v18480_v40  ;;  %v18625_v35 = vcombine.high %v1049_v56, %v1061_v54  ;;  %v1066_v40 = vld [vmem:[#allocation5 + $0x1e18] sm:$0xff] }
 0x329   :  { %7618 = vmatprep.subr.bf16.mxu1 %v18491_v60  ;;  %8521 = vmatprep.subr.bf16.mxu0 %v18505_v11  ;;  %v1078_v60 = vld [vmem:[#allocation5 + $0x1e78] sm:$0xff]  ;;  %v1073_v11 = vld [vmem:[#allocation5 + $0x1e50] sm:$0xff] }
 0x32a   :  { %v18635_v24 = vcombine.high %v1066_v40, %v1078_v60  ;;  %v18634_v4 = vcombine.low %v1066_v40, %v1078_v60  ;;  %v18648_v63 = vcombine.low %v1073_v11, %v1085_v36  ;;  %v1205_v40 = vld [vmem:[#allocation5 + $0x2270] sm:$0xff] }
 0x32c   :  { %7619 = vmatpush1.bf16.msra.mxu1 %v18490_v20  ;;  %8522 = vmatpush1.bf16.msra.mxu0 %v18504_v23  ;;  %v18649_v20 = vcombine.high %v1073_v11, %v1085_v36  ;;  %v1090_v23 = vld [vmem:[#allocation5 + $0x1ed8] sm:$0xff] }
 0x32d   :  { %7620 = vmatprep.subr.bf16.mxu1 %v18515_v45  ;;  %8523 = vmatprep.subr.bf16.mxu0 %v18529_v49  ;;  %v1102_v45 = vld [vmem:[#allocation5 + $0x1f38] sm:$0xff]  ;;  %v1097_v49 = vld [vmem:[#allocation5 + $0x1f10] sm:$0xff] }
 0x32e   :  { %v18659_v32 = vcombine.high %v1090_v23, %v1102_v45  ;;  %v18658_v27 = vcombine.low %v1090_v23, %v1102_v45  ;;  %v18672_v62 = vcombine.low %v1097_v49, %v1109_v51  ;;  %v1229_v23 = vld [vmem:[#allocation5 + $0x2330] sm:$0xff] }
 0x330   :  { %7621 = vmatpush1.bf16.msra.mxu1 %v18514_v10  ;;  %8524 = vmatpush1.bf16.msra.mxu0 %v18528_v34  ;;  %v18673_v10 = vcombine.high %v1097_v49, %v1109_v51  ;;  %v1114_v34 = vld [vmem:[#allocation5 + $0x1f98] sm:$0xff] }
 0x331   :  { %7622 = vmatprep.subr.bf16.mxu1 %v18539_v53  ;;  %8525 = vmatprep.subr.bf16.mxu0 %v18553_v47  ;;  %v1126_v53 = vld [vmem:[#allocation5 + $0x1ff8] sm:$0xff]  ;;  %v1121_v47 = vld [vmem:[#allocation5 + $0x1fd0] sm:$0xff] }
 0x332   :  { %v18683_v50 = vcombine.high %v1114_v34, %v1126_v53  ;;  %v18682_v33 = vcombine.low %v1114_v34, %v1126_v53  ;;  %v18696_v14 = vcombine.low %v1121_v47, %v1133_v6  ;;  %v1253_v34 = vld [vmem:[#allocation5 + $0x23f0] sm:$0xff] }
 0x334   :  { %7623 = vmatpush1.bf16.msra.mxu1 %v18538_v41  ;;  %8526 = vmatpush1.bf16.msra.mxu0 %v18552_v21  ;;  %v18697_v41 = vcombine.high %v1121_v47, %v1133_v6  ;;  %v1138_v21 = vld [vmem:[#allocation5 + $0x2058] sm:$0xff] }
 0x335   :  { %7624 = vmatprep.subr.bf16.mxu1 %v18563_v55  ;;  %8527 = vmatprep.subr.bf16.mxu0 %v18577_v13  ;;  %v1150_v55 = vld [vmem:[#allocation5 + $0x20b8] sm:$0xff]  ;;  %v1145_v13 = vld [vmem:[#allocation5 + $0x2090] sm:$0xff] }
 0x336   :  { %v18707_v5 = vcombine.high %v1138_v21, %v1150_v55  ;;  %v18706_v31 = vcombine.low %v1138_v21, %v1150_v55  ;;  %v18720_v56 = vcombine.low %v1145_v13, %v1157_v1 }
 0x338   :  { %7625 = vmatpush1.bf16.msra.mxu1 %v18562_v52  ;;  %8528 = vmatpush1.bf16.msra.mxu0 %v18576_v57  ;;  %v18721_v52 = vcombine.high %v1145_v13, %v1157_v1  ;;  %v1162_v57 = vld [vmem:[#allocation5 + $0x2118] sm:$0xff]  ;;  %v132_v1 = vld [vmem:[#allocation5 + $0xe8] sm:$0xff] }
 0x339   :  { %7626 = vmatprep.subr.bf16.mxu1 %v18587_v43  ;;  %8529 = vmatprep.subr.bf16.mxu0 %v18601_v29  ;;  %v1174_v43 = vld [vmem:[#allocation5 + $0x2178] sm:$0xff]  ;;  %v1169_v29 = vld [vmem:[#allocation5 + $0x2150] sm:$0xff] }
 0x33a   :  { %v18731_v54 = vcombine.high %v1162_v57, %v1174_v43  ;;  %v18730_v60 = vcombine.low %v1162_v57, %v1174_v43  ;;  %v18744_v11 = vcombine.low %v1169_v29, %v1181_v16  ;;  %v20274_v13 = vld [vmem:[#allocation8 + $0x4] ss:$24 sps:$4 sm:$0xff]   ;;  %v20277_v57 = vld [vmem:[#allocation8 + $0x34] ss:$24 sps:$4 sm:$0xff]  }
 0x33b   :  { %v156_v43 = vld [vmem:[#allocation5 + $0x1a8] sm:$0xff] }
 0x33c   :  { %7627 = vmatpush1.bf16.msra.mxu1 %v18586_v3  ;;  %8530 = vmatpush1.bf16.msra.mxu0 %v18600_v12  ;;  %v18745_v3 = vcombine.high %v1169_v29, %v1181_v16  ;;  %v1186_v12 = vld [vmem:[#allocation5 + $0x21d8] sm:$0xff]  ;;  %v168_v29 = vld [vmem:[#allocation5 + $0x208] sm:$0xff] }
 0x33d   :  { %7628 = vmatprep.subr.bf16.mxu1 %v18611_v0  ;;  %8531 = vmatprep.subr.bf16.mxu0 %v18625_v35  ;;  %v1198_v0 = vld [vmem:[#allocation5 + $0x2238] sm:$0xff]  ;;  %v1193_v35 = vld [vmem:[#allocation5 + $0x2210] sm:$0xff] }
 0x33e   :  { %v18755_v36 = vcombine.high %v1186_v12, %v1198_v0  ;;  %v18754_v45 = vcombine.low %v1186_v12, %v1198_v0  ;;  %v18768_v49 = vcombine.low %v1193_v35, %v1205_v40  ;;  %v192_v12 = vld [vmem:[#allocation5 + $0x2c8] sm:$0xff]  ;;  %v17726_v0 = vcombine.low %v156_v43, %v168_v29 }
 0x340   :  { %7629 = vmatpush1.bf16.msra.mxu1 %v18610_v28  ;;  %8532 = vmatpush1.bf16.msra.mxu0 %v18624_v17  ;;  %v18769_v28 = vcombine.high %v1193_v35, %v1205_v40  ;;  %v1210_v17 = vld [vmem:[#allocation5 + $0x2298] sm:$0xff] }
 0x341   :  { %7630 = vmatprep.subr.bf16.mxu1 %v18635_v24  ;;  %8533 = vmatprep.subr.bf16.mxu0 %v18649_v20  ;;  %v1222_v24 = vld [vmem:[#allocation5 + $0x22f8] sm:$0xff]  ;;  %v1217_v20 = vld [vmem:[#allocation5 + $0x22d0] sm:$0xff] }
 0x342   :  { %v18779_v51 = vcombine.high %v1210_v17, %v1222_v24  ;;  %v18778_v53 = vcombine.low %v1210_v17, %v1222_v24  ;;  %v18792_v47 = vcombine.low %v1217_v20, %v1229_v23  ;;  %v20278_v35 = vld [vmem:[#allocation8 + $0x60] ss:$24 sps:$4 sm:$0xff]   ;;  %v20281_v17 = vld [vmem:[#allocation8 + $0x90] ss:$24 sps:$4 sm:$0xff]  }
 0x344   :  { %7631 = vmatpush1.bf16.msra.mxu1 %v18634_v4  ;;  %8534 = vmatpush1.bf16.msra.mxu0 %v18648_v63  ;;  %v18793_v4 = vcombine.high %v1217_v20, %v1229_v23  ;;  %v1234_v63 = vld [vmem:[#allocation5 + $0x2358] sm:$0xff]  ;;  %v228_v23 = vld [vmem:[#allocation5 + $0x3e8] sm:$0xff] }
 0x345   :  { %7632 = vmatprep.subr.bf16.mxu1 %v18659_v32  ;;  %8535 = vmatprep.subr.bf16.mxu0 %v18673_v10  ;;  %v1246_v32 = vld [vmem:[#allocation5 + $0x23b8] sm:$0xff]  ;;  %v1241_v10 = vld [vmem:[#allocation5 + $0x2390] sm:$0xff] }
 0x346   :  { %v18803_v6 = vcombine.high %v1234_v63, %v1246_v32  ;;  %v18816_v21 = vcombine.low %v1241_v10, %v1253_v34  ;;  %v20286_v20 = vld [vmem:[#allocation8 + $0xc4] ss:$24 sps:$4 sm:$0xff]  }
 0x348   :  { %7633 = vmatpush1.bf16.msra.mxu1 %v18658_v27  ;;  %8536 = vmatpush1.bf16.msra.mxu0 %v18672_v62  ;;  %v18817_v27 = vcombine.high %v1241_v10, %v1253_v34  ;;  %v108_v62 = vld [vmem:[#allocation5 + $0x28] sm:$0xff] }
 0x349   :  { %7634 = vmatprep.subr.bf16.mxu1 %v18683_v50  ;;  %8537 = vmatprep.subr.bf16.mxu0 %v18697_v41  ;;  %v120_v50 = vld [vmem:[#allocation5 + $0x88] sm:$0xff]  ;;  %v18802_v41 = vcombine.low %v1234_v63, %v1246_v32  ;;  %v1257_v63 = vld [vmem:[#allocation7 + $0x10] sm:$0xff] }
 0x34a   :  { %v17679_v55 = vcombine.high %v108_v62, %v120_v50  ;;  %v20289_v32 = vld [vmem:[#allocation8 + $0xf4] ss:$24 sps:$4 sm:$0xff]  }
 0x34b   :  { %v252_v10 = vld [vmem:[#allocation5 + $0x4a8] sm:$0xff] }
 0x34c   :  { %7635 = vmatpush1.bf16.msra.mxu1 %v18682_v33  ;;  %8538 = vmatpush1.bf16.msra.mxu0 %v18696_v14  ;;  %v144_v33 = vld [vmem:[#allocation5 + $0x148] sm:$0xff]  ;;  %v17678_v14 = vcombine.low %v108_v62, %v120_v50  ;;  %v1328_v62 = vrot.slane %v1257_v63, %v22390_v59 }
 0x34d   :  { %7636 = vmatprep.subr.bf16.mxu1 %v18707_v5  ;;  %8539 = vmatprep.subr.bf16.mxu0 %v18721_v52  ;;  %v20272_v5 = vld [vmem:[#allocation8] ss:$24 sps:$4 sm:$0xff]   ;;  %v17703_v52 = vcombine.high %v132_v1, %v144_v33  ;;  %v17702_v16 = vcombine.low %v132_v1, %v144_v33  ;;  %v264_v34 = vld [vmem:[#allocation5 + $0x508] sm:$0xff]  ;;  %v20292_v33 = vld [vmem:[#allocation8 + $0x124] ss:$24 sps:$4 sm:$0xff]  }
 0x34e   :  { %v20287_v50 = vld [vmem:[#allocation8 + $0xf0] ss:$24 sps:$4 sm:$0xff]  }
 0x350   :  { %7637 = vmatpush1.bf16.msra.mxu1 %v18706_v31  ;;  %8540 = vmatpush1.bf16.msra.mxu0 %v18720_v56  ;;  %v20275_v31 = vld [vmem:[#allocation8 + $0x30] ss:$24 sps:$4 sm:$0xff]   ;;  %v17727_v56 = vcombine.high %v156_v43, %v168_v29 }
 0x351   :  { %7638 = vmatprep.subr.bf16.mxu1 %v18731_v54  ;;  %8541 = vmatprep.subr.bf16.mxu0 %v18745_v3  ;;  %v20280_v54 = vld [vmem:[#allocation8 + $0x64] ss:$24 sps:$4 sm:$0xff]   ;;  %v180_v3 = vld [vmem:[#allocation5 + $0x268] sm:$0xff] }
 0x352   :  { %v17751_v40 = vcombine.high %v180_v3, %v192_v12  ;;  %v22763_v43 = vld [vmem:[#allocation5 + $0x688] sm:$0xff] }
 0x354   :  { %7639 = vmatpush1.bf16.msra.mxu1 %v18730_v60  ;;  %8542 = vmatpush1.bf16.msra.mxu0 %v18744_v11  ;;  %v20283_v60 = vld [vmem:[#allocation8 + $0x94] ss:$24 sps:$4 sm:$0xff]  }
 0x355   :  { %7640 = vmatprep.subr.bf16.mxu1 %v18755_v36  ;;  %8543 = vmatprep.subr.bf16.mxu0 %v18769_v28  ;;  %v204_v11 = vld [vmem:[#allocation5 + $0x328] sm:$0xff]  ;;  %v17750_v28 = vcombine.low %v180_v3, %v192_v12 }
 0x356   :  { %v216_v36 = vld [vmem:[#allocation5 + $0x388] sm:$0xff] }
 0x357   :  { %v17775_v24 = vcombine.high %v204_v11, %v216_v36 }
 0x358   :  { %7641 = vmatpush1.bf16.msra.mxu1 %v18754_v45  ;;  %8544 = vmatpush1.bf16.msra.mxu0 %v18768_v49  ;;  %v240_v45 = vld [vmem:[#allocation5 + $0x448] sm:$0xff]  ;;  %v17774_v49 = vcombine.low %v204_v11, %v216_v36 }
 0x359   :  { %7642 = vmatprep.subr.bf16.mxu1 %v18779_v51  ;;  %8545 = vmatprep.subr.bf16.mxu0 %v18793_v4  ;;  %v20284_v51 = vld [vmem:[#allocation8 + $0xc0] ss:$24 sps:$4 sm:$0xff]   ;;  %v17799_v4 = vcombine.high %v228_v23, %v240_v45 }
 0x35c   :  { %7643 = vmatpush1.bf16.msra.mxu1 %v18778_v53  ;;  %8546 = vmatpush1.bf16.msra.mxu0 %v18792_v47  ;;  %v22098_v53 = vld [vmem:[#allocation7] sm:$0xff] }
 0x35d   :  { %7644 = vmatprep.subr.bf16.mxu1 %v18803_v6  ;;  %8547 = vmatprep.subr.bf16.mxu0 %v18817_v27  ;;  %v1280_v47 = vrot.slane %v22098_v53, %v22578_v26  ;;  %v1284_v6 = vrot.slane %v22098_v53, %v22589_v46  ;;  %v17798_v27 = vcombine.low %v228_v23, %v240_v45  ;;  %v22799_v53 = vld [vmem:[#allocation5 + $0x748] sm:$0xff] }
 0x360   :  { %7645 = vmatpush1.bf16.msra.mxu1 %v18802_v41  ;;  %8548 = vmatpush1.bf16.msra.mxu0 %v18816_v21  ;;  %v17823_v41 = vcombine.high %v252_v10, %v264_v34  ;;  %v22754_v21 = vld [vmem:[#allocation5 + $0x568] sm:$0xff] }
 0x361   :  { %7786 = vmatprep.subr.bf16.mxu1 %v17679_v55  ;;  %16089 = vmatprep.subr.bf16.mxu0 %v20274_v13  ;;  %v22756_v55 = vld [vmem:[#allocation5 + $0x5c8] sm:$0xff]  ;;  %v1332_v13 = vrot.slane %v1257_v63, %v22393_v61 }
 0x363   :  { %7647 = vmatmul.mubr.bf16.vlgmr.msra.gmra.mrb[12].mxu1 %v22369_v44  ;;  %8550 = vmatmul.mubr.bf16.vlgmr.msra.gmra.mrb[12].mxu0 %v22369_v44 }
 0x364   :  { %7787 = vmatpush1.bf16.msra.mxu1 %v17678_v14  ;;  %16090 = vmatpush1.bf16.msra.mxu0 %v20272_v5 }
 0x365   :  { %16121 = vmatprep.mubr.bf16.mxu0 %v22547_v8  ;;  %7788 = vmatprep.subr.bf16.mxu1 %v17703_v52  ;;  %v17822_v52 = vcombine.low %v252_v10, %v264_v34  ;;  %v22797_v34 = vld [vmem:[#allocation5 + $0x6e8] sm:$0xff] }
 0x366   :  { %16091 = vmatprep.subr.bf16.mxu0 %v20277_v57  ;;  %7818 = vmatprep.mubr.bf16.mxu1 %v22349_v58  ;;  %v22761_v57 = vld [vmem:[#allocation5 + $0x628] sm:$0xff] }
 0x368   :  { %7789 = vmatpush1.bf16.msra.mxu1 %v17702_v16  ;;  %16092 = vmatpush1.bf16.msra.mxu0 %v20275_v31 }
 0x369   :  { %7790 = vmatprep.subr.bf16.mxu1 %v17727_v56  ;;  %16093 = vmatprep.subr.bf16.mxu0 %v20280_v54  ;;  %v17846_v56 = vcombine.low %v22754_v21, %v22756_v55  ;;  %v17847_v54 = vcombine.high %v22754_v21, %v22756_v55 }
 0x36c   :  { %7791 = vmatpush1.bf16.msra.mxu1 %v17726_v0  ;;  %16094 = vmatpush1.bf16.msra.mxu0 %v20278_v35 }
 0x36d   :  { %7792 = vmatprep.subr.bf16.mxu1 %v17751_v40  ;;  %16095 = vmatprep.subr.bf16.mxu0 %v20283_v60  ;;  %v20290_v60 = vld [vmem:[#allocation8 + $0x120] ss:$24 sps:$4 sm:$0xff]  }
 0x370   :  { %7793 = vmatpush1.bf16.msra.mxu1 %v17750_v28  ;;  %16096 = vmatpush1.bf16.msra.mxu0 %v20281_v17 }
 0x371   :  { %7794 = vmatprep.subr.bf16.mxu1 %v17775_v24  ;;  %16097 = vmatprep.subr.bf16.mxu0 %v20286_v20  ;;  %v20295_v24 = vld [vmem:[#allocation8 + $0x154] ss:$24 sps:$4 sm:$0xff]   ;;  %v17870_v20 = vcombine.low %v22761_v57, %v22763_v43 }
 0x374   :  { %7795 = vmatpush1.bf16.msra.mxu1 %v17774_v49  ;;  %16098 = vmatpush1.bf16.msra.mxu0 %v20284_v51 }
 0x375   :  { %7796 = vmatprep.subr.bf16.mxu1 %v17799_v4  ;;  %16099 = vmatprep.subr.bf16.mxu0 %v20289_v32  ;;  %v17871_v4 = vcombine.high %v22761_v57, %v22763_v43 }
 0x376   :  { %v7519_v1 = vpop.f32.mrb[8].mxu1  ;;  %v8293_v29 = vpop.f32.mrb[8].mxu0 }
 0x377   :  { %v22759_v14 = vadd.f32 %v7519_v1, %v1280_v47  ;;  %v7521_v5 = vpop.f32.mrb[9].mxu1  ;;  %v22771_v3 = vadd.f32 %v8293_v29, %v1328_v62  ;;  %v8295_v12 = vpop.f32.mrb[9].mxu0  ;;  %v17895_v29 = vcombine.high %v22797_v34, %v22799_v53 }
 0x378   :  { %v22765_v16 = vadd.f32 %v7521_v5, %v1284_v6  ;;  %v7523_v31 = vpop.f32.mrb[10].mxu1  ;;  %7797 = vmatpush1.bf16.msra.mxu1 %v17798_v27  ;;  %16100 = vmatpush1.bf16.msra.mxu0 %v20287_v50  ;;  %v22777_v11 = vadd.f32 %v8295_v12, %v1332_v13  ;;  %v8297_v36 = vpop.f32.mrb[10].mxu0  ;;  %v20298_v5 = vld [vmem:[#allocation8 + $0x184] ss:$24 sps:$4 sm:$0xff]  }
 0x379   :  { %v8693_v0 = vmul.f32 %v22759_v14, %v22759_v14  ;;  %v22775_v35 = vadd.f32 %v7523_v31, %v1280_v47  ;;  %v7525_v40 = vpop.f32.mrb[11].mxu1  ;;  %7798 = vmatprep.subr.bf16.mxu1 %v17823_v41  ;;  %16101 = vmatprep.subr.bf16.mxu0 %v20292_v33  ;;  %v8705_v23 = vmul.f32 %v22771_v3, %v22771_v3  ;;  %v8299_v45 = vpop.f32.mrb[11].mxu0  ;;  %v20293_v41 = vld [vmem:[#allocation8 + $0x150] ss:$24 sps:$4 sm:$0xff]  }
 0x37a   :  { %v8694_v28 = vmul.f32 %v22765_v16, %v22765_v16  ;;  %v22781_v17 = vadd.f32 %v7525_v40, %v1284_v6  ;;  %v8706_v63 = vmul.f32 %v22777_v11, %v22777_v11  ;;  %v22802_v6 = vadd.f32 %v8297_v36, %v1328_v62  ;;  %v20296_v36 = vld [vmem:[#allocation8 + $0x180] ss:$24 sps:$4 sm:$0xff]  }
 0x37b   :  { %v8741_v49 = vmul.f32 %v22759_v14, %v8693_v0  ;;  %v8717_v51 = vmul.f32 %v22775_v35, %v22775_v35  ;;  %v8753_v47 = vmul.f32 %v22771_v3, %v8705_v23  ;;  %v22806_v55 = vadd.f32 %v8299_v45, %v1332_v13 }
 0x37c   :  { %v8742_v32 = vmul.f32 %v22765_v16, %v8694_v28  ;;  %v8718_v10 = vmul.f32 %v22781_v17, %v22781_v17  ;;  %7799 = vmatpush1.bf16.msra.mxu1 %v17822_v52  ;;  %16102 = vmatpush1.bf16.msra.mxu0 %v20290_v60  ;;  %v8754_v21 = vmul.f32 %v22777_v11, %v8706_v63  ;;  %v20301_v28 = vld [vmem:[#allocation8 + $0x1b4] ss:$24 sps:$4 sm:$0xff]  }
 0x37d   :  { %v8789_v27 = vmul.f32 0.044715, %v8741_v49  ;;  %v8765_v50 = vmul.f32 %v22775_v35, %v8717_v51  ;;  %7800 = vmatprep.subr.bf16.mxu1 %v17847_v54  ;;  %16103 = vmatprep.subr.bf16.mxu0 %v20295_v24  ;;  %v8801_v52 = vmul.f32 0.044715, %v8753_v47  ;;  %v8729_v62 = vmul.f32 %v22802_v6, %v22802_v6  ;;  %v348_v51 = vld [vmem:[#allocation5 + $0x7a8] sm:$0xff] }
 0x37e   :  { %v8790_v1 = vmul.f32 0.044715, %v8742_v32  ;;  %v8766_v33 = vmul.f32 %v22781_v17, %v8718_v10  ;;  %v8802_v31 = vmul.f32 0.044715, %v8754_v21  ;;  %v8730_v23 = vmul.f32 %v22806_v55, %v22806_v55  ;;  %v360_v63 = vld [vmem:[#allocation5 + $0x808] sm:$0xff] }
 0x37f   :  { %v8837_v57 = vadd.f32 %v22759_v14, %v8789_v27  ;;  %v8813_v43 = vmul.f32 0.044715, %v8765_v50  ;;  %v8849_v12 = vadd.f32 %v22771_v3, %v8801_v52  ;;  %v8777_v0 = vmul.f32 %v22802_v6, %v8729_v62  ;;  %v20299_v21 = vld [vmem:[#allocation8 + $0x1b0] ss:$24 sps:$4 sm:$0xff]  }
 0x380   :  { %v8838_v54 = vadd.f32 %v22765_v16, %v8790_v1  ;;  %v8814_v13 = vmul.f32 0.044715, %v8766_v33  ;;  %7801 = vmatpush1.bf16.msra.mxu1 %v17846_v56  ;;  %16104 = vmatpush1.bf16.msra.mxu0 %v20293_v41  ;;  %v8850_v24 = vadd.f32 %v22777_v11, %v8802_v31  ;;  %v17894_v56 = vcombine.low %v22797_v34, %v22799_v53  ;;  %v20304_v53 = vld [vmem:[#allocation8 + $0x1e4] ss:$24 sps:$4 sm:$0xff]   ;;  %v372_v33 = vld [vmem:[#allocation5 + $0x868] sm:$0xff] }
 0x381   :  { %v8885_v40 = vmul.f32 0.7978846, %v8837_v57  ;;  %v8861_v60 = vadd.f32 %v22775_v35, %v8813_v43  ;;  %7802 = vmatprep.subr.bf16.mxu1 %v17871_v4  ;;  %16105 = vmatprep.subr.bf16.mxu0 %v20298_v5  ;;  %v8825_v32 = vmul.f32 0.044715, %v8777_v0  ;;  %v8897_v4 = vmul.f32 0.7978846, %v8849_v12 }
 0x382   :  { %v8886_v45 = vmul.f32 0.7978846, %v8838_v54  ;;  %v8862_v49 = vadd.f32 %v22781_v17, %v8814_v13  ;;  %v8778_v47 = vmul.f32 %v22806_v55, %v8730_v23  ;;  %v8898_v50 = vmul.f32 0.7978846, %v8850_v24  ;;  %v384_v5 = vld [vmem:[#allocation5 + $0x8c8] sm:$0xff] }
 0x383   :  { %22032 = vtanh.f32 %v8885_v40  ;;  %v8909_v10 = vmul.f32 0.7978846, %v8861_v60  ;;  %v8873_v41 = vadd.f32 %v22802_v6, %v8825_v32  ;;  %v17919_v1 = vcombine.high %v348_v51, %v360_v63  ;;  %v20302_v57 = vld [vmem:[#allocation8 + $0x1e0] ss:$24 sps:$4 sm:$0xff]   ;;  %v20307_v31 = vld [vmem:[#allocation8 + $0x214] ss:$24 sps:$4 sm:$0xff]  }
 0x384   :  { %22034 = vtanh.f32 %v8886_v45  ;;  %v8910_v27 = vmul.f32 0.7978846, %v8862_v49  ;;  %7803 = vmatpush1.bf16.msra.mxu1 %v17870_v20  ;;  %16106 = vmatpush1.bf16.msra.mxu0 %v20296_v36  ;;  %v8826_v34 = vmul.f32 0.044715, %v8778_v47  ;;  %v17918_v20 = vcombine.low %v348_v51, %v360_v63  ;;  %v396_v54 = vld [vmem:[#allocation5 + $0x928] sm:$0xff] }
 0x385   :  { %22036 = vtanh.f32 %v8909_v10  ;;  %7804 = vmatprep.subr.bf16.mxu1 %v17895_v29  ;;  %16107 = vmatprep.subr.bf16.mxu0 %v20301_v28  ;;  %v8921_v52 = vmul.f32 0.7978846, %v8873_v41  ;;  %v17943_v43 = vcombine.high %v372_v33, %v384_v5  ;;  %v408_v13 = vld [vmem:[#allocation5 + $0x988] sm:$0xff]  ;;  %v17942_v12 = vcombine.low %v372_v33, %v384_v5  ;;  %v20310_v23 = vld [vmem:[#allocation8 + $0x244] ss:$24 sps:$4 sm:$0xff]  }
 0x386   :  { %22038 = vtanh.f32 %v8910_v27  ;;  %v8874_v62 = vadd.f32 %v22806_v55, %v8826_v34  ;;  %v420_v0 = vld [vmem:[#allocation5 + $0x9e8] sm:$0xff]  ;;  %v17967_v28 = vcombine.high %v396_v54, %v408_v13  ;;  %v8933_v10 = vmul.f32 0.5, %v22759_v14  ;;  %v20308_v41 = vld [vmem:[#allocation8 + $0x240] ss:$24 sps:$4 sm:$0xff]  }
 0x387   :  { %22040 = vtanh.f32 %v8897_v4  ;;  %v432_v40 = vld [vmem:[#allocation5 + $0xa48] sm:$0xff]  ;;  %v8957_v4 = vmul.f32 0.5, %v22775_v35  ;;  %v8945_v47 = vmul.f32 0.5, %v22771_v3  ;;  %v8958_v34 = vmul.f32 0.5, %v22781_v17 }
 0x388   :  { %7805 = vmatpush1.bf16.msra.mxu1 %v17894_v56  ;;  %22042 = vtanh.f32 %v8898_v50  ;;  %16108 = vmatpush1.bf16.msra.mxu0 %v20299_v21  ;;  %v8922_v29 = vmul.f32 0.7978846, %v8874_v62  ;;  %v20305_v36 = vld [vmem:[#allocation8 + $0x210] ss:$24 sps:$4 sm:$0xff]   ;;  %v17966_v56 = vcombine.low %v396_v54, %v408_v13  ;;  %v17991_v51 = vcombine.high %v420_v0, %v432_v40  ;;  %v20313_v14 = vld [vmem:[#allocation8 + $0x274] ss:$24 sps:$4 sm:$0xff]  }
 0x389   :  { %7806 = vmatprep.subr.bf16.mxu1 %v17919_v1  ;;  %22044 = vtanh.f32 %v8921_v52  ;;  %16109 = vmatprep.subr.bf16.mxu0 %v20304_v53  ;;  %v8969_v21 = vmul.f32 0.5, %v22802_v6  ;;  %v8934_v1 = vmul.f32 0.5, %v22765_v16  ;;  %v444_v5 = vld [vmem:[#allocation5 + $0xaa8] sm:$0xff]  ;;  %v8946_v3 = vmul.f32 0.5, %v22777_v11  ;;  %v20316_v11 = vld [vmem:[#allocation8 + $0x2a4] ss:$24 sps:$4 sm:$0xff]  }
 0x38a   :  { %22046 = vtanh.f32 %v8922_v29  ;;  %v456_v35 = vld [vmem:[#allocation5 + $0xb08] sm:$0xff]  ;;  %v8970_v17 = vmul.f32 0.5, %v22806_v55 }
 0x38c   :  { %7807 = vmatpush1.bf16.msra.mxu1 %v17918_v20  ;;  %16110 = vmatpush1.bf16.msra.mxu0 %v20302_v57 }
 0x38d   :  { %v22033_v60 = vpop.eup %22032  ;;  %7808 = vmatprep.subr.bf16.mxu1 %v17943_v43  ;;  %16111 = vmatprep.subr.bf16.mxu0 %v20307_v31  ;;  %v17990_v43 = vcombine.low %v420_v0, %v432_v40  ;;  %v468_v0 = vld [vmem:[#allocation5 + $0xb68] sm:$0xff] }
 0x38e   :  { %v22035_v24 = vpop.eup %22034  ;;  %v9029_v45 = vadd.f32 1.0, %v22033_v60  ;;  %v20311_v60 = vld [vmem:[#allocation8 + $0x270] ss:$24 sps:$4 sm:$0xff]  }
 0x38f   :  { %v22037_v49 = vpop.eup %22036  ;;  %v9030_v63 = vadd.f32 1.0, %v22035_v24  ;;  %v480_v40 = vld [vmem:[#allocation5 + $0xbc8] sm:$0xff] }
 0x390   :  { %v22039_v32 = vpop.eup %22038  ;;  %7809 = vmatpush1.bf16.msra.mxu1 %v17942_v12  ;;  %v9053_v27 = vadd.f32 1.0, %v22037_v49  ;;  %16112 = vmatpush1.bf16.msra.mxu0 %v20305_v36  ;;  %v9077_v52 = vmul.f32 %v9029_v45, %v8933_v10  ;;  %v18015_v36 = vcombine.high %v444_v5, %v456_v35  ;;  %v18014_v49 = vcombine.low %v444_v5, %v456_v35  ;;  %v492_v10 = vld [vmem:[#allocation5 + $0xc28] sm:$0xff] }
 0x391   :  { %v22041_v50 = vpop.eup %22040  ;;  %7810 = vmatprep.subr.bf16.mxu1 %v17967_v28  ;;  %v9054_v53 = vadd.f32 1.0, %v22039_v32  ;;  %16113 = vmatprep.subr.bf16.mxu0 %v20310_v23  ;;  %v9078_v29 = vmul.f32 %v9030_v63, %v8934_v1  ;;  %v20314_v63 = vld [vmem:[#allocation8 + $0x2a0] ss:$24 sps:$4 sm:$0xff]   ;;  %v20319_v32 = vld [vmem:[#allocation8 + $0x2d4] ss:$24 sps:$4 sm:$0xff]  }
 0x392   :  { %v22043_v33 = vpop.eup %22042  ;;  %v9101_v62 = vmul.f32 %v9053_v27, %v8957_v4  ;;  %v9041_v20 = vadd.f32 1.0, %v22041_v50  ;;  %v504_v4 = vld [vmem:[#allocation5 + $0xc88] sm:$0xff]  ;;  %v18038_v27 = vcombine.low %v468_v0, %v480_v40 }
 0x393   :  { %v22045_v57 = vpop.eup %22044  ;;  %v9102_v31 = vmul.f32 %v9054_v53, %v8958_v34  ;;  %v9042_v6 = vadd.f32 1.0, %v22043_v33  ;;  %v20317_v50 = vld [vmem:[#allocation8 + $0x2d0] ss:$24 sps:$4 sm:$0xff]   ;;  %v18062_v53 = vcombine.low %v492_v10, %v504_v4  ;;  %v20320_v33 = vld [vmem:[#allocation8 + $0x300] ss:$24 sps:$4 sm:$0xff]  }
 0x394   :  { %7811 = vmatpush1.bf16.msra.mxu1 %v17966_v56  ;;  %v22834_v16 = vpack.c.bf16 %v9101_v62, %v9077_v52  ;;  %v9065_v54 = vadd.f32 1.0, %v22045_v57  ;;  %v9089_v13 = vmul.f32 %v9041_v20, %v8945_v47  ;;  %v22047_v12 = vpop.eup %22046  ;;  %16114 = vmatpush1.bf16.msra.mxu0 %v20308_v41  ;;  %v18063_v41 = vcombine.high %v492_v10, %v504_v4  ;;  %v516_v1 = vld [vmem:[#allocation5 + $0xce8] sm:$0xff]  ;;  %v20328_v57 = vld [vmem:[#allocation8 + $0x364] ss:$24 sps:$4 sm:$0xff]  }
 0x395   :  { %7812 = vmatprep.subr.bf16.mxu1 %v17991_v51  ;;  %v22837_v28 = vpack.c.bf16 %v9102_v31, %v9078_v29  ;;  %16115 = vmatprep.subr.bf16.mxu0 %v20313_v14  ;;  %v9066_v24 = vadd.f32 1.0, %v22047_v12  ;;  %v9090_v23 = vmul.f32 %v9042_v6, %v8946_v3  ;;  %v18039_v51 = vcombine.high %v468_v0, %v480_v40  ;;  %v528_v34 = vld [vmem:[#allocation5 + $0xd48] sm:$0xff]  ;;  %v20326_v6 = vld [vmem:[#allocation8 + $0x360] ss:$24 sps:$4 sm:$0xff]   ;;  %v20334_v0 = vld [vmem:[#allocation8 + $0x3c4] ss:$24 sps:$4 sm:$0xff]  }
 0x396   :  { %v9113_v45 = vmul.f32 %v9065_v54, %v8969_v21  ;;  %v20322_v21 = vld [vmem:[#allocation8 + $0x304] ss:$24 sps:$4 sm:$0xff]   ;;  %v18087_v14 = vcombine.high %v516_v1, %v528_v34  ;;  %v20325_v5 = vld [vmem:[#allocation8 + $0x334] ss:$24 sps:$4 sm:$0xff]   ;;  %v18086_v62 = vcombine.low %v516_v1, %v528_v34  ;;  %v20323_v3 = vld [vmem:[#allocation8 + $0x330] ss:$24 sps:$4 sm:$0xff]  }
 0x397   :  { %v9114_v56 = vmul.f32 %v9066_v24, %v8970_v17  ;;  %v540_v35 = vld [vmem:[#allocation5 + $0xda8] sm:$0xff]  ;;  %v20338_v1 = vld [vmem:[#allocation8 + $0x420] ss:$24 sps:$4 sm:$0xff]  }
 0x398   :  { %7813 = vmatpush1.bf16.msra.mxu1 %v17990_v43  ;;  %v22839_v55 = vpack.c.bf16 %v9113_v45, %v9089_v13  ;;  %16116 = vmatpush1.bf16.msra.mxu0 %v20311_v60  ;;  %v552_v52 = vld [vmem:[#allocation5 + $0xe08] sm:$0xff]  ;;  %v20332_v45 = vld [vmem:[#allocation8 + $0x3c0] ss:$24 sps:$4 sm:$0xff]  }
 0x399   :  { %7814 = vmatprep.subr.bf16.mxu1 %v18015_v36  ;;  %16117 = vmatprep.subr.bf16.mxu0 %v20316_v11  ;;  %v22841_v47 = vpack.c.bf16 %v9114_v56, %v9090_v23  ;;  %v18111_v20 = vcombine.high %v540_v35, %v552_v52  ;;  %v564_v43 = vld [vmem:[#allocation5 + $0xe68] sm:$0xff]  ;;  %v18110_v31 = vcombine.low %v540_v35, %v552_v52 }
 0x39a   :  { %v576_v29 = vld [vmem:[#allocation5 + $0xec8] sm:$0xff] }
 0x39b   :  { %v18135_v17 = vcombine.high %v564_v43, %v576_v29  ;;  %v20331_v54 = vld [vmem:[#allocation8 + $0x394] ss:$24 sps:$4 sm:$0xff]   ;;  %v18134_v60 = vcombine.low %v564_v43, %v576_v29  ;;  %v20329_v36 = vld [vmem:[#allocation8 + $0x390] ss:$24 sps:$4 sm:$0xff]   ;;  %v20344_v43 = vld [vmem:[#allocation8 + $0x480] ss:$24 sps:$4 sm:$0xff]  }
 0x39c   :  { %7815 = vmatpush1.bf16.msra.mxu1 %v18014_v49  ;;  %16118 = vmatpush1.bf16.msra.mxu0 %v20314_v63  ;;  %v588_v13 = vld [vmem:[#allocation5 + $0xf28] sm:$0xff] }
 0x39d   :  { %7816 = vmatprep.subr.bf16.mxu1 %v18039_v51  ;;  %16119 = vmatprep.subr.bf16.mxu0 %v20319_v32  ;;  %v600_v12 = vld [vmem:[#allocation5 + $0xf88] sm:$0xff] }
 0x39e   :  { %v18159_v11 = vcombine.high %v588_v13, %v600_v12  ;;  %v612_v40 = vld [vmem:[#allocation5 + $0xfe8] sm:$0xff]  ;;  %v18158_v23 = vcombine.low %v588_v13, %v600_v12 }
 0x39f   :  { %v624_v24 = vld [vmem:[#allocation5 + $0x1048] sm:$0xff] }
 0x3a0   :  { %7817 = vmatpush1.bf16.msra.mxu1 %v18038_v27  ;;  %16120 = vmatpush1.bf16.msra.mxu0 %v20317_v50  ;;  %v18183_v49 = vcombine.high %v612_v40, %v624_v24  ;;  %v20337_v56 = vld [vmem:[#allocation8 + $0x3f4] ss:$24 sps:$4 sm:$0xff]   ;;  %v18182_v32 = vcombine.low %v612_v40, %v624_v24  ;;  %v20335_v10 = vld [vmem:[#allocation8 + $0x3f0] ss:$24 sps:$4 sm:$0xff]   ;;  %v20340_v27 = vld [vmem:[#allocation8 + $0x424] ss:$24 sps:$4 sm:$0xff]  }
 0x3a1   :  { %7829 = vmatprep.subr.bf16.mxu1 %v18063_v41  ;;  %16132 = vmatprep.subr.bf16.mxu0 %v20322_v21  ;;  %v636_v63 = vld [vmem:[#allocation5 + $0x10a8] sm:$0xff]  ;;  %v20350_v40 = vld [vmem:[#allocation8 + $0x4e0] ss:$24 sps:$4 sm:$0xff]  }
 0x3a2   :  { %v648_v51 = vld [vmem:[#allocation5 + $0x1108] sm:$0xff] }
 0x3a3   :  { %7819 = vmatmul.mubr.bf16.vlgmr.msra.gmra.mrb[16].mxu1 %v22353_v15  ;;  %16122 = vmatmul.mubr.bf16.vlgmr.msra.gmra.mrb[16].mxu0 %v22542_v38  ;;  %v18207_v4 = vcombine.high %v636_v63, %v648_v51  ;;  %v660_v50 = vld [vmem:[#allocation5 + $0x1168] sm:$0xff]  ;;  %v18206_v21 = vcombine.low %v636_v63, %v648_v51 }
 0x3a4   :  { %7830 = vmatpush1.bf16.msra.mxu1 %v18062_v53  ;;  %16133 = vmatpush1.bf16.msra.mxu0 %v20320_v33  ;;  %v672_v41 = vld [vmem:[#allocation5 + $0x11c8] sm:$0xff] }
 0x3a5   :  { %16164 = vmatprep.mubr.bf16.mxu0 %v22733_v22  ;;  %7831 = vmatprep.subr.bf16.mxu1 %v18087_v14  ;;  %v18231_v34 = vcombine.high %v660_v50, %v672_v41  ;;  %v20343_v53 = vld [vmem:[#allocation8 + $0x454] ss:$24 sps:$4 sm:$0xff]   ;;  %v20341_v35 = vld [vmem:[#allocation8 + $0x450] ss:$24 sps:$4 sm:$0xff]  }
 0x3a6   :  { %16134 = vmatprep.subr.bf16.mxu0 %v20325_v5  ;;  %7861 = vmatprep.mubr.bf16.mxu1 %v22355_v25  ;;  %v684_v33 = vld [vmem:[#allocation5 + $0x1228] sm:$0xff]  ;;  %v18230_v5 = vcombine.low %v660_v50, %v672_v41  ;;  %v20356_v50 = vld [vmem:[#allocation8 + $0x540] ss:$24 sps:$4 sm:$0xff]  }
 0x3a7   :  { %v696_v14 = vld [vmem:[#allocation5 + $0x1288] sm:$0xff] }
 0x3a8   :  { %7832 = vmatpush1.bf16.msra.mxu1 %v18086_v62  ;;  %16135 = vmatpush1.bf16.msra.mxu0 %v20323_v3  ;;  %v18255_v52 = vcombine.high %v684_v33, %v696_v14  ;;  %v20346_v62 = vld [vmem:[#allocation8 + $0x484] ss:$24 sps:$4 sm:$0xff]   ;;  %v708_v3 = vld [vmem:[#allocation5 + $0x12e8] sm:$0xff] }
 0x3a9   :  { %7833 = vmatprep.subr.bf16.mxu1 %v18111_v20  ;;  %16136 = vmatprep.subr.bf16.mxu0 %v20328_v57  ;;  %v720_v20 = vld [vmem:[#allocation5 + $0x1348] sm:$0xff]  ;;  %v18254_v57 = vcombine.low %v684_v33, %v696_v14 }
 0x3aa   :  { %v18279_v29 = vcombine.high %v708_v3, %v720_v20  ;;  %v20347_v13 = vld [vmem:[#allocation8 + $0x4b0] ss:$24 sps:$4 sm:$0xff]  }
 0x3ab   :  { %v20353_v63 = vld [vmem:[#allocation8 + $0x510] ss:$24 sps:$4 sm:$0xff]  }
 0x3ac   :  { %7834 = vmatpush1.bf16.msra.mxu1 %v18110_v31  ;;  %16137 = vmatpush1.bf16.msra.mxu0 %v20326_v6  ;;  %v20349_v31 = vld [vmem:[#allocation8 + $0x4b4] ss:$24 sps:$4 sm:$0xff]   ;;  %v20359_v33 = vld [vmem:[#allocation8 + $0x570] ss:$24 sps:$4 sm:$0xff]  }
 0x3ad   :  { %7835 = vmatprep.subr.bf16.mxu1 %v18135_v17  ;;  %16138 = vmatprep.subr.bf16.mxu0 %v20331_v54  ;;  %v732_v6 = vld [vmem:[#allocation5 + $0x13a8] sm:$0xff]  ;;  %v18278_v54 = vcombine.low %v708_v3, %v720_v20  ;;  %v20362_v3 = vld [vmem:[#allocation8 + $0x5a0] ss:$24 sps:$4 sm:$0xff]  }
 0x3ae   :  { %v744_v17 = vld [vmem:[#allocation5 + $0x1408] sm:$0xff] }
 0x3af   :  { %v18303_v12 = vcombine.high %v732_v6, %v744_v17 }
 0x3b0   :  { %7836 = vmatpush1.bf16.msra.mxu1 %v18134_v60  ;;  %16139 = vmatpush1.bf16.msra.mxu0 %v20329_v36  ;;  %v20352_v60 = vld [vmem:[#allocation8 + $0x4e4] ss:$24 sps:$4 sm:$0xff]   ;;  %v756_v36 = vld [vmem:[#allocation5 + $0x1468] sm:$0xff] }
 0x3b1   :  { %7837 = vmatprep.subr.bf16.mxu1 %v18159_v11  ;;  %16140 = vmatprep.subr.bf16.mxu0 %v20334_v0  ;;  %v768_v11 = vld [vmem:[#allocation5 + $0x14c8] sm:$0xff]  ;;  %v18302_v0 = vcombine.low %v732_v6, %v744_v17 }
 0x3b2   :  { %v18327_v24 = vcombine.high %v756_v36, %v768_v11  ;;  %v20365_v6 = vld [vmem:[#allocation8 + $0x5d0] ss:$24 sps:$4 sm:$0xff]  }
 0x3b4   :  { %7838 = vmatpush1.bf16.msra.mxu1 %v18158_v23  ;;  %16141 = vmatpush1.bf16.msra.mxu0 %v20332_v45  ;;  %v20355_v23 = vld [vmem:[#allocation8 + $0x514] ss:$24 sps:$4 sm:$0xff]  }
 0x3b5   :  { %7839 = vmatprep.subr.bf16.mxu1 %v18183_v49  ;;  %16142 = vmatprep.subr.bf16.mxu0 %v20337_v56  ;;  %v780_v45 = vld [vmem:[#allocation5 + $0x1528] sm:$0xff]  ;;  %v18326_v56 = vcombine.low %v756_v36, %v768_v11  ;;  %v20368_v36 = vld [vmem:[#allocation8 + $0x600] ss:$24 sps:$4 sm:$0xff]  }
 0x3b6   :  { %v792_v49 = vld [vmem:[#allocation5 + $0x1588] sm:$0xff] }
 0x3b7   :  { %v18351_v51 = vcombine.high %v780_v45, %v792_v49 }
 0x3b8   :  { %7840 = vmatpush1.bf16.msra.mxu1 %v18182_v32  ;;  %16143 = vmatpush1.bf16.msra.mxu0 %v20335_v10  ;;  %v20358_v32 = vld [vmem:[#allocation8 + $0x544] ss:$24 sps:$4 sm:$0xff]   ;;  %v804_v10 = vld [vmem:[#allocation5 + $0x15e8] sm:$0xff] }
 0x3b9   :  { %7841 = vmatprep.subr.bf16.mxu1 %v18207_v4  ;;  %16144 = vmatprep.subr.bf16.mxu0 %v20340_v27  ;;  %v816_v4 = vld [vmem:[#allocation5 + $0x1648] sm:$0xff]  ;;  %v18350_v27 = vcombine.low %v780_v45, %v792_v49 }
 0x3ba   :  { %v18375_v41 = vcombine.high %v804_v10, %v816_v4  ;;  %v20371_v45 = vld [vmem:[#allocation8 + $0x630] ss:$24 sps:$4 sm:$0xff]  }
 0x3bc   :  { %7842 = vmatpush1.bf16.msra.mxu1 %v18206_v21  ;;  %16145 = vmatpush1.bf16.msra.mxu0 %v20338_v1  ;;  %v20361_v21 = vld [vmem:[#allocation8 + $0x574] ss:$24 sps:$4 sm:$0xff]  }
 0x3bd   :  { %7843 = vmatprep.subr.bf16.mxu1 %v18231_v34  ;;  %16146 = vmatprep.subr.bf16.mxu0 %v20343_v53  ;;  %v828_v1 = vld [vmem:[#allocation5 + $0x16a8] sm:$0xff]  ;;  %v18374_v53 = vcombine.low %v804_v10, %v816_v4  ;;  %v20374_v10 = vld [vmem:[#allocation8 + $0x660] ss:$24 sps:$4 sm:$0xff]  }
 0x3be   :  { %v840_v34 = vld [vmem:[#allocation5 + $0x1708] sm:$0xff] }
 0x3bf   :  { %v18399_v14 = vcombine.high %v828_v1, %v840_v34 }
 0x3c0   :  { %7844 = vmatpush1.bf16.msra.mxu1 %v18230_v5  ;;  %16147 = vmatpush1.bf16.msra.mxu0 %v20341_v35  ;;  %v20364_v5 = vld [vmem:[#allocation8 + $0x5a4] ss:$24 sps:$4 sm:$0xff]   ;;  %v852_v35 = vld [vmem:[#allocation5 + $0x1768] sm:$0xff] }
 0x3c1   :  { %7845 = vmatprep.subr.bf16.mxu1 %v18255_v52  ;;  %16148 = vmatprep.subr.bf16.mxu0 %v20346_v62  ;;  %v864_v52 = vld [vmem:[#allocation5 + $0x17c8] sm:$0xff]  ;;  %v18398_v62 = vcombine.low %v828_v1, %v840_v34 }
 0x3c2   :  { %v18423_v20 = vcombine.high %v852_v35, %v864_v52  ;;  %v20377_v1 = vld [vmem:[#allocation8 + $0x690] ss:$24 sps:$4 sm:$0xff]  }
 0x3c4   :  { %7846 = vmatpush1.bf16.msra.mxu1 %v18254_v57  ;;  %16149 = vmatpush1.bf16.msra.mxu0 %v20344_v43  ;;  %v20367_v57 = vld [vmem:[#allocation8 + $0x5d4] ss:$24 sps:$4 sm:$0xff]  }
 0x3c5   :  { %7847 = vmatprep.subr.bf16.mxu1 %v18279_v29  ;;  %16150 = vmatprep.subr.bf16.mxu0 %v20349_v31  ;;  %v876_v43 = vld [vmem:[#allocation5 + $0x1828] sm:$0xff]  ;;  %v18422_v31 = vcombine.low %v852_v35, %v864_v52  ;;  %v20380_v35 = vld [vmem:[#allocation8 + $0x6c0] ss:$24 sps:$4 sm:$0xff]  }
 0x3c6   :  { %v888_v29 = vld [vmem:[#allocation5 + $0x1888] sm:$0xff] }
 0x3c7   :  { %v18447_v17 = vcombine.high %v876_v43, %v888_v29 }
 0x3c8   :  { %7848 = vmatpush1.bf16.msra.mxu1 %v18278_v54  ;;  %16151 = vmatpush1.bf16.msra.mxu0 %v20347_v13  ;;  %v20370_v54 = vld [vmem:[#allocation8 + $0x604] ss:$24 sps:$4 sm:$0xff]   ;;  %v900_v13 = vld [vmem:[#allocation5 + $0x18e8] sm:$0xff] }
 0x3c9   :  { %7849 = vmatprep.subr.bf16.mxu1 %v18303_v12  ;;  %16152 = vmatprep.subr.bf16.mxu0 %v20352_v60  ;;  %v912_v12 = vld [vmem:[#allocation5 + $0x1948] sm:$0xff]  ;;  %v18446_v60 = vcombine.low %v876_v43, %v888_v29 }
 0x3ca   :  { %v18471_v11 = vcombine.high %v900_v13, %v912_v12  ;;  %v20383_v43 = vld [vmem:[#allocation8 + $0x6f0] ss:$24 sps:$4 sm:$0xff]  }
 0x3cc   :  { %7850 = vmatpush1.bf16.msra.mxu1 %v18302_v0  ;;  %16153 = vmatpush1.bf16.msra.mxu0 %v20350_v40  ;;  %v20373_v0 = vld [vmem:[#allocation8 + $0x634] ss:$24 sps:$4 sm:$0xff]  }
 0x3cd   :  { %7851 = vmatprep.subr.bf16.mxu1 %v18327_v24  ;;  %16154 = vmatprep.subr.bf16.mxu0 %v20355_v23  ;;  %v924_v40 = vld [vmem:[#allocation5 + $0x19a8] sm:$0xff]  ;;  %v18470_v23 = vcombine.low %v900_v13, %v912_v12  ;;  %v20386_v13 = vld [vmem:[#allocation8 + $0x720] ss:$24 sps:$4 sm:$0xff]  }
 0x3ce   :  { %v936_v24 = vld [vmem:[#allocation5 + $0x1a08] sm:$0xff] }
 0x3cf   :  { %v18495_v49 = vcombine.high %v924_v40, %v936_v24 }
 0x3d0   :  { %7852 = vmatpush1.bf16.msra.mxu1 %v18326_v56  ;;  %16155 = vmatpush1.bf16.msra.mxu0 %v20353_v63  ;;  %v20376_v56 = vld [vmem:[#allocation8 + $0x664] ss:$24 sps:$4 sm:$0xff]   ;;  %v948_v63 = vld [vmem:[#allocation5 + $0x1a68] sm:$0xff] }
 0x3d1   :  { %7853 = vmatprep.subr.bf16.mxu1 %v18351_v51  ;;  %16156 = vmatprep.subr.bf16.mxu0 %v20358_v32  ;;  %v960_v51 = vld [vmem:[#allocation5 + $0x1ac8] sm:$0xff]  ;;  %v18494_v32 = vcombine.low %v924_v40, %v936_v24 }
 0x3d2   :  { %v18519_v4 = vcombine.high %v948_v63, %v960_v51  ;;  %v20389_v40 = vld [vmem:[#allocation8 + $0x750] ss:$24 sps:$4 sm:$0xff]  }
 0x3d4   :  { %7854 = vmatpush1.bf16.msra.mxu1 %v18350_v27  ;;  %16157 = vmatpush1.bf16.msra.mxu0 %v20356_v50  ;;  %v20379_v27 = vld [vmem:[#allocation8 + $0x694] ss:$24 sps:$4 sm:$0xff]  }
 0x3d5   :  { %7855 = vmatprep.subr.bf16.mxu1 %v18375_v41  ;;  %16158 = vmatprep.subr.bf16.mxu0 %v20361_v21  ;;  %v972_v50 = vld [vmem:[#allocation5 + $0x1b28] sm:$0xff]  ;;  %v18518_v21 = vcombine.low %v948_v63, %v960_v51  ;;  %v20392_v63 = vld [vmem:[#allocation8 + $0x780] ss:$24 sps:$4 sm:$0xff]  }
 0x3d6   :  { %v984_v41 = vld [vmem:[#allocation5 + $0x1b88] sm:$0xff] }
 0x3d7   :  { %v18543_v34 = vcombine.high %v972_v50, %v984_v41 }
 0x3d8   :  { %7856 = vmatpush1.bf16.msra.mxu1 %v18374_v53  ;;  %16159 = vmatpush1.bf16.msra.mxu0 %v20359_v33  ;;  %v20382_v53 = vld [vmem:[#allocation8 + $0x6c4] ss:$24 sps:$4 sm:$0xff]   ;;  %v996_v33 = vld [vmem:[#allocation5 + $0x1be8] sm:$0xff] }
 0x3d9   :  { %7857 = vmatprep.subr.bf16.mxu1 %v18399_v14  ;;  %16160 = vmatprep.subr.bf16.mxu0 %v20364_v5  ;;  %v1008_v14 = vld [vmem:[#allocation5 + $0x1c48] sm:$0xff]  ;;  %v18542_v5 = vcombine.low %v972_v50, %v984_v41 }
 0x3da   :  { %v18567_v52 = vcombine.high %v996_v33, %v1008_v14  ;;  %v20395_v50 = vld [vmem:[#allocation8 + $0x7b0] ss:$24 sps:$4 sm:$0xff]  }
 0x3dc   :  { %7858 = vmatpush1.bf16.msra.mxu1 %v18398_v62  ;;  %16161 = vmatpush1.bf16.msra.mxu0 %v20362_v3  ;;  %v20385_v62 = vld [vmem:[#allocation8 + $0x6f4] ss:$24 sps:$4 sm:$0xff]  }
 0x3dd   :  { %7859 = vmatprep.subr.bf16.mxu1 %v18423_v20  ;;  %16162 = vmatprep.subr.bf16.mxu0 %v20367_v57  ;;  %v1020_v3 = vld [vmem:[#allocation5 + $0x1ca8] sm:$0xff]  ;;  %v18566_v57 = vcombine.low %v996_v33, %v1008_v14  ;;  %v20398_v33 = vld [vmem:[#allocation8 + $0x7e0] ss:$24 sps:$4 sm:$0xff]  }
 0x3de   :  { %v1032_v20 = vld [vmem:[#allocation5 + $0x1d08] sm:$0xff] }
 0x3df   :  { %v18591_v29 = vcombine.high %v1020_v3, %v1032_v20 }
 0x3e0   :  { %7860 = vmatpush1.bf16.msra.mxu1 %v18422_v31  ;;  %16163 = vmatpush1.bf16.msra.mxu0 %v20365_v6  ;;  %v20388_v31 = vld [vmem:[#allocation8 + $0x724] ss:$24 sps:$4 sm:$0xff]   ;;  %v1044_v6 = vld [vmem:[#allocation5 + $0x1d68] sm:$0xff] }
 0x3e1   :  { %7872 = vmatprep.subr.bf16.mxu1 %v18447_v17  ;;  %16175 = vmatprep.subr.bf16.mxu0 %v20370_v54  ;;  %v1056_v17 = vld [vmem:[#allocation5 + $0x1dc8] sm:$0xff]  ;;  %v18590_v54 = vcombine.low %v1020_v3, %v1032_v20 }
 0x3e2   :  { %v18615_v12 = vcombine.high %v1044_v6, %v1056_v17  ;;  %v20401_v3 = vld [vmem:[#allocation8 + $0x810] ss:$24 sps:$4 sm:$0xff]  }
 0x3e3   :  { %7862 = vmatmul.mubr.bf16.vlgmr.msra.gmra.mrb[16].mxu1 %v22361_v30  ;;  %16165 = vmatmul.mubr.bf16.vlgmr.msra.gmra.mrb[16].mxu0 %v22728_v42 }
 0x3e4   :  { %7873 = vmatpush1.bf16.msra.mxu1 %v18446_v60  ;;  %16176 = vmatpush1.bf16.msra.mxu0 %v20368_v36  ;;  %v20391_v60 = vld [vmem:[#allocation8 + $0x754] ss:$24 sps:$4 sm:$0xff]  }
 0x3e5   :  { %16207 = vmatprep.mubr.bf16.mxu0 %v22837_v28  ;;  %7874 = vmatprep.subr.bf16.mxu1 %v18471_v11  ;;  %v1068_v36 = vld [vmem:[#allocation5 + $0x1e28] sm:$0xff] }
 0x3e6   :  { %16177 = vmatprep.subr.bf16.mxu0 %v20373_v0  ;;  %7904 = vmatprep.mubr.bf16.mxu1 %v22363_v39  ;;  %v1080_v11 = vld [vmem:[#allocation5 + $0x1e88] sm:$0xff]  ;;  %v18614_v0 = vcombine.low %v1044_v6, %v1056_v17  ;;  %v20404_v6 = vld [vmem:[#allocation8 + $0x840] ss:$24 sps:$4 sm:$0xff]  }
 0x3e7   :  { %v18639_v24 = vcombine.high %v1068_v36, %v1080_v11 }
 0x3e8   :  { %7875 = vmatpush1.bf16.msra.mxu1 %v18470_v23  ;;  %16178 = vmatpush1.bf16.msra.mxu0 %v20371_v45  ;;  %v20394_v23 = vld [vmem:[#allocation8 + $0x784] ss:$24 sps:$4 sm:$0xff]   ;;  %v1092_v45 = vld [vmem:[#allocation5 + $0x1ee8] sm:$0xff] }
 0x3e9   :  { %7876 = vmatprep.subr.bf16.mxu1 %v18495_v49  ;;  %16179 = vmatprep.subr.bf16.mxu0 %v20376_v56  ;;  %v1104_v49 = vld [vmem:[#allocation5 + $0x1f48] sm:$0xff]  ;;  %v18638_v56 = vcombine.low %v1068_v36, %v1080_v11 }
 0x3ea   :  { %v18663_v51 = vcombine.high %v1092_v45, %v1104_v49  ;;  %v20407_v36 = vld [vmem:[#allocation8 + $0x870] ss:$24 sps:$4 sm:$0xff]  }
 0x3ec   :  { %7877 = vmatpush1.bf16.msra.mxu1 %v18494_v32  ;;  %16180 = vmatpush1.bf16.msra.mxu0 %v20374_v10  ;;  %v20397_v32 = vld [vmem:[#allocation8 + $0x7b4] ss:$24 sps:$4 sm:$0xff]  }
 0x3ed   :  { %7878 = vmatprep.subr.bf16.mxu1 %v18519_v4  ;;  %16181 = vmatprep.subr.bf16.mxu0 %v20379_v27  ;;  %v1116_v10 = vld [vmem:[#allocation5 + $0x1fa8] sm:$0xff]  ;;  %v18662_v27 = vcombine.low %v1092_v45, %v1104_v49  ;;  %v20410_v45 = vld [vmem:[#allocation8 + $0x8a0] ss:$24 sps:$4 sm:$0xff]  }
 0x3ee   :  { %v1128_v4 = vld [vmem:[#allocation5 + $0x2008] sm:$0xff] }
 0x3ef   :  { %v18687_v41 = vcombine.high %v1116_v10, %v1128_v4 }
 0x3f0   :  { %7879 = vmatpush1.bf16.msra.mxu1 %v18518_v21  ;;  %16182 = vmatpush1.bf16.msra.mxu0 %v20377_v1  ;;  %v20400_v21 = vld [vmem:[#allocation8 + $0x7e4] ss:$24 sps:$4 sm:$0xff]   ;;  %v1140_v1 = vld [vmem:[#allocation5 + $0x2068] sm:$0xff] }
 0x3f1   :  { %7880 = vmatprep.subr.bf16.mxu1 %v18543_v34  ;;  %16183 = vmatprep.subr.bf16.mxu0 %v20382_v53  ;;  %v1152_v34 = vld [vmem:[#allocation5 + $0x20c8] sm:$0xff]  ;;  %v18686_v53 = vcombine.low %v1116_v10, %v1128_v4 }
 0x3f2   :  { %v18711_v14 = vcombine.high %v1140_v1, %v1152_v34  ;;  %v20413_v10 = vld [vmem:[#allocation8 + $0x8d0] ss:$24 sps:$4 sm:$0xff]  }
 0x3f4   :  { %7881 = vmatpush1.bf16.msra.mxu1 %v18542_v5  ;;  %16184 = vmatpush1.bf16.msra.mxu0 %v20380_v35  ;;  %v20403_v5 = vld [vmem:[#allocation8 + $0x814] ss:$24 sps:$4 sm:$0xff]  }
 0x3f5   :  { %7882 = vmatprep.subr.bf16.mxu1 %v18567_v52  ;;  %16185 = vmatprep.subr.bf16.mxu0 %v20385_v62  ;;  %v1164_v35 = vld [vmem:[#allocation5 + $0x2128] sm:$0xff]  ;;  %v18710_v62 = vcombine.low %v1140_v1, %v1152_v34  ;;  %v20416_v1 = vld [vmem:[#allocation8 + $0x900] ss:$24 sps:$4 sm:$0xff]  }
 0x3f6   :  { %v1176_v52 = vld [vmem:[#allocation5 + $0x2188] sm:$0xff] }
 0x3f7   :  { %v18735_v20 = vcombine.high %v1164_v35, %v1176_v52 }
 0x3f8   :  { %7883 = vmatpush1.bf16.msra.mxu1 %v18566_v57  ;;  %16186 = vmatpush1.bf16.msra.mxu0 %v20383_v43  ;;  %v20406_v57 = vld [vmem:[#allocation8 + $0x844] ss:$24 sps:$4 sm:$0xff]   ;;  %v1188_v43 = vld [vmem:[#allocation5 + $0x21e8] sm:$0xff] }
 0x3f9   :  { %7884 = vmatprep.subr.bf16.mxu1 %v18591_v29  ;;  %16187 = vmatprep.subr.bf16.mxu0 %v20388_v31  ;;  %v1200_v29 = vld [vmem:[#allocation5 + $0x2248] sm:$0xff]  ;;  %v18734_v31 = vcombine.low %v1164_v35, %v1176_v52 }
 0x3fa   :  { %v18759_v17 = vcombine.high %v1188_v43, %v1200_v29  ;;  %v20419_v35 = vld [vmem:[#allocation8 + $0x930] ss:$24 sps:$4 sm:$0xff]  }
 0x3fc   :  { %7885 = vmatpush1.bf16.msra.mxu1 %v18590_v54  ;;  %16188 = vmatpush1.bf16.msra.mxu0 %v20386_v13  ;;  %v20409_v54 = vld [vmem:[#allocation8 + $0x874] ss:$24 sps:$4 sm:$0xff]  }
 0x3fd   :  { %7886 = vmatprep.subr.bf16.mxu1 %v18615_v12  ;;  %16189 = vmatprep.subr.bf16.mxu0 %v20391_v60  ;;  %v1212_v13 = vld [vmem:[#allocation5 + $0x22a8] sm:$0xff]  ;;  %v18758_v60 = vcombine.low %v1188_v43, %v1200_v29  ;;  %v20422_v43 = vld [vmem:[#allocation8 + $0x960] ss:$24 sps:$4 sm:$0xff]  }
 0x3fe   :  { %v1224_v12 = vld [vmem:[#allocation5 + $0x2308] sm:$0xff] }
 0x3ff   :  { %v18783_v11 = vcombine.high %v1212_v13, %v1224_v12 }
 0x400   :  { %7887 = vmatpush1.bf16.msra.mxu1 %v18614_v0  ;;  %16190 = vmatpush1.bf16.msra.mxu0 %v20389_v40  ;;  %v20412_v0 = vld [vmem:[#allocation8 + $0x8a4] ss:$24 sps:$4 sm:$0xff]   ;;  %v1236_v40 = vld [vmem:[#allocation5 + $0x2368] sm:$0xff] }
 0x401   :  { %7888 = vmatprep.subr.bf16.mxu1 %v18639_v24  ;;  %16191 = vmatprep.subr.bf16.mxu0 %v20394_v23  ;;  %v1248_v24 = vld [vmem:[#allocation5 + $0x23c8] sm:$0xff]  ;;  %v18782_v23 = vcombine.low %v1212_v13, %v1224_v12 }
 0x402   :  { %v18807_v49 = vcombine.high %v1236_v40, %v1248_v24  ;;  %v20425_v13 = vld [vmem:[#allocation8 + $0x990] ss:$24 sps:$4 sm:$0xff]  }
 0x404   :  { %7889 = vmatpush1.bf16.msra.mxu1 %v18638_v56  ;;  %16192 = vmatpush1.bf16.msra.mxu0 %v20392_v63  ;;  %v20415_v56 = vld [vmem:[#allocation8 + $0x8d4] ss:$24 sps:$4 sm:$0xff]   ;;  %v110_v63 = vld [vmem:[#allocation5 + $0x38] sm:$0xff] }
 0x405   :  { %7890 = vmatprep.subr.bf16.mxu1 %v18663_v51  ;;  %16193 = vmatprep.subr.bf16.mxu0 %v20397_v32  ;;  %v122_v51 = vld [vmem:[#allocation5 + $0x98] sm:$0xff]  ;;  %v18806_v32 = vcombine.low %v1236_v40, %v1248_v24  ;;  %v22858_v24 = vsub.s32 7, %v22387_v48 }
 0x406   :  { %v17683_v4 = vcombine.high %v110_v63, %v122_v51 }
 0x408   :  { %7891 = vmatpush1.bf16.msra.mxu1 %v18662_v27  ;;  %16194 = vmatpush1.bf16.msra.mxu0 %v20395_v50  ;;  %v20418_v27 = vld [vmem:[#allocation8 + $0x904] ss:$24 sps:$4 sm:$0xff]  }
 0x409   :  { %7892 = vmatprep.subr.bf16.mxu1 %v18687_v41  ;;  %16195 = vmatprep.subr.bf16.mxu0 %v20400_v21  ;;  %v134_v50 = vld [vmem:[#allocation5 + $0xf8] sm:$0xff]  ;;  %v17682_v21 = vcombine.low %v110_v63, %v122_v51  ;;  %v22099_v51 = vld [vmem:[#allocation7] sm:$0xff] }
 0x40a   :  { %v146_v41 = vld [vmem:[#allocation5 + $0x158] sm:$0xff] }
 0x40b   :  { %v17707_v34 = vcombine.high %v134_v50, %v146_v41  ;;  %v266_v63 = vld [vmem:[#allocation5 + $0x518] sm:$0xff] }
 0x40c   :  { %7893 = vmatpush1.bf16.msra.mxu1 %v18686_v53  ;;  %16196 = vmatpush1.bf16.msra.mxu0 %v20398_v33  ;;  %v20421_v53 = vld [vmem:[#allocation8 + $0x934] ss:$24 sps:$4 sm:$0xff]   ;;  %v158_v33 = vld [vmem:[#allocation5 + $0x1b8] sm:$0xff] }
 0x40d   :  { %7894 = vmatprep.subr.bf16.mxu1 %v18711_v14  ;;  %16197 = vmatprep.subr.bf16.mxu0 %v20403_v5  ;;  %v170_v14 = vld [vmem:[#allocation5 + $0x218] sm:$0xff]  ;;  %v17706_v5 = vcombine.low %v134_v50, %v146_v41 }
 0x40e   :  { %v17731_v52 = vcombine.high %v158_v33, %v170_v14 }
 0x410   :  { %7895 = vmatpush1.bf16.msra.mxu1 %v18710_v62  ;;  %16198 = vmatpush1.bf16.msra.mxu0 %v20401_v3  ;;  %v20424_v62 = vld [vmem:[#allocation8 + $0x964] ss:$24 sps:$4 sm:$0xff]  }
 0x411   :  { %7896 = vmatprep.subr.bf16.mxu1 %v18735_v20  ;;  %16199 = vmatprep.subr.bf16.mxu0 %v20406_v57  ;;  %v182_v3 = vld [vmem:[#allocation5 + $0x278] sm:$0xff]  ;;  %v17730_v57 = vcombine.low %v158_v33, %v170_v14 }
 0x412   :  { %v194_v20 = vld [vmem:[#allocation5 + $0x2d8] sm:$0xff] }
 0x413   :  { %v17755_v29 = vcombine.high %v182_v3, %v194_v20  ;;  %v20436_v33 = vld [vmem:[#allocation8 + $0xa24] ss:$24 sps:$4 sm:$0xff]  }
 0x414   :  { %7897 = vmatpush1.bf16.msra.mxu1 %v18734_v31  ;;  %16200 = vmatpush1.bf16.msra.mxu0 %v20404_v6  ;;  %v20427_v31 = vld [vmem:[#allocation8 + $0x994] ss:$24 sps:$4 sm:$0xff]   ;;  %v206_v6 = vld [vmem:[#allocation5 + $0x338] sm:$0xff] }
 0x415   :  { %7898 = vmatprep.subr.bf16.mxu1 %v18759_v17  ;;  %16201 = vmatprep.subr.bf16.mxu0 %v20409_v54  ;;  %v218_v17 = vld [vmem:[#allocation5 + $0x398] sm:$0xff]  ;;  %v17754_v54 = vcombine.low %v182_v3, %v194_v20 }
 0x416   :  { %v17779_v12 = vcombine.high %v206_v6, %v218_v17  ;;  %v17778_v40 = vcombine.low %v206_v6, %v218_v17 }
 0x418   :  { %7899 = vmatpush1.bf16.msra.mxu1 %v18758_v60  ;;  %16202 = vmatpush1.bf16.msra.mxu0 %v20407_v36  ;;  %v20430_v60 = vld [vmem:[#allocation8 + $0x9c4] ss:$24 sps:$4 sm:$0xff]  }
 0x419   :  { %7900 = vmatprep.subr.bf16.mxu1 %v18783_v11  ;;  %16203 = vmatprep.subr.bf16.mxu0 %v20412_v0  ;;  %v230_v36 = vld [vmem:[#allocation5 + $0x3f8] sm:$0xff]  ;;  %v22855_v0 = vsub.s32 6, %v22387_v48  ;;  %v20431_v48 = vld [vmem:[#allocation8 + $0x9f0] ss:$24 sps:$4 sm:$0xff]  }
 0x41a   :  { %v242_v11 = vld [vmem:[#allocation5 + $0x458] sm:$0xff] }
 0x41c   :  { %7901 = vmatpush1.bf16.msra.mxu1 %v18782_v23  ;;  %16204 = vmatpush1.bf16.msra.mxu0 %v20410_v45  ;;  %v20428_v23 = vld [vmem:[#allocation8 + $0x9c0] ss:$24 sps:$4 sm:$0xff]   ;;  %v17803_v45 = vcombine.high %v230_v36, %v242_v11 }
 0x41d   :  { %7902 = vmatprep.subr.bf16.mxu1 %v18807_v49  ;;  %16205 = vmatprep.subr.bf16.mxu0 %v20415_v56  ;;  %v20433_v49 = vld [vmem:[#allocation8 + $0x9f4] ss:$24 sps:$4 sm:$0xff]   ;;  %v254_v56 = vld [vmem:[#allocation5 + $0x4b8] sm:$0xff] }
 0x41e   :  { %v17827_v41 = vcombine.high %v254_v56, %v266_v63  ;;  %v17826_v3 = vcombine.low %v254_v56, %v266_v63 }
 0x420   :  { %7903 = vmatpush1.bf16.msra.mxu1 %v18806_v32  ;;  %16206 = vmatpush1.bf16.msra.mxu0 %v20413_v10  ;;  %v1288_v32 = vrot.slane %v22099_v51, %v22855_v0  ;;  %v1292_v10 = vrot.slane %v22099_v51, %v22858_v24 }
 0x421   :  { %8044 = vmatprep.subr.bf16.mxu1 %v17683_v4  ;;  %16218 = vmatprep.subr.bf16.mxu0 %v20418_v27  ;;  %v17802_v4 = vcombine.low %v230_v36, %v242_v11  ;;  %v22100_v27 = vld [vmem:[#allocation7 + $0x10] sm:$0xff] }
 0x422   :  { %v1344_v50 = vrot.slane %v22100_v27, %v22578_v26 }
 0x423   :  { %7905 = vmatmul.mubr.bf16.vlgmr.msra.gmra.mrb[16].mxu1 %v22369_v44  ;;  %16208 = vmatmul.mubr.bf16.vlgmr.msra.gmra.mrb[16].mxu0 %v22834_v16 }
 0x424   :  { %8045 = vmatpush1.bf16.msra.mxu1 %v17682_v21  ;;  %16219 = vmatpush1.bf16.msra.mxu0 %v20416_v1  ;;  %v278_v21 = vld [vmem:[#allocation5 + $0x578] sm:$0xff] }
 0x425   :  { %8046 = vmatprep.subr.bf16.mxu1 %v17707_v34  ;;  %16220 = vmatprep.subr.bf16.mxu0 %v20421_v53  ;;  %v290_v1 = vld [vmem:[#allocation5 + $0x5d8] sm:$0xff]  ;;  %v1348_v34 = vrot.slane %v22100_v27, %v22589_v46 }
 0x426   :  { %8076 = vmatprep.mubr.bf16.mxu1 %v22349_v58  ;;  %v17851_v20 = vcombine.high %v278_v21, %v290_v1  ;;  %v17850_v63 = vcombine.low %v278_v21, %v290_v1  ;;  %v20437_v21 = vld [vmem:[#allocation8 + $0xa50] ss:$24 sps:$4 sm:$0xff]   ;;  %v326_v1 = vld [vmem:[#allocation5 + $0x6f8] sm:$0xff] }
 0x428   :  { %8047 = vmatpush1.bf16.msra.mxu1 %v17706_v5  ;;  %16221 = vmatpush1.bf16.msra.mxu0 %v20419_v35 }
 0x429   :  { %8048 = vmatprep.subr.bf16.mxu1 %v17731_v52  ;;  %16222 = vmatprep.subr.bf16.mxu0 %v20424_v62 }
 0x42c   :  { %8049 = vmatpush1.bf16.msra.mxu1 %v17730_v57  ;;  %16223 = vmatpush1.bf16.msra.mxu0 %v20422_v43  ;;  %v22868_v57 = vld [vmem:[#allocation5 + $0x638] sm:$0xff] }
 0x42d   :  { %8050 = vmatprep.subr.bf16.mxu1 %v17755_v29  ;;  %16224 = vmatprep.subr.bf16.mxu0 %v20427_v31  ;;  %v22870_v43 = vld [vmem:[#allocation5 + $0x698] sm:$0xff] }
 0x42e   :  { %v17874_v51 = vcombine.low %v22868_v57, %v22870_v43 }
 0x430   :  { %8051 = vmatpush1.bf16.msra.mxu1 %v17754_v54  ;;  %16225 = vmatpush1.bf16.msra.mxu0 %v20425_v13  ;;  %v20434_v13 = vld [vmem:[#allocation8 + $0xa20] ss:$24 sps:$4 sm:$0xff]  }
 0x431   :  { %8052 = vmatprep.subr.bf16.mxu1 %v17779_v12  ;;  %16226 = vmatprep.subr.bf16.mxu0 %v20430_v60 }
 0x434   :  { %8053 = vmatpush1.bf16.msra.mxu1 %v17778_v40  ;;  %16227 = vmatpush1.bf16.msra.mxu0 %v20428_v23  ;;  %v20439_v40 = vld [vmem:[#allocation8 + $0xa54] ss:$24 sps:$4 sm:$0xff]  }
 0x435   :  { %8054 = vmatprep.subr.bf16.mxu1 %v17803_v45  ;;  %16228 = vmatprep.subr.bf16.mxu0 %v20433_v49 }
 0x436   :  { %v7648_v53 = vpop.f32.mrb[12].mxu1  ;;  %v8551_v35 = vpop.f32.mrb[12].mxu0 }
 0x437   :  { %v22864_v14 = vadd.f32 %v7648_v53, %v1288_v32  ;;  %v7650_v5 = vpop.f32.mrb[13].mxu1  ;;  %v22872_v29 = vadd.f32 %v8551_v35, %v1344_v50  ;;  %v8553_v31 = vpop.f32.mrb[13].mxu0  ;;  %v338_v53 = vld [vmem:[#allocation5 + $0x758] sm:$0xff] }
 0x438   :  { %v22866_v52 = vadd.f32 %v7650_v5, %v1292_v10  ;;  %v7652_v62 = vpop.f32.mrb[14].mxu1  ;;  %8055 = vmatpush1.bf16.msra.mxu1 %v17802_v4  ;;  %16229 = vmatpush1.bf16.msra.mxu0 %v20431_v48  ;;  %v22878_v12 = vadd.f32 %v8553_v31, %v1348_v34  ;;  %v8555_v60 = vpop.f32.mrb[14].mxu0  ;;  %v17875_v4 = vcombine.high %v22868_v57, %v22870_v43 }
 0x439   :  { %v8695_v6 = vmul.f32 %v22864_v14, %v22864_v14  ;;  %v22876_v17 = vadd.f32 %v7652_v62, %v1288_v32  ;;  %v7654_v54 = vpop.f32.mrb[15].mxu1  ;;  %8056 = vmatprep.subr.bf16.mxu1 %v17827_v41  ;;  %16230 = vmatprep.subr.bf16.mxu0 %v20436_v33  ;;  %v8709_v23 = vmul.f32 %v22872_v29, %v22872_v29  ;;  %v8557_v45 = vpop.f32.mrb[15].mxu0 }
 0x43a   :  { %v8696_v36 = vmul.f32 %v22866_v52, %v22866_v52  ;;  %v22882_v11 = vadd.f32 %v7654_v54, %v1292_v10  ;;  %v8710_v33 = vmul.f32 %v22878_v12, %v22878_v12  ;;  %v22900_v5 = vadd.f32 %v8555_v60, %v1344_v50  ;;  %v20440_v60 = vld [vmem:[#allocation8 + $0xa80] ss:$24 sps:$4 sm:$0xff]  }
 0x43b   :  { %v8743_v49 = vmul.f32 %v22864_v14, %v8695_v6  ;;  %v8719_v56 = vmul.f32 %v22876_v17, %v22876_v17  ;;  %v8757_v27 = vmul.f32 %v22872_v29, %v8709_v23  ;;  %v22903_v43 = vadd.f32 %v8557_v45, %v1348_v34  ;;  %v20445_v45 = vld [vmem:[#allocation8 + $0xab4] ss:$24 sps:$4 sm:$0xff]  }
 0x43c   :  { %v8744_v32 = vmul.f32 %v22866_v52, %v8696_v36  ;;  %v8720_v10 = vmul.f32 %v22882_v11, %v22882_v11  ;;  %8057 = vmatpush1.bf16.msra.mxu1 %v17826_v3  ;;  %16231 = vmatpush1.bf16.msra.mxu0 %v20434_v13  ;;  %v20442_v3 = vld [vmem:[#allocation8 + $0xa84] ss:$24 sps:$4 sm:$0xff]   ;;  %v8733_v54 = vmul.f32 %v22900_v5, %v22900_v5 }
 0x43d   :  { %v8791_v48 = vmul.f32 0.044715, %v8743_v49  ;;  %v8767_v41 = vmul.f32 %v22876_v17, %v8719_v56  ;;  %8058 = vmatprep.subr.bf16.mxu1 %v17851_v20  ;;  %16232 = vmatprep.subr.bf16.mxu0 %v20439_v40  ;;  %v8805_v57 = vmul.f32 0.044715, %v8757_v27  ;;  %v8758_v20 = vmul.f32 %v22878_v12, %v8710_v33  ;;  %v350_v27 = vld [vmem:[#allocation5 + $0x7b8] sm:$0xff] }
 0x43e   :  { %v8792_v35 = vmul.f32 0.044715, %v8744_v32  ;;  %v8768_v62 = vmul.f32 %v22882_v11, %v8720_v10  ;;  %v17899_v36 = vcombine.high %v326_v1, %v338_v53  ;;  %v8781_v56 = vmul.f32 %v22900_v5, %v8733_v54  ;;  %v20448_v54 = vld [vmem:[#allocation8 + $0xae4] ss:$24 sps:$4 sm:$0xff]  }
 0x43f   :  { %v8839_v31 = vadd.f32 %v22864_v14, %v8791_v48  ;;  %v8815_v6 = vmul.f32 0.044715, %v8767_v41  ;;  %v8853_v40 = vadd.f32 %v22872_v29, %v8805_v57  ;;  %v8806_v49 = vmul.f32 0.044715, %v8758_v20  ;;  %v362_v48 = vld [vmem:[#allocation5 + $0x818] sm:$0xff] }
 0x440   :  { %v8840_v13 = vadd.f32 %v22866_v52, %v8792_v35  ;;  %v8816_v50 = vmul.f32 0.044715, %v8768_v62  ;;  %8059 = vmatpush1.bf16.msra.mxu1 %v17850_v63  ;;  %16233 = vmatpush1.bf16.msra.mxu0 %v20437_v21  ;;  %v8734_v41 = vmul.f32 %v22903_v43, %v22903_v43  ;;  %v8829_v21 = vmul.f32 0.044715, %v8781_v56 }
 0x441   :  { %v8887_v23 = vmul.f32 0.7978846, %v8839_v31  ;;  %v8863_v34 = vadd.f32 %v22876_v17, %v8815_v6  ;;  %8060 = vmatprep.subr.bf16.mxu1 %v17875_v4  ;;  %16234 = vmatprep.subr.bf16.mxu0 %v20442_v3  ;;  %v8901_v63 = vmul.f32 0.7978846, %v8853_v40  ;;  %v8854_v35 = vadd.f32 %v22878_v12, %v8806_v49  ;;  %v20443_v3 = vld [vmem:[#allocation8 + $0xab0] ss:$24 sps:$4 sm:$0xff]  }
 0x442   :  { %v8888_v32 = vmul.f32 0.7978846, %v8840_v13  ;;  %v8864_v10 = vadd.f32 %v22882_v11, %v8816_v50  ;;  %v17898_v62 = vcombine.low %v326_v1, %v338_v53  ;;  %v8782_v57 = vmul.f32 %v22903_v43, %v8734_v41  ;;  %v374_v13 = vld [vmem:[#allocation5 + $0x878] sm:$0xff] }
 0x443   :  { %22048 = vtanh.f32 %v8887_v23  ;;  %v8911_v33 = vmul.f32 0.7978846, %v8863_v34  ;;  %v17923_v31 = vcombine.high %v350_v27, %v362_v48  ;;  %v8902_v6 = vmul.f32 0.7978846, %v8854_v35  ;;  %v386_v50 = vld [vmem:[#allocation5 + $0x8d8] sm:$0xff] }
 0x444   :  { %22050 = vtanh.f32 %v8888_v32  ;;  %v8912_v4 = vmul.f32 0.7978846, %v8864_v10  ;;  %8061 = vmatpush1.bf16.msra.mxu1 %v17874_v51  ;;  %16235 = vmatpush1.bf16.msra.mxu0 %v20440_v60  ;;  %v8877_v20 = vadd.f32 %v22900_v5, %v8829_v21  ;;  %v8830_v40 = vmul.f32 0.044715, %v8782_v57  ;;  %v20446_v53 = vld [vmem:[#allocation8 + $0xae0] ss:$24 sps:$4 sm:$0xff]  }
 0x445   :  { %22052 = vtanh.f32 %v8911_v33  ;;  %8062 = vmatprep.subr.bf16.mxu1 %v17899_v36  ;;  %16236 = vmatprep.subr.bf16.mxu0 %v20445_v45  ;;  %v17922_v51 = vcombine.low %v350_v27, %v362_v48  ;;  %v17947_v60 = vcombine.high %v374_v13, %v386_v50  ;;  %v20451_v36 = vld [vmem:[#allocation8 + $0xb14] ss:$24 sps:$4 sm:$0xff]   ;;  %v398_v34 = vld [vmem:[#allocation5 + $0x938] sm:$0xff]  ;;  %v17946_v56 = vcombine.low %v374_v13, %v386_v50  ;;  %v20449_v10 = vld [vmem:[#allocation8 + $0xb10] ss:$24 sps:$4 sm:$0xff]  }
 0x446   :  { %22054 = vtanh.f32 %v8912_v4  ;;  %v8925_v23 = vmul.f32 0.7978846, %v8877_v20  ;;  %v8878_v1 = vadd.f32 %v22903_v43, %v8830_v40  ;;  %v410_v45 = vld [vmem:[#allocation5 + $0x998] sm:$0xff]  ;;  %v8949_v20 = vmul.f32 0.5, %v22872_v29 }
 0x447   :  { %22056 = vtanh.f32 %v8901_v63  ;;  %v17971_v27 = vcombine.high %v398_v34, %v410_v45  ;;  %v20454_v63 = vld [vmem:[#allocation8 + $0xb44] ss:$24 sps:$4 sm:$0xff]   ;;  %v17970_v4 = vcombine.low %v398_v34, %v410_v45  ;;  %v20452_v13 = vld [vmem:[#allocation8 + $0xb40] ss:$24 sps:$4 sm:$0xff]   ;;  %v8936_v40 = vmul.f32 0.5, %v22866_v52 }
 0x448   :  { %8063 = vmatpush1.bf16.msra.mxu1 %v17898_v62  ;;  %22058 = vtanh.f32 %v8902_v6  ;;  %16237 = vmatpush1.bf16.msra.mxu0 %v20443_v3  ;;  %v8926_v49 = vmul.f32 0.7978846, %v8878_v1  ;;  %v422_v41 = vld [vmem:[#allocation5 + $0x9f8] sm:$0xff]  ;;  %v8935_v3 = vmul.f32 0.5, %v22864_v14  ;;  %v8973_v34 = vmul.f32 0.5, %v22900_v5 }
 0x449   :  { %8064 = vmatprep.subr.bf16.mxu1 %v17923_v31  ;;  %22060 = vtanh.f32 %v8925_v23  ;;  %16238 = vmatprep.subr.bf16.mxu0 %v20448_v54  ;;  %v434_v33 = vld [vmem:[#allocation5 + $0xa58] sm:$0xff]  ;;  %v8959_v31 = vmul.f32 0.5, %v22876_v17  ;;  %v8960_v23 = vmul.f32 0.5, %v22882_v11  ;;  %v8974_v5 = vmul.f32 0.5, %v22903_v43  ;;  %v20463_v43 = vld [vmem:[#allocation8 + $0xbd4] ss:$24 sps:$4 sm:$0xff]  }
 0x44a   :  { %22062 = vtanh.f32 %v8926_v49  ;;  %v17995_v50 = vcombine.high %v422_v41, %v434_v33  ;;  %v446_v14 = vld [vmem:[#allocation5 + $0xab8] sm:$0xff]  ;;  %v17994_v52 = vcombine.low %v422_v41, %v434_v33 }
 0x44c   :  { %8065 = vmatpush1.bf16.msra.mxu1 %v17922_v51  ;;  %16239 = vmatpush1.bf16.msra.mxu0 %v20446_v53  ;;  %v20457_v53 = vld [vmem:[#allocation8 + $0xb74] ss:$24 sps:$4 sm:$0xff]  }
 0x44d   :  { %v22049_v32 = vpop.eup %22048  ;;  %8066 = vmatprep.subr.bf16.mxu1 %v17947_v60  ;;  %16240 = vmatprep.subr.bf16.mxu0 %v20451_v36  ;;  %v458_v60 = vld [vmem:[#allocation5 + $0xb18] sm:$0xff] }
 0x44e   :  { %v22051_v48 = vpop.eup %22050  ;;  %v9031_v35 = vadd.f32 1.0, %v22049_v32  ;;  %v8950_v32 = vmul.f32 0.5, %v22878_v12  ;;  %v482_v12 = vld [vmem:[#allocation5 + $0xbd8] sm:$0xff] }
 0x44f   :  { %v22053_v21 = vpop.eup %22052  ;;  %v9032_v62 = vadd.f32 1.0, %v22051_v48 }
 0x450   :  { %v22055_v57 = vpop.eup %22054  ;;  %8067 = vmatpush1.bf16.msra.mxu1 %v17946_v56  ;;  %v9055_v6 = vadd.f32 1.0, %v22053_v21  ;;  %16241 = vmatpush1.bf16.msra.mxu0 %v20449_v10  ;;  %v9079_v17 = vmul.f32 %v9031_v35, %v8935_v3  ;;  %v18019_v21 = vcombine.high %v446_v14, %v458_v60  ;;  %v470_v3 = vld [vmem:[#allocation5 + $0xb78] sm:$0xff] }
 0x451   :  { %v22057_v54 = vpop.eup %22056  ;;  %8068 = vmatprep.subr.bf16.mxu1 %v17971_v27  ;;  %v9056_v51 = vadd.f32 1.0, %v22055_v57  ;;  %16242 = vmatprep.subr.bf16.mxu0 %v20454_v63  ;;  %v9080_v49 = vmul.f32 %v9032_v62, %v8936_v40  ;;  %v20455_v63 = vld [vmem:[#allocation8 + $0xb70] ss:$24 sps:$4 sm:$0xff]   ;;  %v20460_v62 = vld [vmem:[#allocation8 + $0xba4] ss:$24 sps:$4 sm:$0xff]  }
 0x452   :  { %v22059_v1 = vpop.eup %22058  ;;  %v9103_v36 = vmul.f32 %v9055_v6, %v8959_v31  ;;  %v9045_v29 = vadd.f32 1.0, %v22057_v54  ;;  %v18043_v54 = vcombine.high %v470_v3, %v482_v12  ;;  %v506_v40 = vld [vmem:[#allocation5 + $0xc98] sm:$0xff] }
 0x453   :  { %v22061_v45 = vpop.eup %22060  ;;  %v9104_v56 = vmul.f32 %v9056_v51, %v8960_v23  ;;  %v9046_v10 = vadd.f32 1.0, %v22059_v1  ;;  %v18042_v51 = vcombine.low %v470_v3, %v482_v12  ;;  %v20461_v1 = vld [vmem:[#allocation8 + $0xbd0] ss:$24 sps:$4 sm:$0xff]   ;;  %v590_v3 = vld [vmem:[#allocation5 + $0xf38] sm:$0xff] }
 0x454   :  { %8069 = vmatpush1.bf16.msra.mxu1 %v17970_v4  ;;  %v22927_v11 = vpack.c.bf16 %v9103_v36, %v9079_v17  ;;  %v9069_v27 = vadd.f32 1.0, %v22061_v45  ;;  %v9093_v48 = vmul.f32 %v9045_v29, %v8949_v20  ;;  %16243 = vmatpush1.bf16.msra.mxu0 %v20452_v13  ;;  %v22063_v57 = vpop.eup %22062  ;;  %v18018_v4 = vcombine.low %v446_v14, %v458_v60  ;;  %v20458_v20 = vld [vmem:[#allocation8 + $0xba0] ss:$24 sps:$4 sm:$0xff]   ;;  %v20466_v14 = vld [vmem:[#allocation8 + $0xc04] ss:$24 sps:$4 sm:$0xff]  }
 0x455   :  { %8070 = vmatprep.subr.bf16.mxu1 %v17995_v50  ;;  %v22929_v35 = vpack.c.bf16 %v9104_v56, %v9080_v49  ;;  %16244 = vmatprep.subr.bf16.mxu0 %v20457_v53  ;;  %v9070_v41 = vadd.f32 1.0, %v22063_v57  ;;  %v9094_v33 = vmul.f32 %v9046_v10, %v8950_v32  ;;  %v494_v50 = vld [vmem:[#allocation5 + $0xc38] sm:$0xff]  ;;  %v20469_v45 = vld [vmem:[#allocation8 + $0xc34] ss:$24 sps:$4 sm:$0xff]   ;;  %v20467_v10 = vld [vmem:[#allocation8 + $0xc30] ss:$24 sps:$4 sm:$0xff]  }
 0x456   :  { %v9117_v31 = vmul.f32 %v9069_v27, %v8973_v34  ;;  %v18067_v53 = vcombine.high %v494_v50, %v506_v40  ;;  %v518_v60 = vld [vmem:[#allocation5 + $0xcf8] sm:$0xff]  ;;  %v18066_v36 = vcombine.low %v494_v50, %v506_v40  ;;  %v20481_v40 = vld [vmem:[#allocation8 + $0xcf4] ss:$24 sps:$4 sm:$0xff]  }
 0x457   :  { %16250 = vmatprep.mubr.bf16.mxu0 %v22929_v35  ;;  %v9118_v13 = vmul.f32 %v9070_v41, %v8974_v5  ;;  %v530_v17 = vld [vmem:[#allocation5 + $0xd58] sm:$0xff]  ;;  %v20473_v41 = vld [vmem:[#allocation8 + $0xc90] ss:$24 sps:$4 sm:$0xff]  }
 0x458   :  { %8071 = vmatpush1.bf16.msra.mxu1 %v17994_v52  ;;  %v22933_v6 = vpack.c.bf16 %v9117_v31, %v9093_v48  ;;  %16245 = vmatpush1.bf16.msra.mxu0 %v20455_v63  ;;  %v20464_v34 = vld [vmem:[#allocation8 + $0xc00] ss:$24 sps:$4 sm:$0xff]   ;;  %v18091_v29 = vcombine.high %v518_v60, %v530_v17  ;;  %v18090_v32 = vcombine.low %v518_v60, %v530_v17  ;;  %v20472_v27 = vld [vmem:[#allocation8 + $0xc64] ss:$24 sps:$4 sm:$0xff]  }
 0x459   :  { %8072 = vmatprep.subr.bf16.mxu1 %v18019_v21  ;;  %16246 = vmatprep.subr.bf16.mxu0 %v20460_v62  ;;  %v22935_v23 = vpack.c.bf16 %v9118_v13, %v9094_v33  ;;  %v542_v49 = vld [vmem:[#allocation5 + $0xdb8] sm:$0xff]  ;;  %v20475_v62 = vld [vmem:[#allocation8 + $0xc94] ss:$24 sps:$4 sm:$0xff]  }
 0x45a   :  { %v554_v56 = vld [vmem:[#allocation5 + $0xe18] sm:$0xff] }
 0x45b   :  { %v18115_v52 = vcombine.high %v542_v49, %v554_v56  ;;  %v566_v48 = vld [vmem:[#allocation5 + $0xe78] sm:$0xff]  ;;  %v18114_v21 = vcombine.low %v542_v49, %v554_v56  ;;  %v20487_v56 = vld [vmem:[#allocation8 + $0xd54] ss:$24 sps:$4 sm:$0xff]  }
 0x45c   :  { %8073 = vmatpush1.bf16.msra.mxu1 %v18018_v4  ;;  %16247 = vmatpush1.bf16.msra.mxu0 %v20458_v20  ;;  %v578_v63 = vld [vmem:[#allocation5 + $0xed8] sm:$0xff] }
 0x45d   :  { %8074 = vmatprep.subr.bf16.mxu1 %v18043_v54  ;;  %16248 = vmatprep.subr.bf16.mxu0 %v20463_v43  ;;  %v20470_v5 = vld [vmem:[#allocation8 + $0xc60] ss:$24 sps:$4 sm:$0xff]   ;;  %v18139_v57 = vcombine.high %v566_v48, %v578_v63  ;;  %v18138_v31 = vcombine.low %v566_v48, %v578_v63  ;;  %v20478_v4 = vld [vmem:[#allocation8 + $0xcc4] ss:$24 sps:$4 sm:$0xff]  }
 0x45e   :  { %v602_v12 = vld [vmem:[#allocation5 + $0xf98] sm:$0xff] }
 0x45f   :  { %v18163_v33 = vcombine.high %v590_v3, %v602_v12  ;;  %v614_v20 = vld [vmem:[#allocation5 + $0xff8] sm:$0xff]  ;;  %v18162_v13 = vcombine.low %v590_v3, %v602_v12  ;;  %v20493_v12 = vld [vmem:[#allocation8 + $0xdb4] ss:$24 sps:$4 sm:$0xff]  }
 0x460   :  { %8075 = vmatpush1.bf16.msra.mxu1 %v18042_v51  ;;  %16249 = vmatpush1.bf16.msra.mxu0 %v20461_v1  ;;  %v626_v54 = vld [vmem:[#allocation5 + $0x1058] sm:$0xff] }
 0x461   :  { %8087 = vmatprep.subr.bf16.mxu1 %v18067_v53  ;;  %16261 = vmatprep.subr.bf16.mxu0 %v20466_v14  ;;  %v20476_v43 = vld [vmem:[#allocation8 + $0xcc0] ss:$24 sps:$4 sm:$0xff]   ;;  %v18187_v50 = vcombine.high %v614_v20, %v626_v54  ;;  %v18186_v53 = vcombine.low %v614_v20, %v626_v54  ;;  %v20479_v14 = vld [vmem:[#allocation8 + $0xcf0] ss:$24 sps:$4 sm:$0xff]   ;;  %v20484_v17 = vld [vmem:[#allocation8 + $0xd24] ss:$24 sps:$4 sm:$0xff]  }
 0x462   :  { %v638_v51 = vld [vmem:[#allocation5 + $0x10b8] sm:$0xff] }
 0x463   :  { %8077 = vmatmul.mubr.bf16.vlgmr.msra.gmra.mrb[20].mxu1 %v22353_v15  ;;  %16251 = vmatmul.mubr.bf16.vlgmr.msra.gmra.mrb[16].mxu0 %v22927_v11  ;;  %v650_v1 = vld [vmem:[#allocation5 + $0x1118] sm:$0xff] }
 0x464   :  { %8088 = vmatpush1.bf16.msra.mxu1 %v18066_v36  ;;  %16262 = vmatpush1.bf16.msra.mxu0 %v20464_v34  ;;  %v18211_v60 = vcombine.high %v638_v51, %v650_v1  ;;  %v662_v36 = vld [vmem:[#allocation5 + $0x1178] sm:$0xff] }
 0x465   :  { %16293 = vmatprep.mubr.bf16.mxu0 %v22551_v37  ;;  %8089 = vmatprep.subr.bf16.mxu1 %v18091_v29  ;;  %v674_v34 = vld [vmem:[#allocation5 + $0x11d8] sm:$0xff]  ;;  %v18210_v29 = vcombine.low %v638_v51, %v650_v1  ;;  %v20499_v1 = vld [vmem:[#allocation8 + $0xe14] ss:$24 sps:$4 sm:$0xff]  }
 0x466   :  { %16263 = vmatprep.subr.bf16.mxu0 %v20469_v45  ;;  %8119 = vmatprep.mubr.bf16.mxu1 %v22355_v25  ;;  %v20482_v45 = vld [vmem:[#allocation8 + $0xd20] ss:$24 sps:$4 sm:$0xff]   ;;  %v18235_v49 = vcombine.high %v662_v36, %v674_v34  ;;  %v20490_v63 = vld [vmem:[#allocation8 + $0xd84] ss:$24 sps:$4 sm:$0xff]  }
 0x467   :  { %v20496_v54 = vld [vmem:[#allocation8 + $0xde4] ss:$24 sps:$4 sm:$0xff]  }
 0x468   :  { %8090 = vmatpush1.bf16.msra.mxu1 %v18090_v32  ;;  %16264 = vmatpush1.bf16.msra.mxu0 %v20467_v10  ;;  %v686_v32 = vld [vmem:[#allocation5 + $0x1238] sm:$0xff] }
 0x469   :  { %8091 = vmatprep.subr.bf16.mxu1 %v18115_v52  ;;  %16265 = vmatprep.subr.bf16.mxu0 %v20472_v27  ;;  %v698_v10 = vld [vmem:[#allocation5 + $0x1298] sm:$0xff]  ;;  %v18234_v52 = vcombine.low %v662_v36, %v674_v34  ;;  %v20485_v27 = vld [vmem:[#allocation8 + $0xd50] ss:$24 sps:$4 sm:$0xff]  }
 0x46a   :  { %v18259_v48 = vcombine.high %v686_v32, %v698_v10  ;;  %v20502_v34 = vld [vmem:[#allocation8 + $0xe44] ss:$24 sps:$4 sm:$0xff]  }
 0x46c   :  { %8092 = vmatpush1.bf16.msra.mxu1 %v18114_v21  ;;  %16266 = vmatpush1.bf16.msra.mxu0 %v20470_v5  ;;  %v710_v21 = vld [vmem:[#allocation5 + $0x12f8] sm:$0xff] }
 0x46d   :  { %8093 = vmatprep.subr.bf16.mxu1 %v18139_v57  ;;  %16267 = vmatprep.subr.bf16.mxu0 %v20475_v62  ;;  %v722_v5 = vld [vmem:[#allocation5 + $0x1358] sm:$0xff]  ;;  %v18258_v57 = vcombine.low %v686_v32, %v698_v10  ;;  %v20505_v10 = vld [vmem:[#allocation8 + $0xe74] ss:$24 sps:$4 sm:$0xff]  }
 0x46e   :  { %v20488_v62 = vld [vmem:[#allocation8 + $0xd80] ss:$24 sps:$4 sm:$0xff]   ;;  %v18283_v3 = vcombine.high %v710_v21, %v722_v5 }
 0x470   :  { %8094 = vmatpush1.bf16.msra.mxu1 %v18138_v31  ;;  %16268 = vmatpush1.bf16.msra.mxu0 %v20473_v41  ;;  %v734_v31 = vld [vmem:[#allocation5 + $0x13b8] sm:$0xff] }
 0x471   :  { %8095 = vmatprep.subr.bf16.mxu1 %v18163_v33  ;;  %16269 = vmatprep.subr.bf16.mxu0 %v20478_v4  ;;  %v746_v41 = vld [vmem:[#allocation5 + $0x1418] sm:$0xff]  ;;  %v18282_v33 = vcombine.low %v710_v21, %v722_v5  ;;  %v20491_v4 = vld [vmem:[#allocation8 + $0xdb0] ss:$24 sps:$4 sm:$0xff]  }
 0x472   :  { %v18307_v20 = vcombine.high %v734_v31, %v746_v41  ;;  %v20508_v5 = vld [vmem:[#allocation8 + $0xea4] ss:$24 sps:$4 sm:$0xff]  }
 0x474   :  { %8096 = vmatpush1.bf16.msra.mxu1 %v18162_v13  ;;  %16270 = vmatpush1.bf16.msra.mxu0 %v20476_v43  ;;  %v758_v13 = vld [vmem:[#allocation5 + $0x1478] sm:$0xff] }
 0x475   :  { %8097 = vmatprep.subr.bf16.mxu1 %v18187_v50  ;;  %16271 = vmatprep.subr.bf16.mxu0 %v20481_v40  ;;  %v770_v43 = vld [vmem:[#allocation5 + $0x14d8] sm:$0xff]  ;;  %v18306_v50 = vcombine.low %v734_v31, %v746_v41  ;;  %v20511_v41 = vld [vmem:[#allocation8 + $0xed4] ss:$24 sps:$4 sm:$0xff]  }
 0x476   :  { %v20494_v40 = vld [vmem:[#allocation8 + $0xde0] ss:$24 sps:$4 sm:$0xff]   ;;  %v18331_v51 = vcombine.high %v758_v13, %v770_v43 }
 0x478   :  { %8098 = vmatpush1.bf16.msra.mxu1 %v18186_v53  ;;  %16272 = vmatpush1.bf16.msra.mxu0 %v20479_v14  ;;  %v782_v53 = vld [vmem:[#allocation5 + $0x1538] sm:$0xff] }
 0x479   :  { %8099 = vmatprep.subr.bf16.mxu1 %v18211_v60  ;;  %16273 = vmatprep.subr.bf16.mxu0 %v20484_v17  ;;  %v794_v14 = vld [vmem:[#allocation5 + $0x1598] sm:$0xff]  ;;  %v18330_v60 = vcombine.low %v758_v13, %v770_v43  ;;  %v20497_v17 = vld [vmem:[#allocation8 + $0xe10] ss:$24 sps:$4 sm:$0xff]  }
 0x47a   :  { %v18355_v36 = vcombine.high %v782_v53, %v794_v14  ;;  %v902_v43 = vld [vmem:[#allocation5 + $0x18f8] sm:$0xff] }
 0x47c   :  { %8100 = vmatpush1.bf16.msra.mxu1 %v18210_v29  ;;  %16274 = vmatpush1.bf16.msra.mxu0 %v20482_v45  ;;  %v806_v29 = vld [vmem:[#allocation5 + $0x15f8] sm:$0xff] }
 0x47d   :  { %8101 = vmatprep.subr.bf16.mxu1 %v18235_v49  ;;  %16275 = vmatprep.subr.bf16.mxu0 %v20487_v56  ;;  %v818_v45 = vld [vmem:[#allocation5 + $0x1658] sm:$0xff]  ;;  %v18354_v49 = vcombine.low %v782_v53, %v794_v14 }
 0x47e   :  { %v20500_v56 = vld [vmem:[#allocation8 + $0xe40] ss:$24 sps:$4 sm:$0xff]   ;;  %v18379_v32 = vcombine.high %v806_v29, %v818_v45 }
 0x47f   :  { %v20512_v53 = vld [vmem:[#allocation8 + $0xf00] ss:$24 sps:$4 sm:$0xff]  }
 0x480   :  { %8102 = vmatpush1.bf16.msra.mxu1 %v18234_v52  ;;  %16276 = vmatpush1.bf16.msra.mxu0 %v20485_v27  ;;  %v830_v52 = vld [vmem:[#allocation5 + $0x16b8] sm:$0xff] }
 0x481   :  { %8103 = vmatprep.subr.bf16.mxu1 %v18259_v48  ;;  %16277 = vmatprep.subr.bf16.mxu0 %v20490_v63  ;;  %v842_v27 = vld [vmem:[#allocation5 + $0x1718] sm:$0xff]  ;;  %v18378_v48 = vcombine.low %v806_v29, %v818_v45  ;;  %v20503_v63 = vld [vmem:[#allocation8 + $0xe70] ss:$24 sps:$4 sm:$0xff]  }
 0x482   :  { %v18403_v21 = vcombine.high %v830_v52, %v842_v27  ;;  %v926_v14 = vld [vmem:[#allocation5 + $0x19b8] sm:$0xff]  ;;  %v20515_v29 = vld [vmem:[#allocation8 + $0xf30] ss:$24 sps:$4 sm:$0xff]  }
 0x483   :  { %v950_v45 = vld [vmem:[#allocation5 + $0x1a78] sm:$0xff] }
 0x484   :  { %8104 = vmatpush1.bf16.msra.mxu1 %v18258_v57  ;;  %16278 = vmatpush1.bf16.msra.mxu0 %v20488_v62  ;;  %v854_v57 = vld [vmem:[#allocation5 + $0x1778] sm:$0xff] }
 0x485   :  { %8105 = vmatprep.subr.bf16.mxu1 %v18283_v3  ;;  %16279 = vmatprep.subr.bf16.mxu0 %v20493_v12  ;;  %v866_v62 = vld [vmem:[#allocation5 + $0x17d8] sm:$0xff]  ;;  %v18402_v3 = vcombine.low %v830_v52, %v842_v27 }
 0x486   :  { %v20506_v12 = vld [vmem:[#allocation8 + $0xea0] ss:$24 sps:$4 sm:$0xff]   ;;  %v18427_v31 = vcombine.high %v854_v57, %v866_v62 }
 0x487   :  { %v20518_v52 = vld [vmem:[#allocation8 + $0xf60] ss:$24 sps:$4 sm:$0xff]  }
 0x488   :  { %8106 = vmatpush1.bf16.msra.mxu1 %v18282_v33  ;;  %16280 = vmatpush1.bf16.msra.mxu0 %v20491_v4  ;;  %v878_v33 = vld [vmem:[#allocation5 + $0x1838] sm:$0xff] }
 0x489   :  { %8107 = vmatprep.subr.bf16.mxu1 %v18307_v20  ;;  %16281 = vmatprep.subr.bf16.mxu0 %v20496_v54  ;;  %v890_v4 = vld [vmem:[#allocation5 + $0x1898] sm:$0xff]  ;;  %v18426_v20 = vcombine.low %v854_v57, %v866_v62  ;;  %v20509_v54 = vld [vmem:[#allocation8 + $0xed0] ss:$24 sps:$4 sm:$0xff]  }
 0x48a   :  { %v18451_v13 = vcombine.high %v878_v33, %v890_v4  ;;  %v974_v27 = vld [vmem:[#allocation5 + $0x1b38] sm:$0xff]  ;;  %v20521_v57 = vld [vmem:[#allocation8 + $0xf90] ss:$24 sps:$4 sm:$0xff]  }
 0x48b   :  { %v998_v62 = vld [vmem:[#allocation5 + $0x1bf8] sm:$0xff] }
 0x48c   :  { %8108 = vmatpush1.bf16.msra.mxu1 %v18306_v50  ;;  %16282 = vmatpush1.bf16.msra.mxu0 %v20494_v40  ;;  %v914_v50 = vld [vmem:[#allocation5 + $0x1958] sm:$0xff] }
 0x48d   :  { %8109 = vmatprep.subr.bf16.mxu1 %v18331_v51  ;;  %16283 = vmatprep.subr.bf16.mxu0 %v20499_v1  ;;  %v20514_v40 = vld [vmem:[#allocation8 + $0xf04] ss:$24 sps:$4 sm:$0xff]   ;;  %v18450_v51 = vcombine.low %v878_v33, %v890_v4  ;;  %v18475_v1 = vcombine.high %v902_v43, %v914_v50  ;;  %v20524_v33 = vld [vmem:[#allocation8 + $0xfc0] ss:$24 sps:$4 sm:$0xff]  }
 0x48e   :  { %v1022_v4 = vld [vmem:[#allocation5 + $0x1cb8] sm:$0xff] }
 0x490   :  { %8110 = vmatpush1.bf16.msra.mxu1 %v18330_v60  ;;  %16284 = vmatpush1.bf16.msra.mxu0 %v20497_v17  ;;  %v938_v60 = vld [vmem:[#allocation5 + $0x1a18] sm:$0xff]  ;;  %v20517_v17 = vld [vmem:[#allocation8 + $0xf34] ss:$24 sps:$4 sm:$0xff]  }
 0x491   :  { %8111 = vmatprep.subr.bf16.mxu1 %v18355_v36  ;;  %16285 = vmatprep.subr.bf16.mxu0 %v20502_v34  ;;  %v18474_v36 = vcombine.low %v902_v43, %v914_v50  ;;  %v18499_v34 = vcombine.high %v926_v14, %v938_v60  ;;  %v20527_v50 = vld [vmem:[#allocation8 + $0xff0] ss:$24 sps:$4 sm:$0xff]  }
 0x494   :  { %8112 = vmatpush1.bf16.msra.mxu1 %v18354_v49  ;;  %16286 = vmatpush1.bf16.msra.mxu0 %v20500_v56  ;;  %v962_v49 = vld [vmem:[#allocation5 + $0x1ad8] sm:$0xff] }
 0x495   :  { %8113 = vmatprep.subr.bf16.mxu1 %v18379_v32  ;;  %16287 = vmatprep.subr.bf16.mxu0 %v20505_v10  ;;  %v20520_v56 = vld [vmem:[#allocation8 + $0xf64] ss:$24 sps:$4 sm:$0xff]   ;;  %v18498_v32 = vcombine.low %v926_v14, %v938_v60  ;;  %v18523_v10 = vcombine.high %v950_v45, %v962_v49  ;;  %v20530_v60 = vld [vmem:[#allocation8 + $0x1020] ss:$24 sps:$4 sm:$0xff]  }
 0x498   :  { %8114 = vmatpush1.bf16.msra.mxu1 %v18378_v48  ;;  %16288 = vmatpush1.bf16.msra.mxu0 %v20503_v63  ;;  %v986_v48 = vld [vmem:[#allocation5 + $0x1b98] sm:$0xff]  ;;  %v20523_v63 = vld [vmem:[#allocation8 + $0xf94] ss:$24 sps:$4 sm:$0xff]  }
 0x499   :  { %8115 = vmatprep.subr.bf16.mxu1 %v18403_v21  ;;  %16289 = vmatprep.subr.bf16.mxu0 %v20508_v5  ;;  %v18522_v21 = vcombine.low %v950_v45, %v962_v49  ;;  %v18547_v5 = vcombine.high %v974_v27, %v986_v48  ;;  %v20533_v49 = vld [vmem:[#allocation8 + $0x1050] ss:$24 sps:$4 sm:$0xff]  }
 0x49c   :  { %8116 = vmatpush1.bf16.msra.mxu1 %v18402_v3  ;;  %16290 = vmatpush1.bf16.msra.mxu0 %v20506_v12  ;;  %v1010_v3 = vld [vmem:[#allocation5 + $0x1c58] sm:$0xff] }
 0x49d   :  { %8117 = vmatprep.subr.bf16.mxu1 %v18427_v31  ;;  %16291 = vmatprep.subr.bf16.mxu0 %v20511_v41  ;;  %v20526_v12 = vld [vmem:[#allocation8 + $0xfc4] ss:$24 sps:$4 sm:$0xff]   ;;  %v18546_v31 = vcombine.low %v974_v27, %v986_v48  ;;  %v18571_v41 = vcombine.high %v998_v62, %v1010_v3  ;;  %v20536_v48 = vld [vmem:[#allocation8 + $0x1080] ss:$24 sps:$4 sm:$0xff]  }
 0x4a0   :  { %8118 = vmatpush1.bf16.msra.mxu1 %v18426_v20  ;;  %16292 = vmatpush1.bf16.msra.mxu0 %v20509_v54  ;;  %v1034_v20 = vld [vmem:[#allocation5 + $0x1d18] sm:$0xff]  ;;  %v20529_v54 = vld [vmem:[#allocation8 + $0xff4] ss:$24 sps:$4 sm:$0xff]  }
 0x4a1   :  { %8130 = vmatprep.subr.bf16.mxu1 %v18451_v13  ;;  %16304 = vmatprep.subr.bf16.mxu0 %v20514_v40  ;;  %v18570_v13 = vcombine.low %v998_v62, %v1010_v3  ;;  %v18595_v43 = vcombine.high %v1022_v4, %v1034_v20  ;;  %v1046_v40 = vld [vmem:[#allocation5 + $0x1d78] sm:$0xff]  ;;  %v20539_v3 = vld [vmem:[#allocation8 + $0x10b0] ss:$24 sps:$4 sm:$0xff]  }
 0x4a3   :  { %8120 = vmatmul.mubr.bf16.vlgmr.msra.gmra.mrb[20].mxu1 %v22361_v30  ;;  %16294 = vmatmul.mubr.bf16.vlgmr.msra.gmra.mrb[16].mxu0 %v22549_v19 }
 0x4a4   :  { %8131 = vmatpush1.bf16.msra.mxu1 %v18450_v51  ;;  %16305 = vmatpush1.bf16.msra.mxu0 %v20512_v53  ;;  %v1058_v51 = vld [vmem:[#allocation5 + $0x1dd8] sm:$0xff]  ;;  %v18594_v53 = vcombine.low %v1022_v4, %v1034_v20 }
 0x4a5   :  { %8132 = vmatprep.subr.bf16.mxu1 %v18475_v1  ;;  %16306 = vmatprep.subr.bf16.mxu0 %v20517_v17  ;;  %v20532_v1 = vld [vmem:[#allocation8 + $0x1024] ss:$24 sps:$4 sm:$0xff]   ;;  %v18619_v14 = vcombine.high %v1046_v40, %v1058_v51  ;;  %v20542_v20 = vld [vmem:[#allocation8 + $0x10e0] ss:$24 sps:$4 sm:$0xff]  }
 0x4a6   :  { %8162 = vmatprep.mubr.bf16.mxu1 %v22363_v39  ;;  %v1070_v17 = vld [vmem:[#allocation5 + $0x1e38] sm:$0xff] }
 0x4a8   :  { %8133 = vmatpush1.bf16.msra.mxu1 %v18474_v36  ;;  %16307 = vmatpush1.bf16.msra.mxu0 %v20515_v29  ;;  %v1082_v36 = vld [vmem:[#allocation5 + $0x1e98] sm:$0xff]  ;;  %v18618_v29 = vcombine.low %v1046_v40, %v1058_v51  ;;  %v20545_v51 = vld [vmem:[#allocation8 + $0x1110] ss:$24 sps:$4 sm:$0xff]  }
 0x4a9   :  { %8134 = vmatprep.subr.bf16.mxu1 %v18499_v34  ;;  %16308 = vmatprep.subr.bf16.mxu0 %v20520_v56  ;;  %v20535_v34 = vld [vmem:[#allocation8 + $0x1054] ss:$24 sps:$4 sm:$0xff]   ;;  %v18643_v45 = vcombine.high %v1070_v17, %v1082_v36  ;;  %v1094_v56 = vld [vmem:[#allocation5 + $0x1ef8] sm:$0xff] }
 0x4ac   :  { %8135 = vmatpush1.bf16.msra.mxu1 %v18498_v32  ;;  %16309 = vmatpush1.bf16.msra.mxu0 %v20518_v52  ;;  %v1106_v32 = vld [vmem:[#allocation5 + $0x1f58] sm:$0xff]  ;;  %v18642_v52 = vcombine.low %v1070_v17, %v1082_v36 }
 0x4ad   :  { %8136 = vmatprep.subr.bf16.mxu1 %v18523_v10  ;;  %16310 = vmatprep.subr.bf16.mxu0 %v20523_v63  ;;  %v20538_v10 = vld [vmem:[#allocation8 + $0x1084] ss:$24 sps:$4 sm:$0xff]   ;;  %v18667_v27 = vcombine.high %v1094_v56, %v1106_v32  ;;  %v20548_v36 = vld [vmem:[#allocation8 + $0x1140] ss:$24 sps:$4 sm:$0xff]  }
 0x4ae   :  { %v1118_v63 = vld [vmem:[#allocation5 + $0x1fb8] sm:$0xff] }
 0x4b0   :  { %8137 = vmatpush1.bf16.msra.mxu1 %v18522_v21  ;;  %16311 = vmatpush1.bf16.msra.mxu0 %v20521_v57  ;;  %v1130_v21 = vld [vmem:[#allocation5 + $0x2018] sm:$0xff]  ;;  %v18666_v57 = vcombine.low %v1094_v56, %v1106_v32  ;;  %v20551_v32 = vld [vmem:[#allocation8 + $0x1170] ss:$24 sps:$4 sm:$0xff]  }
 0x4b1   :  { %8138 = vmatprep.subr.bf16.mxu1 %v18547_v5  ;;  %16312 = vmatprep.subr.bf16.mxu0 %v20526_v12  ;;  %v20541_v5 = vld [vmem:[#allocation8 + $0x10b4] ss:$24 sps:$4 sm:$0xff]   ;;  %v18691_v62 = vcombine.high %v1118_v63, %v1130_v21  ;;  %v1142_v12 = vld [vmem:[#allocation5 + $0x2078] sm:$0xff] }
 0x4b4   :  { %8139 = vmatpush1.bf16.msra.mxu1 %v18546_v31  ;;  %16313 = vmatpush1.bf16.msra.mxu0 %v20524_v33  ;;  %v1154_v31 = vld [vmem:[#allocation5 + $0x20d8] sm:$0xff]  ;;  %v18690_v33 = vcombine.low %v1118_v63, %v1130_v21 }
 0x4b5   :  { %8140 = vmatprep.subr.bf16.mxu1 %v18571_v41  ;;  %16314 = vmatprep.subr.bf16.mxu0 %v20529_v54  ;;  %v20544_v41 = vld [vmem:[#allocation8 + $0x10e4] ss:$24 sps:$4 sm:$0xff]   ;;  %v18715_v4 = vcombine.high %v1142_v12, %v1154_v31  ;;  %v20554_v21 = vld [vmem:[#allocation8 + $0x11a0] ss:$24 sps:$4 sm:$0xff]  }
 0x4b6   :  { %v1166_v54 = vld [vmem:[#allocation5 + $0x2138] sm:$0xff] }
 0x4b8   :  { %8141 = vmatpush1.bf16.msra.mxu1 %v18570_v13  ;;  %16315 = vmatpush1.bf16.msra.mxu0 %v20527_v50  ;;  %v1178_v13 = vld [vmem:[#allocation5 + $0x2198] sm:$0xff]  ;;  %v18714_v50 = vcombine.low %v1142_v12, %v1154_v31  ;;  %v20557_v31 = vld [vmem:[#allocation8 + $0x11d0] ss:$24 sps:$4 sm:$0xff]  }
 0x4b9   :  { %8142 = vmatprep.subr.bf16.mxu1 %v18595_v43  ;;  %16316 = vmatprep.subr.bf16.mxu0 %v20532_v1  ;;  %v20547_v43 = vld [vmem:[#allocation8 + $0x1114] ss:$24 sps:$4 sm:$0xff]   ;;  %v18739_v40 = vcombine.high %v1166_v54, %v1178_v13  ;;  %v1190_v1 = vld [vmem:[#allocation5 + $0x21f8] sm:$0xff] }
 0x4bc   :  { %8143 = vmatpush1.bf16.msra.mxu1 %v18594_v53  ;;  %16317 = vmatpush1.bf16.msra.mxu0 %v20530_v60  ;;  %v1202_v53 = vld [vmem:[#allocation5 + $0x2258] sm:$0xff]  ;;  %v18738_v60 = vcombine.low %v1166_v54, %v1178_v13  ;;  %v160_v13 = vld [vmem:[#allocation5 + $0x1c8] sm:$0xff] }
 0x4bd   :  { %8144 = vmatprep.subr.bf16.mxu1 %v18619_v14  ;;  %16318 = vmatprep.subr.bf16.mxu0 %v20535_v34  ;;  %v20550_v14 = vld [vmem:[#allocation8 + $0x1144] ss:$24 sps:$4 sm:$0xff]   ;;  %v18763_v17 = vcombine.high %v1190_v1, %v1202_v53 }
 0x4be   :  { %v1214_v34 = vld [vmem:[#allocation5 + $0x22b8] sm:$0xff] }
 0x4c0   :  { %8145 = vmatpush1.bf16.msra.mxu1 %v18618_v29  ;;  %16319 = vmatpush1.bf16.msra.mxu0 %v20533_v49  ;;  %v1226_v29 = vld [vmem:[#allocation5 + $0x2318] sm:$0xff]  ;;  %v18762_v49 = vcombine.low %v1190_v1, %v1202_v53  ;;  %v196_v1 = vld [vmem:[#allocation5 + $0x2e8] sm:$0xff] }
 0x4c1   :  { %8146 = vmatprep.subr.bf16.mxu1 %v18643_v45  ;;  %16320 = vmatprep.subr.bf16.mxu0 %v20538_v10  ;;  %v20553_v45 = vld [vmem:[#allocation8 + $0x1174] ss:$24 sps:$4 sm:$0xff]   ;;  %v18787_v56 = vcombine.high %v1214_v34, %v1226_v29  ;;  %v1238_v10 = vld [vmem:[#allocation5 + $0x2378] sm:$0xff] }
 0x4c4   :  { %8147 = vmatpush1.bf16.msra.mxu1 %v18642_v52  ;;  %16321 = vmatpush1.bf16.msra.mxu0 %v20536_v48  ;;  %v1250_v52 = vld [vmem:[#allocation5 + $0x23d8] sm:$0xff]  ;;  %v18786_v48 = vcombine.low %v1214_v34, %v1226_v29  ;;  %v232_v29 = vld [vmem:[#allocation5 + $0x408] sm:$0xff] }
 0x4c5   :  { %8148 = vmatprep.subr.bf16.mxu1 %v18667_v27  ;;  %16322 = vmatprep.subr.bf16.mxu0 %v20541_v5  ;;  %v20556_v27 = vld [vmem:[#allocation8 + $0x11a4] ss:$24 sps:$4 sm:$0xff]   ;;  %v18811_v63 = vcombine.high %v1238_v10, %v1250_v52  ;;  %v112_v5 = vld [vmem:[#allocation5 + $0x48] sm:$0xff] }
 0x4c8   :  { %8149 = vmatpush1.bf16.msra.mxu1 %v18666_v57  ;;  %16323 = vmatpush1.bf16.msra.mxu0 %v20539_v3  ;;  %v124_v57 = vld [vmem:[#allocation5 + $0xa8] sm:$0xff]  ;;  %v18810_v3 = vcombine.low %v1238_v10, %v1250_v52 }
 0x4c9   :  { %8150 = vmatprep.subr.bf16.mxu1 %v18691_v62  ;;  %16324 = vmatprep.subr.bf16.mxu0 %v20544_v41  ;;  %v20559_v62 = vld [vmem:[#allocation8 + $0x11d4] ss:$24 sps:$4 sm:$0xff]   ;;  %v17687_v12 = vcombine.high %v112_v5, %v124_v57 }
 0x4ca   :  { %v136_v41 = vld [vmem:[#allocation5 + $0x108] sm:$0xff] }
 0x4cb   :  { %v268_v10 = vld [vmem:[#allocation5 + $0x528] sm:$0xff] }
 0x4cc   :  { %8151 = vmatpush1.bf16.msra.mxu1 %v18690_v33  ;;  %16325 = vmatpush1.bf16.msra.mxu0 %v20542_v20  ;;  %v148_v33 = vld [vmem:[#allocation5 + $0x168] sm:$0xff]  ;;  %v17686_v20 = vcombine.low %v112_v5, %v124_v57 }
 0x4cd   :  { %8152 = vmatprep.subr.bf16.mxu1 %v18715_v4  ;;  %16326 = vmatprep.subr.bf16.mxu0 %v20547_v43  ;;  %v20562_v4 = vld [vmem:[#allocation8 + $0x1204] ss:$24 sps:$4 sm:$0xff]   ;;  %v17711_v54 = vcombine.high %v136_v41, %v148_v33  ;;  %v172_v43 = vld [vmem:[#allocation5 + $0x228] sm:$0xff] }
 0x4ce   :  { %v17734_v53 = vcombine.low %v160_v13, %v172_v43  ;;  %v22946_v52 = vld [vmem:[#allocation7 + $0x8] sm:$0xff] }
 0x4cf   :  { %v280_v57 = vld [vmem:[#allocation5 + $0x588] sm:$0xff] }
 0x4d0   :  { %8153 = vmatpush1.bf16.msra.mxu1 %v18714_v50  ;;  %16327 = vmatpush1.bf16.msra.mxu0 %v20545_v51  ;;  %v17710_v50 = vcombine.low %v136_v41, %v148_v33  ;;  %v184_v51 = vld [vmem:[#allocation5 + $0x288] sm:$0xff] }
 0x4d1   :  { %8154 = vmatprep.subr.bf16.mxu1 %v18739_v40  ;;  %16328 = vmatprep.subr.bf16.mxu0 %v20550_v14  ;;  %v17735_v40 = vcombine.high %v160_v13, %v172_v43  ;;  %v17759_v14 = vcombine.high %v184_v51, %v196_v1 }
 0x4d4   :  { %8155 = vmatpush1.bf16.msra.mxu1 %v18738_v60  ;;  %16329 = vmatpush1.bf16.msra.mxu0 %v20548_v36  ;;  %v208_v60 = vld [vmem:[#allocation5 + $0x348] sm:$0xff]  ;;  %v17758_v36 = vcombine.low %v184_v51, %v196_v1 }
 0x4d5   :  { %8156 = vmatprep.subr.bf16.mxu1 %v18763_v17  ;;  %16330 = vmatprep.subr.bf16.mxu0 %v20553_v45  ;;  %v220_v17 = vld [vmem:[#allocation5 + $0x3a8] sm:$0xff] }
 0x4d6   :  { %v17783_v34 = vcombine.high %v208_v60, %v220_v17  ;;  %v244_v45 = vld [vmem:[#allocation5 + $0x468] sm:$0xff] }
 0x4d7   :  { %v316_v51 = vld [vmem:[#allocation5 + $0x6a8] sm:$0xff] }
 0x4d8   :  { %8157 = vmatpush1.bf16.msra.mxu1 %v18762_v49  ;;  %16331 = vmatpush1.bf16.msra.mxu0 %v20551_v32  ;;  %v17782_v49 = vcombine.low %v208_v60, %v220_v17  ;;  %v256_v32 = vld [vmem:[#allocation5 + $0x4c8] sm:$0xff] }
 0x4d9   :  { %8158 = vmatprep.subr.bf16.mxu1 %v18787_v56  ;;  %16332 = vmatprep.subr.bf16.mxu0 %v20556_v27  ;;  %v17807_v56 = vcombine.high %v232_v29, %v244_v45  ;;  %v1304_v27 = vrot.slane %v22946_v52, %v22568_v9  ;;  %v17830_v33 = vcombine.low %v256_v32, %v268_v10 }
 0x4dc   :  { %8159 = vmatpush1.bf16.msra.mxu1 %v18786_v48  ;;  %16333 = vmatpush1.bf16.msra.mxu0 %v20554_v21  ;;  %v1308_v48 = vrot.slane %v22946_v52, %v22571_v18  ;;  %v17831_v21 = vcombine.high %v256_v32, %v268_v10  ;;  %v340_v32 = vld [vmem:[#allocation5 + $0x768] sm:$0xff] }
 0x4dd   :  { %8160 = vmatprep.subr.bf16.mxu1 %v18811_v63  ;;  %16334 = vmatprep.subr.bf16.mxu0 %v20559_v62  ;;  %v17806_v63 = vcombine.low %v232_v29, %v244_v45  ;;  %v292_v62 = vld [vmem:[#allocation5 + $0x5e8] sm:$0xff] }
 0x4de   :  { %v17855_v13 = vcombine.high %v280_v57, %v292_v62  ;;  %v17854_v17 = vcombine.low %v280_v57, %v292_v62 }
 0x4e0   :  { %8161 = vmatpush1.bf16.msra.mxu1 %v18810_v3  ;;  %16335 = vmatpush1.bf16.msra.mxu0 %v20557_v31 }
 0x4e1   :  { %8302 = vmatprep.subr.bf16.mxu1 %v17687_v12  ;;  %16347 = vmatprep.subr.bf16.mxu0 %v20562_v4 }
 0x4e3   :  { %8163 = vmatmul.mubr.bf16.vlgmr.msra.gmra.mrb[20].mxu1 %v22369_v44 }
 0x4e4   :  { %8303 = vmatpush1.bf16.msra.mxu1 %v17686_v20  ;;  %8334 = vmatprep.mubr.bf16.mxu1 %v22349_v58 }
 0x4e5   :  { %8304 = vmatprep.subr.bf16.mxu1 %v17711_v54 }
 0x4e8   :  { %8305 = vmatpush1.bf16.msra.mxu1 %v17710_v50 }
 0x4e9   :  { %8306 = vmatprep.subr.bf16.mxu1 %v17735_v40  ;;  %v304_v40 = vld [vmem:[#allocation5 + $0x648] sm:$0xff] }
 0x4ea   :  { %v17879_v29 = vcombine.high %v304_v40, %v316_v51 }
 0x4ec   :  { %8307 = vmatpush1.bf16.msra.mxu1 %v17734_v53 }
 0x4ed   :  { %8308 = vmatprep.subr.bf16.mxu1 %v17759_v14 }
 0x4f0   :  { %8309 = vmatpush1.bf16.msra.mxu1 %v17758_v36 }
 0x4f1   :  { %8310 = vmatprep.subr.bf16.mxu1 %v17783_v34 }
 0x4f4   :  { %8311 = vmatpush1.bf16.msra.mxu1 %v17782_v49 }
 0x4f5   :  { %8312 = vmatprep.subr.bf16.mxu1 %v17807_v56  ;;  %v328_v56 = vld [vmem:[#allocation5 + $0x708] sm:$0xff] }
 0x4f6   :  { %v7906_v5 = vpop.f32.mrb[16].mxu1  ;;  %v17903_v62 = vcombine.high %v328_v56, %v340_v32 }
 0x4f7   :  { %v22952_v3 = vadd.f32 %v7906_v5, %v1304_v27  ;;  %v7908_v12 = vpop.f32.mrb[17].mxu1 }
 0x4f8   :  { %v22954_v31 = vadd.f32 %v7908_v12, %v1308_v48  ;;  %v7910_v41 = vpop.f32.mrb[18].mxu1  ;;  %8313 = vmatpush1.bf16.msra.mxu1 %v17806_v63 }
 0x4f9   :  { %v8699_v4 = vmul.f32 %v22952_v3, %v22952_v3  ;;  %v22958_v20 = vadd.f32 %v7910_v41, %v1304_v27  ;;  %v7912_v54 = vpop.f32.mrb[19].mxu1  ;;  %8314 = vmatprep.subr.bf16.mxu1 %v17831_v21  ;;  %v17878_v21 = vcombine.low %v304_v40, %v316_v51  ;;  %v376_v40 = vld [vmem:[#allocation5 + $0x888] sm:$0xff] }
 0x4fa   :  { %v8700_v43 = vmul.f32 %v22954_v31, %v22954_v31  ;;  %v22962_v50 = vadd.f32 %v7912_v54, %v1308_v48  ;;  %v388_v51 = vld [vmem:[#allocation5 + $0x8e8] sm:$0xff] }
 0x4fb   :  { %v8747_v1 = vmul.f32 %v22952_v3, %v8699_v4  ;;  %v8723_v53 = vmul.f32 %v22958_v20, %v22958_v20  ;;  %v364_v4 = vld [vmem:[#allocation5 + $0x828] sm:$0xff] }
 0x4fc   :  { %v8748_v14 = vmul.f32 %v22954_v31, %v8700_v43  ;;  %v8724_v60 = vmul.f32 %v22962_v50, %v22962_v50  ;;  %8315 = vmatpush1.bf16.msra.mxu1 %v17830_v33  ;;  %v352_v33 = vld [vmem:[#allocation5 + $0x7c8] sm:$0xff]  ;;  %v17902_v43 = vcombine.low %v328_v56, %v340_v32 }
 0x4fd   :  { %v8795_v36 = vmul.f32 0.044715, %v8747_v1  ;;  %v8771_v34 = vmul.f32 %v22958_v20, %v8723_v53  ;;  %8316 = vmatprep.subr.bf16.mxu1 %v17855_v13  ;;  %v17927_v1 = vcombine.high %v352_v33, %v364_v4  ;;  %v17926_v53 = vcombine.low %v352_v33, %v364_v4  ;;  %v436_v56 = vld [vmem:[#allocation5 + $0xa68] sm:$0xff] }
 0x4fe   :  { %v8796_v45 = vmul.f32 0.044715, %v8748_v14  ;;  %v8772_v49 = vmul.f32 %v22962_v50, %v8724_v60  ;;  %v17951_v14 = vcombine.high %v376_v40, %v388_v51  ;;  %v400_v60 = vld [vmem:[#allocation5 + $0x948] sm:$0xff] }
 0x4ff   :  { %v8843_v10 = vadd.f32 %v22952_v3, %v8795_v36  ;;  %v8819_v27 = vmul.f32 0.044715, %v8771_v34  ;;  %v17950_v36 = vcombine.low %v376_v40, %v388_v51  ;;  %v460_v40 = vld [vmem:[#allocation5 + $0xb28] sm:$0xff] }
 0x500   :  { %v8844_v48 = vadd.f32 %v22954_v31, %v8796_v45  ;;  %v8820_v63 = vmul.f32 0.044715, %v8772_v49  ;;  %8317 = vmatpush1.bf16.msra.mxu1 %v17854_v17  ;;  %v412_v17 = vld [vmem:[#allocation5 + $0x9a8] sm:$0xff] }
 0x501   :  { %v8891_v5 = vmul.f32 0.7978846, %v8843_v10  ;;  %v8867_v57 = vadd.f32 %v22958_v20, %v8819_v27  ;;  %8318 = vmatprep.subr.bf16.mxu1 %v17879_v29  ;;  %v17975_v29 = vcombine.high %v400_v60, %v412_v17  ;;  %v424_v49 = vld [vmem:[#allocation5 + $0xa08] sm:$0xff] }
 0x502   :  { %v8892_v12 = vmul.f32 0.7978846, %v8844_v48  ;;  %v8868_v41 = vadd.f32 %v22962_v50, %v8820_v63  ;;  %v8939_v63 = vmul.f32 0.5, %v22952_v3  ;;  %v17998_v3 = vcombine.low %v424_v49, %v436_v56 }
 0x503   :  { %22064 = vtanh.f32 %v8891_v5  ;;  %v8915_v54 = vmul.f32 0.7978846, %v8867_v57  ;;  %v17974_v5 = vcombine.low %v400_v60, %v412_v17  ;;  %v20565_v60 = vld [vmem:[#allocation8 + $0x1234] ss:$24 sps:$4 sm:$0xff]  }
 0x504   :  { %22066 = vtanh.f32 %v8892_v12  ;;  %v8916_v13 = vmul.f32 0.7978846, %v8868_v41  ;;  %8319 = vmatpush1.bf16.msra.mxu1 %v17878_v21  ;;  %v8963_v21 = vmul.f32 0.5, %v22958_v20  ;;  %v8940_v12 = vmul.f32 0.5, %v22954_v31  ;;  %v472_v31 = vld [vmem:[#allocation5 + $0xb88] sm:$0xff] }
 0x505   :  { %22068 = vtanh.f32 %v8915_v54  ;;  %8320 = vmatprep.subr.bf16.mxu1 %v17903_v62  ;;  %v17999_v62 = vcombine.high %v424_v49, %v436_v56  ;;  %v8964_v41 = vmul.f32 0.5, %v22962_v50  ;;  %v484_v17 = vld [vmem:[#allocation5 + $0xbe8] sm:$0xff] }
 0x506   :  { %22070 = vtanh.f32 %v8916_v13  ;;  %v508_v49 = vld [vmem:[#allocation5 + $0xca8] sm:$0xff]  ;;  %v18046_v56 = vcombine.low %v472_v31, %v484_v17 }
 0x508   :  { %8321 = vmatpush1.bf16.msra.mxu1 %v17902_v43 }
 0x509   :  { %8322 = vmatprep.subr.bf16.mxu1 %v17927_v1  ;;  %v448_v1 = vld [vmem:[#allocation5 + $0xac8] sm:$0xff] }
 0x50a   :  { %v18022_v50 = vcombine.low %v448_v1, %v460_v40 }
 0x50c   :  { %8323 = vmatpush1.bf16.msra.mxu1 %v17926_v53  ;;  %v20560_v53 = vld [vmem:[#allocation8 + $0x1200] ss:$24 sps:$4 sm:$0xff]  }
 0x50d   :  { %v22065_v34 = vpop.eup %22064  ;;  %8324 = vmatprep.subr.bf16.mxu1 %v17951_v14  ;;  %v18023_v14 = vcombine.high %v448_v1, %v460_v40  ;;  %v580_v1 = vld [vmem:[#allocation5 + $0xee8] sm:$0xff] }
 0x50e   :  { %v22067_v45 = vpop.eup %22066  ;;  %v9035_v32 = vadd.f32 1.0, %v22065_v34  ;;  %v18047_v34 = vcombine.high %v472_v31, %v484_v17  ;;  %v604_v31 = vld [vmem:[#allocation5 + $0xfa8] sm:$0xff] }
 0x50f   :  { %v22069_v10 = vpop.eup %22068  ;;  %v9036_v27 = vadd.f32 1.0, %v22067_v45  ;;  %v496_v45 = vld [vmem:[#allocation5 + $0xc48] sm:$0xff] }
 0x510   :  { %v22071_v48 = vpop.eup %22070  ;;  %8325 = vmatpush1.bf16.msra.mxu1 %v17950_v36  ;;  %v9059_v57 = vadd.f32 1.0, %v22069_v10  ;;  %v9083_v4 = vmul.f32 %v9035_v32, %v8939_v63  ;;  %v20563_v36 = vld [vmem:[#allocation8 + $0x1230] ss:$24 sps:$4 sm:$0xff]   ;;  %v20566_v32 = vld [vmem:[#allocation8 + $0x1260] ss:$24 sps:$4 sm:$0xff]   ;;  %v18071_v10 = vcombine.high %v496_v45, %v508_v49 }
 0x511   :  { %8326 = vmatprep.subr.bf16.mxu1 %v17975_v29  ;;  %v9060_v33 = vadd.f32 1.0, %v22071_v48  ;;  %v9084_v13 = vmul.f32 %v9036_v27, %v8940_v12  ;;  %v20568_v29 = vld [vmem:[#allocation8 + $0x1264] ss:$24 sps:$4 sm:$0xff]   ;;  %v20571_v27 = vld [vmem:[#allocation8 + $0x1294] ss:$24 sps:$4 sm:$0xff]  }
 0x512   :  { %v9107_v54 = vmul.f32 %v9059_v57, %v8963_v21  ;;  %v520_v48 = vld [vmem:[#allocation5 + $0xd08] sm:$0xff]  ;;  %v18070_v21 = vcombine.low %v496_v45, %v508_v49 }
 0x513   :  { %v9108_v43 = vmul.f32 %v9060_v33, %v8964_v41  ;;  %v532_v63 = vld [vmem:[#allocation5 + $0xd68] sm:$0xff] }
 0x514   :  { %8327 = vmatpush1.bf16.msra.mxu1 %v17974_v5  ;;  %v22980_v51 = vpack.c.bf16 %v9107_v54, %v9083_v4  ;;  %v20569_v5 = vld [vmem:[#allocation8 + $0x1290] ss:$24 sps:$4 sm:$0xff]   ;;  %v18095_v57 = vcombine.high %v520_v48, %v532_v63  ;;  %v18094_v33 = vcombine.low %v520_v48, %v532_v63  ;;  %v20572_v4 = vld [vmem:[#allocation8 + $0x12c0] ss:$24 sps:$4 sm:$0xff]  }
 0x515   :  { %8328 = vmatprep.subr.bf16.mxu1 %v17999_v62  ;;  %v22982_v20 = vpack.c.bf16 %v9108_v43, %v9084_v13  ;;  %v20574_v62 = vld [vmem:[#allocation8 + $0x12c4] ss:$24 sps:$4 sm:$0xff]   ;;  %v544_v12 = vld [vmem:[#allocation5 + $0xdc8] sm:$0xff] }
 0x516   :  { %v556_v41 = vld [vmem:[#allocation5 + $0xe28] sm:$0xff] }
 0x517   :  { %16336 = vmatprep.mubr.bf16.mxu0 %v22982_v20  ;;  %v18119_v54 = vcombine.high %v544_v12, %v556_v41  ;;  %v20577_v13 = vld [vmem:[#allocation8 + $0x12f4] ss:$24 sps:$4 sm:$0xff]   ;;  %v18118_v40 = vcombine.low %v544_v12, %v556_v41 }
 0x518   :  { %8329 = vmatpush1.bf16.msra.mxu1 %v17998_v3  ;;  %16337 = vmatmul.mubr.bf16.vlgmr.msra.gmra.mrb[16].mxu0 %v22980_v51  ;;  %v568_v43 = vld [vmem:[#allocation5 + $0xe88] sm:$0xff] }
 0x519   :  { %16348 = vmatpush1.bf16.msra.mxu0 %v20560_v53  ;;  %16379 = vmatprep.mubr.bf16.mxu0 %v22737_v2  ;;  %v20575_v3 = vld [vmem:[#allocation8 + $0x12f0] ss:$24 sps:$4 sm:$0xff]   ;;  %v18143_v53 = vcombine.high %v568_v43, %v580_v1  ;;  %v18142_v17 = vcombine.low %v568_v43, %v580_v1 }
 0x51a   :  { %8330 = vmatprep.subr.bf16.mxu1 %v18023_v14  ;;  %16349 = vmatprep.subr.bf16.mxu0 %v20565_v60  ;;  %v20580_v14 = vld [vmem:[#allocation8 + $0x1324] ss:$24 sps:$4 sm:$0xff]   ;;  %v592_v60 = vld [vmem:[#allocation5 + $0xf48] sm:$0xff] }
 0x51b   :  { %v628_v45 = vld [vmem:[#allocation5 + $0x1068] sm:$0xff]  ;;  %v18166_v49 = vcombine.low %v592_v60, %v604_v31 }
 0x51c   :  { %8331 = vmatpush1.bf16.msra.mxu1 %v18022_v50  ;;  %v20578_v50 = vld [vmem:[#allocation8 + $0x1320] ss:$24 sps:$4 sm:$0xff]   ;;  %v652_v48 = vld [vmem:[#allocation5 + $0x1128] sm:$0xff] }
 0x51d   :  { %16350 = vmatpush1.bf16.msra.mxu0 %v20563_v36  ;;  %8332 = vmatprep.subr.bf16.mxu1 %v18047_v34  ;;  %v18167_v36 = vcombine.high %v592_v60, %v604_v31  ;;  %v20583_v34 = vld [vmem:[#allocation8 + $0x1354] ss:$24 sps:$4 sm:$0xff]  }
 0x51e   :  { %16351 = vmatprep.subr.bf16.mxu0 %v20568_v29  ;;  %v616_v29 = vld [vmem:[#allocation5 + $0x1008] sm:$0xff] }
 0x51f   :  { %v18190_v63 = vcombine.low %v616_v29, %v628_v45  ;;  %v676_v12 = vld [vmem:[#allocation5 + $0x11e8] sm:$0xff] }
 0x520   :  { %8333 = vmatpush1.bf16.msra.mxu1 %v18046_v56  ;;  %v20581_v56 = vld [vmem:[#allocation8 + $0x1350] ss:$24 sps:$4 sm:$0xff]  }
 0x521   :  { %16352 = vmatpush1.bf16.msra.mxu0 %v20566_v32  ;;  %8345 = vmatprep.subr.bf16.mxu1 %v18071_v10  ;;  %v18191_v32 = vcombine.high %v616_v29, %v628_v45  ;;  %v20586_v10 = vld [vmem:[#allocation8 + $0x1384] ss:$24 sps:$4 sm:$0xff]   ;;  %v700_v43 = vld [vmem:[#allocation5 + $0x12a8] sm:$0xff] }
 0x522   :  { %16353 = vmatprep.subr.bf16.mxu0 %v20571_v27  ;;  %v640_v27 = vld [vmem:[#allocation5 + $0x10c8] sm:$0xff] }
 0x523   :  { %8335 = vmatmul.mubr.bf16.vlgmr.msra.gmra.mrb[24].mxu1 %v22353_v15  ;;  %v18214_v41 = vcombine.low %v640_v27, %v652_v48  ;;  %v724_v60 = vld [vmem:[#allocation5 + $0x1368] sm:$0xff] }
 0x524   :  { %8346 = vmatpush1.bf16.msra.mxu1 %v18070_v21  ;;  %8377 = vmatprep.mubr.bf16.mxu1 %v22355_v25  ;;  %v20584_v21 = vld [vmem:[#allocation8 + $0x1380] ss:$24 sps:$4 sm:$0xff]   ;;  %v748_v29 = vld [vmem:[#allocation5 + $0x1428] sm:$0xff] }
 0x525   :  { %16354 = vmatpush1.bf16.msra.mxu0 %v20569_v5  ;;  %8347 = vmatprep.subr.bf16.mxu1 %v18095_v57  ;;  %v18215_v5 = vcombine.high %v640_v27, %v652_v48  ;;  %v20589_v57 = vld [vmem:[#allocation8 + $0x13b4] ss:$24 sps:$4 sm:$0xff]  }
 0x526   :  { %16355 = vmatprep.subr.bf16.mxu0 %v20574_v62  ;;  %v664_v62 = vld [vmem:[#allocation5 + $0x1188] sm:$0xff] }
 0x527   :  { %v18238_v1 = vcombine.low %v664_v62, %v676_v12  ;;  %v772_v27 = vld [vmem:[#allocation5 + $0x14e8] sm:$0xff] }
 0x528   :  { %8348 = vmatpush1.bf16.msra.mxu1 %v18094_v33  ;;  %v20587_v33 = vld [vmem:[#allocation8 + $0x13b0] ss:$24 sps:$4 sm:$0xff]  }
 0x529   :  { %16356 = vmatpush1.bf16.msra.mxu0 %v20572_v4  ;;  %8349 = vmatprep.subr.bf16.mxu1 %v18119_v54  ;;  %v18239_v4 = vcombine.high %v664_v62, %v676_v12  ;;  %v20592_v54 = vld [vmem:[#allocation8 + $0x13e4] ss:$24 sps:$4 sm:$0xff]   ;;  %v796_v62 = vld [vmem:[#allocation5 + $0x15a8] sm:$0xff] }
 0x52a   :  { %16357 = vmatprep.subr.bf16.mxu0 %v20577_v13  ;;  %v688_v13 = vld [vmem:[#allocation5 + $0x1248] sm:$0xff] }
 0x52b   :  { %v18262_v31 = vcombine.low %v688_v13, %v700_v43 }
 0x52c   :  { %8350 = vmatpush1.bf16.msra.mxu1 %v18118_v40  ;;  %v20590_v40 = vld [vmem:[#allocation8 + $0x13e0] ss:$24 sps:$4 sm:$0xff]  }
 0x52d   :  { %16358 = vmatpush1.bf16.msra.mxu0 %v20575_v3  ;;  %8351 = vmatprep.subr.bf16.mxu1 %v18143_v53  ;;  %v18263_v3 = vcombine.high %v688_v13, %v700_v43  ;;  %v20595_v53 = vld [vmem:[#allocation8 + $0x1414] ss:$24 sps:$4 sm:$0xff]  }
 0x52e   :  { %16359 = vmatprep.subr.bf16.mxu0 %v20580_v14  ;;  %v712_v14 = vld [vmem:[#allocation5 + $0x1308] sm:$0xff] }
 0x52f   :  { %v18286_v45 = vcombine.low %v712_v14, %v724_v60  ;;  %v820_v13 = vld [vmem:[#allocation5 + $0x1668] sm:$0xff] }
 0x530   :  { %8352 = vmatpush1.bf16.msra.mxu1 %v18142_v17  ;;  %v20593_v17 = vld [vmem:[#allocation8 + $0x1410] ss:$24 sps:$4 sm:$0xff]  }
 0x531   :  { %16360 = vmatpush1.bf16.msra.mxu0 %v20578_v50  ;;  %8353 = vmatprep.subr.bf16.mxu1 %v18167_v36  ;;  %v18287_v50 = vcombine.high %v712_v14, %v724_v60  ;;  %v20598_v36 = vld [vmem:[#allocation8 + $0x1444] ss:$24 sps:$4 sm:$0xff]  }
 0x532   :  { %16361 = vmatprep.subr.bf16.mxu0 %v20583_v34  ;;  %v736_v34 = vld [vmem:[#allocation5 + $0x13c8] sm:$0xff]  ;;  %v20610_v14 = vld [vmem:[#allocation8 + $0x1504] ss:$24 sps:$4 sm:$0xff]  }
 0x533   :  { %v18310_v48 = vcombine.low %v736_v34, %v748_v29 }
 0x534   :  { %8354 = vmatpush1.bf16.msra.mxu1 %v18166_v49  ;;  %v20596_v49 = vld [vmem:[#allocation8 + $0x1440] ss:$24 sps:$4 sm:$0xff]  }
 0x535   :  { %16362 = vmatpush1.bf16.msra.mxu0 %v20581_v56  ;;  %8355 = vmatprep.subr.bf16.mxu1 %v18191_v32  ;;  %v18311_v56 = vcombine.high %v736_v34, %v748_v29  ;;  %v20601_v32 = vld [vmem:[#allocation8 + $0x1474] ss:$24 sps:$4 sm:$0xff]  }
 0x536   :  { %16363 = vmatprep.subr.bf16.mxu0 %v20586_v10  ;;  %v760_v10 = vld [vmem:[#allocation5 + $0x1488] sm:$0xff] }
 0x537   :  { %v18334_v12 = vcombine.low %v760_v10, %v772_v27  ;;  %v20613_v34 = vld [vmem:[#allocation8 + $0x1534] ss:$24 sps:$4 sm:$0xff]  }
 0x538   :  { %8356 = vmatpush1.bf16.msra.mxu1 %v18190_v63  ;;  %v20599_v63 = vld [vmem:[#allocation8 + $0x1470] ss:$24 sps:$4 sm:$0xff]  }
 0x539   :  { %16364 = vmatpush1.bf16.msra.mxu0 %v20584_v21  ;;  %8357 = vmatprep.subr.bf16.mxu1 %v18215_v5  ;;  %v18335_v21 = vcombine.high %v760_v10, %v772_v27  ;;  %v20604_v5 = vld [vmem:[#allocation8 + $0x14a4] ss:$24 sps:$4 sm:$0xff]  }
 0x53a   :  { %16365 = vmatprep.subr.bf16.mxu0 %v20589_v57  ;;  %v784_v57 = vld [vmem:[#allocation5 + $0x1548] sm:$0xff]  ;;  %v20616_v10 = vld [vmem:[#allocation8 + $0x1564] ss:$24 sps:$4 sm:$0xff]  }
 0x53b   :  { %v18358_v43 = vcombine.low %v784_v57, %v796_v62 }
 0x53c   :  { %8358 = vmatpush1.bf16.msra.mxu1 %v18214_v41  ;;  %v20602_v41 = vld [vmem:[#allocation8 + $0x14a0] ss:$24 sps:$4 sm:$0xff]  }
 0x53d   :  { %16366 = vmatpush1.bf16.msra.mxu0 %v20587_v33  ;;  %8359 = vmatprep.subr.bf16.mxu1 %v18239_v4  ;;  %v18359_v33 = vcombine.high %v784_v57, %v796_v62  ;;  %v20607_v4 = vld [vmem:[#allocation8 + $0x14d4] ss:$24 sps:$4 sm:$0xff]  }
 0x53e   :  { %16367 = vmatprep.subr.bf16.mxu0 %v20592_v54  ;;  %v808_v54 = vld [vmem:[#allocation5 + $0x1608] sm:$0xff] }
 0x53f   :  { %v18382_v60 = vcombine.low %v808_v54, %v820_v13  ;;  %v20619_v57 = vld [vmem:[#allocation8 + $0x1594] ss:$24 sps:$4 sm:$0xff]  }
 0x540   :  { %8360 = vmatpush1.bf16.msra.mxu1 %v18238_v1  ;;  %v20605_v1 = vld [vmem:[#allocation8 + $0x14d0] ss:$24 sps:$4 sm:$0xff]  }
 0x541   :  { %16368 = vmatpush1.bf16.msra.mxu0 %v20590_v40  ;;  %8361 = vmatprep.subr.bf16.mxu1 %v18263_v3  ;;  %v18383_v40 = vcombine.high %v808_v54, %v820_v13  ;;  %v832_v3 = vld [vmem:[#allocation5 + $0x16c8] sm:$0xff]  ;;  %v20622_v54 = vld [vmem:[#allocation8 + $0x15c4] ss:$24 sps:$4 sm:$0xff]  }
 0x542   :  { %16369 = vmatprep.subr.bf16.mxu0 %v20595_v53  ;;  %v844_v53 = vld [vmem:[#allocation5 + $0x1728] sm:$0xff] }
 0x543   :  { %v18406_v29 = vcombine.low %v832_v3, %v844_v53 }
 0x544   :  { %8362 = vmatpush1.bf16.msra.mxu1 %v18262_v31  ;;  %v18407_v31 = vcombine.high %v832_v3, %v844_v53  ;;  %v964_v3 = vld [vmem:[#allocation5 + $0x1ae8] sm:$0xff] }
 0x545   :  { %16370 = vmatpush1.bf16.msra.mxu0 %v20593_v17  ;;  %8363 = vmatprep.subr.bf16.mxu1 %v18287_v50  ;;  %v20608_v17 = vld [vmem:[#allocation8 + $0x1500] ss:$24 sps:$4 sm:$0xff]   ;;  %v856_v50 = vld [vmem:[#allocation5 + $0x1788] sm:$0xff] }
 0x546   :  { %16371 = vmatprep.subr.bf16.mxu0 %v20598_v36  ;;  %v868_v36 = vld [vmem:[#allocation5 + $0x17e8] sm:$0xff] }
 0x547   :  { %v18430_v27 = vcombine.low %v856_v50, %v868_v36  ;;  %v20625_v53 = vld [vmem:[#allocation8 + $0x15f4] ss:$24 sps:$4 sm:$0xff]  }
 0x548   :  { %8364 = vmatpush1.bf16.msra.mxu1 %v18286_v45  ;;  %v18431_v45 = vcombine.high %v856_v50, %v868_v36  ;;  %v988_v50 = vld [vmem:[#allocation5 + $0x1ba8] sm:$0xff]  ;;  %v20628_v36 = vld [vmem:[#allocation8 + $0x1624] ss:$24 sps:$4 sm:$0xff]  }
 0x549   :  { %16372 = vmatpush1.bf16.msra.mxu0 %v20596_v49  ;;  %8365 = vmatprep.subr.bf16.mxu1 %v18311_v56  ;;  %v20611_v49 = vld [vmem:[#allocation8 + $0x1530] ss:$24 sps:$4 sm:$0xff]  }
 0x54a   :  { %16373 = vmatprep.subr.bf16.mxu0 %v20601_v32  ;;  %v880_v56 = vld [vmem:[#allocation5 + $0x1848] sm:$0xff] }
 0x54b   :  { %v892_v32 = vld [vmem:[#allocation5 + $0x18a8] sm:$0xff] }
 0x54c   :  { %8366 = vmatpush1.bf16.msra.mxu1 %v18310_v48  ;;  %v18455_v48 = vcombine.high %v880_v56, %v892_v32  ;;  %v18454_v62 = vcombine.low %v880_v56, %v892_v32  ;;  %v1012_v56 = vld [vmem:[#allocation5 + $0x1c68] sm:$0xff] }
 0x54d   :  { %16374 = vmatpush1.bf16.msra.mxu0 %v20599_v63  ;;  %8367 = vmatprep.subr.bf16.mxu1 %v18335_v21  ;;  %v20614_v63 = vld [vmem:[#allocation8 + $0x1560] ss:$24 sps:$4 sm:$0xff]   ;;  %v904_v21 = vld [vmem:[#allocation5 + $0x1908] sm:$0xff] }
 0x54e   :  { %16375 = vmatprep.subr.bf16.mxu0 %v20604_v5  ;;  %v916_v5 = vld [vmem:[#allocation5 + $0x1968] sm:$0xff] }
 0x54f   :  { %v18478_v13 = vcombine.low %v904_v21, %v916_v5  ;;  %v20631_v32 = vld [vmem:[#allocation8 + $0x1654] ss:$24 sps:$4 sm:$0xff]  }
 0x550   :  { %8368 = vmatpush1.bf16.msra.mxu1 %v18334_v12  ;;  %v18479_v12 = vcombine.high %v904_v21, %v916_v5  ;;  %v1036_v21 = vld [vmem:[#allocation5 + $0x1d28] sm:$0xff]  ;;  %v20634_v5 = vld [vmem:[#allocation8 + $0x1684] ss:$24 sps:$4 sm:$0xff]  }
 0x551   :  { %16376 = vmatpush1.bf16.msra.mxu0 %v20602_v41  ;;  %8369 = vmatprep.subr.bf16.mxu1 %v18359_v33  ;;  %v20617_v41 = vld [vmem:[#allocation8 + $0x1590] ss:$24 sps:$4 sm:$0xff]  }
 0x552   :  { %16377 = vmatprep.subr.bf16.mxu0 %v20607_v4  ;;  %v928_v33 = vld [vmem:[#allocation5 + $0x19c8] sm:$0xff] }
 0x553   :  { %v940_v4 = vld [vmem:[#allocation5 + $0x1a28] sm:$0xff] }
 0x554   :  { %8370 = vmatpush1.bf16.msra.mxu1 %v18358_v43  ;;  %v18503_v43 = vcombine.high %v928_v33, %v940_v4 }
 0x555   :  { %16378 = vmatpush1.bf16.msra.mxu0 %v20605_v1  ;;  %8371 = vmatprep.subr.bf16.mxu1 %v18383_v40  ;;  %v20620_v1 = vld [vmem:[#allocation8 + $0x15c0] ss:$24 sps:$4 sm:$0xff]   ;;  %v952_v40 = vld [vmem:[#allocation5 + $0x1a88] sm:$0xff] }
 0x556   :  { %16390 = vmatprep.subr.bf16.mxu0 %v20610_v14  ;;  %v18502_v14 = vcombine.low %v928_v33, %v940_v4  ;;  %v1060_v33 = vld [vmem:[#allocation5 + $0x1de8] sm:$0xff] }
 0x557   :  { %v20637_v4 = vld [vmem:[#allocation8 + $0x16b4] ss:$24 sps:$4 sm:$0xff]  }
 0x558   :  { %16380 = vmatmul.mubr.bf16.vlgmr.msra.gmra.mrb[16].mxu0 %v22735_v7  ;;  %8372 = vmatpush1.bf16.msra.mxu1 %v18382_v60  ;;  %v18527_v60 = vcombine.high %v952_v40, %v964_v3 }
 0x559   :  { %8373 = vmatprep.subr.bf16.mxu1 %v18407_v31  ;;  %16391 = vmatpush1.bf16.msra.mxu0 %v20608_v17  ;;  %v20623_v31 = vld [vmem:[#allocation8 + $0x15f0] ss:$24 sps:$4 sm:$0xff]  }
 0x55a   :  { %16392 = vmatprep.subr.bf16.mxu0 %v20613_v34  ;;  %v976_v17 = vld [vmem:[#allocation5 + $0x1b48] sm:$0xff]  ;;  %v18526_v34 = vcombine.low %v952_v40, %v964_v3  ;;  %v20640_v3 = vld [vmem:[#allocation8 + $0x16e4] ss:$24 sps:$4 sm:$0xff]  }
 0x55b   :  { %v1084_v40 = vld [vmem:[#allocation5 + $0x1ea8] sm:$0xff] }
 0x55c   :  { %8374 = vmatpush1.bf16.msra.mxu1 %v18406_v29  ;;  %v18551_v29 = vcombine.high %v976_v17, %v988_v50 }
 0x55d   :  { %8375 = vmatprep.subr.bf16.mxu1 %v18431_v45  ;;  %16393 = vmatpush1.bf16.msra.mxu0 %v20611_v49  ;;  %v20626_v45 = vld [vmem:[#allocation8 + $0x1620] ss:$24 sps:$4 sm:$0xff]   ;;  %v1000_v49 = vld [vmem:[#allocation5 + $0x1c08] sm:$0xff] }
 0x55e   :  { %16394 = vmatprep.subr.bf16.mxu0 %v20616_v10  ;;  %v18550_v10 = vcombine.low %v976_v17, %v988_v50  ;;  %v1108_v17 = vld [vmem:[#allocation5 + $0x1f68] sm:$0xff] }
 0x55f   :  { %v20643_v50 = vld [vmem:[#allocation8 + $0x1714] ss:$24 sps:$4 sm:$0xff]  }
 0x560   :  { %8376 = vmatpush1.bf16.msra.mxu1 %v18430_v27  ;;  %v18575_v27 = vcombine.high %v1000_v49, %v1012_v56 }
 0x561   :  { %8388 = vmatprep.subr.bf16.mxu1 %v18455_v48  ;;  %16395 = vmatpush1.bf16.msra.mxu0 %v20614_v63  ;;  %v20629_v48 = vld [vmem:[#allocation8 + $0x1650] ss:$24 sps:$4 sm:$0xff]  }
 0x562   :  { %16396 = vmatprep.subr.bf16.mxu0 %v20619_v57  ;;  %v1024_v63 = vld [vmem:[#allocation5 + $0x1cc8] sm:$0xff]  ;;  %v18574_v57 = vcombine.low %v1000_v49, %v1012_v56  ;;  %v20646_v56 = vld [vmem:[#allocation8 + $0x1744] ss:$24 sps:$4 sm:$0xff]  }
 0x563   :  { %8378 = vmatmul.mubr.bf16.vlgmr.msra.gmra.mrb[24].mxu1 %v22361_v30  ;;  %v1132_v49 = vld [vmem:[#allocation5 + $0x2028] sm:$0xff] }
 0x564   :  { %8389 = vmatpush1.bf16.msra.mxu1 %v18454_v62  ;;  %8420 = vmatprep.mubr.bf16.mxu1 %v22363_v39  ;;  %v18599_v62 = vcombine.high %v1024_v63, %v1036_v21 }
 0x565   :  { %8390 = vmatprep.subr.bf16.mxu1 %v18479_v12  ;;  %16397 = vmatpush1.bf16.msra.mxu0 %v20617_v41  ;;  %v20632_v12 = vld [vmem:[#allocation8 + $0x1680] ss:$24 sps:$4 sm:$0xff]   ;;  %v1048_v41 = vld [vmem:[#allocation5 + $0x1d88] sm:$0xff] }
 0x566   :  { %16398 = vmatprep.subr.bf16.mxu0 %v20622_v54  ;;  %v18598_v54 = vcombine.low %v1024_v63, %v1036_v21  ;;  %v1156_v63 = vld [vmem:[#allocation5 + $0x20e8] sm:$0xff] }
 0x567   :  { %v20649_v21 = vld [vmem:[#allocation8 + $0x1774] ss:$24 sps:$4 sm:$0xff]  }
 0x568   :  { %8391 = vmatpush1.bf16.msra.mxu1 %v18478_v13  ;;  %v18623_v13 = vcombine.high %v1048_v41, %v1060_v33 }
 0x569   :  { %8392 = vmatprep.subr.bf16.mxu1 %v18503_v43  ;;  %16399 = vmatpush1.bf16.msra.mxu0 %v20620_v1  ;;  %v20635_v43 = vld [vmem:[#allocation8 + $0x16b0] ss:$24 sps:$4 sm:$0xff]  }
 0x56a   :  { %16400 = vmatprep.subr.bf16.mxu0 %v20625_v53  ;;  %v1072_v1 = vld [vmem:[#allocation5 + $0x1e48] sm:$0xff]  ;;  %v18622_v53 = vcombine.low %v1048_v41, %v1060_v33  ;;  %v20652_v33 = vld [vmem:[#allocation8 + $0x17a4] ss:$24 sps:$4 sm:$0xff]  }
 0x56b   :  { %v1180_v41 = vld [vmem:[#allocation5 + $0x21a8] sm:$0xff] }
 0x56c   :  { %8393 = vmatpush1.bf16.msra.mxu1 %v18502_v14  ;;  %v18647_v14 = vcombine.high %v1072_v1, %v1084_v40 }
 0x56d   :  { %8394 = vmatprep.subr.bf16.mxu1 %v18527_v60  ;;  %16401 = vmatpush1.bf16.msra.mxu0 %v20623_v31  ;;  %v20638_v60 = vld [vmem:[#allocation8 + $0x16e0] ss:$24 sps:$4 sm:$0xff]   ;;  %v1096_v31 = vld [vmem:[#allocation5 + $0x1f08] sm:$0xff] }
 0x56e   :  { %16402 = vmatprep.subr.bf16.mxu0 %v20628_v36  ;;  %v18646_v36 = vcombine.low %v1072_v1, %v1084_v40  ;;  %v1204_v1 = vld [vmem:[#allocation5 + $0x2268] sm:$0xff] }
 0x56f   :  { %v20655_v40 = vld [vmem:[#allocation8 + $0x17d4] ss:$24 sps:$4 sm:$0xff]  }
 0x570   :  { %8395 = vmatpush1.bf16.msra.mxu1 %v18526_v34  ;;  %v18671_v34 = vcombine.high %v1096_v31, %v1108_v17 }
 0x571   :  { %8396 = vmatprep.subr.bf16.mxu1 %v18551_v29  ;;  %16403 = vmatpush1.bf16.msra.mxu0 %v20626_v45  ;;  %v20641_v29 = vld [vmem:[#allocation8 + $0x1710] ss:$24 sps:$4 sm:$0xff]  }
 0x572   :  { %16404 = vmatprep.subr.bf16.mxu0 %v20631_v32  ;;  %v1120_v45 = vld [vmem:[#allocation5 + $0x1fc8] sm:$0xff]  ;;  %v18670_v32 = vcombine.low %v1096_v31, %v1108_v17  ;;  %v20658_v17 = vld [vmem:[#allocation8 + $0x1804] ss:$24 sps:$4 sm:$0xff]  }
 0x573   :  { %v1228_v31 = vld [vmem:[#allocation5 + $0x2328] sm:$0xff] }
 0x574   :  { %8397 = vmatpush1.bf16.msra.mxu1 %v18550_v10  ;;  %v18695_v10 = vcombine.high %v1120_v45, %v1132_v49 }
 0x575   :  { %8398 = vmatprep.subr.bf16.mxu1 %v18575_v27  ;;  %16405 = vmatpush1.bf16.msra.mxu0 %v20629_v48  ;;  %v20644_v27 = vld [vmem:[#allocation8 + $0x1740] ss:$24 sps:$4 sm:$0xff]   ;;  %v1144_v48 = vld [vmem:[#allocation5 + $0x2088] sm:$0xff] }
 0x576   :  { %16406 = vmatprep.subr.bf16.mxu0 %v20634_v5  ;;  %v18694_v5 = vcombine.low %v1120_v45, %v1132_v49 }
 0x578   :  { %8399 = vmatpush1.bf16.msra.mxu1 %v18574_v57  ;;  %v18719_v57 = vcombine.high %v1144_v48, %v1156_v63 }
 0x579   :  { %8400 = vmatprep.subr.bf16.mxu1 %v18599_v62  ;;  %16407 = vmatpush1.bf16.msra.mxu0 %v20632_v12  ;;  %v20647_v62 = vld [vmem:[#allocation8 + $0x1770] ss:$24 sps:$4 sm:$0xff]  }
 0x57a   :  { %16408 = vmatprep.subr.bf16.mxu0 %v20637_v4  ;;  %v1168_v12 = vld [vmem:[#allocation5 + $0x2148] sm:$0xff]  ;;  %v18718_v4 = vcombine.low %v1144_v48, %v1156_v63  ;;  %v138_v48 = vld [vmem:[#allocation5 + $0x118] sm:$0xff] }
 0x57b   :  { %v150_v63 = vld [vmem:[#allocation5 + $0x178] sm:$0xff] }
 0x57c   :  { %8401 = vmatpush1.bf16.msra.mxu1 %v18598_v54  ;;  %v18743_v54 = vcombine.high %v1168_v12, %v1180_v41 }
 0x57d   :  { %8402 = vmatprep.subr.bf16.mxu1 %v18623_v13  ;;  %16409 = vmatpush1.bf16.msra.mxu0 %v20635_v43  ;;  %v20650_v13 = vld [vmem:[#allocation8 + $0x17a0] ss:$24 sps:$4 sm:$0xff]   ;;  %v1192_v43 = vld [vmem:[#allocation5 + $0x2208] sm:$0xff] }
 0x57e   :  { %16410 = vmatprep.subr.bf16.mxu0 %v20640_v3  ;;  %v18742_v3 = vcombine.low %v1168_v12, %v1180_v41  ;;  %v17714_v12 = vcombine.low %v138_v48, %v150_v63 }
 0x580   :  { %8403 = vmatpush1.bf16.msra.mxu1 %v18622_v53  ;;  %v18767_v53 = vcombine.high %v1192_v43, %v1204_v1 }
 0x581   :  { %8404 = vmatprep.subr.bf16.mxu1 %v18647_v14  ;;  %16411 = vmatpush1.bf16.msra.mxu0 %v20638_v60  ;;  %v20653_v14 = vld [vmem:[#allocation8 + $0x17d0] ss:$24 sps:$4 sm:$0xff]  }
 0x582   :  { %16412 = vmatprep.subr.bf16.mxu0 %v20643_v50  ;;  %v1216_v60 = vld [vmem:[#allocation5 + $0x22c8] sm:$0xff]  ;;  %v18766_v50 = vcombine.low %v1192_v43, %v1204_v1  ;;  %v210_v43 = vld [vmem:[#allocation5 + $0x358] sm:$0xff] }
 0x583   :  { %v18790_v45 = vcombine.low %v1216_v60, %v1228_v31  ;;  %v222_v1 = vld [vmem:[#allocation5 + $0x3b8] sm:$0xff] }
 0x584   :  { %8405 = vmatpush1.bf16.msra.mxu1 %v18646_v36  ;;  %v18791_v36 = vcombine.high %v1216_v60, %v1228_v31  ;;  %v17786_v60 = vcombine.low %v210_v43, %v222_v1  ;;  %v258_v31 = vld [vmem:[#allocation5 + $0x4d8] sm:$0xff] }
 0x585   :  { %8406 = vmatprep.subr.bf16.mxu1 %v18671_v34  ;;  %16413 = vmatpush1.bf16.msra.mxu0 %v20641_v29  ;;  %v1240_v34 = vld [vmem:[#allocation5 + $0x2388] sm:$0xff] }
 0x586   :  { %16414 = vmatprep.subr.bf16.mxu0 %v20646_v56  ;;  %v1252_v29 = vld [vmem:[#allocation5 + $0x23e8] sm:$0xff]  ;;  %v114_v56 = vld [vmem:[#allocation5 + $0x58] sm:$0xff] }
 0x587   :  { %v18815_v49 = vcombine.high %v1240_v34, %v1252_v29 }
 0x588   :  { %8407 = vmatpush1.bf16.msra.mxu1 %v18670_v32  ;;  %v126_v32 = vld [vmem:[#allocation5 + $0xb8] sm:$0xff] }
 0x589   :  { %8408 = vmatprep.subr.bf16.mxu1 %v18695_v10  ;;  %16415 = vmatpush1.bf16.msra.mxu0 %v20644_v27  ;;  %v18814_v10 = vcombine.low %v1240_v34, %v1252_v29  ;;  %v17691_v27 = vcombine.high %v114_v56, %v126_v32 }
 0x58a   :  { %16416 = vmatprep.subr.bf16.mxu0 %v20649_v21  ;;  %v17690_v21 = vcombine.low %v114_v56, %v126_v32  ;;  %v294_v56 = vld [vmem:[#allocation5 + $0x5f8] sm:$0xff] }
 0x58c   :  { %8409 = vmatpush1.bf16.msra.mxu1 %v18694_v5  ;;  %v17715_v5 = vcombine.high %v138_v48, %v150_v63 }
 0x58d   :  { %8410 = vmatprep.subr.bf16.mxu1 %v18719_v57  ;;  %16417 = vmatpush1.bf16.msra.mxu0 %v20647_v62  ;;  %v162_v57 = vld [vmem:[#allocation5 + $0x1d8] sm:$0xff] }
 0x58e   :  { %16418 = vmatprep.subr.bf16.mxu0 %v20652_v33  ;;  %v174_v62 = vld [vmem:[#allocation5 + $0x238] sm:$0xff] }
 0x58f   :  { %v17739_v41 = vcombine.high %v162_v57, %v174_v62  ;;  %v186_v33 = vld [vmem:[#allocation5 + $0x298] sm:$0xff] }
 0x590   :  { %8411 = vmatpush1.bf16.msra.mxu1 %v18718_v4  ;;  %v198_v4 = vld [vmem:[#allocation5 + $0x2f8] sm:$0xff] }
 0x591   :  { %8412 = vmatprep.subr.bf16.mxu1 %v18743_v54  ;;  %16419 = vmatpush1.bf16.msra.mxu0 %v20650_v13  ;;  %v17738_v54 = vcombine.low %v162_v57, %v174_v62  ;;  %v17763_v13 = vcombine.high %v186_v33, %v198_v4 }
 0x592   :  { %16420 = vmatprep.subr.bf16.mxu0 %v20655_v40  ;;  %v17762_v40 = vcombine.low %v186_v33, %v198_v4  ;;  %v318_v33 = vld [vmem:[#allocation5 + $0x6b8] sm:$0xff] }
 0x594   :  { %8413 = vmatpush1.bf16.msra.mxu1 %v18742_v3  ;;  %v17787_v3 = vcombine.high %v210_v43, %v222_v1 }
 0x595   :  { %8414 = vmatprep.subr.bf16.mxu1 %v18767_v53  ;;  %16421 = vmatpush1.bf16.msra.mxu0 %v20653_v14  ;;  %v234_v53 = vld [vmem:[#allocation5 + $0x418] sm:$0xff] }
 0x596   :  { %16433 = vmatprep.subr.bf16.mxu0 %v20658_v17  ;;  %v246_v14 = vld [vmem:[#allocation5 + $0x478] sm:$0xff] }
 0x597   :  { %v270_v17 = vld [vmem:[#allocation5 + $0x538] sm:$0xff]  ;;  %v17810_v34 = vcombine.low %v234_v53, %v246_v14 }
 0x598   :  { %8415 = vmatpush1.bf16.msra.mxu1 %v18766_v50  ;;  %v1320_v50 = vrot.slane %v22946_v52, %v22855_v0  ;;  %v17835_v29 = vcombine.high %v258_v31, %v270_v17  ;;  %v17834_v63 = vcombine.low %v258_v31, %v270_v17  ;;  %v342_v31 = vld [vmem:[#allocation5 + $0x778] sm:$0xff] }
 0x599   :  { %8416 = vmatprep.subr.bf16.mxu1 %v18791_v36  ;;  %v1324_v36 = vrot.slane %v22946_v52, %v22858_v24 }
 0x59c   :  { %8417 = vmatpush1.bf16.msra.mxu1 %v18790_v45 }
 0x59d   :  { %8418 = vmatprep.subr.bf16.mxu1 %v18815_v49  ;;  %v282_v49 = vld [vmem:[#allocation5 + $0x598] sm:$0xff] }
 0x59e   :  { %v17859_v57 = vcombine.high %v282_v49, %v294_v56  ;;  %v17858_v1 = vcombine.low %v282_v49, %v294_v56 }
 0x5a0   :  { %8419 = vmatpush1.bf16.msra.mxu1 %v18814_v10 }
 0x5a1   :  { %8560 = vmatprep.subr.bf16.mxu1 %v17691_v27 }
 0x5a3   :  { %8421 = vmatmul.mubr.bf16.vlgmr.msra.gmra.mrb[24].mxu1 %v22369_v44 }
 0x5a4   :  { %8561 = vmatpush1.bf16.msra.mxu1 %v17690_v21  ;;  %8592 = vmatprep.mubr.bf16.mxu1 %v22349_v58  ;;  %v17811_v58 = vcombine.high %v234_v53, %v246_v14 }
 0x5a5   :  { %8562 = vmatprep.subr.bf16.mxu1 %v17715_v5 }
 0x5a8   :  { %8563 = vmatpush1.bf16.msra.mxu1 %v17714_v12 }
 0x5a9   :  { %8564 = vmatprep.subr.bf16.mxu1 %v17739_v41  ;;  %v306_v41 = vld [vmem:[#allocation5 + $0x658] sm:$0xff] }
 0x5aa   :  { %v17883_v53 = vcombine.high %v306_v41, %v318_v33 }
 0x5ac   :  { %8565 = vmatpush1.bf16.msra.mxu1 %v17738_v54 }
 0x5ad   :  { %8566 = vmatprep.subr.bf16.mxu1 %v17763_v13 }
 0x5b0   :  { %8567 = vmatpush1.bf16.msra.mxu1 %v17762_v40 }
 0x5b1   :  { %8568 = vmatprep.subr.bf16.mxu1 %v17787_v3 }
 0x5b4   :  { %8569 = vmatpush1.bf16.msra.mxu1 %v17786_v60 }
 0x5b5   :  { %8570 = vmatprep.subr.bf16.mxu1 %v17811_v58  ;;  %v330_v58 = vld [vmem:[#allocation5 + $0x718] sm:$0xff] }
 0x5b6   :  { %v8164_v45 = vpop.f32.mrb[20].mxu1  ;;  %v17907_v56 = vcombine.high %v330_v58, %v342_v31 }
 0x5b7   :  { %v22998_v32 = vadd.f32 %v8164_v45, %v1320_v50  ;;  %v8166_v10 = vpop.f32.mrb[21].mxu1 }
 0x5b8   :  { %v23000_v27 = vadd.f32 %v8166_v10, %v1324_v36  ;;  %v8168_v48 = vpop.f32.mrb[22].mxu1  ;;  %8571 = vmatpush1.bf16.msra.mxu1 %v17810_v34 }
 0x5b9   :  { %v8703_v21 = vmul.f32 %v22998_v32, %v22998_v32  ;;  %v23004_v5 = vadd.f32 %v8168_v48, %v1320_v50  ;;  %v8170_v52 = vpop.f32.mrb[23].mxu1  ;;  %8572 = vmatprep.subr.bf16.mxu1 %v17835_v29  ;;  %v17882_v29 = vcombine.low %v306_v41, %v318_v33  ;;  %v378_v41 = vld [vmem:[#allocation5 + $0x898] sm:$0xff] }
 0x5ba   :  { %v8704_v62 = vmul.f32 %v23000_v27, %v23000_v27  ;;  %v23008_v12 = vadd.f32 %v8170_v52, %v1324_v36  ;;  %v390_v33 = vld [vmem:[#allocation5 + $0x8f8] sm:$0xff] }
 0x5bb   :  { %v8751_v4 = vmul.f32 %v22998_v32, %v8703_v21  ;;  %v8727_v54 = vmul.f32 %v23004_v5, %v23004_v5  ;;  %v366_v21 = vld [vmem:[#allocation5 + $0x838] sm:$0xff] }
 0x5bc   :  { %v8752_v13 = vmul.f32 %v23000_v27, %v8704_v62  ;;  %v8728_v43 = vmul.f32 %v23008_v12, %v23008_v12  ;;  %8573 = vmatpush1.bf16.msra.mxu1 %v17834_v63  ;;  %v354_v63 = vld [vmem:[#allocation5 + $0x7d8] sm:$0xff]  ;;  %v17906_v62 = vcombine.low %v330_v58, %v342_v31 }
 0x5bd   :  { %v8799_v40 = vmul.f32 0.044715, %v8751_v4  ;;  %v8775_v3 = vmul.f32 %v23004_v5, %v8727_v54  ;;  %8574 = vmatprep.subr.bf16.mxu1 %v17859_v57  ;;  %v17931_v4 = vcombine.high %v354_v63, %v366_v21  ;;  %v17930_v54 = vcombine.low %v354_v63, %v366_v21  ;;  %v438_v58 = vld [vmem:[#allocation5 + $0xa78] sm:$0xff] }
 0x5be   :  { %v8800_v14 = vmul.f32 0.044715, %v8752_v13  ;;  %v8776_v60 = vmul.f32 %v23008_v12, %v8728_v43  ;;  %v17955_v13 = vcombine.high %v378_v41, %v390_v33  ;;  %v402_v43 = vld [vmem:[#allocation5 + $0x958] sm:$0xff] }
 0x5bf   :  { %v8847_v17 = vadd.f32 %v22998_v32, %v8799_v40  ;;  %v8823_v50 = vmul.f32 0.044715, %v8775_v3  ;;  %v17954_v40 = vcombine.low %v378_v41, %v390_v33  ;;  %v462_v41 = vld [vmem:[#allocation5 + $0xb38] sm:$0xff] }
 0x5c0   :  { %v8848_v36 = vadd.f32 %v23000_v27, %v8800_v14  ;;  %v8824_v34 = vmul.f32 0.044715, %v8776_v60  ;;  %8575 = vmatpush1.bf16.msra.mxu1 %v17858_v1  ;;  %v414_v1 = vld [vmem:[#allocation5 + $0x9b8] sm:$0xff] }
 0x5c1   :  { %v8895_v45 = vmul.f32 0.7978846, %v8847_v17  ;;  %v8871_v49 = vadd.f32 %v23004_v5, %v8823_v50  ;;  %8576 = vmatprep.subr.bf16.mxu1 %v17883_v53  ;;  %v17979_v53 = vcombine.high %v402_v43, %v414_v1  ;;  %v426_v60 = vld [vmem:[#allocation5 + $0xa18] sm:$0xff] }
 0x5c2   :  { %v8896_v10 = vmul.f32 0.7978846, %v8848_v36  ;;  %v8872_v48 = vadd.f32 %v23008_v12, %v8824_v34  ;;  %v8943_v34 = vmul.f32 0.5, %v22998_v32  ;;  %v18002_v32 = vcombine.low %v426_v60, %v438_v58 }
 0x5c3   :  { %22072 = vtanh.f32 %v8895_v45  ;;  %v8919_v52 = vmul.f32 0.7978846, %v8871_v49  ;;  %v17978_v45 = vcombine.low %v402_v43, %v414_v1  ;;  %v20661_v43 = vld [vmem:[#allocation8 + $0x1834] ss:$24 sps:$4 sm:$0xff]   ;;  %v486_v1 = vld [vmem:[#allocation5 + $0xbf8] sm:$0xff] }
 0x5c4   :  { %22074 = vtanh.f32 %v8896_v10  ;;  %v8920_v57 = vmul.f32 0.7978846, %v8872_v48  ;;  %8577 = vmatpush1.bf16.msra.mxu1 %v17882_v29  ;;  %v8967_v29 = vmul.f32 0.5, %v23004_v5  ;;  %v8944_v10 = vmul.f32 0.5, %v23000_v27  ;;  %v474_v27 = vld [vmem:[#allocation5 + $0xb98] sm:$0xff] }
 0x5c5   :  { %22076 = vtanh.f32 %v8919_v52  ;;  %8578 = vmatprep.subr.bf16.mxu1 %v17907_v56  ;;  %v18003_v56 = vcombine.high %v426_v60, %v438_v58  ;;  %v8968_v48 = vmul.f32 0.5, %v23008_v12  ;;  %v510_v60 = vld [vmem:[#allocation5 + $0xcb8] sm:$0xff]  ;;  %v18050_v58 = vcombine.low %v474_v27, %v486_v1 }
 0x5c6   :  { %22078 = vtanh.f32 %v8920_v57 }
 0x5c8   :  { %8579 = vmatpush1.bf16.msra.mxu1 %v17906_v62 }
 0x5c9   :  { %8580 = vmatprep.subr.bf16.mxu1 %v17931_v4  ;;  %v450_v4 = vld [vmem:[#allocation5 + $0xad8] sm:$0xff] }
 0x5ca   :  { %v18026_v12 = vcombine.low %v450_v4, %v462_v41 }
 0x5cc   :  { %8581 = vmatpush1.bf16.msra.mxu1 %v17930_v54  ;;  %v20656_v54 = vld [vmem:[#allocation8 + $0x1800] ss:$24 sps:$4 sm:$0xff]  }
 0x5cd   :  { %v22073_v3 = vpop.eup %22072  ;;  %8582 = vmatprep.subr.bf16.mxu1 %v17955_v13  ;;  %v18027_v13 = vcombine.high %v450_v4, %v462_v41  ;;  %v582_v4 = vld [vmem:[#allocation5 + $0xef8] sm:$0xff] }
 0x5ce   :  { %v22075_v14 = vpop.eup %22074  ;;  %v9039_v31 = vadd.f32 1.0, %v22073_v3  ;;  %v18051_v3 = vcombine.high %v474_v27, %v486_v1  ;;  %v20674_v27 = vld [vmem:[#allocation8 + $0x1920] ss:$24 sps:$4 sm:$0xff]  }
 0x5cf   :  { %v22077_v17 = vpop.eup %22076  ;;  %v9040_v50 = vadd.f32 1.0, %v22075_v14  ;;  %v498_v14 = vld [vmem:[#allocation5 + $0xc58] sm:$0xff] }
 0x5d0   :  { %v22079_v36 = vpop.eup %22078  ;;  %8583 = vmatpush1.bf16.msra.mxu1 %v17954_v40  ;;  %v9063_v49 = vadd.f32 1.0, %v22077_v17  ;;  %v9087_v21 = vmul.f32 %v9039_v31, %v8943_v34  ;;  %v20659_v40 = vld [vmem:[#allocation8 + $0x1830] ss:$24 sps:$4 sm:$0xff]   ;;  %v20662_v31 = vld [vmem:[#allocation8 + $0x1860] ss:$24 sps:$4 sm:$0xff]   ;;  %v18075_v17 = vcombine.high %v498_v14, %v510_v60 }
 0x5d1   :  { %8584 = vmatprep.subr.bf16.mxu1 %v17979_v53  ;;  %v9064_v63 = vadd.f32 1.0, %v22079_v36  ;;  %v9088_v57 = vmul.f32 %v9040_v50, %v8944_v10  ;;  %v20664_v53 = vld [vmem:[#allocation8 + $0x1864] ss:$24 sps:$4 sm:$0xff]   ;;  %v20667_v50 = vld [vmem:[#allocation8 + $0x1894] ss:$24 sps:$4 sm:$0xff]  }
 0x5d2   :  { %v9111_v52 = vmul.f32 %v9063_v49, %v8967_v29  ;;  %v522_v36 = vld [vmem:[#allocation5 + $0xd18] sm:$0xff]  ;;  %v18074_v29 = vcombine.low %v498_v14, %v510_v60  ;;  %v20677_v14 = vld [vmem:[#allocation8 + $0x1950] ss:$24 sps:$4 sm:$0xff]  }
 0x5d3   :  { %v9112_v62 = vmul.f32 %v9064_v63, %v8968_v48  ;;  %v534_v34 = vld [vmem:[#allocation5 + $0xd78] sm:$0xff] }
 0x5d4   :  { %8585 = vmatpush1.bf16.msra.mxu1 %v17978_v45  ;;  %v23026_v33 = vpack.c.bf16 %v9111_v52, %v9087_v21  ;;  %v20665_v45 = vld [vmem:[#allocation8 + $0x1890] ss:$24 sps:$4 sm:$0xff]   ;;  %v18099_v49 = vcombine.high %v522_v36, %v534_v34  ;;  %v546_v10 = vld [vmem:[#allocation5 + $0xdd8] sm:$0xff]  ;;  %v18098_v63 = vcombine.low %v522_v36, %v534_v34 }
 0x5d5   :  { %8586 = vmatprep.subr.bf16.mxu1 %v18003_v56  ;;  %v23028_v5 = vpack.c.bf16 %v9112_v62, %v9088_v57  ;;  %v20670_v56 = vld [vmem:[#allocation8 + $0x18c4] ss:$24 sps:$4 sm:$0xff]   ;;  %v20668_v21 = vld [vmem:[#allocation8 + $0x18c0] ss:$24 sps:$4 sm:$0xff]   ;;  %v20673_v57 = vld [vmem:[#allocation8 + $0x18f4] ss:$24 sps:$4 sm:$0xff]  }
 0x5d6   :  { %v558_v48 = vld [vmem:[#allocation5 + $0xe38] sm:$0xff] }
 0x5d7   :  { %16422 = vmatprep.mubr.bf16.mxu0 %v23028_v5  ;;  %v18123_v52 = vcombine.high %v546_v10, %v558_v48  ;;  %v570_v62 = vld [vmem:[#allocation5 + $0xe98] sm:$0xff]  ;;  %v18122_v41 = vcombine.low %v546_v10, %v558_v48  ;;  %v20683_v10 = vld [vmem:[#allocation8 + $0x19b0] ss:$24 sps:$4 sm:$0xff]  }
 0x5d8   :  { %8587 = vmatpush1.bf16.msra.mxu1 %v18002_v32  ;;  %16423 = vmatmul.mubr.bf16.vlgmr.msra.gmra.mrb[16].mxu0 %v23026_v33  ;;  %v20671_v32 = vld [vmem:[#allocation8 + $0x18f0] ss:$24 sps:$4 sm:$0xff]   ;;  %v20680_v36 = vld [vmem:[#allocation8 + $0x1980] ss:$24 sps:$4 sm:$0xff]  }
 0x5d9   :  { %16434 = vmatpush1.bf16.msra.mxu0 %v20656_v54  ;;  %16465 = vmatprep.mubr.bf16.mxu0 %v22841_v47  ;;  %v18147_v54 = vcombine.high %v570_v62, %v582_v4 }
 0x5da   :  { %8588 = vmatprep.subr.bf16.mxu1 %v18027_v13  ;;  %16435 = vmatprep.subr.bf16.mxu0 %v20661_v43  ;;  %v594_v13 = vld [vmem:[#allocation5 + $0xf58] sm:$0xff] }
 0x5db   :  { %v606_v43 = vld [vmem:[#allocation5 + $0xfb8] sm:$0xff] }
 0x5dc   :  { %8589 = vmatpush1.bf16.msra.mxu1 %v18026_v12  ;;  %v18171_v1 = vcombine.high %v594_v13, %v606_v43  ;;  %v20679_v12 = vld [vmem:[#allocation8 + $0x1954] ss:$24 sps:$4 sm:$0xff]  }
 0x5dd   :  { %16436 = vmatpush1.bf16.msra.mxu0 %v20659_v40  ;;  %8590 = vmatprep.subr.bf16.mxu1 %v18051_v3  ;;  %v618_v40 = vld [vmem:[#allocation5 + $0x1018] sm:$0xff] }
 0x5de   :  { %16437 = vmatprep.subr.bf16.mxu0 %v20664_v53  ;;  %v630_v3 = vld [vmem:[#allocation5 + $0x1078] sm:$0xff]  ;;  %v18170_v53 = vcombine.low %v594_v13, %v606_v43  ;;  %v20689_v13 = vld [vmem:[#allocation8 + $0x1a10] ss:$24 sps:$4 sm:$0xff]  }
 0x5df   :  { %v18195_v60 = vcombine.high %v618_v40, %v630_v3 }
 0x5e0   :  { %8591 = vmatpush1.bf16.msra.mxu1 %v18050_v58  ;;  %v20682_v58 = vld [vmem:[#allocation8 + $0x1984] ss:$24 sps:$4 sm:$0xff]  }
 0x5e1   :  { %16438 = vmatpush1.bf16.msra.mxu0 %v20662_v31  ;;  %8603 = vmatprep.subr.bf16.mxu1 %v18075_v17  ;;  %v642_v31 = vld [vmem:[#allocation5 + $0x10d8] sm:$0xff] }
 0x5e2   :  { %16439 = vmatprep.subr.bf16.mxu0 %v20667_v50  ;;  %v654_v17 = vld [vmem:[#allocation5 + $0x1138] sm:$0xff]  ;;  %v18194_v50 = vcombine.low %v618_v40, %v630_v3 }
 0x5e3   :  { %8593 = vmatmul.mubr.bf16.vlgmr.msra.gmra.mrb[28].mxu1 %v22353_v15  ;;  %v20676_v15 = vld [vmem:[#allocation8 + $0x1924] ss:$24 sps:$4 sm:$0xff]   ;;  %v18219_v34 = vcombine.high %v642_v31, %v654_v17  ;;  %v20692_v40 = vld [vmem:[#allocation8 + $0x1a40] ss:$24 sps:$4 sm:$0xff]  }
 0x5e4   :  { %8604 = vmatpush1.bf16.msra.mxu1 %v18074_v29  ;;  %8635 = vmatprep.mubr.bf16.mxu1 %v22355_v25  ;;  %v18146_v25 = vcombine.low %v570_v62, %v582_v4  ;;  %v20685_v29 = vld [vmem:[#allocation8 + $0x19b4] ss:$24 sps:$4 sm:$0xff]   ;;  %v20686_v62 = vld [vmem:[#allocation8 + $0x19e0] ss:$24 sps:$4 sm:$0xff]  }
 0x5e5   :  { %16440 = vmatpush1.bf16.msra.mxu0 %v20665_v45  ;;  %8605 = vmatprep.subr.bf16.mxu1 %v18099_v49  ;;  %v666_v45 = vld [vmem:[#allocation5 + $0x1198] sm:$0xff] }
 0x5e6   :  { %16441 = vmatprep.subr.bf16.mxu0 %v20670_v56  ;;  %v678_v49 = vld [vmem:[#allocation5 + $0x11f8] sm:$0xff]  ;;  %v18218_v56 = vcombine.low %v642_v31, %v654_v17  ;;  %v20695_v31 = vld [vmem:[#allocation8 + $0x1a70] ss:$24 sps:$4 sm:$0xff]  }
 0x5e7   :  { %v18243_v48 = vcombine.high %v666_v45, %v678_v49 }
 0x5e8   :  { %8606 = vmatpush1.bf16.msra.mxu1 %v18098_v63  ;;  %v20688_v63 = vld [vmem:[#allocation8 + $0x19e4] ss:$24 sps:$4 sm:$0xff]  }
 0x5e9   :  { %16442 = vmatpush1.bf16.msra.mxu0 %v20668_v21  ;;  %8607 = vmatprep.subr.bf16.mxu1 %v18123_v52  ;;  %v690_v21 = vld [vmem:[#allocation5 + $0x1258] sm:$0xff] }
 0x5ea   :  { %16443 = vmatprep.subr.bf16.mxu0 %v20673_v57  ;;  %v702_v52 = vld [vmem:[#allocation5 + $0x12b8] sm:$0xff]  ;;  %v18242_v57 = vcombine.low %v666_v45, %v678_v49 }
 0x5eb   :  { %v18267_v4 = vcombine.high %v690_v21, %v702_v52  ;;  %v20698_v45 = vld [vmem:[#allocation8 + $0x1aa0] ss:$24 sps:$4 sm:$0xff]  }
 0x5ec   :  { %8608 = vmatpush1.bf16.msra.mxu1 %v18122_v41  ;;  %v20691_v41 = vld [vmem:[#allocation8 + $0x1a14] ss:$24 sps:$4 sm:$0xff]  }
 0x5ed   :  { %16444 = vmatpush1.bf16.msra.mxu0 %v20671_v32  ;;  %8609 = vmatprep.subr.bf16.mxu1 %v18147_v54  ;;  %v714_v32 = vld [vmem:[#allocation5 + $0x1318] sm:$0xff] }
 0x5ee   :  { %16445 = vmatprep.subr.bf16.mxu0 %v20676_v15  ;;  %v726_v54 = vld [vmem:[#allocation5 + $0x1378] sm:$0xff]  ;;  %v18266_v15 = vcombine.low %v690_v21, %v702_v52  ;;  %v20701_v21 = vld [vmem:[#allocation8 + $0x1ad0] ss:$24 sps:$4 sm:$0xff]  }
 0x5ef   :  { %v18291_v43 = vcombine.high %v714_v32, %v726_v54 }
 0x5f0   :  { %8610 = vmatpush1.bf16.msra.mxu1 %v18146_v25  ;;  %v20694_v25 = vld [vmem:[#allocation8 + $0x1a44] ss:$24 sps:$4 sm:$0xff]  }
 0x5f1   :  { %16446 = vmatpush1.bf16.msra.mxu0 %v20674_v27  ;;  %8611 = vmatprep.subr.bf16.mxu1 %v18171_v1  ;;  %v738_v27 = vld [vmem:[#allocation5 + $0x13d8] sm:$0xff] }
 0x5f2   :  { %16447 = vmatprep.subr.bf16.mxu0 %v20679_v12  ;;  %v750_v1 = vld [vmem:[#allocation5 + $0x1438] sm:$0xff]  ;;  %v18290_v12 = vcombine.low %v714_v32, %v726_v54 }
 0x5f3   :  { %v18315_v3 = vcombine.high %v738_v27, %v750_v1  ;;  %v20704_v54 = vld [vmem:[#allocation8 + $0x1b00] ss:$24 sps:$4 sm:$0xff]  }
 0x5f4   :  { %8612 = vmatpush1.bf16.msra.mxu1 %v18170_v53  ;;  %v20697_v53 = vld [vmem:[#allocation8 + $0x1a74] ss:$24 sps:$4 sm:$0xff]  }
 0x5f5   :  { %16448 = vmatpush1.bf16.msra.mxu0 %v20677_v14  ;;  %8613 = vmatprep.subr.bf16.mxu1 %v18195_v60  ;;  %v762_v14 = vld [vmem:[#allocation5 + $0x1498] sm:$0xff] }
 0x5f6   :  { %16449 = vmatprep.subr.bf16.mxu0 %v20682_v58  ;;  %v774_v60 = vld [vmem:[#allocation5 + $0x14f8] sm:$0xff]  ;;  %v18314_v58 = vcombine.low %v738_v27, %v750_v1  ;;  %v20707_v1 = vld [vmem:[#allocation8 + $0x1b30] ss:$24 sps:$4 sm:$0xff]  }
 0x5f7   :  { %v18339_v17 = vcombine.high %v762_v14, %v774_v60 }
 0x5f8   :  { %8614 = vmatpush1.bf16.msra.mxu1 %v18194_v50  ;;  %v20700_v50 = vld [vmem:[#allocation8 + $0x1aa4] ss:$24 sps:$4 sm:$0xff]  }
 0x5f9   :  { %16450 = vmatpush1.bf16.msra.mxu0 %v20680_v36  ;;  %8615 = vmatprep.subr.bf16.mxu1 %v18219_v34  ;;  %v786_v36 = vld [vmem:[#allocation5 + $0x1558] sm:$0xff] }
 0x5fa   :  { %16451 = vmatprep.subr.bf16.mxu0 %v20685_v29  ;;  %v798_v34 = vld [vmem:[#allocation5 + $0x15b8] sm:$0xff]  ;;  %v18338_v29 = vcombine.low %v762_v14, %v774_v60 }
 0x5fb   :  { %v18363_v49 = vcombine.high %v786_v36, %v798_v34  ;;  %v20710_v60 = vld [vmem:[#allocation8 + $0x1b60] ss:$24 sps:$4 sm:$0xff]  }
 0x5fc   :  { %8616 = vmatpush1.bf16.msra.mxu1 %v18218_v56  ;;  %v20703_v56 = vld [vmem:[#allocation8 + $0x1ad4] ss:$24 sps:$4 sm:$0xff]  }
 0x5fd   :  { %16452 = vmatpush1.bf16.msra.mxu0 %v20683_v10  ;;  %8617 = vmatprep.subr.bf16.mxu1 %v18243_v48  ;;  %v810_v10 = vld [vmem:[#allocation5 + $0x1618] sm:$0xff] }
 0x5fe   :  { %16453 = vmatprep.subr.bf16.mxu0 %v20688_v63  ;;  %v822_v48 = vld [vmem:[#allocation5 + $0x1678] sm:$0xff]  ;;  %v18362_v63 = vcombine.low %v786_v36, %v798_v34  ;;  %v20713_v34 = vld [vmem:[#allocation8 + $0x1b90] ss:$24 sps:$4 sm:$0xff]  }
 0x5ff   :  { %v18387_v52 = vcombine.high %v810_v10, %v822_v48 }
 0x600   :  { %8618 = vmatpush1.bf16.msra.mxu1 %v18242_v57  ;;  %v834_v57 = vld [vmem:[#allocation5 + $0x16d8] sm:$0xff] }
 0x601   :  { %16454 = vmatpush1.bf16.msra.mxu0 %v20686_v62  ;;  %8619 = vmatprep.subr.bf16.mxu1 %v18267_v4  ;;  %v846_v62 = vld [vmem:[#allocation5 + $0x1738] sm:$0xff] }
 0x602   :  { %16455 = vmatprep.subr.bf16.mxu0 %v20691_v41  ;;  %v20706_v4 = vld [vmem:[#allocation8 + $0x1b04] ss:$24 sps:$4 sm:$0xff]   ;;  %v18386_v41 = vcombine.low %v810_v10, %v822_v48  ;;  %v18411_v32 = vcombine.high %v834_v57, %v846_v62  ;;  %v20719_v48 = vld [vmem:[#allocation8 + $0x1bc0] ss:$24 sps:$4 sm:$0xff]  }
 0x604   :  { %8620 = vmatpush1.bf16.msra.mxu1 %v18266_v15  ;;  %v858_v15 = vld [vmem:[#allocation5 + $0x1798] sm:$0xff] }
 0x605   :  { %16456 = vmatpush1.bf16.msra.mxu0 %v20689_v13  ;;  %8621 = vmatprep.subr.bf16.mxu1 %v18291_v43  ;;  %v870_v13 = vld [vmem:[#allocation5 + $0x17f8] sm:$0xff]  ;;  %v20709_v43 = vld [vmem:[#allocation8 + $0x1b34] ss:$24 sps:$4 sm:$0xff]  }
 0x606   :  { %16457 = vmatprep.subr.bf16.mxu0 %v20694_v25  ;;  %v18410_v25 = vcombine.low %v834_v57, %v846_v62  ;;  %v18435_v27 = vcombine.high %v858_v15, %v870_v13 }
 0x608   :  { %8622 = vmatpush1.bf16.msra.mxu1 %v18290_v12  ;;  %v882_v12 = vld [vmem:[#allocation5 + $0x1858] sm:$0xff] }
 0x609   :  { %16458 = vmatpush1.bf16.msra.mxu0 %v20692_v40  ;;  %8623 = vmatprep.subr.bf16.mxu1 %v18315_v3  ;;  %v894_v40 = vld [vmem:[#allocation5 + $0x18b8] sm:$0xff] }
 0x60a   :  { %16459 = vmatprep.subr.bf16.mxu0 %v20697_v53  ;;  %v20712_v3 = vld [vmem:[#allocation8 + $0x1b64] ss:$24 sps:$4 sm:$0xff]   ;;  %v18434_v53 = vcombine.low %v858_v15, %v870_v13  ;;  %v18459_v14 = vcombine.high %v882_v12, %v894_v40  ;;  %v20731_v15 = vld [vmem:[#allocation8 + $0x1c20] ss:$24 sps:$4 sm:$0xff]  }
 0x60b   :  { %v1002_v13 = vld [vmem:[#allocation5 + $0x1c18] sm:$0xff] }
 0x60c   :  { %8624 = vmatpush1.bf16.msra.mxu1 %v18314_v58  ;;  %v906_v58 = vld [vmem:[#allocation5 + $0x1918] sm:$0xff] }
 0x60d   :  { %16460 = vmatpush1.bf16.msra.mxu0 %v20695_v31  ;;  %8625 = vmatprep.subr.bf16.mxu1 %v18339_v17  ;;  %v918_v31 = vld [vmem:[#allocation5 + $0x1978] sm:$0xff]  ;;  %v20715_v17 = vld [vmem:[#allocation8 + $0x1b94] ss:$24 sps:$4 sm:$0xff]  }
 0x60e   :  { %16461 = vmatprep.subr.bf16.mxu0 %v20700_v50  ;;  %v18458_v50 = vcombine.low %v882_v12, %v894_v40  ;;  %v18483_v36 = vcombine.high %v906_v58, %v918_v31  ;;  %v20737_v12 = vld [vmem:[#allocation8 + $0x1c50] ss:$24 sps:$4 sm:$0xff]   ;;  %v1026_v40 = vld [vmem:[#allocation5 + $0x1cd8] sm:$0xff] }
 0x610   :  { %8626 = vmatpush1.bf16.msra.mxu1 %v18338_v29  ;;  %v930_v29 = vld [vmem:[#allocation5 + $0x19d8] sm:$0xff] }
 0x611   :  { %16462 = vmatpush1.bf16.msra.mxu0 %v20698_v45  ;;  %8627 = vmatprep.subr.bf16.mxu1 %v18363_v49  ;;  %v942_v45 = vld [vmem:[#allocation5 + $0x1a38] sm:$0xff] }
 0x612   :  { %16463 = vmatprep.subr.bf16.mxu0 %v20703_v56  ;;  %v20721_v49 = vld [vmem:[#allocation8 + $0x1bc4] ss:$24 sps:$4 sm:$0xff]   ;;  %v18482_v56 = vcombine.low %v906_v58, %v918_v31  ;;  %v18507_v10 = vcombine.high %v930_v29, %v942_v45  ;;  %v18506_v57 = vcombine.low %v930_v29, %v942_v45  ;;  %v20743_v58 = vld [vmem:[#allocation8 + $0x1c80] ss:$24 sps:$4 sm:$0xff]   ;;  %v20749_v29 = vld [vmem:[#allocation8 + $0x1cb0] ss:$24 sps:$4 sm:$0xff]  }
 0x613   :  { %v1050_v31 = vld [vmem:[#allocation5 + $0x1d98] sm:$0xff] }
 0x614   :  { %8628 = vmatpush1.bf16.msra.mxu1 %v18362_v63  ;;  %v954_v63 = vld [vmem:[#allocation5 + $0x1a98] sm:$0xff] }
 0x615   :  { %16464 = vmatpush1.bf16.msra.mxu0 %v20701_v21  ;;  %8629 = vmatprep.subr.bf16.mxu1 %v18387_v52  ;;  %v966_v21 = vld [vmem:[#allocation5 + $0x1af8] sm:$0xff]  ;;  %v20727_v52 = vld [vmem:[#allocation8 + $0x1bf4] ss:$24 sps:$4 sm:$0xff]  }
 0x616   :  { %16476 = vmatprep.subr.bf16.mxu0 %v20706_v4  ;;  %v18531_v62 = vcombine.high %v954_v63, %v966_v21  ;;  %v20725_v4 = vld [vmem:[#allocation8 + $0x1bf0] ss:$24 sps:$4 sm:$0xff]   ;;  %v1074_v45 = vld [vmem:[#allocation5 + $0x1e58] sm:$0xff] }
 0x618   :  { %16466 = vmatmul.mubr.bf16.vlgmr.msra.gmra.mrb[16].mxu0 %v22839_v55  ;;  %8630 = vmatpush1.bf16.msra.mxu1 %v18386_v41  ;;  %v978_v41 = vld [vmem:[#allocation5 + $0x1b58] sm:$0xff] }
 0x619   :  { %8631 = vmatprep.subr.bf16.mxu1 %v18411_v32  ;;  %16477 = vmatpush1.bf16.msra.mxu0 %v20704_v54  ;;  %v20733_v32 = vld [vmem:[#allocation8 + $0x1c24] ss:$24 sps:$4 sm:$0xff]  }
 0x61a   :  { %16478 = vmatprep.subr.bf16.mxu0 %v20709_v43  ;;  %v1014_v43 = vld [vmem:[#allocation5 + $0x1c78] sm:$0xff] }
 0x61c   :  { %8632 = vmatpush1.bf16.msra.mxu1 %v18410_v25  ;;  %v20739_v25 = vld [vmem:[#allocation8 + $0x1c54] ss:$24 sps:$4 sm:$0xff]  }
 0x61d   :  { %8633 = vmatprep.subr.bf16.mxu1 %v18435_v27  ;;  %16479 = vmatpush1.bf16.msra.mxu0 %v20707_v1  ;;  %v18579_v1 = vcombine.high %v1002_v13, %v1014_v43 }
 0x61e   :  { %16480 = vmatprep.subr.bf16.mxu0 %v20712_v3  ;;  %v1038_v3 = vld [vmem:[#allocation5 + $0x1d38] sm:$0xff] }
 0x620   :  { %8634 = vmatpush1.bf16.msra.mxu1 %v18434_v53  ;;  %v20745_v53 = vld [vmem:[#allocation8 + $0x1c84] ss:$24 sps:$4 sm:$0xff]  }
 0x621   :  { %8646 = vmatprep.subr.bf16.mxu1 %v18459_v14  ;;  %16481 = vmatpush1.bf16.msra.mxu0 %v20710_v60  ;;  %v18578_v14 = vcombine.low %v1002_v13, %v1014_v43  ;;  %v18603_v60 = vcombine.high %v1026_v40, %v1038_v3  ;;  %v20767_v13 = vld [vmem:[#allocation8 + $0x1d40] ss:$24 sps:$4 sm:$0xff]  }
 0x622   :  { %16482 = vmatprep.subr.bf16.mxu0 %v20715_v17  ;;  %v1062_v17 = vld [vmem:[#allocation5 + $0x1df8] sm:$0xff] }
 0x623   :  { %8636 = vmatmul.mubr.bf16.vlgmr.msra.gmra.mrb[28].mxu1 %v22361_v30  ;;  %v990_v30 = vld [vmem:[#allocation5 + $0x1bb8] sm:$0xff] }
 0x624   :  { %8647 = vmatpush1.bf16.msra.mxu1 %v18458_v50  ;;  %8678 = vmatprep.mubr.bf16.mxu1 %v22363_v39  ;;  %v18530_v39 = vcombine.low %v954_v63, %v966_v21  ;;  %v18555_v54 = vcombine.high %v978_v41, %v990_v30  ;;  %v18554_v27 = vcombine.low %v978_v41, %v990_v30  ;;  %v20751_v50 = vld [vmem:[#allocation8 + $0x1cb4] ss:$24 sps:$4 sm:$0xff]   ;;  %v20755_v63 = vld [vmem:[#allocation8 + $0x1ce0] ss:$24 sps:$4 sm:$0xff]   ;;  %v20761_v41 = vld [vmem:[#allocation8 + $0x1d10] ss:$24 sps:$4 sm:$0xff]  }
 0x625   :  { %8648 = vmatprep.subr.bf16.mxu1 %v18483_v36  ;;  %16483 = vmatpush1.bf16.msra.mxu0 %v20713_v34  ;;  %v18602_v36 = vcombine.low %v1026_v40, %v1038_v3  ;;  %v18627_v34 = vcombine.high %v1050_v31, %v1062_v17  ;;  %v1098_v21 = vld [vmem:[#allocation5 + $0x1f18] sm:$0xff]  ;;  %v20773_v40 = vld [vmem:[#allocation8 + $0x1d70] ss:$24 sps:$4 sm:$0xff]  }
 0x626   :  { %16484 = vmatprep.subr.bf16.mxu0 %v20721_v49  ;;  %v1086_v49 = vld [vmem:[#allocation5 + $0x1eb8] sm:$0xff] }
 0x627   :  { %v1122_v30 = vld [vmem:[#allocation5 + $0x1fd8] sm:$0xff] }
 0x628   :  { %8649 = vmatpush1.bf16.msra.mxu1 %v18482_v56  ;;  %v20757_v56 = vld [vmem:[#allocation8 + $0x1ce4] ss:$24 sps:$4 sm:$0xff]  }
 0x629   :  { %8650 = vmatprep.subr.bf16.mxu1 %v18507_v10  ;;  %16485 = vmatpush1.bf16.msra.mxu0 %v20719_v48  ;;  %v18626_v10 = vcombine.low %v1050_v31, %v1062_v17  ;;  %v18651_v48 = vcombine.high %v1074_v45, %v1086_v49  ;;  %v1146_v43 = vld [vmem:[#allocation5 + $0x2098] sm:$0xff] }
 0x62a   :  { %16486 = vmatprep.subr.bf16.mxu0 %v20727_v52  ;;  %v1110_v52 = vld [vmem:[#allocation5 + $0x1f78] sm:$0xff] }
 0x62b   :  { %v1170_v3 = vld [vmem:[#allocation5 + $0x2158] sm:$0xff] }
 0x62c   :  { %8651 = vmatpush1.bf16.msra.mxu1 %v18506_v57  ;;  %v20763_v57 = vld [vmem:[#allocation8 + $0x1d14] ss:$24 sps:$4 sm:$0xff]   ;;  %v20779_v31 = vld [vmem:[#allocation8 + $0x1da0] ss:$24 sps:$4 sm:$0xff]  }
 0x62d   :  { %8652 = vmatprep.subr.bf16.mxu1 %v18531_v62  ;;  %16487 = vmatpush1.bf16.msra.mxu0 %v20725_v4  ;;  %v18650_v62 = vcombine.low %v1074_v45, %v1086_v49  ;;  %v18675_v4 = vcombine.high %v1098_v21, %v1110_v52  ;;  %v1194_v17 = vld [vmem:[#allocation5 + $0x2218] sm:$0xff]  ;;  %v20785_v45 = vld [vmem:[#allocation8 + $0x1dd0] ss:$24 sps:$4 sm:$0xff]  }
 0x62e   :  { %16488 = vmatprep.subr.bf16.mxu0 %v20733_v32  ;;  %v1134_v32 = vld [vmem:[#allocation5 + $0x2038] sm:$0xff] }
 0x62f   :  { %v1218_v49 = vld [vmem:[#allocation5 + $0x22d8] sm:$0xff] }
 0x630   :  { %8653 = vmatpush1.bf16.msra.mxu1 %v18530_v39  ;;  %v20769_v39 = vld [vmem:[#allocation8 + $0x1d44] ss:$24 sps:$4 sm:$0xff]  }
 0x631   :  { %8654 = vmatprep.subr.bf16.mxu1 %v18555_v54  ;;  %16489 = vmatpush1.bf16.msra.mxu0 %v20731_v15  ;;  %v18674_v54 = vcombine.low %v1098_v21, %v1110_v52  ;;  %v18699_v15 = vcombine.high %v1122_v30, %v1134_v32  ;;  %v1242_v21 = vld [vmem:[#allocation5 + $0x2398] sm:$0xff] }
 0x632   :  { %16490 = vmatprep.subr.bf16.mxu0 %v20739_v25  ;;  %v1158_v25 = vld [vmem:[#allocation5 + $0x20f8] sm:$0xff] }
 0x633   :  { %v1254_v52 = vld [vmem:[#allocation5 + $0x23f8] sm:$0xff] }
 0x634   :  { %8655 = vmatpush1.bf16.msra.mxu1 %v18554_v27  ;;  %v20775_v27 = vld [vmem:[#allocation8 + $0x1d74] ss:$24 sps:$4 sm:$0xff]  }
 0x635   :  { %8656 = vmatprep.subr.bf16.mxu1 %v18579_v1  ;;  %16491 = vmatpush1.bf16.msra.mxu0 %v20737_v12  ;;  %v18698_v1 = vcombine.low %v1122_v30, %v1134_v32  ;;  %v18723_v12 = vcombine.high %v1146_v43, %v1158_v25  ;;  %v20716_v30 = vld [vmem:[#allocation8 + $0x8] ss:$24 sps:$4 sm:$0xff]   ;;  %v20724_v32 = vld [vmem:[#allocation8 + $0x3c] ss:$24 sps:$4 sm:$0xff]  }
 0x636   :  { %16492 = vmatprep.subr.bf16.mxu0 %v20745_v53  ;;  %v1182_v53 = vld [vmem:[#allocation5 + $0x21b8] sm:$0xff] }
 0x638   :  { %8657 = vmatpush1.bf16.msra.mxu1 %v18578_v14  ;;  %v20781_v14 = vld [vmem:[#allocation8 + $0x1da4] ss:$24 sps:$4 sm:$0xff]  }
 0x639   :  { %8658 = vmatprep.subr.bf16.mxu1 %v18603_v60  ;;  %16493 = vmatpush1.bf16.msra.mxu0 %v20743_v58  ;;  %v18722_v60 = vcombine.low %v1146_v43, %v1158_v25  ;;  %v18747_v58 = vcombine.high %v1170_v3, %v1182_v53  ;;  %v20734_v43 = vld [vmem:[#allocation8 + $0x98] ss:$24 sps:$4 sm:$0xff]   ;;  %v20742_v25 = vld [vmem:[#allocation8 + $0xcc] ss:$24 sps:$4 sm:$0xff]  }
 0x63a   :  { %16494 = vmatprep.subr.bf16.mxu0 %v20751_v50  ;;  %v1206_v50 = vld [vmem:[#allocation5 + $0x2278] sm:$0xff] }
 0x63c   :  { %8659 = vmatpush1.bf16.msra.mxu1 %v18602_v36  ;;  %v20787_v36 = vld [vmem:[#allocation8 + $0x1dd4] ss:$24 sps:$4 sm:$0xff]  }
 0x63d   :  { %8660 = vmatprep.subr.bf16.mxu1 %v18627_v34  ;;  %16495 = vmatpush1.bf16.msra.mxu0 %v20749_v29  ;;  %v18746_v34 = vcombine.low %v1170_v3, %v1182_v53  ;;  %v18771_v29 = vcombine.high %v1194_v17, %v1206_v50  ;;  %v20746_v3 = vld [vmem:[#allocation8 + $0xf8] ss:$24 sps:$4 sm:$0xff]   ;;  %v20754_v53 = vld [vmem:[#allocation8 + $0x12c] ss:$24 sps:$4 sm:$0xff]  }
 0x63e   :  { %16496 = vmatprep.subr.bf16.mxu0 %v20757_v56  ;;  %v1230_v56 = vld [vmem:[#allocation5 + $0x2338] sm:$0xff] }
 0x640   :  { %8661 = vmatpush1.bf16.msra.mxu1 %v18626_v10  ;;  %v20793_v10 = vld [vmem:[#allocation8 + $0x1e04] ss:$24 sps:$4 sm:$0xff]  }
 0x641   :  { %8662 = vmatprep.subr.bf16.mxu1 %v18651_v48  ;;  %16497 = vmatpush1.bf16.msra.mxu0 %v20755_v63  ;;  %v18770_v48 = vcombine.low %v1194_v17, %v1206_v50  ;;  %v18795_v63 = vcombine.high %v1218_v49, %v1230_v56  ;;  %v20752_v50 = vld [vmem:[#allocation8 + $0x128] ss:$24 sps:$4 sm:$0xff]  }
 0x642   :  { %16498 = vmatprep.subr.bf16.mxu0 %v20763_v57  ;;  %v18794_v57 = vcombine.low %v1218_v49, %v1230_v56 }
 0x644   :  { %8663 = vmatpush1.bf16.msra.mxu1 %v18650_v62  ;;  %v18819_v62 = vcombine.high %v1242_v21, %v1254_v52 }
 0x645   :  { %8664 = vmatprep.subr.bf16.mxu1 %v18675_v4  ;;  %16499 = vmatpush1.bf16.msra.mxu0 %v20761_v41  ;;  %v18818_v4 = vcombine.low %v1242_v21, %v1254_v52  ;;  %v20718_v41 = vld [vmem:[#allocation8 + $0xc] ss:$24 sps:$4 sm:$0xff]   ;;  %v20758_v52 = vld [vmem:[#allocation8 + $0x158] ss:$24 sps:$4 sm:$0xff]  }
 0x646   :  { %16500 = vmatprep.subr.bf16.mxu0 %v20769_v39  ;;  %v20722_v39 = vld [vmem:[#allocation8 + $0x38] ss:$24 sps:$4 sm:$0xff]  }
 0x648   :  { %8665 = vmatpush1.bf16.msra.mxu1 %v18674_v54  ;;  %v20730_v54 = vld [vmem:[#allocation8 + $0x6c] ss:$24 sps:$4 sm:$0xff]  }
 0x649   :  { %8666 = vmatprep.subr.bf16.mxu1 %v18699_v15  ;;  %16501 = vmatpush1.bf16.msra.mxu0 %v20767_v13  ;;  %v20728_v15 = vld [vmem:[#allocation8 + $0x68] ss:$24 sps:$4 sm:$0xff]   ;;  %v20736_v13 = vld [vmem:[#allocation8 + $0x9c] ss:$24 sps:$4 sm:$0xff]  }
 0x64a   :  { %16502 = vmatprep.subr.bf16.mxu0 %v20775_v27  ;;  %v20740_v27 = vld [vmem:[#allocation8 + $0xc8] ss:$24 sps:$4 sm:$0xff]  }
 0x64c   :  { %8667 = vmatpush1.bf16.msra.mxu1 %v18698_v1  ;;  %v20748_v1 = vld [vmem:[#allocation8 + $0xfc] ss:$24 sps:$4 sm:$0xff]  }
 0x64d   :  { %8668 = vmatprep.subr.bf16.mxu1 %v18723_v12  ;;  %16503 = vmatpush1.bf16.msra.mxu0 %v20773_v40  ;;  %v23040_v12 = vld [vmem:[#allocation7 + $0x10] sm:$0xff] }
 0x64e   :  { %16504 = vmatprep.subr.bf16.mxu0 %v20781_v14  ;;  %v1340_v40 = vrot.slane %v23040_v12, %v22571_v18 }
 0x650   :  { %8669 = vmatpush1.bf16.msra.mxu1 %v18722_v60 }
 0x651   :  { %8670 = vmatprep.subr.bf16.mxu1 %v18747_v58  ;;  %16505 = vmatpush1.bf16.msra.mxu0 %v20779_v31 }
 0x652   :  { %16506 = vmatprep.subr.bf16.mxu0 %v20787_v36 }
 0x654   :  { %8671 = vmatpush1.bf16.msra.mxu1 %v18746_v34 }
 0x655   :  { %8672 = vmatprep.subr.bf16.mxu1 %v18771_v29  ;;  %16507 = vmatpush1.bf16.msra.mxu0 %v20785_v45  ;;  %v20760_v45 = vld [vmem:[#allocation8 + $0x15c] ss:$24 sps:$4 sm:$0xff]  }
 0x656   :  { %16519 = vmatprep.subr.bf16.mxu0 %v20793_v10 }
 0x658   :  { %8673 = vmatpush1.bf16.msra.mxu1 %v18770_v48 }
 0x659   :  { %8674 = vmatprep.subr.bf16.mxu1 %v18795_v63 }
 0x65c   :  { %8675 = vmatpush1.bf16.msra.mxu1 %v18794_v57 }
 0x65d   :  { %8676 = vmatprep.subr.bf16.mxu1 %v18819_v62 }
 0x660   :  { %8677 = vmatpush1.bf16.msra.mxu1 %v18818_v4  ;;  %v20766_v4 = vld [vmem:[#allocation8 + $0x18c] ss:$24 sps:$4 sm:$0xff]  }
 0x661   :  { %16605 = vmatprep.subr.bf16.mxu1 %v20718_v41 }
 0x663   :  { %8679 = vmatmul.mubr.bf16.vlgmr.msra.gmra.mrb[28].mxu1 %v22369_v44  ;;  %v1336_v44 = vrot.slane %v23040_v12, %v22568_v9 }
 0x664   :  { %16606 = vmatpush1.bf16.msra.mxu1 %v20716_v30  ;;  %16637 = vmatprep.mubr.bf16.mxu1 %v22547_v8 }
 0x665   :  { %16607 = vmatprep.subr.bf16.mxu1 %v20724_v32 }
 0x668   :  { %16608 = vmatpush1.bf16.msra.mxu1 %v20722_v39 }
 0x669   :  { %16609 = vmatprep.subr.bf16.mxu1 %v20730_v54 }
 0x66c   :  { %16610 = vmatpush1.bf16.msra.mxu1 %v20728_v15 }
 0x66d   :  { %16611 = vmatprep.subr.bf16.mxu1 %v20736_v13  ;;  %v20764_v13 = vld [vmem:[#allocation8 + $0x188] ss:$24 sps:$4 sm:$0xff]  }
 0x670   :  { %16612 = vmatpush1.bf16.msra.mxu1 %v20734_v43 }
 0x671   :  { %16613 = vmatprep.subr.bf16.mxu1 %v20742_v25 }
 0x674   :  { %16614 = vmatpush1.bf16.msra.mxu1 %v20740_v27  ;;  %v20772_v27 = vld [vmem:[#allocation8 + $0x1bc] ss:$24 sps:$4 sm:$0xff]  }
 0x675   :  { %16615 = vmatprep.subr.bf16.mxu1 %v20748_v1 }
 0x676   :  { %v8422_v14 = vpop.f32.mrb[24].mxu1 }
 0x677   :  { %v20008_v60 = vadd.f32 %v8422_v14, %v1336_v44  ;;  %v8424_v58 = vpop.f32.mrb[25].mxu1  ;;  %v20778_v14 = vld [vmem:[#allocation8 + $0x1ec] ss:$24 sps:$4 sm:$0xff]  }
 0x678   :  { %v23046_v31 = vadd.f32 %v8424_v58, %v1340_v40  ;;  %v8426_v17 = vpop.f32.mrb[26].mxu1  ;;  %16616 = vmatpush1.bf16.msra.mxu1 %v20746_v3  ;;  %v20776_v58 = vld [vmem:[#allocation8 + $0x1e8] ss:$24 sps:$4 sm:$0xff]  }
 0x679   :  { %v8707_v36 = vmul.f32 %v20008_v60, %v20008_v60  ;;  %v20010_v34 = vadd.f32 %v8426_v17, %v1336_v44  ;;  %v8428_v29 = vpop.f32.mrb[27].mxu1  ;;  %16617 = vmatprep.subr.bf16.mxu1 %v20754_v53  ;;  %v20770_v53 = vld [vmem:[#allocation8 + $0x1b8] ss:$24 sps:$4 sm:$0xff]   ;;  %v20784_v17 = vld [vmem:[#allocation8 + $0x21c] ss:$24 sps:$4 sm:$0xff]  }
 0x67a   :  { %v8708_v49 = vmul.f32 %v23046_v31, %v23046_v31  ;;  %v20011_v56 = vadd.f32 %v8428_v29, %v1340_v40  ;;  %v20790_v29 = vld [vmem:[#allocation8 + $0x24c] ss:$24 sps:$4 sm:$0xff]  }
 0x67b   :  { %v8755_v10 = vmul.f32 %v20008_v60, %v8707_v36  ;;  %v8731_v48 = vmul.f32 %v20010_v34, %v20010_v34 }
 0x67c   :  { %v8756_v63 = vmul.f32 %v23046_v31, %v8708_v49  ;;  %v8732_v21 = vmul.f32 %v20011_v56, %v20011_v56  ;;  %16618 = vmatpush1.bf16.msra.mxu1 %v20752_v50  ;;  %v20782_v50 = vld [vmem:[#allocation8 + $0x218] ss:$24 sps:$4 sm:$0xff]  }
 0x67d   :  { %v8803_v57 = vmul.f32 0.044715, %v8755_v10  ;;  %v8779_v62 = vmul.f32 %v20010_v34, %v8731_v48  ;;  %16619 = vmatprep.subr.bf16.mxu1 %v20760_v45 }
 0x67e   :  { %v8804_v41 = vmul.f32 0.044715, %v8756_v63  ;;  %v8780_v30 = vmul.f32 %v20011_v56, %v8732_v21  ;;  %v8947_v21 = vmul.f32 0.5, %v20008_v60 }
 0x67f   :  { %v8851_v32 = vadd.f32 %v20008_v60, %v8803_v57  ;;  %v8827_v39 = vmul.f32 0.044715, %v8779_v62  ;;  %v20788_v57 = vld [vmem:[#allocation8 + $0x248] ss:$24 sps:$4 sm:$0xff]  }
 0x680   :  { %v8852_v54 = vadd.f32 %v23046_v31, %v8804_v41  ;;  %v8828_v15 = vmul.f32 0.044715, %v8780_v30  ;;  %16620 = vmatpush1.bf16.msra.mxu1 %v20758_v52  ;;  %v8971_v52 = vmul.f32 0.5, %v20010_v34  ;;  %v8972_v41 = vmul.f32 0.5, %v20011_v56  ;;  %v20791_v60 = vld [vmem:[#allocation8 + $0x1e00] ss:$24 sps:$4 sm:$0xff]  }
 0x681   :  { %v8899_v43 = vmul.f32 0.7978846, %v8851_v32  ;;  %v8875_v25 = vadd.f32 %v20010_v34, %v8827_v39  ;;  %16621 = vmatprep.subr.bf16.mxu1 %v20766_v4  ;;  %v8948_v4 = vmul.f32 0.5, %v23046_v31  ;;  %v20796_v32 = vld [vmem:[#allocation8 + $0x27c] ss:$24 sps:$4 sm:$0xff]  }
 0x682   :  { %v8900_v1 = vmul.f32 0.7978846, %v8852_v54  ;;  %v8876_v44 = vadd.f32 %v20011_v56, %v8828_v15  ;;  %v20799_v34 = vld [vmem:[#allocation8 + $0x1e34] ss:$24 sps:$4 sm:$0xff]   ;;  %v20800_v31 = vld [vmem:[#allocation8 + $0x2a8] ss:$24 sps:$4 sm:$0xff]  }
 0x683   :  { %22080 = vtanh.f32 %v8899_v43  ;;  %v8923_v40 = vmul.f32 0.7978846, %v8875_v25  ;;  %v20794_v43 = vld [vmem:[#allocation8 + $0x278] ss:$24 sps:$4 sm:$0xff]  }
 0x684   :  { %22082 = vtanh.f32 %v8900_v1  ;;  %v8924_v3 = vmul.f32 0.7978846, %v8876_v44  ;;  %16622 = vmatpush1.bf16.msra.mxu1 %v20764_v13  ;;  %v20802_v1 = vld [vmem:[#allocation8 + $0x2ac] ss:$24 sps:$4 sm:$0xff]   ;;  %v20797_v56 = vld [vmem:[#allocation8 + $0x1e30] ss:$24 sps:$4 sm:$0xff]  }
 0x685   :  { %22084 = vtanh.f32 %v8923_v40  ;;  %16623 = vmatprep.subr.bf16.mxu1 %v20772_v27  ;;  %v20808_v44 = vld [vmem:[#allocation8 + $0x2dc] ss:$24 sps:$4 sm:$0xff]  }
 0x686   :  { %22086 = vtanh.f32 %v8924_v3  ;;  %v20805_v40 = vld [vmem:[#allocation8 + $0x1e64] ss:$24 sps:$4 sm:$0xff]   ;;  %v20806_v3 = vld [vmem:[#allocation8 + $0x2d8] ss:$24 sps:$4 sm:$0xff]  }
 0x688   :  { %16624 = vmatpush1.bf16.msra.mxu1 %v20770_v53  ;;  %v20803_v53 = vld [vmem:[#allocation8 + $0x1e60] ss:$24 sps:$4 sm:$0xff]  }
 0x689   :  { %16625 = vmatprep.subr.bf16.mxu1 %v20778_v14  ;;  %v20814_v14 = vld [vmem:[#allocation8 + $0x30c] ss:$24 sps:$4 sm:$0xff]  }
 0x68c   :  { %16626 = vmatpush1.bf16.msra.mxu1 %v20776_v58  ;;  %v20811_v58 = vld [vmem:[#allocation8 + $0x1e94] ss:$24 sps:$4 sm:$0xff]  }
 0x68d   :  { %v22081_v36 = vpop.eup %22080  ;;  %16627 = vmatprep.subr.bf16.mxu1 %v20784_v17  ;;  %v20812_v17 = vld [vmem:[#allocation8 + $0x308] ss:$24 sps:$4 sm:$0xff]  }
 0x68e   :  { %v22083_v45 = vpop.eup %22082  ;;  %v9043_v49 = vadd.f32 1.0, %v22081_v36  ;;  %v20820_v36 = vld [vmem:[#allocation8 + $0x33c] ss:$24 sps:$4 sm:$0xff]  }
 0x68f   :  { %v22085_v10 = vpop.eup %22084  ;;  %v9044_v48 = vadd.f32 1.0, %v22083_v45  ;;  %v20818_v45 = vld [vmem:[#allocation8 + $0x338] ss:$24 sps:$4 sm:$0xff]  }
 0x690   :  { %v22087_v63 = vpop.eup %22086  ;;  %16628 = vmatpush1.bf16.msra.mxu1 %v20782_v50  ;;  %v9067_v62 = vadd.f32 1.0, %v22085_v10  ;;  %v9091_v39 = vmul.f32 %v9043_v49, %v8947_v21  ;;  %v20809_v50 = vld [vmem:[#allocation8 + $0x1e90] ss:$24 sps:$4 sm:$0xff]   ;;  %v20815_v49 = vld [vmem:[#allocation8 + $0x1ec0] ss:$24 sps:$4 sm:$0xff]  }
 0x691   :  { %16629 = vmatprep.subr.bf16.mxu1 %v20790_v29  ;;  %v9068_v30 = vadd.f32 1.0, %v22087_v63  ;;  %v9092_v15 = vmul.f32 %v9044_v48, %v8948_v4  ;;  %v20817_v29 = vld [vmem:[#allocation8 + $0x1ec4] ss:$24 sps:$4 sm:$0xff]   ;;  %v20823_v48 = vld [vmem:[#allocation8 + $0x1ef4] ss:$24 sps:$4 sm:$0xff]  }
 0x692   :  { %v9115_v54 = vmul.f32 %v9067_v62, %v8971_v52  ;;  %v20826_v10 = vld [vmem:[#allocation8 + $0x36c] ss:$24 sps:$4 sm:$0xff]   ;;  %v20824_v63 = vld [vmem:[#allocation8 + $0x368] ss:$24 sps:$4 sm:$0xff]   ;;  %v20832_v52 = vld [vmem:[#allocation8 + $0x39c] ss:$24 sps:$4 sm:$0xff]  }
 0x693   :  { %v9116_v13 = vmul.f32 %v9068_v30, %v8972_v41  ;;  %v20821_v21 = vld [vmem:[#allocation8 + $0x1ef0] ss:$24 sps:$4 sm:$0xff]   ;;  %v20827_v4 = vld [vmem:[#allocation8 + $0x1f20] ss:$24 sps:$4 sm:$0xff]   ;;  %v20838_v41 = vld [vmem:[#allocation8 + $0x3cc] ss:$24 sps:$4 sm:$0xff]  }
 0x694   :  { %16630 = vmatpush1.bf16.msra.mxu1 %v20788_v57  ;;  %v23053_v25 = vpack.c.bf16 %v9115_v54, %v9091_v39  ;;  %v20829_v57 = vld [vmem:[#allocation8 + $0x1f24] ss:$24 sps:$4 sm:$0xff]   ;;  %v20830_v62 = vld [vmem:[#allocation8 + $0x398] ss:$24 sps:$4 sm:$0xff]   ;;  %v20835_v30 = vld [vmem:[#allocation8 + $0x1f54] ss:$24 sps:$4 sm:$0xff]  }
 0x695   :  { %v23055_v27 = vpack.c.bf16 %v9116_v13, %v9092_v15  ;;  %16631 = vmatprep.subr.bf16.mxu1 %v20796_v32  ;;  %v20836_v32 = vld [vmem:[#allocation8 + $0x3c8] ss:$24 sps:$4 sm:$0xff]   ;;  %v20844_v54 = vld [vmem:[#allocation8 + $0x3fc] ss:$24 sps:$4 sm:$0xff]   ;;  %v20842_v13 = vld [vmem:[#allocation8 + $0x3f8] ss:$24 sps:$4 sm:$0xff]  }
 0x696   :  { %v20833_v39 = vld [vmem:[#allocation8 + $0x1f50] ss:$24 sps:$4 sm:$0xff]   ;;  %v20841_v15 = vld [vmem:[#allocation8 + $0x1f84] ss:$24 sps:$4 sm:$0xff]  }
 0x697   :  { %16508 = vmatprep.mubr.bf16.mxu0 %v23055_v27 }
 0x698   :  { %16509 = vmatmul.mubr.bf16.vlgmr.msra.gmra.mrb[16].mxu0 %v23053_v25  ;;  %16632 = vmatpush1.bf16.msra.mxu1 %v20794_v43  ;;  %v20839_v43 = vld [vmem:[#allocation8 + $0x1f80] ss:$24 sps:$4 sm:$0xff]  }
 0x699   :  { %16520 = vmatpush1.bf16.msra.mxu0 %v20791_v60  ;;  %16551 = vmatprep.mubr.bf16.mxu0 %v22935_v23  ;;  %v20850_v60 = vld [vmem:[#allocation8 + $0x42c] ss:$24 sps:$4 sm:$0xff]  }
 0x69a   :  { %16521 = vmatprep.subr.bf16.mxu0 %v20799_v34  ;;  %16633 = vmatprep.subr.bf16.mxu1 %v20802_v1  ;;  %v20847_v34 = vld [vmem:[#allocation8 + $0x1fb4] ss:$24 sps:$4 sm:$0xff]   ;;  %v20848_v1 = vld [vmem:[#allocation8 + $0x428] ss:$24 sps:$4 sm:$0xff]  }
 0x69c   :  { %16634 = vmatpush1.bf16.msra.mxu1 %v20800_v31  ;;  %v20845_v31 = vld [vmem:[#allocation8 + $0x1fb0] ss:$24 sps:$4 sm:$0xff]  }
 0x69d   :  { %16522 = vmatpush1.bf16.msra.mxu0 %v20797_v56  ;;  %16635 = vmatprep.subr.bf16.mxu1 %v20808_v44  ;;  %v20856_v56 = vld [vmem:[#allocation8 + $0x45c] ss:$24 sps:$4 sm:$0xff]  }
 0x69e   :  { %16523 = vmatprep.subr.bf16.mxu0 %v20805_v40  ;;  %v20853_v44 = vld [vmem:[#allocation8 + $0x1fe4] ss:$24 sps:$4 sm:$0xff]   ;;  %v20854_v40 = vld [vmem:[#allocation8 + $0x458] ss:$24 sps:$4 sm:$0xff]  }
 0x6a0   :  { %16636 = vmatpush1.bf16.msra.mxu1 %v20806_v3  ;;  %v20851_v3 = vld [vmem:[#allocation8 + $0x1fe0] ss:$24 sps:$4 sm:$0xff]  }
 0x6a1   :  { %16524 = vmatpush1.bf16.msra.mxu0 %v20803_v53  ;;  %16648 = vmatprep.subr.bf16.mxu1 %v20814_v14  ;;  %v20862_v53 = vld [vmem:[#allocation8 + $0x48c] ss:$24 sps:$4 sm:$0xff]  }
 0x6a2   :  { %16525 = vmatprep.subr.bf16.mxu0 %v20811_v58  ;;  %v20859_v14 = vld [vmem:[#allocation8 + $0x2014] ss:$24 sps:$4 sm:$0xff]   ;;  %v20860_v58 = vld [vmem:[#allocation8 + $0x488] ss:$24 sps:$4 sm:$0xff]  }
 0x6a3   :  { %16638 = vmatmul.mubr.bf16.vlgmr.msra.gmra.mrb[32].mxu1 %v22542_v38 }
 0x6a4   :  { %16649 = vmatpush1.bf16.msra.mxu1 %v20812_v17  ;;  %16680 = vmatprep.mubr.bf16.mxu1 %v22733_v22  ;;  %v20857_v17 = vld [vmem:[#allocation8 + $0x2010] ss:$24 sps:$4 sm:$0xff]  }
 0x6a5   :  { %16526 = vmatpush1.bf16.msra.mxu0 %v20809_v50  ;;  %16650 = vmatprep.subr.bf16.mxu1 %v20820_v36  ;;  %v20868_v50 = vld [vmem:[#allocation8 + $0x4bc] ss:$24 sps:$4 sm:$0xff]  }
 0x6a6   :  { %16527 = vmatprep.subr.bf16.mxu0 %v20817_v29  ;;  %v20865_v36 = vld [vmem:[#allocation8 + $0x2044] ss:$24 sps:$4 sm:$0xff]   ;;  %v20866_v29 = vld [vmem:[#allocation8 + $0x4b8] ss:$24 sps:$4 sm:$0xff]  }
 0x6a8   :  { %16651 = vmatpush1.bf16.msra.mxu1 %v20818_v45  ;;  %v20863_v45 = vld [vmem:[#allocation8 + $0x2040] ss:$24 sps:$4 sm:$0xff]  }
 0x6a9   :  { %16528 = vmatpush1.bf16.msra.mxu0 %v20815_v49  ;;  %16652 = vmatprep.subr.bf16.mxu1 %v20826_v10  ;;  %v20874_v49 = vld [vmem:[#allocation8 + $0x4ec] ss:$24 sps:$4 sm:$0xff]  }
 0x6aa   :  { %16529 = vmatprep.subr.bf16.mxu0 %v20823_v48  ;;  %v20871_v10 = vld [vmem:[#allocation8 + $0x2074] ss:$24 sps:$4 sm:$0xff]   ;;  %v20872_v48 = vld [vmem:[#allocation8 + $0x4e8] ss:$24 sps:$4 sm:$0xff]  }
 0x6ac   :  { %16653 = vmatpush1.bf16.msra.mxu1 %v20824_v63  ;;  %v20869_v63 = vld [vmem:[#allocation8 + $0x2070] ss:$24 sps:$4 sm:$0xff]  }
 0x6ad   :  { %16530 = vmatpush1.bf16.msra.mxu0 %v20821_v21  ;;  %16654 = vmatprep.subr.bf16.mxu1 %v20832_v52  ;;  %v20880_v21 = vld [vmem:[#allocation8 + $0x51c] ss:$24 sps:$4 sm:$0xff]  }
 0x6ae   :  { %16531 = vmatprep.subr.bf16.mxu0 %v20829_v57  ;;  %v20877_v52 = vld [vmem:[#allocation8 + $0x20a4] ss:$24 sps:$4 sm:$0xff]   ;;  %v20878_v57 = vld [vmem:[#allocation8 + $0x518] ss:$24 sps:$4 sm:$0xff]  }
 0x6b0   :  { %16655 = vmatpush1.bf16.msra.mxu1 %v20830_v62  ;;  %v20875_v62 = vld [vmem:[#allocation8 + $0x20a0] ss:$24 sps:$4 sm:$0xff]  }
 0x6b1   :  { %16532 = vmatpush1.bf16.msra.mxu0 %v20827_v4  ;;  %16656 = vmatprep.subr.bf16.mxu1 %v20838_v41  ;;  %v20886_v4 = vld [vmem:[#allocation8 + $0x54c] ss:$24 sps:$4 sm:$0xff]  }
 0x6b2   :  { %16533 = vmatprep.subr.bf16.mxu0 %v20835_v30  ;;  %v20883_v41 = vld [vmem:[#allocation8 + $0x20d4] ss:$24 sps:$4 sm:$0xff]   ;;  %v20884_v30 = vld [vmem:[#allocation8 + $0x548] ss:$24 sps:$4 sm:$0xff]  }
 0x6b4   :  { %16657 = vmatpush1.bf16.msra.mxu1 %v20836_v32  ;;  %v20881_v32 = vld [vmem:[#allocation8 + $0x20d0] ss:$24 sps:$4 sm:$0xff]  }
 0x6b5   :  { %16534 = vmatpush1.bf16.msra.mxu0 %v20833_v39  ;;  %16658 = vmatprep.subr.bf16.mxu1 %v20844_v54  ;;  %v20889_v39 = vld [vmem:[#allocation8 + $0x57c] ss:$24 sps:$4 sm:$0xff]  }
 0x6b6   :  { %16535 = vmatprep.subr.bf16.mxu0 %v20841_v15  ;;  %v20937_v54 = vld [vmem:[#allocation8 + $0x2104] ss:$24 sps:$4 sm:$0xff]   ;;  %v20887_v15 = vld [vmem:[#allocation8 + $0x578] ss:$24 sps:$4 sm:$0xff]  }
 0x6b8   :  { %16659 = vmatpush1.bf16.msra.mxu1 %v20842_v13  ;;  %v20892_v13 = vld [vmem:[#allocation8 + $0x5ac] ss:$24 sps:$4 sm:$0xff]  }
 0x6b9   :  { %16536 = vmatpush1.bf16.msra.mxu0 %v20839_v43  ;;  %16660 = vmatprep.subr.bf16.mxu1 %v20850_v60  ;;  %v20935_v43 = vld [vmem:[#allocation8 + $0x2100] ss:$24 sps:$4 sm:$0xff]   ;;  %v20943_v60 = vld [vmem:[#allocation8 + $0x2134] ss:$24 sps:$4 sm:$0xff]  }
 0x6ba   :  { %16537 = vmatprep.subr.bf16.mxu0 %v20847_v34  ;;  %v20890_v34 = vld [vmem:[#allocation8 + $0x5a8] ss:$24 sps:$4 sm:$0xff]  }
 0x6bc   :  { %16661 = vmatpush1.bf16.msra.mxu1 %v20848_v1  ;;  %v20895_v1 = vld [vmem:[#allocation8 + $0x5dc] ss:$24 sps:$4 sm:$0xff]  }
 0x6bd   :  { %16538 = vmatpush1.bf16.msra.mxu0 %v20845_v31  ;;  %16662 = vmatprep.subr.bf16.mxu1 %v20856_v56  ;;  %v20941_v31 = vld [vmem:[#allocation8 + $0x2130] ss:$24 sps:$4 sm:$0xff]   ;;  %v20949_v56 = vld [vmem:[#allocation8 + $0x2164] ss:$24 sps:$4 sm:$0xff]  }
 0x6be   :  { %16539 = vmatprep.subr.bf16.mxu0 %v20853_v44  ;;  %v20893_v44 = vld [vmem:[#allocation8 + $0x5d8] ss:$24 sps:$4 sm:$0xff]  }
 0x6c0   :  { %16663 = vmatpush1.bf16.msra.mxu1 %v20854_v40  ;;  %v20898_v40 = vld [vmem:[#allocation8 + $0x60c] ss:$24 sps:$4 sm:$0xff]  }
 0x6c1   :  { %16540 = vmatpush1.bf16.msra.mxu0 %v20851_v3  ;;  %16664 = vmatprep.subr.bf16.mxu1 %v20862_v53  ;;  %v20947_v3 = vld [vmem:[#allocation8 + $0x2160] ss:$24 sps:$4 sm:$0xff]   ;;  %v20955_v53 = vld [vmem:[#allocation8 + $0x2194] ss:$24 sps:$4 sm:$0xff]  }
 0x6c2   :  { %16541 = vmatprep.subr.bf16.mxu0 %v20859_v14  ;;  %v20896_v14 = vld [vmem:[#allocation8 + $0x608] ss:$24 sps:$4 sm:$0xff]  }
 0x6c4   :  { %16665 = vmatpush1.bf16.msra.mxu1 %v20860_v58  ;;  %v20901_v58 = vld [vmem:[#allocation8 + $0x63c] ss:$24 sps:$4 sm:$0xff]  }
 0x6c5   :  { %16542 = vmatpush1.bf16.msra.mxu0 %v20857_v17  ;;  %16666 = vmatprep.subr.bf16.mxu1 %v20868_v50  ;;  %v20953_v17 = vld [vmem:[#allocation8 + $0x2190] ss:$24 sps:$4 sm:$0xff]   ;;  %v20961_v50 = vld [vmem:[#allocation8 + $0x21c4] ss:$24 sps:$4 sm:$0xff]  }
 0x6c6   :  { %16543 = vmatprep.subr.bf16.mxu0 %v20865_v36  ;;  %v20899_v36 = vld [vmem:[#allocation8 + $0x638] ss:$24 sps:$4 sm:$0xff]  }
 0x6c8   :  { %16667 = vmatpush1.bf16.msra.mxu1 %v20866_v29  ;;  %v20904_v29 = vld [vmem:[#allocation8 + $0x66c] ss:$24 sps:$4 sm:$0xff]  }
 0x6c9   :  { %16544 = vmatpush1.bf16.msra.mxu0 %v20863_v45  ;;  %16668 = vmatprep.subr.bf16.mxu1 %v20874_v49  ;;  %v20959_v45 = vld [vmem:[#allocation8 + $0x21c0] ss:$24 sps:$4 sm:$0xff]   ;;  %v20967_v49 = vld [vmem:[#allocation8 + $0x21f4] ss:$24 sps:$4 sm:$0xff]  }
 0x6ca   :  { %16545 = vmatprep.subr.bf16.mxu0 %v20871_v10  ;;  %v20902_v10 = vld [vmem:[#allocation8 + $0x668] ss:$24 sps:$4 sm:$0xff]  }
 0x6cc   :  { %16669 = vmatpush1.bf16.msra.mxu1 %v20872_v48  ;;  %v20907_v48 = vld [vmem:[#allocation8 + $0x69c] ss:$24 sps:$4 sm:$0xff]  }
 0x6cd   :  { %16546 = vmatpush1.bf16.msra.mxu0 %v20869_v63  ;;  %16670 = vmatprep.subr.bf16.mxu1 %v20880_v21  ;;  %v20965_v63 = vld [vmem:[#allocation8 + $0x21f0] ss:$24 sps:$4 sm:$0xff]   ;;  %v20973_v21 = vld [vmem:[#allocation8 + $0x2224] ss:$24 sps:$4 sm:$0xff]  }
 0x6ce   :  { %16547 = vmatprep.subr.bf16.mxu0 %v20877_v52  ;;  %v20905_v52 = vld [vmem:[#allocation8 + $0x698] ss:$24 sps:$4 sm:$0xff]  }
 0x6d0   :  { %16671 = vmatpush1.bf16.msra.mxu1 %v20878_v57  ;;  %v20910_v57 = vld [vmem:[#allocation8 + $0x6cc] ss:$24 sps:$4 sm:$0xff]  }
 0x6d1   :  { %16548 = vmatpush1.bf16.msra.mxu0 %v20875_v62  ;;  %16672 = vmatprep.subr.bf16.mxu1 %v20886_v4  ;;  %v20971_v62 = vld [vmem:[#allocation8 + $0x2220] ss:$24 sps:$4 sm:$0xff]   ;;  %v20979_v4 = vld [vmem:[#allocation8 + $0x2254] ss:$24 sps:$4 sm:$0xff]  }
 0x6d2   :  { %16549 = vmatprep.subr.bf16.mxu0 %v20883_v41  ;;  %v20908_v41 = vld [vmem:[#allocation8 + $0x6c8] ss:$24 sps:$4 sm:$0xff]  }
 0x6d4   :  { %16673 = vmatpush1.bf16.msra.mxu1 %v20884_v30  ;;  %v20913_v30 = vld [vmem:[#allocation8 + $0x6fc] ss:$24 sps:$4 sm:$0xff]  }
 0x6d5   :  { %16550 = vmatpush1.bf16.msra.mxu0 %v20881_v32  ;;  %16674 = vmatprep.subr.bf16.mxu1 %v20889_v39  ;;  %v20977_v32 = vld [vmem:[#allocation8 + $0x2250] ss:$24 sps:$4 sm:$0xff]   ;;  %v20985_v39 = vld [vmem:[#allocation8 + $0x2284] ss:$24 sps:$4 sm:$0xff]  }
 0x6d6   :  { %16562 = vmatprep.subr.bf16.mxu0 %v20937_v54  ;;  %v20911_v54 = vld [vmem:[#allocation8 + $0x6f8] ss:$24 sps:$4 sm:$0xff]  }
 0x6d8   :  { %16552 = vmatmul.mubr.bf16.vlgmr.msra.gmra.mrb[16].mxu0 %v22933_v6  ;;  %16675 = vmatpush1.bf16.msra.mxu1 %v20887_v15  ;;  %v20916_v15 = vld [vmem:[#allocation8 + $0x72c] ss:$24 sps:$4 sm:$0xff]  }
 0x6d9   :  { %16676 = vmatprep.subr.bf16.mxu1 %v20892_v13  ;;  %16563 = vmatpush1.bf16.msra.mxu0 %v20935_v43  ;;  %v20983_v13 = vld [vmem:[#allocation8 + $0x2280] ss:$24 sps:$4 sm:$0xff]   ;;  %v20991_v43 = vld [vmem:[#allocation8 + $0x22b4] ss:$24 sps:$4 sm:$0xff]  }
 0x6da   :  { %16564 = vmatprep.subr.bf16.mxu0 %v20943_v60  ;;  %v20914_v60 = vld [vmem:[#allocation8 + $0x728] ss:$24 sps:$4 sm:$0xff]  }
 0x6dc   :  { %16677 = vmatpush1.bf16.msra.mxu1 %v20890_v34  ;;  %v20919_v34 = vld [vmem:[#allocation8 + $0x75c] ss:$24 sps:$4 sm:$0xff]  }
 0x6dd   :  { %16678 = vmatprep.subr.bf16.mxu1 %v20895_v1  ;;  %16565 = vmatpush1.bf16.msra.mxu0 %v20941_v31  ;;  %v20989_v1 = vld [vmem:[#allocation8 + $0x22b0] ss:$24 sps:$4 sm:$0xff]   ;;  %v20997_v31 = vld [vmem:[#allocation8 + $0x22e4] ss:$24 sps:$4 sm:$0xff]  }
 0x6de   :  { %16566 = vmatprep.subr.bf16.mxu0 %v20949_v56  ;;  %v20917_v56 = vld [vmem:[#allocation8 + $0x758] ss:$24 sps:$4 sm:$0xff]  }
 0x6e0   :  { %16679 = vmatpush1.bf16.msra.mxu1 %v20893_v44  ;;  %v20922_v44 = vld [vmem:[#allocation8 + $0x78c] ss:$24 sps:$4 sm:$0xff]  }
 0x6e1   :  { %16691 = vmatprep.subr.bf16.mxu1 %v20898_v40  ;;  %16567 = vmatpush1.bf16.msra.mxu0 %v20947_v3  ;;  %v20995_v40 = vld [vmem:[#allocation8 + $0x22e0] ss:$24 sps:$4 sm:$0xff]   ;;  %v21003_v3 = vld [vmem:[#allocation8 + $0x2314] ss:$24 sps:$4 sm:$0xff]  }
 0x6e2   :  { %16568 = vmatprep.subr.bf16.mxu0 %v20955_v53  ;;  %v20920_v53 = vld [vmem:[#allocation8 + $0x788] ss:$24 sps:$4 sm:$0xff]  }
 0x6e3   :  { %16681 = vmatmul.mubr.bf16.vlgmr.msra.gmra.mrb[32].mxu1 %v22728_v42 }
 0x6e4   :  { %16692 = vmatpush1.bf16.msra.mxu1 %v20896_v14  ;;  %16723 = vmatprep.mubr.bf16.mxu1 %v22837_v28  ;;  %v20925_v14 = vld [vmem:[#allocation8 + $0x7bc] ss:$24 sps:$4 sm:$0xff]  }
 0x6e5   :  { %16693 = vmatprep.subr.bf16.mxu1 %v20901_v58  ;;  %16569 = vmatpush1.bf16.msra.mxu0 %v20953_v17  ;;  %v21001_v58 = vld [vmem:[#allocation8 + $0x2310] ss:$24 sps:$4 sm:$0xff]   ;;  %v21009_v17 = vld [vmem:[#allocation8 + $0x2344] ss:$24 sps:$4 sm:$0xff]  }
 0x6e6   :  { %16570 = vmatprep.subr.bf16.mxu0 %v20961_v50  ;;  %v20923_v50 = vld [vmem:[#allocation8 + $0x7b8] ss:$24 sps:$4 sm:$0xff]  }
 0x6e8   :  { %16694 = vmatpush1.bf16.msra.mxu1 %v20899_v36  ;;  %v20928_v36 = vld [vmem:[#allocation8 + $0x7ec] ss:$24 sps:$4 sm:$0xff]  }
 0x6e9   :  { %16695 = vmatprep.subr.bf16.mxu1 %v20904_v29  ;;  %16571 = vmatpush1.bf16.msra.mxu0 %v20959_v45  ;;  %v21007_v29 = vld [vmem:[#allocation8 + $0x2340] ss:$24 sps:$4 sm:$0xff]   ;;  %v21015_v45 = vld [vmem:[#allocation8 + $0x2374] ss:$24 sps:$4 sm:$0xff]  }
 0x6ea   :  { %16572 = vmatprep.subr.bf16.mxu0 %v20967_v49  ;;  %v20926_v49 = vld [vmem:[#allocation8 + $0x7e8] ss:$24 sps:$4 sm:$0xff]  }
 0x6ec   :  { %16696 = vmatpush1.bf16.msra.mxu1 %v20902_v10  ;;  %v20931_v10 = vld [vmem:[#allocation8 + $0x81c] ss:$24 sps:$4 sm:$0xff]  }
 0x6ed   :  { %16697 = vmatprep.subr.bf16.mxu1 %v20907_v48  ;;  %16573 = vmatpush1.bf16.msra.mxu0 %v20965_v63  ;;  %v21013_v48 = vld [vmem:[#allocation8 + $0x2370] ss:$24 sps:$4 sm:$0xff]   ;;  %v21021_v63 = vld [vmem:[#allocation8 + $0x23a4] ss:$24 sps:$4 sm:$0xff]  }
 0x6ee   :  { %16574 = vmatprep.subr.bf16.mxu0 %v20973_v21  ;;  %v20929_v21 = vld [vmem:[#allocation8 + $0x818] ss:$24 sps:$4 sm:$0xff]  }
 0x6f0   :  { %16698 = vmatpush1.bf16.msra.mxu1 %v20905_v52  ;;  %v20934_v52 = vld [vmem:[#allocation8 + $0x84c] ss:$24 sps:$4 sm:$0xff]  }
 0x6f1   :  { %16699 = vmatprep.subr.bf16.mxu1 %v20910_v57  ;;  %16575 = vmatpush1.bf16.msra.mxu0 %v20971_v62  ;;  %v21019_v57 = vld [vmem:[#allocation8 + $0x23a0] ss:$24 sps:$4 sm:$0xff]   ;;  %v21027_v62 = vld [vmem:[#allocation8 + $0x23d4] ss:$24 sps:$4 sm:$0xff]  }
 0x6f2   :  { %16576 = vmatprep.subr.bf16.mxu0 %v20979_v4  ;;  %v20932_v4 = vld [vmem:[#allocation8 + $0x848] ss:$24 sps:$4 sm:$0xff]  }
 0x6f4   :  { %16700 = vmatpush1.bf16.msra.mxu1 %v20908_v41  ;;  %v20940_v41 = vld [vmem:[#allocation8 + $0x87c] ss:$24 sps:$4 sm:$0xff]  }
 0x6f5   :  { %16701 = vmatprep.subr.bf16.mxu1 %v20913_v30  ;;  %16577 = vmatpush1.bf16.msra.mxu0 %v20977_v32  ;;  %v21025_v30 = vld [vmem:[#allocation8 + $0x23d0] ss:$24 sps:$4 sm:$0xff]   ;;  %v21036_v32 = vld [vmem:[#allocation8 + $0x14] ss:$24 sps:$4 sm:$0xff]  }
 0x6f6   :  { %16578 = vmatprep.subr.bf16.mxu0 %v20985_v39  ;;  %v20938_v39 = vld [vmem:[#allocation8 + $0x878] ss:$24 sps:$4 sm:$0xff]  }
 0x6f8   :  { %16702 = vmatpush1.bf16.msra.mxu1 %v20911_v54  ;;  %v20946_v54 = vld [vmem:[#allocation8 + $0x8ac] ss:$24 sps:$4 sm:$0xff]  }
 0x6f9   :  { %16703 = vmatprep.subr.bf16.mxu1 %v20916_v15  ;;  %16579 = vmatpush1.bf16.msra.mxu0 %v20983_v13  ;;  %v20944_v15 = vld [vmem:[#allocation8 + $0x8a8] ss:$24 sps:$4 sm:$0xff]   ;;  %v20952_v13 = vld [vmem:[#allocation8 + $0x8dc] ss:$24 sps:$4 sm:$0xff]  }
 0x6fa   :  { %16580 = vmatprep.subr.bf16.mxu0 %v20991_v43  ;;  %v20950_v43 = vld [vmem:[#allocation8 + $0x8d8] ss:$24 sps:$4 sm:$0xff]  }
 0x6fc   :  { %16704 = vmatpush1.bf16.msra.mxu1 %v20914_v60  ;;  %v20958_v60 = vld [vmem:[#allocation8 + $0x90c] ss:$24 sps:$4 sm:$0xff]  }
 0x6fd   :  { %16705 = vmatprep.subr.bf16.mxu1 %v20919_v34  ;;  %16581 = vmatpush1.bf16.msra.mxu0 %v20989_v1  ;;  %v20956_v34 = vld [vmem:[#allocation8 + $0x908] ss:$24 sps:$4 sm:$0xff]   ;;  %v20964_v1 = vld [vmem:[#allocation8 + $0x93c] ss:$24 sps:$4 sm:$0xff]  }
 0x6fe   :  { %16582 = vmatprep.subr.bf16.mxu0 %v20997_v31  ;;  %v20962_v31 = vld [vmem:[#allocation8 + $0x938] ss:$24 sps:$4 sm:$0xff]  }
 0x700   :  { %16706 = vmatpush1.bf16.msra.mxu1 %v20917_v56  ;;  %v20970_v56 = vld [vmem:[#allocation8 + $0x96c] ss:$24 sps:$4 sm:$0xff]  }
 0x701   :  { %16707 = vmatprep.subr.bf16.mxu1 %v20922_v44  ;;  %16583 = vmatpush1.bf16.msra.mxu0 %v20995_v40  ;;  %v20968_v44 = vld [vmem:[#allocation8 + $0x968] ss:$24 sps:$4 sm:$0xff]   ;;  %v20976_v40 = vld [vmem:[#allocation8 + $0x99c] ss:$24 sps:$4 sm:$0xff]  }
 0x702   :  { %16584 = vmatprep.subr.bf16.mxu0 %v21003_v3  ;;  %v20974_v3 = vld [vmem:[#allocation8 + $0x998] ss:$24 sps:$4 sm:$0xff]  }
 0x704   :  { %16708 = vmatpush1.bf16.msra.mxu1 %v20920_v53  ;;  %v20982_v53 = vld [vmem:[#allocation8 + $0x9cc] ss:$24 sps:$4 sm:$0xff]  }
 0x705   :  { %16709 = vmatprep.subr.bf16.mxu1 %v20925_v14  ;;  %16585 = vmatpush1.bf16.msra.mxu0 %v21001_v58  ;;  %v20980_v14 = vld [vmem:[#allocation8 + $0x9c8] ss:$24 sps:$4 sm:$0xff]   ;;  %v20988_v58 = vld [vmem:[#allocation8 + $0x9fc] ss:$24 sps:$4 sm:$0xff]  }
 0x706   :  { %16586 = vmatprep.subr.bf16.mxu0 %v21009_v17  ;;  %v1352_v17 = vrot.slane %v23040_v12, %v22855_v0  ;;  %v21000_v0 = vld [vmem:[#allocation8 + $0xa5c] ss:$24 sps:$4 sm:$0xff]  }
 0x708   :  { %16710 = vmatpush1.bf16.msra.mxu1 %v20923_v50  ;;  %v1356_v50 = vrot.slane %v23040_v12, %v22858_v24 }
 0x709   :  { %16711 = vmatprep.subr.bf16.mxu1 %v20928_v36  ;;  %16587 = vmatpush1.bf16.msra.mxu0 %v21007_v29  ;;  %v20986_v36 = vld [vmem:[#allocation8 + $0x9f8] ss:$24 sps:$4 sm:$0xff]   ;;  %v20994_v29 = vld [vmem:[#allocation8 + $0xa2c] ss:$24 sps:$4 sm:$0xff]  }
 0x70a   :  { %16588 = vmatprep.subr.bf16.mxu0 %v21015_v45 }
 0x70c   :  { %16712 = vmatpush1.bf16.msra.mxu1 %v20926_v49 }
 0x70d   :  { %16713 = vmatprep.subr.bf16.mxu1 %v20931_v10  ;;  %16589 = vmatpush1.bf16.msra.mxu0 %v21013_v48 }
 0x70e   :  { %16590 = vmatprep.subr.bf16.mxu0 %v21021_v63 }
 0x710   :  { %16714 = vmatpush1.bf16.msra.mxu1 %v20929_v21  ;;  %v20992_v21 = vld [vmem:[#allocation8 + $0xa28] ss:$24 sps:$4 sm:$0xff]  }
 0x711   :  { %16715 = vmatprep.subr.bf16.mxu1 %v20934_v52  ;;  %16591 = vmatpush1.bf16.msra.mxu0 %v21019_v57 }
 0x712   :  { %16592 = vmatprep.subr.bf16.mxu0 %v21027_v62 }
 0x714   :  { %16716 = vmatpush1.bf16.msra.mxu1 %v20932_v4 }
 0x715   :  { %16717 = vmatprep.subr.bf16.mxu1 %v20940_v41  ;;  %16593 = vmatpush1.bf16.msra.mxu0 %v21025_v30 }
 0x716   :  { %17121 = vmatprep.subr.bf16.mxu0 %v21036_v32 }
 0x718   :  { %16718 = vmatpush1.bf16.msra.mxu1 %v20938_v39  ;;  %v20998_v39 = vld [vmem:[#allocation8 + $0xa58] ss:$24 sps:$4 sm:$0xff]  }
 0x719   :  { %16719 = vmatprep.subr.bf16.mxu1 %v20946_v54 }
 0x71c   :  { %16720 = vmatpush1.bf16.msra.mxu1 %v20944_v15 }
 0x71d   :  { %16721 = vmatprep.subr.bf16.mxu1 %v20952_v13  ;;  %v21006_v13 = vld [vmem:[#allocation8 + $0xa8c] ss:$24 sps:$4 sm:$0xff]  }
 0x720   :  { %16722 = vmatpush1.bf16.msra.mxu1 %v20950_v43 }
 0x721   :  { %16734 = vmatprep.subr.bf16.mxu1 %v20958_v60 }
 0x723   :  { %16724 = vmatmul.mubr.bf16.vlgmr.msra.gmra.mrb[32].mxu1 %v22834_v16 }
 0x724   :  { %16735 = vmatpush1.bf16.msra.mxu1 %v20956_v34  ;;  %16766 = vmatprep.mubr.bf16.mxu1 %v22929_v35 }
 0x725   :  { %16736 = vmatprep.subr.bf16.mxu1 %v20964_v1 }
 0x728   :  { %16737 = vmatpush1.bf16.msra.mxu1 %v20962_v31 }
 0x729   :  { %16738 = vmatprep.subr.bf16.mxu1 %v20970_v56 }
 0x72c   :  { %16739 = vmatpush1.bf16.msra.mxu1 %v20968_v44  ;;  %v21004_v44 = vld [vmem:[#allocation8 + $0xa88] ss:$24 sps:$4 sm:$0xff]  }
 0x72d   :  { %16740 = vmatprep.subr.bf16.mxu1 %v20976_v40 }
 0x730   :  { %16741 = vmatpush1.bf16.msra.mxu1 %v20974_v3 }
 0x731   :  { %16742 = vmatprep.subr.bf16.mxu1 %v20982_v53  ;;  %v21012_v53 = vld [vmem:[#allocation8 + $0xabc] ss:$24 sps:$4 sm:$0xff]  }
 0x734   :  { %16743 = vmatpush1.bf16.msra.mxu1 %v20980_v14 }
 0x735   :  { %16744 = vmatprep.subr.bf16.mxu1 %v20988_v58 }
 0x736   :  { %v8680_v45 = vpop.f32.mrb[28].mxu1 }
 0x737   :  { %v20016_v49 = vadd.f32 %v8680_v45, %v1352_v17  ;;  %v8682_v10 = vpop.f32.mrb[29].mxu1  ;;  %v21016_v45 = vld [vmem:[#allocation8 + $0xae8] ss:$24 sps:$4 sm:$0xff]  }
 0x738   :  { %v23071_v48 = vadd.f32 %v8682_v10, %v1356_v50  ;;  %v8684_v63 = vpop.f32.mrb[30].mxu1  ;;  %16745 = vmatpush1.bf16.msra.mxu1 %v20986_v36  ;;  %v21010_v36 = vld [vmem:[#allocation8 + $0xab8] ss:$24 sps:$4 sm:$0xff]   ;;  %v21024_v10 = vld [vmem:[#allocation8 + $0xb1c] ss:$24 sps:$4 sm:$0xff]  }
 0x739   :  { %v8711_v52 = vmul.f32 %v20016_v49, %v20016_v49  ;;  %v20018_v57 = vadd.f32 %v8684_v63, %v1352_v17  ;;  %v8686_v62 = vpop.f32.mrb[31].mxu1  ;;  %16746 = vmatprep.subr.bf16.mxu1 %v20994_v29  ;;  %v21018_v29 = vld [vmem:[#allocation8 + $0xaec] ss:$24 sps:$4 sm:$0xff]   ;;  %v21022_v63 = vld [vmem:[#allocation8 + $0xb18] ss:$24 sps:$4 sm:$0xff]  }
 0x73a   :  { %v8712_v4 = vmul.f32 %v23071_v48, %v23071_v48  ;;  %v20019_v24 = vadd.f32 %v8686_v62, %v1356_v50 }
 0x73b   :  { %v8759_v12 = vmul.f32 %v20016_v49, %v8711_v52  ;;  %v8735_v41 = vmul.f32 %v20018_v57, %v20018_v57  ;;  %v21030_v52 = vld [vmem:[#allocation8 + $0xb4c] ss:$24 sps:$4 sm:$0xff]  }
 0x73c   :  { %v8760_v30 = vmul.f32 %v23071_v48, %v8712_v4  ;;  %v8736_v32 = vmul.f32 %v20019_v24, %v20019_v24  ;;  %16747 = vmatpush1.bf16.msra.mxu1 %v20992_v21 }
 0x73d   :  { %v8807_v54 = vmul.f32 0.044715, %v8759_v12  ;;  %v8783_v15 = vmul.f32 %v20018_v57, %v8735_v41  ;;  %16748 = vmatprep.subr.bf16.mxu1 %v21000_v0 }
 0x73e   :  { %v8808_v43 = vmul.f32 0.044715, %v8760_v30  ;;  %v8784_v60 = vmul.f32 %v20019_v24, %v8736_v32  ;;  %v8951_v30 = vmul.f32 0.5, %v20016_v49  ;;  %v8975_v32 = vmul.f32 0.5, %v20018_v57 }
 0x73f   :  { %v8855_v34 = vadd.f32 %v20016_v49, %v8807_v54  ;;  %v8831_v1 = vmul.f32 0.044715, %v8783_v15  ;;  %v8952_v15 = vmul.f32 0.5, %v23071_v48  ;;  %v21034_v49 = vld [vmem:[#allocation8 + $0x10] ss:$24 sps:$4 sm:$0xff]  }
 0x740   :  { %v8856_v31 = vadd.f32 %v23071_v48, %v8808_v43  ;;  %v8832_v56 = vmul.f32 0.044715, %v8784_v60  ;;  %16749 = vmatpush1.bf16.msra.mxu1 %v20998_v39  ;;  %v21028_v39 = vld [vmem:[#allocation8 + $0xb48] ss:$24 sps:$4 sm:$0xff]   ;;  %v21033_v60 = vld [vmem:[#allocation8 + $0xb7c] ss:$24 sps:$4 sm:$0xff]  }
 0x741   :  { %v8903_v40 = vmul.f32 0.7978846, %v8855_v34  ;;  %v8879_v3 = vadd.f32 %v20018_v57, %v8831_v1  ;;  %16750 = vmatprep.subr.bf16.mxu1 %v21006_v13  ;;  %v8976_v13 = vmul.f32 0.5, %v20019_v24  ;;  %v21039_v57 = vld [vmem:[#allocation8 + $0xbac] ss:$24 sps:$4 sm:$0xff]  }
 0x742   :  { %v8904_v14 = vmul.f32 0.7978846, %v8856_v31  ;;  %v8880_v58 = vadd.f32 %v20019_v24, %v8832_v56  ;;  %v21037_v48 = vld [vmem:[#allocation8 + $0xba8] ss:$24 sps:$4 sm:$0xff]  }
 0x743   :  { %22088 = vtanh.f32 %v8903_v40  ;;  %v8927_v17 = vmul.f32 0.7978846, %v8879_v3  ;;  %v21040_v24 = vld [vmem:[#allocation8 + $0x40] ss:$24 sps:$4 sm:$0xff]  }
 0x744   :  { %22090 = vtanh.f32 %v8904_v14  ;;  %v8928_v50 = vmul.f32 0.7978846, %v8880_v58  ;;  %16751 = vmatpush1.bf16.msra.mxu1 %v21004_v44  ;;  %v21031_v44 = vld [vmem:[#allocation8 + $0xb78] ss:$24 sps:$4 sm:$0xff]   ;;  %v21045_v14 = vld [vmem:[#allocation8 + $0xbdc] ss:$24 sps:$4 sm:$0xff]  }
 0x745   :  { %22092 = vtanh.f32 %v8927_v17  ;;  %16752 = vmatprep.subr.bf16.mxu1 %v21012_v53  ;;  %v21042_v53 = vld [vmem:[#allocation8 + $0x44] ss:$24 sps:$4 sm:$0xff]   ;;  %v21048_v58 = vld [vmem:[#allocation8 + $0x74] ss:$24 sps:$4 sm:$0xff]   ;;  %v21043_v17 = vld [vmem:[#allocation8 + $0xbd8] ss:$24 sps:$4 sm:$0xff]  }
 0x746   :  { %22094 = vtanh.f32 %v8928_v50  ;;  %v21046_v50 = vld [vmem:[#allocation8 + $0x70] ss:$24 sps:$4 sm:$0xff]  }
 0x748   :  { %16753 = vmatpush1.bf16.msra.mxu1 %v21010_v36  ;;  %v21051_v36 = vld [vmem:[#allocation8 + $0xc0c] ss:$24 sps:$4 sm:$0xff]  }
 0x749   :  { %16754 = vmatprep.subr.bf16.mxu1 %v21018_v29  ;;  %v21054_v29 = vld [vmem:[#allocation8 + $0xa4] ss:$24 sps:$4 sm:$0xff]  }
 0x74c   :  { %16755 = vmatpush1.bf16.msra.mxu1 %v21016_v45  ;;  %v21049_v45 = vld [vmem:[#allocation8 + $0xc08] ss:$24 sps:$4 sm:$0xff]  }
 0x74d   :  { %v22089_v21 = vpop.eup %22088  ;;  %16756 = vmatprep.subr.bf16.mxu1 %v21024_v10  ;;  %v21052_v10 = vld [vmem:[#allocation8 + $0xa0] ss:$24 sps:$4 sm:$0xff]  }
 0x74e   :  { %v22091_v62 = vpop.eup %22090  ;;  %v9047_v0 = vadd.f32 1.0, %v22089_v21  ;;  %v21055_v21 = vld [vmem:[#allocation8 + $0xc38] ss:$24 sps:$4 sm:$0xff]  }
 0x74f   :  { %v22093_v4 = vpop.eup %22092  ;;  %v9048_v12 = vadd.f32 1.0, %v22091_v62  ;;  %v21063_v62 = vld [vmem:[#allocation8 + $0xc6c] ss:$24 sps:$4 sm:$0xff]  }
 0x750   :  { %v22095_v41 = vpop.eup %22094  ;;  %16757 = vmatpush1.bf16.msra.mxu1 %v21022_v63  ;;  %v9071_v54 = vadd.f32 1.0, %v22093_v4  ;;  %v9095_v34 = vmul.f32 %v9047_v0, %v8951_v30  ;;  %v21057_v63 = vld [vmem:[#allocation8 + $0xc3c] ss:$24 sps:$4 sm:$0xff]   ;;  %v21061_v4 = vld [vmem:[#allocation8 + $0xc68] ss:$24 sps:$4 sm:$0xff]  }
 0x751   :  { %16758 = vmatprep.subr.bf16.mxu1 %v21030_v52  ;;  %v9072_v43 = vadd.f32 1.0, %v22095_v41  ;;  %v9096_v31 = vmul.f32 %v9048_v12, %v8952_v15  ;;  %v21058_v52 = vld [vmem:[#allocation8 + $0xd0] ss:$24 sps:$4 sm:$0xff]   ;;  %v21066_v0 = vld [vmem:[#allocation8 + $0x104] ss:$24 sps:$4 sm:$0xff]  }
 0x752   :  { %v9119_v1 = vmul.f32 %v9071_v54, %v8975_v32  ;;  %v21064_v12 = vld [vmem:[#allocation8 + $0x100] ss:$24 sps:$4 sm:$0xff]   ;;  %v21069_v41 = vld [vmem:[#allocation8 + $0xc9c] ss:$24 sps:$4 sm:$0xff]   ;;  %v21075_v54 = vld [vmem:[#allocation8 + $0xccc] ss:$24 sps:$4 sm:$0xff]  }
 0x753   :  { %v9120_v56 = vmul.f32 %v9072_v43, %v8976_v13  ;;  %v21072_v30 = vld [vmem:[#allocation8 + $0x134] ss:$24 sps:$4 sm:$0xff]   ;;  %v21067_v32 = vld [vmem:[#allocation8 + $0xc98] ss:$24 sps:$4 sm:$0xff]   ;;  %v21078_v15 = vld [vmem:[#allocation8 + $0x164] ss:$24 sps:$4 sm:$0xff]  }
 0x754   :  { %16759 = vmatpush1.bf16.msra.mxu1 %v21028_v39  ;;  %v23078_v40 = vpack.c.bf16 %v9119_v1, %v9095_v34  ;;  %v21070_v39 = vld [vmem:[#allocation8 + $0x130] ss:$24 sps:$4 sm:$0xff]   ;;  %v21076_v43 = vld [vmem:[#allocation8 + $0x160] ss:$24 sps:$4 sm:$0xff]   ;;  %v21084_v34 = vld [vmem:[#allocation8 + $0x194] ss:$24 sps:$4 sm:$0xff]  }
 0x755   :  { %v23080_v3 = vpack.c.bf16 %v9120_v56, %v9096_v31  ;;  %16760 = vmatprep.subr.bf16.mxu1 %v21033_v60  ;;  %v21073_v13 = vld [vmem:[#allocation8 + $0xcc8] ss:$24 sps:$4 sm:$0xff]   ;;  %v21081_v60 = vld [vmem:[#allocation8 + $0xcfc] ss:$24 sps:$4 sm:$0xff]   ;;  %v21079_v1 = vld [vmem:[#allocation8 + $0xcf8] ss:$24 sps:$4 sm:$0xff]  }
 0x756   :  { %v21082_v31 = vld [vmem:[#allocation8 + $0x190] ss:$24 sps:$4 sm:$0xff]   ;;  %v21087_v56 = vld [vmem:[#allocation8 + $0xd2c] ss:$24 sps:$4 sm:$0xff]  }
 0x757   :  { %16594 = vmatprep.mubr.bf16.mxu0 %v23080_v3 }
 0x758   :  { %16595 = vmatmul.mubr.bf16.vlgmr.msra.gmra.mrb[16].mxu0 %v23078_v40  ;;  %16761 = vmatpush1.bf16.msra.mxu1 %v21031_v44  ;;  %v21090_v44 = vld [vmem:[#allocation8 + $0x1c4] ss:$24 sps:$4 sm:$0xff]  }
 0x759   :  { %17122 = vmatpush1.bf16.msra.mxu0 %v21034_v49  ;;  %17153 = vmatprep.mubr.bf16.mxu0 %v22547_v8  ;;  %v21060_v8 = vld [vmem:[#allocation8 + $0xd4] ss:$24 sps:$4 sm:$0xff]   ;;  %v21085_v49 = vld [vmem:[#allocation8 + $0xd28] ss:$24 sps:$4 sm:$0xff]  }
 0x75a   :  { %16762 = vmatprep.subr.bf16.mxu1 %v21039_v57  ;;  %17123 = vmatprep.subr.bf16.mxu0 %v21042_v53  ;;  %v21088_v57 = vld [vmem:[#allocation8 + $0x1c0] ss:$24 sps:$4 sm:$0xff]   ;;  %v21093_v53 = vld [vmem:[#allocation8 + $0xd5c] ss:$24 sps:$4 sm:$0xff]  }
 0x75c   :  { %16763 = vmatpush1.bf16.msra.mxu1 %v21037_v48  ;;  %v21096_v48 = vld [vmem:[#allocation8 + $0x1f4] ss:$24 sps:$4 sm:$0xff]  }
 0x75d   :  { %17124 = vmatpush1.bf16.msra.mxu0 %v21040_v24  ;;  %16764 = vmatprep.subr.bf16.mxu1 %v21045_v14  ;;  %v21091_v24 = vld [vmem:[#allocation8 + $0xd58] ss:$24 sps:$4 sm:$0xff]  }
 0x75e   :  { %17125 = vmatprep.subr.bf16.mxu0 %v21048_v58  ;;  %v21094_v14 = vld [vmem:[#allocation8 + $0x1f0] ss:$24 sps:$4 sm:$0xff]   ;;  %v21099_v58 = vld [vmem:[#allocation8 + $0xd8c] ss:$24 sps:$4 sm:$0xff]  }
 0x760   :  { %16765 = vmatpush1.bf16.msra.mxu1 %v21043_v17  ;;  %v21102_v17 = vld [vmem:[#allocation8 + $0x224] ss:$24 sps:$4 sm:$0xff]  }
 0x761   :  { %17126 = vmatpush1.bf16.msra.mxu0 %v21046_v50  ;;  %16777 = vmatprep.subr.bf16.mxu1 %v21051_v36  ;;  %v21097_v50 = vld [vmem:[#allocation8 + $0xd88] ss:$24 sps:$4 sm:$0xff]  }
 0x762   :  { %17127 = vmatprep.subr.bf16.mxu0 %v21054_v29  ;;  %v21100_v36 = vld [vmem:[#allocation8 + $0x220] ss:$24 sps:$4 sm:$0xff]   ;;  %v21105_v29 = vld [vmem:[#allocation8 + $0xdbc] ss:$24 sps:$4 sm:$0xff]  }
 0x763   :  { %16767 = vmatmul.mubr.bf16.vlgmr.msra.gmra.mrb[32].mxu1 %v22927_v11 }
 0x764   :  { %16778 = vmatpush1.bf16.msra.mxu1 %v21049_v45  ;;  %16809 = vmatprep.mubr.bf16.mxu1 %v22551_v37  ;;  %v21108_v45 = vld [vmem:[#allocation8 + $0x254] ss:$24 sps:$4 sm:$0xff]  }
 0x765   :  { %17128 = vmatpush1.bf16.msra.mxu0 %v21052_v10  ;;  %16779 = vmatprep.subr.bf16.mxu1 %v21057_v63  ;;  %v21103_v10 = vld [vmem:[#allocation8 + $0xdb8] ss:$24 sps:$4 sm:$0xff]  }
 0x766   :  { %17129 = vmatprep.subr.bf16.mxu0 %v21060_v8  ;;  %v21106_v63 = vld [vmem:[#allocation8 + $0x250] ss:$24 sps:$4 sm:$0xff]   ;;  %v21111_v8 = vld [vmem:[#allocation8 + $0xdec] ss:$24 sps:$4 sm:$0xff]  }
 0x768   :  { %16780 = vmatpush1.bf16.msra.mxu1 %v21055_v21  ;;  %v21114_v21 = vld [vmem:[#allocation8 + $0x284] ss:$24 sps:$4 sm:$0xff]  }
 0x769   :  { %17130 = vmatpush1.bf16.msra.mxu0 %v21058_v52  ;;  %16781 = vmatprep.subr.bf16.mxu1 %v21063_v62  ;;  %v21109_v52 = vld [vmem:[#allocation8 + $0xde8] ss:$24 sps:$4 sm:$0xff]  }
 0x76a   :  { %17131 = vmatprep.subr.bf16.mxu0 %v21066_v0  ;;  %v21112_v62 = vld [vmem:[#allocation8 + $0x280] ss:$24 sps:$4 sm:$0xff]   ;;  %v21117_v0 = vld [vmem:[#allocation8 + $0xe1c] ss:$24 sps:$4 sm:$0xff]  }
 0x76c   :  { %16782 = vmatpush1.bf16.msra.mxu1 %v21061_v4  ;;  %v21120_v4 = vld [vmem:[#allocation8 + $0x2b4] ss:$24 sps:$4 sm:$0xff]  }
 0x76d   :  { %17132 = vmatpush1.bf16.msra.mxu0 %v21064_v12  ;;  %16783 = vmatprep.subr.bf16.mxu1 %v21069_v41  ;;  %v21115_v12 = vld [vmem:[#allocation8 + $0xe18] ss:$24 sps:$4 sm:$0xff]  }
 0x76e   :  { %17133 = vmatprep.subr.bf16.mxu0 %v21072_v30  ;;  %v21118_v41 = vld [vmem:[#allocation8 + $0x2b0] ss:$24 sps:$4 sm:$0xff]   ;;  %v21123_v30 = vld [vmem:[#allocation8 + $0xe4c] ss:$24 sps:$4 sm:$0xff]  }
 0x770   :  { %16784 = vmatpush1.bf16.msra.mxu1 %v21067_v32  ;;  %v21126_v32 = vld [vmem:[#allocation8 + $0x2e4] ss:$24 sps:$4 sm:$0xff]  }
 0x771   :  { %17134 = vmatpush1.bf16.msra.mxu0 %v21070_v39  ;;  %16785 = vmatprep.subr.bf16.mxu1 %v21075_v54  ;;  %v21121_v39 = vld [vmem:[#allocation8 + $0xe48] ss:$24 sps:$4 sm:$0xff]  }
 0x772   :  { %17135 = vmatprep.subr.bf16.mxu0 %v21078_v15  ;;  %v21124_v54 = vld [vmem:[#allocation8 + $0x2e0] ss:$24 sps:$4 sm:$0xff]   ;;  %v21129_v15 = vld [vmem:[#allocation8 + $0xe7c] ss:$24 sps:$4 sm:$0xff]  }
 0x774   :  { %16786 = vmatpush1.bf16.msra.mxu1 %v21073_v13  ;;  %v21132_v13 = vld [vmem:[#allocation8 + $0x314] ss:$24 sps:$4 sm:$0xff]  }
 0x775   :  { %17136 = vmatpush1.bf16.msra.mxu0 %v21076_v43  ;;  %16787 = vmatprep.subr.bf16.mxu1 %v21081_v60  ;;  %v21127_v43 = vld [vmem:[#allocation8 + $0xe78] ss:$24 sps:$4 sm:$0xff]  }
 0x776   :  { %17137 = vmatprep.subr.bf16.mxu0 %v21084_v34  ;;  %v21130_v60 = vld [vmem:[#allocation8 + $0x310] ss:$24 sps:$4 sm:$0xff]   ;;  %v21135_v34 = vld [vmem:[#allocation8 + $0xeac] ss:$24 sps:$4 sm:$0xff]  }
 0x778   :  { %16788 = vmatpush1.bf16.msra.mxu1 %v21079_v1  ;;  %v21138_v1 = vld [vmem:[#allocation8 + $0x344] ss:$24 sps:$4 sm:$0xff]  }
 0x779   :  { %17138 = vmatpush1.bf16.msra.mxu0 %v21082_v31  ;;  %16789 = vmatprep.subr.bf16.mxu1 %v21087_v56  ;;  %v21133_v31 = vld [vmem:[#allocation8 + $0xea8] ss:$24 sps:$4 sm:$0xff]  }
 0x77a   :  { %17139 = vmatprep.subr.bf16.mxu0 %v21090_v44  ;;  %v21136_v56 = vld [vmem:[#allocation8 + $0x340] ss:$24 sps:$4 sm:$0xff]   ;;  %v21141_v44 = vld [vmem:[#allocation8 + $0xedc] ss:$24 sps:$4 sm:$0xff]  }
 0x77c   :  { %16790 = vmatpush1.bf16.msra.mxu1 %v21085_v49  ;;  %v21144_v49 = vld [vmem:[#allocation8 + $0x374] ss:$24 sps:$4 sm:$0xff]  }
 0x77d   :  { %17140 = vmatpush1.bf16.msra.mxu0 %v21088_v57  ;;  %16791 = vmatprep.subr.bf16.mxu1 %v21093_v53  ;;  %v21139_v57 = vld [vmem:[#allocation8 + $0xed8] ss:$24 sps:$4 sm:$0xff]  }
 0x77e   :  { %17141 = vmatprep.subr.bf16.mxu0 %v21096_v48  ;;  %v21142_v53 = vld [vmem:[#allocation8 + $0x370] ss:$24 sps:$4 sm:$0xff]   ;;  %v21147_v48 = vld [vmem:[#allocation8 + $0xf0c] ss:$24 sps:$4 sm:$0xff]  }
 0x780   :  { %16792 = vmatpush1.bf16.msra.mxu1 %v21091_v24  ;;  %v21150_v24 = vld [vmem:[#allocation8 + $0x3a4] ss:$24 sps:$4 sm:$0xff]  }
 0x781   :  { %17142 = vmatpush1.bf16.msra.mxu0 %v21094_v14  ;;  %16793 = vmatprep.subr.bf16.mxu1 %v21099_v58  ;;  %v21148_v14 = vld [vmem:[#allocation8 + $0x3a0] ss:$24 sps:$4 sm:$0xff]   ;;  %v21153_v58 = vld [vmem:[#allocation8 + $0xf3c] ss:$24 sps:$4 sm:$0xff]  }
 0x782   :  { %17143 = vmatprep.subr.bf16.mxu0 %v21102_v17  ;;  %v21151_v17 = vld [vmem:[#allocation8 + $0xf38] ss:$24 sps:$4 sm:$0xff]  }
 0x784   :  { %16794 = vmatpush1.bf16.msra.mxu1 %v21097_v50  ;;  %v21154_v50 = vld [vmem:[#allocation8 + $0x3d0] ss:$24 sps:$4 sm:$0xff]  }
 0x785   :  { %17144 = vmatpush1.bf16.msra.mxu0 %v21100_v36  ;;  %16795 = vmatprep.subr.bf16.mxu1 %v21105_v29  ;;  %v21159_v36 = vld [vmem:[#allocation8 + $0xf6c] ss:$24 sps:$4 sm:$0xff]  }
 0x786   :  { %17145 = vmatprep.subr.bf16.mxu0 %v21108_v45  ;;  %v21162_v29 = vld [vmem:[#allocation8 + $0x404] ss:$24 sps:$4 sm:$0xff]   ;;  %v21157_v45 = vld [vmem:[#allocation8 + $0xf68] ss:$24 sps:$4 sm:$0xff]  }
 0x788   :  { %16796 = vmatpush1.bf16.msra.mxu1 %v21103_v10  ;;  %v21160_v10 = vld [vmem:[#allocation8 + $0x400] ss:$24 sps:$4 sm:$0xff]  }
 0x789   :  { %17146 = vmatpush1.bf16.msra.mxu0 %v21106_v63  ;;  %16797 = vmatprep.subr.bf16.mxu1 %v21111_v8  ;;  %v21165_v63 = vld [vmem:[#allocation8 + $0xf9c] ss:$24 sps:$4 sm:$0xff]  }
 0x78a   :  { %17147 = vmatprep.subr.bf16.mxu0 %v21114_v21  ;;  %v21168_v8 = vld [vmem:[#allocation8 + $0x434] ss:$24 sps:$4 sm:$0xff]   ;;  %v21163_v21 = vld [vmem:[#allocation8 + $0xf98] ss:$24 sps:$4 sm:$0xff]  }
 0x78c   :  { %16798 = vmatpush1.bf16.msra.mxu1 %v21109_v52  ;;  %v21166_v52 = vld [vmem:[#allocation8 + $0x430] ss:$24 sps:$4 sm:$0xff]  }
 0x78d   :  { %17148 = vmatpush1.bf16.msra.mxu0 %v21112_v62  ;;  %16799 = vmatprep.subr.bf16.mxu1 %v21117_v0  ;;  %v21171_v62 = vld [vmem:[#allocation8 + $0xfcc] ss:$24 sps:$4 sm:$0xff]  }
 0x78e   :  { %17149 = vmatprep.subr.bf16.mxu0 %v21120_v4  ;;  %v21174_v0 = vld [vmem:[#allocation8 + $0x464] ss:$24 sps:$4 sm:$0xff]   ;;  %v21169_v4 = vld [vmem:[#allocation8 + $0xfc8] ss:$24 sps:$4 sm:$0xff]  }
 0x790   :  { %16800 = vmatpush1.bf16.msra.mxu1 %v21115_v12  ;;  %v21172_v12 = vld [vmem:[#allocation8 + $0x460] ss:$24 sps:$4 sm:$0xff]  }
 0x791   :  { %17150 = vmatpush1.bf16.msra.mxu0 %v21118_v41  ;;  %16801 = vmatprep.subr.bf16.mxu1 %v21123_v30  ;;  %v21177_v41 = vld [vmem:[#allocation8 + $0xffc] ss:$24 sps:$4 sm:$0xff]  }
 0x792   :  { %17151 = vmatprep.subr.bf16.mxu0 %v21126_v32  ;;  %v21180_v30 = vld [vmem:[#allocation8 + $0x494] ss:$24 sps:$4 sm:$0xff]   ;;  %v21175_v32 = vld [vmem:[#allocation8 + $0xff8] ss:$24 sps:$4 sm:$0xff]  }
 0x794   :  { %16802 = vmatpush1.bf16.msra.mxu1 %v21121_v39  ;;  %v21178_v39 = vld [vmem:[#allocation8 + $0x490] ss:$24 sps:$4 sm:$0xff]  }
 0x795   :  { %17152 = vmatpush1.bf16.msra.mxu0 %v21124_v54  ;;  %16803 = vmatprep.subr.bf16.mxu1 %v21129_v15  ;;  %v21183_v54 = vld [vmem:[#allocation8 + $0x102c] ss:$24 sps:$4 sm:$0xff]  }
 0x796   :  { %17164 = vmatprep.subr.bf16.mxu0 %v21132_v13  ;;  %v21186_v15 = vld [vmem:[#allocation8 + $0x4c4] ss:$24 sps:$4 sm:$0xff]   ;;  %v21181_v13 = vld [vmem:[#allocation8 + $0x1028] ss:$24 sps:$4 sm:$0xff]  }
 0x798   :  { %17154 = vmatmul.mubr.bf16.vlgmr.msra.gmra.mrb[20].mxu0 %v22542_v38  ;;  %16804 = vmatpush1.bf16.msra.mxu1 %v21127_v43  ;;  %v21145_v38 = vld [vmem:[#allocation8 + $0xf08] ss:$24 sps:$4 sm:$0xff]  }
 0x799   :  { %17165 = vmatpush1.bf16.msra.mxu0 %v21130_v60  ;;  %17196 = vmatprep.mubr.bf16.mxu0 %v22733_v22  ;;  %v21156_v22 = vld [vmem:[#allocation8 + $0x3d4] ss:$24 sps:$4 sm:$0xff]   ;;  %v21184_v43 = vld [vmem:[#allocation8 + $0x4c0] ss:$24 sps:$4 sm:$0xff]  }
 0x79a   :  { %16805 = vmatprep.subr.bf16.mxu1 %v21135_v34  ;;  %17166 = vmatprep.subr.bf16.mxu0 %v21138_v1  ;;  %v21189_v60 = vld [vmem:[#allocation8 + $0x105c] ss:$24 sps:$4 sm:$0xff]   ;;  %v21187_v1 = vld [vmem:[#allocation8 + $0x1058] ss:$24 sps:$4 sm:$0xff]  }
 0x79b   :  { %v21192_v34 = vld [vmem:[#allocation8 + $0x4f4] ss:$24 sps:$4 sm:$0xff]  }
 0x79c   :  { %16806 = vmatpush1.bf16.msra.mxu1 %v21133_v31  ;;  %v21190_v31 = vld [vmem:[#allocation8 + $0x4f0] ss:$24 sps:$4 sm:$0xff]  }
 0x79d   :  { %17167 = vmatpush1.bf16.msra.mxu0 %v21136_v56  ;;  %16807 = vmatprep.subr.bf16.mxu1 %v21141_v44  ;;  %v21195_v56 = vld [vmem:[#allocation8 + $0x108c] ss:$24 sps:$4 sm:$0xff]  }
 0x79e   :  { %17168 = vmatprep.subr.bf16.mxu0 %v21144_v49  ;;  %v21198_v44 = vld [vmem:[#allocation8 + $0x524] ss:$24 sps:$4 sm:$0xff]   ;;  %v21193_v49 = vld [vmem:[#allocation8 + $0x1088] ss:$24 sps:$4 sm:$0xff]  }
 0x7a0   :  { %16808 = vmatpush1.bf16.msra.mxu1 %v21139_v57  ;;  %v21196_v57 = vld [vmem:[#allocation8 + $0x520] ss:$24 sps:$4 sm:$0xff]  }
 0x7a1   :  { %17169 = vmatpush1.bf16.msra.mxu0 %v21142_v53  ;;  %16820 = vmatprep.subr.bf16.mxu1 %v21147_v48  ;;  %v21201_v53 = vld [vmem:[#allocation8 + $0x10bc] ss:$24 sps:$4 sm:$0xff]  }
 0x7a2   :  { %17170 = vmatprep.subr.bf16.mxu0 %v21150_v24  ;;  %v21204_v48 = vld [vmem:[#allocation8 + $0x554] ss:$24 sps:$4 sm:$0xff]   ;;  %v21199_v24 = vld [vmem:[#allocation8 + $0x10b8] ss:$24 sps:$4 sm:$0xff]  }
 0x7a3   :  { %16810 = vmatmul.mubr.bf16.vlgmr.msra.gmra.mrb[32].mxu1 %v22549_v19 }
 0x7a4   :  { %16821 = vmatpush1.bf16.msra.mxu1 %v21145_v38  ;;  %16852 = vmatprep.mubr.bf16.mxu1 %v22982_v20  ;;  %v21202_v38 = vld [vmem:[#allocation8 + $0x550] ss:$24 sps:$4 sm:$0xff]  }
 0x7a5   :  { %17171 = vmatpush1.bf16.msra.mxu0 %v21148_v14  ;;  %16822 = vmatprep.subr.bf16.mxu1 %v21153_v58  ;;  %v21207_v14 = vld [vmem:[#allocation8 + $0x10ec] ss:$24 sps:$4 sm:$0xff]  }
 0x7a6   :  { %17172 = vmatprep.subr.bf16.mxu0 %v21156_v22  ;;  %v21210_v58 = vld [vmem:[#allocation8 + $0x584] ss:$24 sps:$4 sm:$0xff]   ;;  %v21205_v22 = vld [vmem:[#allocation8 + $0x10e8] ss:$24 sps:$4 sm:$0xff]  }
 0x7a8   :  { %16823 = vmatpush1.bf16.msra.mxu1 %v21151_v17  ;;  %v21208_v17 = vld [vmem:[#allocation8 + $0x580] ss:$24 sps:$4 sm:$0xff]  }
 0x7a9   :  { %17173 = vmatpush1.bf16.msra.mxu0 %v21154_v50  ;;  %16824 = vmatprep.subr.bf16.mxu1 %v21159_v36  ;;  %v21213_v50 = vld [vmem:[#allocation8 + $0x111c] ss:$24 sps:$4 sm:$0xff]  }
 0x7aa   :  { %17174 = vmatprep.subr.bf16.mxu0 %v21162_v29  ;;  %v21216_v36 = vld [vmem:[#allocation8 + $0x5b4] ss:$24 sps:$4 sm:$0xff]   ;;  %v21211_v29 = vld [vmem:[#allocation8 + $0x1118] ss:$24 sps:$4 sm:$0xff]  }
 0x7ac   :  { %16825 = vmatpush1.bf16.msra.mxu1 %v21157_v45  ;;  %v21214_v45 = vld [vmem:[#allocation8 + $0x5b0] ss:$24 sps:$4 sm:$0xff]  }
 0x7ad   :  { %17175 = vmatpush1.bf16.msra.mxu0 %v21160_v10  ;;  %16826 = vmatprep.subr.bf16.mxu1 %v21165_v63  ;;  %v21219_v10 = vld [vmem:[#allocation8 + $0x114c] ss:$24 sps:$4 sm:$0xff]  }
 0x7ae   :  { %17176 = vmatprep.subr.bf16.mxu0 %v21168_v8  ;;  %v21222_v63 = vld [vmem:[#allocation8 + $0x5e4] ss:$24 sps:$4 sm:$0xff]   ;;  %v21217_v8 = vld [vmem:[#allocation8 + $0x1148] ss:$24 sps:$4 sm:$0xff]  }
 0x7b0   :  { %16827 = vmatpush1.bf16.msra.mxu1 %v21163_v21  ;;  %v21220_v21 = vld [vmem:[#allocation8 + $0x5e0] ss:$24 sps:$4 sm:$0xff]  }
 0x7b1   :  { %17177 = vmatpush1.bf16.msra.mxu0 %v21166_v52  ;;  %16828 = vmatprep.subr.bf16.mxu1 %v21171_v62  ;;  %v21225_v52 = vld [vmem:[#allocation8 + $0x117c] ss:$24 sps:$4 sm:$0xff]  }
 0x7b2   :  { %17178 = vmatprep.subr.bf16.mxu0 %v21174_v0  ;;  %v21228_v62 = vld [vmem:[#allocation8 + $0x614] ss:$24 sps:$4 sm:$0xff]   ;;  %v21223_v0 = vld [vmem:[#allocation8 + $0x1178] ss:$24 sps:$4 sm:$0xff]  }
 0x7b4   :  { %16829 = vmatpush1.bf16.msra.mxu1 %v21169_v4  ;;  %v21226_v4 = vld [vmem:[#allocation8 + $0x610] ss:$24 sps:$4 sm:$0xff]  }
 0x7b5   :  { %17179 = vmatpush1.bf16.msra.mxu0 %v21172_v12  ;;  %16830 = vmatprep.subr.bf16.mxu1 %v21177_v41  ;;  %v21231_v12 = vld [vmem:[#allocation8 + $0x11ac] ss:$24 sps:$4 sm:$0xff]  }
 0x7b6   :  { %17180 = vmatprep.subr.bf16.mxu0 %v21180_v30  ;;  %v21234_v41 = vld [vmem:[#allocation8 + $0x644] ss:$24 sps:$4 sm:$0xff]   ;;  %v21229_v30 = vld [vmem:[#allocation8 + $0x11a8] ss:$24 sps:$4 sm:$0xff]  }
 0x7b8   :  { %16831 = vmatpush1.bf16.msra.mxu1 %v21175_v32  ;;  %v21232_v32 = vld [vmem:[#allocation8 + $0x640] ss:$24 sps:$4 sm:$0xff]  }
 0x7b9   :  { %17181 = vmatpush1.bf16.msra.mxu0 %v21178_v39  ;;  %16832 = vmatprep.subr.bf16.mxu1 %v21183_v54  ;;  %v21237_v39 = vld [vmem:[#allocation8 + $0x11dc] ss:$24 sps:$4 sm:$0xff]  }
 0x7ba   :  { %17182 = vmatprep.subr.bf16.mxu0 %v21186_v15  ;;  %v21240_v54 = vld [vmem:[#allocation8 + $0x674] ss:$24 sps:$4 sm:$0xff]   ;;  %v21235_v15 = vld [vmem:[#allocation8 + $0x11d8] ss:$24 sps:$4 sm:$0xff]  }
 0x7bc   :  { %16833 = vmatpush1.bf16.msra.mxu1 %v21181_v13  ;;  %v21238_v13 = vld [vmem:[#allocation8 + $0x670] ss:$24 sps:$4 sm:$0xff]  }
 0x7bd   :  { %17183 = vmatpush1.bf16.msra.mxu0 %v21184_v43  ;;  %16834 = vmatprep.subr.bf16.mxu1 %v21189_v60  ;;  %v21243_v43 = vld [vmem:[#allocation8 + $0x120c] ss:$24 sps:$4 sm:$0xff]  }
 0x7be   :  { %17184 = vmatprep.subr.bf16.mxu0 %v21192_v34  ;;  %v21246_v60 = vld [vmem:[#allocation8 + $0x6a4] ss:$24 sps:$4 sm:$0xff]   ;;  %v21244_v34 = vld [vmem:[#allocation8 + $0x6a0] ss:$24 sps:$4 sm:$0xff]  }
 0x7c0   :  { %16835 = vmatpush1.bf16.msra.mxu1 %v21187_v1  ;;  %v21249_v1 = vld [vmem:[#allocation8 + $0x123c] ss:$24 sps:$4 sm:$0xff]  }
 0x7c1   :  { %17185 = vmatpush1.bf16.msra.mxu0 %v21190_v31  ;;  %16836 = vmatprep.subr.bf16.mxu1 %v21195_v56  ;;  %v21247_v31 = vld [vmem:[#allocation8 + $0x1238] ss:$24 sps:$4 sm:$0xff]  }
 0x7c2   :  { %17186 = vmatprep.subr.bf16.mxu0 %v21198_v44  ;;  %v21250_v56 = vld [vmem:[#allocation8 + $0x6d0] ss:$24 sps:$4 sm:$0xff]   ;;  %v21255_v44 = vld [vmem:[#allocation8 + $0x126c] ss:$24 sps:$4 sm:$0xff]  }
 0x7c4   :  { %16837 = vmatpush1.bf16.msra.mxu1 %v21193_v49  ;;  %v21258_v49 = vld [vmem:[#allocation8 + $0x704] ss:$24 sps:$4 sm:$0xff]  }
 0x7c5   :  { %17187 = vmatpush1.bf16.msra.mxu0 %v21196_v57  ;;  %16838 = vmatprep.subr.bf16.mxu1 %v21201_v53  ;;  %v21253_v57 = vld [vmem:[#allocation8 + $0x1268] ss:$24 sps:$4 sm:$0xff]  }
 0x7c6   :  { %17188 = vmatprep.subr.bf16.mxu0 %v21204_v48  ;;  %v21256_v53 = vld [vmem:[#allocation8 + $0x700] ss:$24 sps:$4 sm:$0xff]   ;;  %v21261_v48 = vld [vmem:[#allocation8 + $0x129c] ss:$24 sps:$4 sm:$0xff]  }
 0x7c8   :  { %16839 = vmatpush1.bf16.msra.mxu1 %v21199_v24  ;;  %v21264_v24 = vld [vmem:[#allocation8 + $0x734] ss:$24 sps:$4 sm:$0xff]  }
 0x7c9   :  { %17189 = vmatpush1.bf16.msra.mxu0 %v21202_v38  ;;  %16840 = vmatprep.subr.bf16.mxu1 %v21207_v14  ;;  %v21259_v38 = vld [vmem:[#allocation8 + $0x1298] ss:$24 sps:$4 sm:$0xff]  }
 0x7ca   :  { %17190 = vmatprep.subr.bf16.mxu0 %v21210_v58  ;;  %v21262_v14 = vld [vmem:[#allocation8 + $0x730] ss:$24 sps:$4 sm:$0xff]   ;;  %v21267_v58 = vld [vmem:[#allocation8 + $0x12cc] ss:$24 sps:$4 sm:$0xff]  }
 0x7cc   :  { %16841 = vmatpush1.bf16.msra.mxu1 %v21205_v22  ;;  %v21270_v22 = vld [vmem:[#allocation8 + $0x764] ss:$24 sps:$4 sm:$0xff]  }
 0x7cd   :  { %17191 = vmatpush1.bf16.msra.mxu0 %v21208_v17  ;;  %16842 = vmatprep.subr.bf16.mxu1 %v21213_v50  ;;  %v21265_v17 = vld [vmem:[#allocation8 + $0x12c8] ss:$24 sps:$4 sm:$0xff]  }
 0x7ce   :  { %17192 = vmatprep.subr.bf16.mxu0 %v21216_v36  ;;  %v21268_v50 = vld [vmem:[#allocation8 + $0x760] ss:$24 sps:$4 sm:$0xff]   ;;  %v21273_v36 = vld [vmem:[#allocation8 + $0x12fc] ss:$24 sps:$4 sm:$0xff]  }
 0x7d0   :  { %16843 = vmatpush1.bf16.msra.mxu1 %v21211_v29  ;;  %v21276_v29 = vld [vmem:[#allocation8 + $0x794] ss:$24 sps:$4 sm:$0xff]  }
 0x7d1   :  { %17193 = vmatpush1.bf16.msra.mxu0 %v21214_v45  ;;  %16844 = vmatprep.subr.bf16.mxu1 %v21219_v10  ;;  %v21271_v45 = vld [vmem:[#allocation8 + $0x12f8] ss:$24 sps:$4 sm:$0xff]  }
 0x7d2   :  { %17194 = vmatprep.subr.bf16.mxu0 %v21222_v63  ;;  %v21274_v10 = vld [vmem:[#allocation8 + $0x790] ss:$24 sps:$4 sm:$0xff]   ;;  %v21279_v63 = vld [vmem:[#allocation8 + $0x132c] ss:$24 sps:$4 sm:$0xff]  }
 0x7d4   :  { %16845 = vmatpush1.bf16.msra.mxu1 %v21217_v8  ;;  %v21282_v8 = vld [vmem:[#allocation8 + $0x7c4] ss:$24 sps:$4 sm:$0xff]  }
 0x7d5   :  { %17195 = vmatpush1.bf16.msra.mxu0 %v21220_v21  ;;  %16846 = vmatprep.subr.bf16.mxu1 %v21225_v52  ;;  %v21277_v21 = vld [vmem:[#allocation8 + $0x1328] ss:$24 sps:$4 sm:$0xff]  }
 0x7d6   :  { %17207 = vmatprep.subr.bf16.mxu0 %v21228_v62  ;;  %v21280_v52 = vld [vmem:[#allocation8 + $0x7c0] ss:$24 sps:$4 sm:$0xff]   ;;  %v21285_v62 = vld [vmem:[#allocation8 + $0x135c] ss:$24 sps:$4 sm:$0xff]  }
 0x7d8   :  { %17197 = vmatmul.mubr.bf16.vlgmr.msra.gmra.mrb[20].mxu0 %v22728_v42  ;;  %16847 = vmatpush1.bf16.msra.mxu1 %v21223_v0  ;;  %v21241_v42 = vld [vmem:[#allocation8 + $0x1208] ss:$24 sps:$4 sm:$0xff]   ;;  %v21288_v0 = vld [vmem:[#allocation8 + $0x7f4] ss:$24 sps:$4 sm:$0xff]  }
 0x7d9   :  { %17208 = vmatpush1.bf16.msra.mxu0 %v21226_v4  ;;  %17239 = vmatprep.mubr.bf16.mxu0 %v22837_v28  ;;  %v21252_v28 = vld [vmem:[#allocation8 + $0x6d4] ss:$24 sps:$4 sm:$0xff]   ;;  %v21283_v4 = vld [vmem:[#allocation8 + $0x1358] ss:$24 sps:$4 sm:$0xff]  }
 0x7da   :  { %16848 = vmatprep.subr.bf16.mxu1 %v21231_v12  ;;  %17209 = vmatprep.subr.bf16.mxu0 %v21234_v41  ;;  %v21286_v12 = vld [vmem:[#allocation8 + $0x7f0] ss:$24 sps:$4 sm:$0xff]   ;;  %v21291_v41 = vld [vmem:[#allocation8 + $0x138c] ss:$24 sps:$4 sm:$0xff]  }
 0x7dc   :  { %16849 = vmatpush1.bf16.msra.mxu1 %v21229_v30  ;;  %v21294_v30 = vld [vmem:[#allocation8 + $0x824] ss:$24 sps:$4 sm:$0xff]  }
 0x7dd   :  { %17210 = vmatpush1.bf16.msra.mxu0 %v21232_v32  ;;  %16850 = vmatprep.subr.bf16.mxu1 %v21237_v39  ;;  %v21289_v32 = vld [vmem:[#allocation8 + $0x1388] ss:$24 sps:$4 sm:$0xff]  }
 0x7de   :  { %17211 = vmatprep.subr.bf16.mxu0 %v21240_v54  ;;  %v21292_v39 = vld [vmem:[#allocation8 + $0x820] ss:$24 sps:$4 sm:$0xff]   ;;  %v21297_v54 = vld [vmem:[#allocation8 + $0x13bc] ss:$24 sps:$4 sm:$0xff]  }
 0x7e0   :  { %16851 = vmatpush1.bf16.msra.mxu1 %v21235_v15  ;;  %v21300_v15 = vld [vmem:[#allocation8 + $0x854] ss:$24 sps:$4 sm:$0xff]  }
 0x7e1   :  { %17212 = vmatpush1.bf16.msra.mxu0 %v21238_v13  ;;  %16863 = vmatprep.subr.bf16.mxu1 %v21243_v43  ;;  %v21295_v13 = vld [vmem:[#allocation8 + $0x13b8] ss:$24 sps:$4 sm:$0xff]  }
 0x7e2   :  { %17213 = vmatprep.subr.bf16.mxu0 %v21246_v60  ;;  %v21298_v43 = vld [vmem:[#allocation8 + $0x850] ss:$24 sps:$4 sm:$0xff]   ;;  %v21303_v60 = vld [vmem:[#allocation8 + $0x13ec] ss:$24 sps:$4 sm:$0xff]  }
 0x7e3   :  { %16853 = vmatmul.mubr.bf16.vlgmr.msra.gmra.mrb[32].mxu1 %v22980_v51 }
 0x7e4   :  { %16864 = vmatpush1.bf16.msra.mxu1 %v21241_v42  ;;  %16895 = vmatprep.mubr.bf16.mxu1 %v22737_v2  ;;  %v21306_v42 = vld [vmem:[#allocation8 + $0x884] ss:$24 sps:$4 sm:$0xff]  }
 0x7e5   :  { %17214 = vmatpush1.bf16.msra.mxu0 %v21244_v34  ;;  %16865 = vmatprep.subr.bf16.mxu1 %v21249_v1  ;;  %v21301_v34 = vld [vmem:[#allocation8 + $0x13e8] ss:$24 sps:$4 sm:$0xff]  }
 0x7e6   :  { %17215 = vmatprep.subr.bf16.mxu0 %v21252_v28  ;;  %v21304_v1 = vld [vmem:[#allocation8 + $0x880] ss:$24 sps:$4 sm:$0xff]   ;;  %v21309_v28 = vld [vmem:[#allocation8 + $0x141c] ss:$24 sps:$4 sm:$0xff]  }
 0x7e8   :  { %16866 = vmatpush1.bf16.msra.mxu1 %v21247_v31  ;;  %v21312_v31 = vld [vmem:[#allocation8 + $0x8b4] ss:$24 sps:$4 sm:$0xff]  }
 0x7e9   :  { %17216 = vmatpush1.bf16.msra.mxu0 %v21250_v56  ;;  %16867 = vmatprep.subr.bf16.mxu1 %v21255_v44  ;;  %v21307_v56 = vld [vmem:[#allocation8 + $0x1418] ss:$24 sps:$4 sm:$0xff]  }
 0x7ea   :  { %17217 = vmatprep.subr.bf16.mxu0 %v21258_v49  ;;  %v21310_v44 = vld [vmem:[#allocation8 + $0x8b0] ss:$24 sps:$4 sm:$0xff]   ;;  %v21315_v49 = vld [vmem:[#allocation8 + $0x144c] ss:$24 sps:$4 sm:$0xff]  }
 0x7ec   :  { %16868 = vmatpush1.bf16.msra.mxu1 %v21253_v57  ;;  %v21318_v57 = vld [vmem:[#allocation8 + $0x8e4] ss:$24 sps:$4 sm:$0xff]  }
 0x7ed   :  { %17218 = vmatpush1.bf16.msra.mxu0 %v21256_v53  ;;  %16869 = vmatprep.subr.bf16.mxu1 %v21261_v48  ;;  %v21313_v53 = vld [vmem:[#allocation8 + $0x1448] ss:$24 sps:$4 sm:$0xff]  }
 0x7ee   :  { %17219 = vmatprep.subr.bf16.mxu0 %v21264_v24  ;;  %v21316_v48 = vld [vmem:[#allocation8 + $0x8e0] ss:$24 sps:$4 sm:$0xff]   ;;  %v21321_v24 = vld [vmem:[#allocation8 + $0x147c] ss:$24 sps:$4 sm:$0xff]  }
 0x7f0   :  { %16870 = vmatpush1.bf16.msra.mxu1 %v21259_v38  ;;  %v21324_v38 = vld [vmem:[#allocation8 + $0x914] ss:$24 sps:$4 sm:$0xff]  }
 0x7f1   :  { %17220 = vmatpush1.bf16.msra.mxu0 %v21262_v14  ;;  %16871 = vmatprep.subr.bf16.mxu1 %v21267_v58  ;;  %v21319_v14 = vld [vmem:[#allocation8 + $0x1478] ss:$24 sps:$4 sm:$0xff]  }
 0x7f2   :  { %17221 = vmatprep.subr.bf16.mxu0 %v21270_v22  ;;  %v21322_v58 = vld [vmem:[#allocation8 + $0x910] ss:$24 sps:$4 sm:$0xff]   ;;  %v21327_v22 = vld [vmem:[#allocation8 + $0x14ac] ss:$24 sps:$4 sm:$0xff]  }
 0x7f4   :  { %16872 = vmatpush1.bf16.msra.mxu1 %v21265_v17  ;;  %v21330_v17 = vld [vmem:[#allocation8 + $0x944] ss:$24 sps:$4 sm:$0xff]  }
 0x7f5   :  { %17222 = vmatpush1.bf16.msra.mxu0 %v21268_v50  ;;  %16873 = vmatprep.subr.bf16.mxu1 %v21273_v36  ;;  %v21325_v50 = vld [vmem:[#allocation8 + $0x14a8] ss:$24 sps:$4 sm:$0xff]  }
 0x7f6   :  { %17223 = vmatprep.subr.bf16.mxu0 %v21276_v29  ;;  %v21328_v36 = vld [vmem:[#allocation8 + $0x940] ss:$24 sps:$4 sm:$0xff]   ;;  %v21333_v29 = vld [vmem:[#allocation8 + $0x14dc] ss:$24 sps:$4 sm:$0xff]  }
 0x7f8   :  { %16874 = vmatpush1.bf16.msra.mxu1 %v21271_v45  ;;  %v21336_v45 = vld [vmem:[#allocation8 + $0x974] ss:$24 sps:$4 sm:$0xff]  }
 0x7f9   :  { %17224 = vmatpush1.bf16.msra.mxu0 %v21274_v10  ;;  %16875 = vmatprep.subr.bf16.mxu1 %v21279_v63  ;;  %v21331_v10 = vld [vmem:[#allocation8 + $0x14d8] ss:$24 sps:$4 sm:$0xff]  }
 0x7fa   :  { %17225 = vmatprep.subr.bf16.mxu0 %v21282_v8  ;;  %v21334_v63 = vld [vmem:[#allocation8 + $0x970] ss:$24 sps:$4 sm:$0xff]   ;;  %v21339_v8 = vld [vmem:[#allocation8 + $0x150c] ss:$24 sps:$4 sm:$0xff]  }
 0x7fc   :  { %16876 = vmatpush1.bf16.msra.mxu1 %v21277_v21  ;;  %v21342_v21 = vld [vmem:[#allocation8 + $0x9a4] ss:$24 sps:$4 sm:$0xff]  }
 0x7fd   :  { %17226 = vmatpush1.bf16.msra.mxu0 %v21280_v52  ;;  %16877 = vmatprep.subr.bf16.mxu1 %v21285_v62  ;;  %v21340_v52 = vld [vmem:[#allocation8 + $0x9a0] ss:$24 sps:$4 sm:$0xff]   ;;  %v21345_v62 = vld [vmem:[#allocation8 + $0x153c] ss:$24 sps:$4 sm:$0xff]  }
 0x7fe   :  { %17227 = vmatprep.subr.bf16.mxu0 %v21288_v0  ;;  %v21343_v0 = vld [vmem:[#allocation8 + $0x1538] ss:$24 sps:$4 sm:$0xff]  }
 0x800   :  { %16878 = vmatpush1.bf16.msra.mxu1 %v21283_v4  ;;  %v21346_v4 = vld [vmem:[#allocation8 + $0x9d0] ss:$24 sps:$4 sm:$0xff]  }
 0x801   :  { %17228 = vmatpush1.bf16.msra.mxu0 %v21286_v12  ;;  %16879 = vmatprep.subr.bf16.mxu1 %v21291_v41  ;;  %v10297_v12 = vld [vmem:[#allocation10] sm:$0x3f] }
 0x802   :  { %17229 = vmatprep.subr.bf16.mxu0 %v21294_v30  ;;  %v21351_v41 = vld [vmem:[#allocation8 + $0x156c] ss:$24 sps:$4 sm:$0xff]  }
 0x803   :  { %v21354_v30 = vld [vmem:[#allocation8 + $0xa04] ss:$24 sps:$4 sm:$0xff]  }
 0x804   :  { %16880 = vmatpush1.bf16.msra.mxu1 %v21289_v32  ;;  %v10302_v32 = vrot.slane %v10297_v12, %v22390_v59  ;;  %v21363_v59 = vld [vmem:[#allocation8 + $0x15cc] ss:$24 sps:$4 sm:$0xff]  }
 0x805   :  { %17230 = vmatpush1.bf16.msra.mxu0 %v21292_v39  ;;  %16881 = vmatprep.subr.bf16.mxu1 %v21297_v54  ;;  %v21349_v39 = vld [vmem:[#allocation8 + $0x1568] ss:$24 sps:$4 sm:$0xff]  }
 0x806   :  { %17231 = vmatprep.subr.bf16.mxu0 %v21300_v15  ;;  %v21352_v54 = vld [vmem:[#allocation8 + $0xa00] ss:$24 sps:$4 sm:$0xff]   ;;  %v10306_v15 = vrot.slane %v10297_v12, %v22393_v61  ;;  %v21399_v12 = vld [vmem:[#allocation8 + $0x16ec] ss:$24 sps:$4 sm:$0xff]  }
 0x808   :  { %16882 = vmatpush1.bf16.msra.mxu1 %v21295_v13  ;;  %v21357_v13 = vld [vmem:[#allocation8 + $0x159c] ss:$24 sps:$4 sm:$0xff]  }
 0x809   :  { %17232 = vmatpush1.bf16.msra.mxu0 %v21298_v43  ;;  %16883 = vmatprep.subr.bf16.mxu1 %v21303_v60  ;;  %v21360_v43 = vld [vmem:[#allocation8 + $0xa34] ss:$24 sps:$4 sm:$0xff]  }
 0x80a   :  { %17233 = vmatprep.subr.bf16.mxu0 %v21306_v42 }
 0x80c   :  { %16884 = vmatpush1.bf16.msra.mxu1 %v21301_v34 }
 0x80d   :  { %17234 = vmatpush1.bf16.msra.mxu0 %v21304_v1  ;;  %16885 = vmatprep.subr.bf16.mxu1 %v21309_v28  ;;  %v21355_v1 = vld [vmem:[#allocation8 + $0x1598] ss:$24 sps:$4 sm:$0xff]  }
 0x80e   :  { %17235 = vmatprep.subr.bf16.mxu0 %v21312_v31 }
 0x810   :  { %16886 = vmatpush1.bf16.msra.mxu1 %v21307_v56  ;;  %v21358_v56 = vld [vmem:[#allocation8 + $0xa30] ss:$24 sps:$4 sm:$0xff]  }
 0x811   :  { %17236 = vmatpush1.bf16.msra.mxu0 %v21310_v44  ;;  %16887 = vmatprep.subr.bf16.mxu1 %v21315_v49 }
 0x812   :  { %17237 = vmatprep.subr.bf16.mxu0 %v21318_v57  ;;  %v21366_v57 = vld [vmem:[#allocation8 + $0xa64] ss:$24 sps:$4 sm:$0xff]  }
 0x814   :  { %16888 = vmatpush1.bf16.msra.mxu1 %v21313_v53  ;;  %v21361_v53 = vld [vmem:[#allocation8 + $0x15c8] ss:$24 sps:$4 sm:$0xff]  }
 0x815   :  { %17238 = vmatpush1.bf16.msra.mxu0 %v21316_v48  ;;  %16889 = vmatprep.subr.bf16.mxu1 %v21321_v24  ;;  %v21364_v48 = vld [vmem:[#allocation8 + $0xa60] ss:$24 sps:$4 sm:$0xff]   ;;  %v21369_v24 = vld [vmem:[#allocation8 + $0x15fc] ss:$24 sps:$4 sm:$0xff]  }
 0x816   :  { %17250 = vmatprep.subr.bf16.mxu0 %v21324_v38  ;;  %v21372_v38 = vld [vmem:[#allocation8 + $0xa94] ss:$24 sps:$4 sm:$0xff]  }
 0x818   :  { %17240 = vmatmul.mubr.bf16.vlgmr.msra.gmra.mrb[20].mxu0 %v22834_v16  ;;  %16890 = vmatpush1.bf16.msra.mxu1 %v21319_v14  ;;  %v21337_v16 = vld [vmem:[#allocation8 + $0x1508] ss:$24 sps:$4 sm:$0xff]   ;;  %v21367_v14 = vld [vmem:[#allocation8 + $0x15f8] ss:$24 sps:$4 sm:$0xff]  }
 0x819   :  { %17251 = vmatpush1.bf16.msra.mxu0 %v21322_v58  ;;  %17282 = vmatprep.mubr.bf16.mxu0 %v22929_v35  ;;  %v21348_v35 = vld [vmem:[#allocation8 + $0x9d4] ss:$24 sps:$4 sm:$0xff]   ;;  %v21370_v58 = vld [vmem:[#allocation8 + $0xa90] ss:$24 sps:$4 sm:$0xff]  }
 0x81a   :  { %16891 = vmatprep.subr.bf16.mxu1 %v21327_v22  ;;  %17252 = vmatprep.subr.bf16.mxu0 %v21330_v17  ;;  %v21375_v22 = vld [vmem:[#allocation8 + $0x162c] ss:$24 sps:$4 sm:$0xff]  }
 0x81b   :  { %v21378_v17 = vld [vmem:[#allocation8 + $0xac4] ss:$24 sps:$4 sm:$0xff]  }
 0x81c   :  { %16892 = vmatpush1.bf16.msra.mxu1 %v21325_v50  ;;  %v21373_v50 = vld [vmem:[#allocation8 + $0x1628] ss:$24 sps:$4 sm:$0xff]  }
 0x81d   :  { %17253 = vmatpush1.bf16.msra.mxu0 %v21328_v36  ;;  %16893 = vmatprep.subr.bf16.mxu1 %v21333_v29  ;;  %v21376_v36 = vld [vmem:[#allocation8 + $0xac0] ss:$24 sps:$4 sm:$0xff]   ;;  %v21381_v29 = vld [vmem:[#allocation8 + $0x165c] ss:$24 sps:$4 sm:$0xff]  }
 0x81e   :  { %17254 = vmatprep.subr.bf16.mxu0 %v21336_v45  ;;  %v21384_v45 = vld [vmem:[#allocation8 + $0xaf4] ss:$24 sps:$4 sm:$0xff]  }
 0x820   :  { %16894 = vmatpush1.bf16.msra.mxu1 %v21331_v10  ;;  %v21379_v10 = vld [vmem:[#allocation8 + $0x1658] ss:$24 sps:$4 sm:$0xff]  }
 0x821   :  { %17255 = vmatpush1.bf16.msra.mxu0 %v21334_v63  ;;  %16906 = vmatprep.subr.bf16.mxu1 %v21339_v8  ;;  %v21382_v63 = vld [vmem:[#allocation8 + $0xaf0] ss:$24 sps:$4 sm:$0xff]   ;;  %v21387_v8 = vld [vmem:[#allocation8 + $0x168c] ss:$24 sps:$4 sm:$0xff]  }
 0x822   :  { %17256 = vmatprep.subr.bf16.mxu0 %v21342_v21  ;;  %v21390_v21 = vld [vmem:[#allocation8 + $0xb24] ss:$24 sps:$4 sm:$0xff]  }
 0x823   :  { %16896 = vmatmul.mubr.bf16.vlgmr.msra.gmra.mrb[32].mxu1 %v22735_v7 }
 0x824   :  { %16907 = vmatpush1.bf16.msra.mxu1 %v21337_v16  ;;  %16938 = vmatprep.mubr.bf16.mxu1 %v23028_v5  ;;  %v21385_v16 = vld [vmem:[#allocation8 + $0x1688] ss:$24 sps:$4 sm:$0xff]  }
 0x825   :  { %17257 = vmatpush1.bf16.msra.mxu0 %v21340_v52  ;;  %16908 = vmatprep.subr.bf16.mxu1 %v21345_v62  ;;  %v21388_v52 = vld [vmem:[#allocation8 + $0xb20] ss:$24 sps:$4 sm:$0xff]   ;;  %v21393_v62 = vld [vmem:[#allocation8 + $0x16bc] ss:$24 sps:$4 sm:$0xff]  }
 0x826   :  { %17258 = vmatprep.subr.bf16.mxu0 %v21348_v35  ;;  %v21396_v35 = vld [vmem:[#allocation8 + $0xb54] ss:$24 sps:$4 sm:$0xff]  }
 0x828   :  { %16909 = vmatpush1.bf16.msra.mxu1 %v21343_v0  ;;  %v21391_v0 = vld [vmem:[#allocation8 + $0x16b8] ss:$24 sps:$4 sm:$0xff]  }
 0x829   :  { %17259 = vmatpush1.bf16.msra.mxu0 %v21346_v4  ;;  %16910 = vmatprep.subr.bf16.mxu1 %v21351_v41  ;;  %v21394_v4 = vld [vmem:[#allocation8 + $0xb50] ss:$24 sps:$4 sm:$0xff]   ;;  %v21402_v41 = vld [vmem:[#allocation8 + $0xb84] ss:$24 sps:$4 sm:$0xff]  }
 0x82a   :  { %17260 = vmatprep.subr.bf16.mxu0 %v21354_v30  ;;  %v21397_v30 = vld [vmem:[#allocation8 + $0x16e8] ss:$24 sps:$4 sm:$0xff]  }
 0x82b   :  { %v16596_v60 = vpop.f32.mrb[16].mxu0 }
 0x82c   :  { %v20020_v42 = vadd.f32 %v16596_v60, %v10302_v32  ;;  %v16598_v34 = vpop.f32.mrb[17].mxu0  ;;  %16911 = vmatpush1.bf16.msra.mxu1 %v21349_v39  ;;  %v21405_v39 = vld [vmem:[#allocation8 + $0x171c] ss:$24 sps:$4 sm:$0xff]  }
 0x82d   :  { %v20021_v28 = vadd.f32 %v16598_v34, %v10306_v15  ;;  %17261 = vmatpush1.bf16.msra.mxu0 %v21352_v54  ;;  %v16600_v31 = vpop.f32.mrb[18].mxu0  ;;  %16912 = vmatprep.subr.bf16.mxu1 %v21357_v13  ;;  %v21408_v54 = vld [vmem:[#allocation8 + $0xbb4] ss:$24 sps:$4 sm:$0xff]   ;;  %v21406_v13 = vld [vmem:[#allocation8 + $0xbb0] ss:$24 sps:$4 sm:$0xff]  }
 0x82e   :  { %17637 = vst [vmem:[#allocation11] sm:$0xff] %v20020_v42  ;;  %v20022_v44 = vadd.f32 %v16600_v31, %v10302_v32  ;;  %v16602_v49 = vpop.f32.mrb[19].mxu0  ;;  %17262 = vmatprep.subr.bf16.mxu0 %v21360_v43  ;;  %v21400_v32 = vld [vmem:[#allocation8 + $0xb80] ss:$24 sps:$4 sm:$0xff]   ;;  %v21411_v43 = vld [vmem:[#allocation8 + $0x174c] ss:$24 sps:$4 sm:$0xff]  }
 0x82f   :  { %17638 = vst [vmem:[#allocation11 + $0x8] sm:$0xff] %v20021_v28  ;;  %v20023_v61 = vadd.f32 %v16602_v49, %v10306_v15  ;;  %v21403_v15 = vld [vmem:[#allocation8 + $0x1718] ss:$24 sps:$4 sm:$0xff]   ;;  %v21414_v60 = vld [vmem:[#allocation8 + $0xbe4] ss:$24 sps:$4 sm:$0xff]  }
 0x830   :  { %17643 = vst [vmem:[#allocation11 + $0x30] sm:$0xff] %v20022_v44  ;;  %16913 = vmatpush1.bf16.msra.mxu1 %v21355_v1  ;;  %v21409_v42 = vld [vmem:[#allocation8 + $0x1748] ss:$24 sps:$4 sm:$0xff]   ;;  %v21417_v1 = vld [vmem:[#allocation8 + $0x177c] ss:$24 sps:$4 sm:$0xff]  }
 0x831   :  { %17644 = vst [vmem:[#allocation11 + $0x38] sm:$0xff] %v20023_v61  ;;  %17263 = vmatpush1.bf16.msra.mxu0 %v21358_v56  ;;  %16914 = vmatprep.subr.bf16.mxu1 %v21363_v59  ;;  %v21412_v34 = vld [vmem:[#allocation8 + $0xbe0] ss:$24 sps:$4 sm:$0xff]   ;;  %v21420_v28 = vld [vmem:[#allocation8 + $0xc14] ss:$24 sps:$4 sm:$0xff]  }
 0x832   :  { %17264 = vmatprep.subr.bf16.mxu0 %v21366_v57  ;;  %v21415_v31 = vld [vmem:[#allocation8 + $0x1778] ss:$24 sps:$4 sm:$0xff]   ;;  %v21423_v59 = vld [vmem:[#allocation8 + $0x17ac] ss:$24 sps:$4 sm:$0xff]   ;;  %v21421_v49 = vld [vmem:[#allocation8 + $0x17a8] ss:$24 sps:$4 sm:$0xff]  }
 0x833   :  { %v21418_v56 = vld [vmem:[#allocation8 + $0xc10] ss:$24 sps:$4 sm:$0xff]   ;;  %v21426_v44 = vld [vmem:[#allocation8 + $0xc44] ss:$24 sps:$4 sm:$0xff]   ;;  %v21424_v57 = vld [vmem:[#allocation8 + $0xc40] ss:$24 sps:$4 sm:$0xff]  }
 0x834   :  { %16915 = vmatpush1.bf16.msra.mxu1 %v21361_v53  ;;  %v21429_v61 = vld [vmem:[#allocation8 + $0x17dc] ss:$24 sps:$4 sm:$0xff]  }
 0x835   :  { %17265 = vmatpush1.bf16.msra.mxu0 %v21364_v48  ;;  %16916 = vmatprep.subr.bf16.mxu1 %v21369_v24  ;;  %v21432_v53 = vld [vmem:[#allocation8 + $0xc74] ss:$24 sps:$4 sm:$0xff]   ;;  %v21427_v48 = vld [vmem:[#allocation8 + $0x17d8] ss:$24 sps:$4 sm:$0xff]  }
 0x836   :  { %17266 = vmatprep.subr.bf16.mxu0 %v21372_v38  ;;  %v21430_v24 = vld [vmem:[#allocation8 + $0xc70] ss:$24 sps:$4 sm:$0xff]   ;;  %v21435_v38 = vld [vmem:[#allocation8 + $0x180c] ss:$24 sps:$4 sm:$0xff]  }
 0x838   :  { %16917 = vmatpush1.bf16.msra.mxu1 %v21367_v14  ;;  %v21438_v14 = vld [vmem:[#allocation8 + $0xca4] ss:$24 sps:$4 sm:$0xff]  }
 0x839   :  { %17267 = vmatpush1.bf16.msra.mxu0 %v21370_v58  ;;  %16918 = vmatprep.subr.bf16.mxu1 %v21375_v22  ;;  %v21436_v58 = vld [vmem:[#allocation8 + $0xca0] ss:$24 sps:$4 sm:$0xff]   ;;  %v21441_v22 = vld [vmem:[#allocation8 + $0x183c] ss:$24 sps:$4 sm:$0xff]  }
 0x83a   :  { %17268 = vmatprep.subr.bf16.mxu0 %v21378_v17  ;;  %v21439_v17 = vld [vmem:[#allocation8 + $0x1838] ss:$24 sps:$4 sm:$0xff]  }
 0x83c   :  { %16919 = vmatpush1.bf16.msra.mxu1 %v21373_v50  ;;  %v21442_v50 = vld [vmem:[#allocation8 + $0xcd0] ss:$24 sps:$4 sm:$0xff]  }
 0x83d   :  { %17269 = vmatpush1.bf16.msra.mxu0 %v21376_v36  ;;  %16920 = vmatprep.subr.bf16.mxu1 %v21381_v29  ;;  %v21447_v36 = vld [vmem:[#allocation8 + $0x186c] ss:$24 sps:$4 sm:$0xff]  }
 0x83e   :  { %17270 = vmatprep.subr.bf16.mxu0 %v21384_v45  ;;  %v21450_v29 = vld [vmem:[#allocation8 + $0xd04] ss:$24 sps:$4 sm:$0xff]   ;;  %v21445_v45 = vld [vmem:[#allocation8 + $0x1868] ss:$24 sps:$4 sm:$0xff]  }
 0x840   :  { %16921 = vmatpush1.bf16.msra.mxu1 %v21379_v10  ;;  %v21448_v10 = vld [vmem:[#allocation8 + $0xd00] ss:$24 sps:$4 sm:$0xff]  }
 0x841   :  { %17271 = vmatpush1.bf16.msra.mxu0 %v21382_v63  ;;  %16922 = vmatprep.subr.bf16.mxu1 %v21387_v8  ;;  %v21453_v63 = vld [vmem:[#allocation8 + $0x189c] ss:$24 sps:$4 sm:$0xff]  }
 0x842   :  { %17272 = vmatprep.subr.bf16.mxu0 %v21390_v21  ;;  %v21456_v8 = vld [vmem:[#allocation8 + $0xd34] ss:$24 sps:$4 sm:$0xff]   ;;  %v21451_v21 = vld [vmem:[#allocation8 + $0x1898] ss:$24 sps:$4 sm:$0xff]  }
 0x844   :  { %16923 = vmatpush1.bf16.msra.mxu1 %v21385_v16  ;;  %v21454_v16 = vld [vmem:[#allocation8 + $0xd30] ss:$24 sps:$4 sm:$0xff]  }
 0x845   :  { %17273 = vmatpush1.bf16.msra.mxu0 %v21388_v52  ;;  %16924 = vmatprep.subr.bf16.mxu1 %v21393_v62  ;;  %v21459_v52 = vld [vmem:[#allocation8 + $0x18cc] ss:$24 sps:$4 sm:$0xff]  }
 0x846   :  { %17274 = vmatprep.subr.bf16.mxu0 %v21396_v35  ;;  %v21462_v62 = vld [vmem:[#allocation8 + $0xd64] ss:$24 sps:$4 sm:$0xff]   ;;  %v21457_v35 = vld [vmem:[#allocation8 + $0x18c8] ss:$24 sps:$4 sm:$0xff]  }
 0x848   :  { %16925 = vmatpush1.bf16.msra.mxu1 %v21391_v0  ;;  %v21460_v0 = vld [vmem:[#allocation8 + $0xd60] ss:$24 sps:$4 sm:$0xff]  }
 0x849   :  { %17275 = vmatpush1.bf16.msra.mxu0 %v21394_v4  ;;  %16926 = vmatprep.subr.bf16.mxu1 %v21399_v12  ;;  %v21465_v4 = vld [vmem:[#allocation8 + $0x18fc] ss:$24 sps:$4 sm:$0xff]  }
 0x84a   :  { %17276 = vmatprep.subr.bf16.mxu0 %v21402_v41  ;;  %v21468_v12 = vld [vmem:[#allocation8 + $0xd94] ss:$24 sps:$4 sm:$0xff]   ;;  %v21463_v41 = vld [vmem:[#allocation8 + $0x18f8] ss:$24 sps:$4 sm:$0xff]  }
 0x84c   :  { %16927 = vmatpush1.bf16.msra.mxu1 %v21397_v30  ;;  %v21466_v30 = vld [vmem:[#allocation8 + $0xd90] ss:$24 sps:$4 sm:$0xff]  }
 0x84d   :  { %17277 = vmatpush1.bf16.msra.mxu0 %v21400_v32  ;;  %16928 = vmatprep.subr.bf16.mxu1 %v21405_v39  ;;  %v21471_v32 = vld [vmem:[#allocation8 + $0x192c] ss:$24 sps:$4 sm:$0xff]  }
 0x84e   :  { %17278 = vmatprep.subr.bf16.mxu0 %v21408_v54  ;;  %v21474_v39 = vld [vmem:[#allocation8 + $0xdc4] ss:$24 sps:$4 sm:$0xff]   ;;  %v21469_v54 = vld [vmem:[#allocation8 + $0x1928] ss:$24 sps:$4 sm:$0xff]  }
 0x850   :  { %16929 = vmatpush1.bf16.msra.mxu1 %v21403_v15  ;;  %v21472_v15 = vld [vmem:[#allocation8 + $0xdc0] ss:$24 sps:$4 sm:$0xff]  }
 0x851   :  { %17279 = vmatpush1.bf16.msra.mxu0 %v21406_v13  ;;  %16930 = vmatprep.subr.bf16.mxu1 %v21411_v43  ;;  %v21477_v13 = vld [vmem:[#allocation8 + $0x195c] ss:$24 sps:$4 sm:$0xff]  }
 0x852   :  { %17280 = vmatprep.subr.bf16.mxu0 %v21414_v60  ;;  %v21480_v43 = vld [vmem:[#allocation8 + $0xdf4] ss:$24 sps:$4 sm:$0xff]   ;;  %v21475_v60 = vld [vmem:[#allocation8 + $0x1958] ss:$24 sps:$4 sm:$0xff]  }
 0x854   :  { %16931 = vmatpush1.bf16.msra.mxu1 %v21409_v42  ;;  %v21478_v42 = vld [vmem:[#allocation8 + $0xdf0] ss:$24 sps:$4 sm:$0xff]  }
 0x855   :  { %17281 = vmatpush1.bf16.msra.mxu0 %v21412_v34  ;;  %16932 = vmatprep.subr.bf16.mxu1 %v21417_v1  ;;  %v21483_v34 = vld [vmem:[#allocation8 + $0x198c] ss:$24 sps:$4 sm:$0xff]  }
 0x856   :  { %17293 = vmatprep.subr.bf16.mxu0 %v21420_v28  ;;  %v21486_v1 = vld [vmem:[#allocation8 + $0xe24] ss:$24 sps:$4 sm:$0xff]   ;;  %v21481_v28 = vld [vmem:[#allocation8 + $0x1988] ss:$24 sps:$4 sm:$0xff]  }
 0x858   :  { %17283 = vmatmul.mubr.bf16.vlgmr.msra.gmra.mrb[20].mxu0 %v22927_v11  ;;  %16933 = vmatpush1.bf16.msra.mxu1 %v21415_v31  ;;  %v21433_v11 = vld [vmem:[#allocation8 + $0x1808] ss:$24 sps:$4 sm:$0xff]  }
 0x859   :  { %17294 = vmatpush1.bf16.msra.mxu0 %v21418_v56  ;;  %17325 = vmatprep.mubr.bf16.mxu0 %v22551_v37  ;;  %v21444_v37 = vld [vmem:[#allocation8 + $0xcd4] ss:$24 sps:$4 sm:$0xff]   ;;  %v21484_v31 = vld [vmem:[#allocation8 + $0xe20] ss:$24 sps:$4 sm:$0xff]  }
 0x85a   :  { %16934 = vmatprep.subr.bf16.mxu1 %v21423_v59  ;;  %17295 = vmatprep.subr.bf16.mxu0 %v21426_v44  ;;  %v21489_v56 = vld [vmem:[#allocation8 + $0x19bc] ss:$24 sps:$4 sm:$0xff]   ;;  %v21487_v44 = vld [vmem:[#allocation8 + $0x19b8] ss:$24 sps:$4 sm:$0xff]  }
 0x85b   :  { %v21492_v59 = vld [vmem:[#allocation8 + $0xe54] ss:$24 sps:$4 sm:$0xff]  }
 0x85c   :  { %16935 = vmatpush1.bf16.msra.mxu1 %v21421_v49  ;;  %v21490_v49 = vld [vmem:[#allocation8 + $0xe50] ss:$24 sps:$4 sm:$0xff]  }
 0x85d   :  { %17296 = vmatpush1.bf16.msra.mxu0 %v21424_v57  ;;  %16936 = vmatprep.subr.bf16.mxu1 %v21429_v61  ;;  %v21495_v57 = vld [vmem:[#allocation8 + $0x19ec] ss:$24 sps:$4 sm:$0xff]  }
 0x85e   :  { %17297 = vmatprep.subr.bf16.mxu0 %v21432_v53  ;;  %v21498_v61 = vld [vmem:[#allocation8 + $0xe84] ss:$24 sps:$4 sm:$0xff]   ;;  %v21493_v53 = vld [vmem:[#allocation8 + $0x19e8] ss:$24 sps:$4 sm:$0xff]  }
 0x860   :  { %16937 = vmatpush1.bf16.msra.mxu1 %v21427_v48  ;;  %v21496_v48 = vld [vmem:[#allocation8 + $0xe80] ss:$24 sps:$4 sm:$0xff]  }
 0x861   :  { %17298 = vmatpush1.bf16.msra.mxu0 %v21430_v24  ;;  %16949 = vmatprep.subr.bf16.mxu1 %v21435_v38  ;;  %v21501_v24 = vld [vmem:[#allocation8 + $0x1a1c] ss:$24 sps:$4 sm:$0xff]  }
 0x862   :  { %17299 = vmatprep.subr.bf16.mxu0 %v21438_v14  ;;  %v21504_v38 = vld [vmem:[#allocation8 + $0xeb4] ss:$24 sps:$4 sm:$0xff]   ;;  %v21499_v14 = vld [vmem:[#allocation8 + $0x1a18] ss:$24 sps:$4 sm:$0xff]  }
 0x863   :  { %16939 = vmatmul.mubr.bf16.vlgmr.msra.gmra.mrb[32].mxu1 %v23026_v33 }
 0x864   :  { %16950 = vmatpush1.bf16.msra.mxu1 %v21433_v11  ;;  %16981 = vmatprep.mubr.bf16.mxu1 %v22841_v47  ;;  %v21502_v11 = vld [vmem:[#allocation8 + $0xeb0] ss:$24 sps:$4 sm:$0xff]  }
 0x865   :  { %17300 = vmatpush1.bf16.msra.mxu0 %v21436_v58  ;;  %16951 = vmatprep.subr.bf16.mxu1 %v21441_v22  ;;  %v21507_v58 = vld [vmem:[#allocation8 + $0x1a4c] ss:$24 sps:$4 sm:$0xff]  }
 0x866   :  { %17301 = vmatprep.subr.bf16.mxu0 %v21444_v37  ;;  %v21510_v22 = vld [vmem:[#allocation8 + $0xee4] ss:$24 sps:$4 sm:$0xff]   ;;  %v21505_v37 = vld [vmem:[#allocation8 + $0x1a48] ss:$24 sps:$4 sm:$0xff]  }
 0x868   :  { %16952 = vmatpush1.bf16.msra.mxu1 %v21439_v17  ;;  %v21508_v17 = vld [vmem:[#allocation8 + $0xee0] ss:$24 sps:$4 sm:$0xff]  }
 0x869   :  { %17302 = vmatpush1.bf16.msra.mxu0 %v21442_v50  ;;  %16953 = vmatprep.subr.bf16.mxu1 %v21447_v36  ;;  %v21513_v50 = vld [vmem:[#allocation8 + $0x1a7c] ss:$24 sps:$4 sm:$0xff]  }
 0x86a   :  { %17303 = vmatprep.subr.bf16.mxu0 %v21450_v29  ;;  %v21516_v36 = vld [vmem:[#allocation8 + $0xf14] ss:$24 sps:$4 sm:$0xff]   ;;  %v21511_v29 = vld [vmem:[#allocation8 + $0x1a78] ss:$24 sps:$4 sm:$0xff]  }
 0x86c   :  { %16954 = vmatpush1.bf16.msra.mxu1 %v21445_v45  ;;  %v21514_v45 = vld [vmem:[#allocation8 + $0xf10] ss:$24 sps:$4 sm:$0xff]  }
 0x86d   :  { %17304 = vmatpush1.bf16.msra.mxu0 %v21448_v10  ;;  %16955 = vmatprep.subr.bf16.mxu1 %v21453_v63  ;;  %v21519_v10 = vld [vmem:[#allocation8 + $0x1aac] ss:$24 sps:$4 sm:$0xff]  }
 0x86e   :  { %17305 = vmatprep.subr.bf16.mxu0 %v21456_v8  ;;  %v21522_v63 = vld [vmem:[#allocation8 + $0xf44] ss:$24 sps:$4 sm:$0xff]   ;;  %v21517_v8 = vld [vmem:[#allocation8 + $0x1aa8] ss:$24 sps:$4 sm:$0xff]  }
 0x870   :  { %16956 = vmatpush1.bf16.msra.mxu1 %v21451_v21  ;;  %v21520_v21 = vld [vmem:[#allocation8 + $0xf40] ss:$24 sps:$4 sm:$0xff]  }
 0x871   :  { %17306 = vmatpush1.bf16.msra.mxu0 %v21454_v16  ;;  %16957 = vmatprep.subr.bf16.mxu1 %v21459_v52  ;;  %v21525_v16 = vld [vmem:[#allocation8 + $0x1adc] ss:$24 sps:$4 sm:$0xff]  }
 0x872   :  { %17307 = vmatprep.subr.bf16.mxu0 %v21462_v62  ;;  %v21528_v52 = vld [vmem:[#allocation8 + $0xf74] ss:$24 sps:$4 sm:$0xff]   ;;  %v21523_v62 = vld [vmem:[#allocation8 + $0x1ad8] ss:$24 sps:$4 sm:$0xff]  }
 0x874   :  { %16958 = vmatpush1.bf16.msra.mxu1 %v21457_v35  ;;  %v21526_v35 = vld [vmem:[#allocation8 + $0xf70] ss:$24 sps:$4 sm:$0xff]  }
 0x875   :  { %17308 = vmatpush1.bf16.msra.mxu0 %v21460_v0  ;;  %16959 = vmatprep.subr.bf16.mxu1 %v21465_v4  ;;  %v21531_v0 = vld [vmem:[#allocation8 + $0x1b0c] ss:$24 sps:$4 sm:$0xff]  }
 0x876   :  { %17309 = vmatprep.subr.bf16.mxu0 %v21468_v12  ;;  %v21534_v4 = vld [vmem:[#allocation8 + $0xfa4] ss:$24 sps:$4 sm:$0xff]   ;;  %v21532_v12 = vld [vmem:[#allocation8 + $0xfa0] ss:$24 sps:$4 sm:$0xff]  }
 0x878   :  { %16960 = vmatpush1.bf16.msra.mxu1 %v21463_v41  ;;  %v21537_v41 = vld [vmem:[#allocation8 + $0x1b3c] ss:$24 sps:$4 sm:$0xff]  }
 0x879   :  { %17310 = vmatpush1.bf16.msra.mxu0 %v21466_v30  ;;  %16961 = vmatprep.subr.bf16.mxu1 %v21471_v32  ;;  %v21535_v30 = vld [vmem:[#allocation8 + $0x1b38] ss:$24 sps:$4 sm:$0xff]  }
 0x87a   :  { %17311 = vmatprep.subr.bf16.mxu0 %v21474_v39  ;;  %v21538_v32 = vld [vmem:[#allocation8 + $0xfd0] ss:$24 sps:$4 sm:$0xff]   ;;  %v21543_v39 = vld [vmem:[#allocation8 + $0x1b6c] ss:$24 sps:$4 sm:$0xff]  }
 0x87c   :  { %16962 = vmatpush1.bf16.msra.mxu1 %v21469_v54  ;;  %v21546_v54 = vld [vmem:[#allocation8 + $0x1004] ss:$24 sps:$4 sm:$0xff]  }
 0x87d   :  { %17312 = vmatpush1.bf16.msra.mxu0 %v21472_v15  ;;  %16963 = vmatprep.subr.bf16.mxu1 %v21477_v13  ;;  %v21541_v15 = vld [vmem:[#allocation8 + $0x1b68] ss:$24 sps:$4 sm:$0xff]  }
 0x87e   :  { %17313 = vmatprep.subr.bf16.mxu0 %v21480_v43  ;;  %v21544_v13 = vld [vmem:[#allocation8 + $0x1000] ss:$24 sps:$4 sm:$0xff]   ;;  %v21549_v43 = vld [vmem:[#allocation8 + $0x1b9c] ss:$24 sps:$4 sm:$0xff]  }
 0x880   :  { %16964 = vmatpush1.bf16.msra.mxu1 %v21475_v60  ;;  %v21552_v60 = vld [vmem:[#allocation8 + $0x1034] ss:$24 sps:$4 sm:$0xff]  }
 0x881   :  { %17314 = vmatpush1.bf16.msra.mxu0 %v21478_v42  ;;  %16965 = vmatprep.subr.bf16.mxu1 %v21483_v34  ;;  %v21547_v42 = vld [vmem:[#allocation8 + $0x1b98] ss:$24 sps:$4 sm:$0xff]  }
 0x882   :  { %17315 = vmatprep.subr.bf16.mxu0 %v21486_v1  ;;  %v21550_v34 = vld [vmem:[#allocation8 + $0x1030] ss:$24 sps:$4 sm:$0xff]   ;;  %v21555_v1 = vld [vmem:[#allocation8 + $0x1bcc] ss:$24 sps:$4 sm:$0xff]  }
 0x884   :  { %16966 = vmatpush1.bf16.msra.mxu1 %v21481_v28  ;;  %v21558_v28 = vld [vmem:[#allocation8 + $0x1064] ss:$24 sps:$4 sm:$0xff]  }
 0x885   :  { %17316 = vmatpush1.bf16.msra.mxu0 %v21484_v31  ;;  %16967 = vmatprep.subr.bf16.mxu1 %v21489_v56  ;;  %v21553_v31 = vld [vmem:[#allocation8 + $0x1bc8] ss:$24 sps:$4 sm:$0xff]  }
 0x886   :  { %17317 = vmatprep.subr.bf16.mxu0 %v21492_v59  ;;  %v21556_v56 = vld [vmem:[#allocation8 + $0x1060] ss:$24 sps:$4 sm:$0xff]   ;;  %v21561_v59 = vld [vmem:[#allocation8 + $0x1bfc] ss:$24 sps:$4 sm:$0xff]  }
 0x888   :  { %16968 = vmatpush1.bf16.msra.mxu1 %v21487_v44  ;;  %v21564_v44 = vld [vmem:[#allocation8 + $0x1094] ss:$24 sps:$4 sm:$0xff]  }
 0x889   :  { %17318 = vmatpush1.bf16.msra.mxu0 %v21490_v49  ;;  %16969 = vmatprep.subr.bf16.mxu1 %v21495_v57  ;;  %v21559_v49 = vld [vmem:[#allocation8 + $0x1bf8] ss:$24 sps:$4 sm:$0xff]  }
 0x88a   :  { %17319 = vmatprep.subr.bf16.mxu0 %v21498_v61  ;;  %v21562_v57 = vld [vmem:[#allocation8 + $0x1090] ss:$24 sps:$4 sm:$0xff]   ;;  %v21567_v61 = vld [vmem:[#allocation8 + $0x1c2c] ss:$24 sps:$4 sm:$0xff]  }
 0x88c   :  { %16970 = vmatpush1.bf16.msra.mxu1 %v21493_v53  ;;  %v21570_v53 = vld [vmem:[#allocation8 + $0x10c4] ss:$24 sps:$4 sm:$0xff]  }
 0x88d   :  { %17320 = vmatpush1.bf16.msra.mxu0 %v21496_v48  ;;  %16971 = vmatprep.subr.bf16.mxu1 %v21501_v24  ;;  %v21565_v48 = vld [vmem:[#allocation8 + $0x1c28] ss:$24 sps:$4 sm:$0xff]  }
 0x88e   :  { %17321 = vmatprep.subr.bf16.mxu0 %v21504_v38  ;;  %v21568_v24 = vld [vmem:[#allocation8 + $0x10c0] ss:$24 sps:$4 sm:$0xff]   ;;  %v21573_v38 = vld [vmem:[#allocation8 + $0x1c5c] ss:$24 sps:$4 sm:$0xff]  }
 0x890   :  { %16972 = vmatpush1.bf16.msra.mxu1 %v21499_v14  ;;  %v21576_v14 = vld [vmem:[#allocation8 + $0x10f4] ss:$24 sps:$4 sm:$0xff]  }
 0x891   :  { %17322 = vmatpush1.bf16.msra.mxu0 %v21502_v11  ;;  %16973 = vmatprep.subr.bf16.mxu1 %v21507_v58  ;;  %v21571_v11 = vld [vmem:[#allocation8 + $0x1c58] ss:$24 sps:$4 sm:$0xff]  }
 0x892   :  { %17323 = vmatprep.subr.bf16.mxu0 %v21510_v22  ;;  %v21574_v58 = vld [vmem:[#allocation8 + $0x10f0] ss:$24 sps:$4 sm:$0xff]   ;;  %v21579_v22 = vld [vmem:[#allocation8 + $0x1c8c] ss:$24 sps:$4 sm:$0xff]  }
 0x894   :  { %16974 = vmatpush1.bf16.msra.mxu1 %v21505_v37  ;;  %v21582_v37 = vld [vmem:[#allocation8 + $0x1124] ss:$24 sps:$4 sm:$0xff]  }
 0x895   :  { %17324 = vmatpush1.bf16.msra.mxu0 %v21508_v17  ;;  %16975 = vmatprep.subr.bf16.mxu1 %v21513_v50  ;;  %v21577_v17 = vld [vmem:[#allocation8 + $0x1c88] ss:$24 sps:$4 sm:$0xff]  }
 0x896   :  { %17336 = vmatprep.subr.bf16.mxu0 %v21516_v36  ;;  %v21580_v50 = vld [vmem:[#allocation8 + $0x1120] ss:$24 sps:$4 sm:$0xff]   ;;  %v21585_v36 = vld [vmem:[#allocation8 + $0x1cbc] ss:$24 sps:$4 sm:$0xff]  }
 0x898   :  { %17326 = vmatmul.mubr.bf16.vlgmr.msra.gmra.mrb[20].mxu0 %v22549_v19  ;;  %16976 = vmatpush1.bf16.msra.mxu1 %v21511_v29  ;;  %v21529_v19 = vld [vmem:[#allocation8 + $0x1b08] ss:$24 sps:$4 sm:$0xff]   ;;  %v21588_v29 = vld [vmem:[#allocation8 + $0x1154] ss:$24 sps:$4 sm:$0xff]  }
 0x899   :  { %17337 = vmatpush1.bf16.msra.mxu0 %v21514_v45  ;;  %17368 = vmatprep.mubr.bf16.mxu0 %v22982_v20  ;;  %v21540_v20 = vld [vmem:[#allocation8 + $0xfd4] ss:$24 sps:$4 sm:$0xff]   ;;  %v21583_v45 = vld [vmem:[#allocation8 + $0x1cb8] ss:$24 sps:$4 sm:$0xff]  }
 0x89a   :  { %16977 = vmatprep.subr.bf16.mxu1 %v21519_v10  ;;  %17338 = vmatprep.subr.bf16.mxu0 %v21522_v63  ;;  %v21586_v10 = vld [vmem:[#allocation8 + $0x1150] ss:$24 sps:$4 sm:$0xff]   ;;  %v21591_v63 = vld [vmem:[#allocation8 + $0x1cec] ss:$24 sps:$4 sm:$0xff]  }
 0x89c   :  { %16978 = vmatpush1.bf16.msra.mxu1 %v21517_v8  ;;  %v21594_v8 = vld [vmem:[#allocation8 + $0x1184] ss:$24 sps:$4 sm:$0xff]  }
 0x89d   :  { %17339 = vmatpush1.bf16.msra.mxu0 %v21520_v21  ;;  %16979 = vmatprep.subr.bf16.mxu1 %v21525_v16  ;;  %v21589_v21 = vld [vmem:[#allocation8 + $0x1ce8] ss:$24 sps:$4 sm:$0xff]  }
 0x89e   :  { %17340 = vmatprep.subr.bf16.mxu0 %v21528_v52  ;;  %v21592_v16 = vld [vmem:[#allocation8 + $0x1180] ss:$24 sps:$4 sm:$0xff]   ;;  %v21597_v52 = vld [vmem:[#allocation8 + $0x1d1c] ss:$24 sps:$4 sm:$0xff]  }
 0x8a0   :  { %16980 = vmatpush1.bf16.msra.mxu1 %v21523_v62  ;;  %v21600_v62 = vld [vmem:[#allocation8 + $0x11b4] ss:$24 sps:$4 sm:$0xff]  }
 0x8a1   :  { %17341 = vmatpush1.bf16.msra.mxu0 %v21526_v35  ;;  %16992 = vmatprep.subr.bf16.mxu1 %v21531_v0  ;;  %v21595_v35 = vld [vmem:[#allocation8 + $0x1d18] ss:$24 sps:$4 sm:$0xff]  }
 0x8a2   :  { %17342 = vmatprep.subr.bf16.mxu0 %v21534_v4  ;;  %v21598_v0 = vld [vmem:[#allocation8 + $0x11b0] ss:$24 sps:$4 sm:$0xff]   ;;  %v21603_v4 = vld [vmem:[#allocation8 + $0x1d4c] ss:$24 sps:$4 sm:$0xff]  }
 0x8a3   :  { %16982 = vmatmul.mubr.bf16.vlgmr.msra.gmra.mrb[32].mxu1 %v22839_v55 }
 0x8a4   :  { %16993 = vmatpush1.bf16.msra.mxu1 %v21529_v19  ;;  %17024 = vmatprep.mubr.bf16.mxu1 %v23055_v27  ;;  %v21606_v19 = vld [vmem:[#allocation8 + $0x11e4] ss:$24 sps:$4 sm:$0xff]  }
 0x8a5   :  { %17343 = vmatpush1.bf16.msra.mxu0 %v21532_v12  ;;  %16994 = vmatprep.subr.bf16.mxu1 %v21537_v41  ;;  %v21601_v12 = vld [vmem:[#allocation8 + $0x1d48] ss:$24 sps:$4 sm:$0xff]  }
 0x8a6   :  { %17344 = vmatprep.subr.bf16.mxu0 %v21540_v20  ;;  %v21604_v41 = vld [vmem:[#allocation8 + $0x11e0] ss:$24 sps:$4 sm:$0xff]   ;;  %v21609_v20 = vld [vmem:[#allocation8 + $0x1d7c] ss:$24 sps:$4 sm:$0xff]  }
 0x8a8   :  { %16995 = vmatpush1.bf16.msra.mxu1 %v21535_v30  ;;  %v21612_v30 = vld [vmem:[#allocation8 + $0x1214] ss:$24 sps:$4 sm:$0xff]  }
 0x8a9   :  { %17345 = vmatpush1.bf16.msra.mxu0 %v21538_v32  ;;  %16996 = vmatprep.subr.bf16.mxu1 %v21543_v39  ;;  %v21607_v32 = vld [vmem:[#allocation8 + $0x1d78] ss:$24 sps:$4 sm:$0xff]  }
 0x8aa   :  { %17346 = vmatprep.subr.bf16.mxu0 %v21546_v54  ;;  %v21610_v39 = vld [vmem:[#allocation8 + $0x1210] ss:$24 sps:$4 sm:$0xff]   ;;  %v21615_v54 = vld [vmem:[#allocation8 + $0x1dac] ss:$24 sps:$4 sm:$0xff]  }
 0x8ac   :  { %16997 = vmatpush1.bf16.msra.mxu1 %v21541_v15  ;;  %v21618_v15 = vld [vmem:[#allocation8 + $0x1244] ss:$24 sps:$4 sm:$0xff]  }
 0x8ad   :  { %17347 = vmatpush1.bf16.msra.mxu0 %v21544_v13  ;;  %16998 = vmatprep.subr.bf16.mxu1 %v21549_v43  ;;  %v21613_v13 = vld [vmem:[#allocation8 + $0x1da8] ss:$24 sps:$4 sm:$0xff]  }
 0x8ae   :  { %17348 = vmatprep.subr.bf16.mxu0 %v21552_v60  ;;  %v21616_v43 = vld [vmem:[#allocation8 + $0x1240] ss:$24 sps:$4 sm:$0xff]   ;;  %v21621_v60 = vld [vmem:[#allocation8 + $0x1ddc] ss:$24 sps:$4 sm:$0xff]  }
 0x8b0   :  { %16999 = vmatpush1.bf16.msra.mxu1 %v21547_v42  ;;  %v21624_v42 = vld [vmem:[#allocation8 + $0x1274] ss:$24 sps:$4 sm:$0xff]  }
 0x8b1   :  { %17349 = vmatpush1.bf16.msra.mxu0 %v21550_v34  ;;  %17000 = vmatprep.subr.bf16.mxu1 %v21555_v1  ;;  %v21619_v34 = vld [vmem:[#allocation8 + $0x1dd8] ss:$24 sps:$4 sm:$0xff]  }
 0x8b2   :  { %17350 = vmatprep.subr.bf16.mxu0 %v21558_v28  ;;  %v21622_v1 = vld [vmem:[#allocation8 + $0x1270] ss:$24 sps:$4 sm:$0xff]   ;;  %v21627_v28 = vld [vmem:[#allocation8 + $0x1e0c] ss:$24 sps:$4 sm:$0xff]  }
 0x8b4   :  { %17001 = vmatpush1.bf16.msra.mxu1 %v21553_v31  ;;  %v21630_v31 = vld [vmem:[#allocation8 + $0x12a4] ss:$24 sps:$4 sm:$0xff]  }
 0x8b5   :  { %17351 = vmatpush1.bf16.msra.mxu0 %v21556_v56  ;;  %17002 = vmatprep.subr.bf16.mxu1 %v21561_v59  ;;  %v21628_v56 = vld [vmem:[#allocation8 + $0x12a0] ss:$24 sps:$4 sm:$0xff]   ;;  %v21633_v59 = vld [vmem:[#allocation8 + $0x1e3c] ss:$24 sps:$4 sm:$0xff]  }
 0x8b6   :  { %17352 = vmatprep.subr.bf16.mxu0 %v21564_v44  ;;  %v21631_v44 = vld [vmem:[#allocation8 + $0x1e38] ss:$24 sps:$4 sm:$0xff]  }
 0x8b8   :  { %17003 = vmatpush1.bf16.msra.mxu1 %v21559_v49  ;;  %v21634_v49 = vld [vmem:[#allocation8 + $0x12d0] ss:$24 sps:$4 sm:$0xff]  }
 0x8b9   :  { %17353 = vmatpush1.bf16.msra.mxu0 %v21562_v57  ;;  %17004 = vmatprep.subr.bf16.mxu1 %v21567_v61  ;;  %v21639_v57 = vld [vmem:[#allocation8 + $0x1e6c] ss:$24 sps:$4 sm:$0xff]  }
 0x8ba   :  { %17354 = vmatprep.subr.bf16.mxu0 %v21570_v53  ;;  %v21642_v61 = vld [vmem:[#allocation8 + $0x1304] ss:$24 sps:$4 sm:$0xff]   ;;  %v21637_v53 = vld [vmem:[#allocation8 + $0x1e68] ss:$24 sps:$4 sm:$0xff]  }
 0x8bc   :  { %17005 = vmatpush1.bf16.msra.mxu1 %v21565_v48  ;;  %v21640_v48 = vld [vmem:[#allocation8 + $0x1300] ss:$24 sps:$4 sm:$0xff]  }
 0x8bd   :  { %17355 = vmatpush1.bf16.msra.mxu0 %v21568_v24  ;;  %17006 = vmatprep.subr.bf16.mxu1 %v21573_v38  ;;  %v21645_v24 = vld [vmem:[#allocation8 + $0x1e9c] ss:$24 sps:$4 sm:$0xff]  }
 0x8be   :  { %17356 = vmatprep.subr.bf16.mxu0 %v21576_v14  ;;  %v21648_v38 = vld [vmem:[#allocation8 + $0x1334] ss:$24 sps:$4 sm:$0xff]   ;;  %v21643_v14 = vld [vmem:[#allocation8 + $0x1e98] ss:$24 sps:$4 sm:$0xff]  }
 0x8c0   :  { %17007 = vmatpush1.bf16.msra.mxu1 %v21571_v11  ;;  %v21646_v11 = vld [vmem:[#allocation8 + $0x1330] ss:$24 sps:$4 sm:$0xff]  }
 0x8c1   :  { %17357 = vmatpush1.bf16.msra.mxu0 %v21574_v58  ;;  %17008 = vmatprep.subr.bf16.mxu1 %v21579_v22  ;;  %v21651_v58 = vld [vmem:[#allocation8 + $0x1ecc] ss:$24 sps:$4 sm:$0xff]  }
 0x8c2   :  { %17358 = vmatprep.subr.bf16.mxu0 %v21582_v37  ;;  %v21654_v22 = vld [vmem:[#allocation8 + $0x1364] ss:$24 sps:$4 sm:$0xff]   ;;  %v21649_v37 = vld [vmem:[#allocation8 + $0x1ec8] ss:$24 sps:$4 sm:$0xff]  }
 0x8c4   :  { %17009 = vmatpush1.bf16.msra.mxu1 %v21577_v17  ;;  %v21652_v17 = vld [vmem:[#allocation8 + $0x1360] ss:$24 sps:$4 sm:$0xff]  }
 0x8c5   :  { %17359 = vmatpush1.bf16.msra.mxu0 %v21580_v50  ;;  %17010 = vmatprep.subr.bf16.mxu1 %v21585_v36  ;;  %v21657_v50 = vld [vmem:[#allocation8 + $0x1efc] ss:$24 sps:$4 sm:$0xff]  }
 0x8c6   :  { %17360 = vmatprep.subr.bf16.mxu0 %v21588_v29  ;;  %v21660_v36 = vld [vmem:[#allocation8 + $0x1394] ss:$24 sps:$4 sm:$0xff]   ;;  %v21655_v29 = vld [vmem:[#allocation8 + $0x1ef8] ss:$24 sps:$4 sm:$0xff]  }
 0x8c8   :  { %17011 = vmatpush1.bf16.msra.mxu1 %v21583_v45  ;;  %v21658_v45 = vld [vmem:[#allocation8 + $0x1390] ss:$24 sps:$4 sm:$0xff]  }
 0x8c9   :  { %17361 = vmatpush1.bf16.msra.mxu0 %v21586_v10  ;;  %17012 = vmatprep.subr.bf16.mxu1 %v21591_v63  ;;  %v21663_v10 = vld [vmem:[#allocation8 + $0x1f2c] ss:$24 sps:$4 sm:$0xff]  }
 0x8ca   :  { %17362 = vmatprep.subr.bf16.mxu0 %v21594_v8  ;;  %v21666_v63 = vld [vmem:[#allocation8 + $0x13c4] ss:$24 sps:$4 sm:$0xff]   ;;  %v21661_v8 = vld [vmem:[#allocation8 + $0x1f28] ss:$24 sps:$4 sm:$0xff]  }
 0x8cc   :  { %17013 = vmatpush1.bf16.msra.mxu1 %v21589_v21  ;;  %v21664_v21 = vld [vmem:[#allocation8 + $0x13c0] ss:$24 sps:$4 sm:$0xff]  }
 0x8cd   :  { %17363 = vmatpush1.bf16.msra.mxu0 %v21592_v16  ;;  %17014 = vmatprep.subr.bf16.mxu1 %v21597_v52  ;;  %v21669_v16 = vld [vmem:[#allocation8 + $0x1f5c] ss:$24 sps:$4 sm:$0xff]  }
 0x8ce   :  { %17364 = vmatprep.subr.bf16.mxu0 %v21600_v62  ;;  %v21672_v52 = vld [vmem:[#allocation8 + $0x13f4] ss:$24 sps:$4 sm:$0xff]   ;;  %v21667_v62 = vld [vmem:[#allocation8 + $0x1f58] ss:$24 sps:$4 sm:$0xff]  }
 0x8d0   :  { %17015 = vmatpush1.bf16.msra.mxu1 %v21595_v35  ;;  %v21670_v35 = vld [vmem:[#allocation8 + $0x13f0] ss:$24 sps:$4 sm:$0xff]  }
 0x8d1   :  { %17365 = vmatpush1.bf16.msra.mxu0 %v21598_v0  ;;  %17016 = vmatprep.subr.bf16.mxu1 %v21603_v4  ;;  %v21675_v0 = vld [vmem:[#allocation8 + $0x1f8c] ss:$24 sps:$4 sm:$0xff]  }
 0x8d2   :  { %17366 = vmatprep.subr.bf16.mxu0 %v21606_v19  ;;  %v21678_v4 = vld [vmem:[#allocation8 + $0x1424] ss:$24 sps:$4 sm:$0xff]   ;;  %v21673_v19 = vld [vmem:[#allocation8 + $0x1f88] ss:$24 sps:$4 sm:$0xff]  }
 0x8d4   :  { %17017 = vmatpush1.bf16.msra.mxu1 %v21601_v12  ;;  %v21676_v12 = vld [vmem:[#allocation8 + $0x1420] ss:$24 sps:$4 sm:$0xff]  }
 0x8d5   :  { %17367 = vmatpush1.bf16.msra.mxu0 %v21604_v41  ;;  %17018 = vmatprep.subr.bf16.mxu1 %v21609_v20  ;;  %v21681_v41 = vld [vmem:[#allocation8 + $0x1fbc] ss:$24 sps:$4 sm:$0xff]  }
 0x8d6   :  { %17379 = vmatprep.subr.bf16.mxu0 %v21612_v30  ;;  %v21684_v20 = vld [vmem:[#allocation8 + $0x1454] ss:$24 sps:$4 sm:$0xff]   ;;  %v21679_v30 = vld [vmem:[#allocation8 + $0x1fb8] ss:$24 sps:$4 sm:$0xff]  }
 0x8d8   :  { %17369 = vmatmul.mubr.bf16.vlgmr.msra.gmra.mrb[20].mxu0 %v22980_v51  ;;  %17019 = vmatpush1.bf16.msra.mxu1 %v21607_v32  ;;  %v21625_v51 = vld [vmem:[#allocation8 + $0x1e08] ss:$24 sps:$4 sm:$0xff]  }
 0x8d9   :  { %17380 = vmatpush1.bf16.msra.mxu0 %v21610_v39  ;;  %17411 = vmatprep.mubr.bf16.mxu0 %v22737_v2  ;;  %v21636_v2 = vld [vmem:[#allocation8 + $0x12d4] ss:$24 sps:$4 sm:$0xff]   ;;  %v21682_v32 = vld [vmem:[#allocation8 + $0x1450] ss:$24 sps:$4 sm:$0xff]  }
 0x8da   :  { %17020 = vmatprep.subr.bf16.mxu1 %v21615_v54  ;;  %17381 = vmatprep.subr.bf16.mxu0 %v21618_v15  ;;  %v21687_v39 = vld [vmem:[#allocation8 + $0x1fec] ss:$24 sps:$4 sm:$0xff]   ;;  %v21685_v15 = vld [vmem:[#allocation8 + $0x1fe8] ss:$24 sps:$4 sm:$0xff]  }
 0x8db   :  { %v21690_v54 = vld [vmem:[#allocation8 + $0x1484] ss:$24 sps:$4 sm:$0xff]  }
 0x8dc   :  { %17021 = vmatpush1.bf16.msra.mxu1 %v21613_v13  ;;  %v21688_v13 = vld [vmem:[#allocation8 + $0x1480] ss:$24 sps:$4 sm:$0xff]  }
 0x8dd   :  { %17382 = vmatpush1.bf16.msra.mxu0 %v21616_v43  ;;  %17022 = vmatprep.subr.bf16.mxu1 %v21621_v60  ;;  %v21693_v43 = vld [vmem:[#allocation8 + $0x201c] ss:$24 sps:$4 sm:$0xff]  }
 0x8de   :  { %17383 = vmatprep.subr.bf16.mxu0 %v21624_v42  ;;  %v21696_v60 = vld [vmem:[#allocation8 + $0x14b4] ss:$24 sps:$4 sm:$0xff]   ;;  %v21691_v42 = vld [vmem:[#allocation8 + $0x2018] ss:$24 sps:$4 sm:$0xff]  }
 0x8e0   :  { %17023 = vmatpush1.bf16.msra.mxu1 %v21619_v34  ;;  %v21694_v34 = vld [vmem:[#allocation8 + $0x14b0] ss:$24 sps:$4 sm:$0xff]  }
 0x8e1   :  { %17384 = vmatpush1.bf16.msra.mxu0 %v21622_v1  ;;  %17035 = vmatprep.subr.bf16.mxu1 %v21627_v28  ;;  %v21699_v1 = vld [vmem:[#allocation8 + $0x204c] ss:$24 sps:$4 sm:$0xff]  }
 0x8e2   :  { %17385 = vmatprep.subr.bf16.mxu0 %v21630_v31  ;;  %v21702_v28 = vld [vmem:[#allocation8 + $0x14e4] ss:$24 sps:$4 sm:$0xff]   ;;  %v21697_v31 = vld [vmem:[#allocation8 + $0x2048] ss:$24 sps:$4 sm:$0xff]  }
 0x8e3   :  { %17025 = vmatmul.mubr.bf16.vlgmr.msra.gmra.mrb[32].mxu1 %v23053_v25 }
 0x8e4   :  { %17036 = vmatpush1.bf16.msra.mxu1 %v21625_v51  ;;  %17067 = vmatprep.mubr.bf16.mxu1 %v22935_v23  ;;  %v21700_v51 = vld [vmem:[#allocation8 + $0x14e0] ss:$24 sps:$4 sm:$0xff]  }
 0x8e5   :  { %17386 = vmatpush1.bf16.msra.mxu0 %v21628_v56  ;;  %17037 = vmatprep.subr.bf16.mxu1 %v21633_v59  ;;  %v21705_v56 = vld [vmem:[#allocation8 + $0x207c] ss:$24 sps:$4 sm:$0xff]  }
 0x8e6   :  { %17387 = vmatprep.subr.bf16.mxu0 %v21636_v2  ;;  %v21708_v59 = vld [vmem:[#allocation8 + $0x1514] ss:$24 sps:$4 sm:$0xff]   ;;  %v21703_v2 = vld [vmem:[#allocation8 + $0x2078] ss:$24 sps:$4 sm:$0xff]  }
 0x8e8   :  { %17038 = vmatpush1.bf16.msra.mxu1 %v21631_v44  ;;  %v21706_v44 = vld [vmem:[#allocation8 + $0x1510] ss:$24 sps:$4 sm:$0xff]  }
 0x8e9   :  { %17388 = vmatpush1.bf16.msra.mxu0 %v21634_v49  ;;  %17039 = vmatprep.subr.bf16.mxu1 %v21639_v57  ;;  %v21711_v49 = vld [vmem:[#allocation8 + $0x20ac] ss:$24 sps:$4 sm:$0xff]  }
 0x8ea   :  { %17389 = vmatprep.subr.bf16.mxu0 %v21642_v61  ;;  %v21714_v57 = vld [vmem:[#allocation8 + $0x1544] ss:$24 sps:$4 sm:$0xff]   ;;  %v21709_v61 = vld [vmem:[#allocation8 + $0x20a8] ss:$24 sps:$4 sm:$0xff]  }
 0x8ec   :  { %17040 = vmatpush1.bf16.msra.mxu1 %v21637_v53  ;;  %v21712_v53 = vld [vmem:[#allocation8 + $0x1540] ss:$24 sps:$4 sm:$0xff]  }
 0x8ed   :  { %17390 = vmatpush1.bf16.msra.mxu0 %v21640_v48  ;;  %17041 = vmatprep.subr.bf16.mxu1 %v21645_v24  ;;  %v21717_v48 = vld [vmem:[#allocation8 + $0x20dc] ss:$24 sps:$4 sm:$0xff]  }
 0x8ee   :  { %17391 = vmatprep.subr.bf16.mxu0 %v21648_v38  ;;  %v21720_v24 = vld [vmem:[#allocation8 + $0x1574] ss:$24 sps:$4 sm:$0xff]   ;;  %v21715_v38 = vld [vmem:[#allocation8 + $0x20d8] ss:$24 sps:$4 sm:$0xff]  }
 0x8f0   :  { %17042 = vmatpush1.bf16.msra.mxu1 %v21643_v14  ;;  %v21718_v14 = vld [vmem:[#allocation8 + $0x1570] ss:$24 sps:$4 sm:$0xff]  }
 0x8f1   :  { %17392 = vmatpush1.bf16.msra.mxu0 %v21646_v11  ;;  %17043 = vmatprep.subr.bf16.mxu1 %v21651_v58  ;;  %v21723_v11 = vld [vmem:[#allocation8 + $0x210c] ss:$24 sps:$4 sm:$0xff]  }
 0x8f2   :  { %17393 = vmatprep.subr.bf16.mxu0 %v21654_v22  ;;  %v21726_v58 = vld [vmem:[#allocation8 + $0x15a4] ss:$24 sps:$4 sm:$0xff]   ;;  %v21724_v22 = vld [vmem:[#allocation8 + $0x15a0] ss:$24 sps:$4 sm:$0xff]  }
 0x8f4   :  { %17044 = vmatpush1.bf16.msra.mxu1 %v21649_v37  ;;  %v21729_v37 = vld [vmem:[#allocation8 + $0x213c] ss:$24 sps:$4 sm:$0xff]  }
 0x8f5   :  { %17394 = vmatpush1.bf16.msra.mxu0 %v21652_v17  ;;  %17045 = vmatprep.subr.bf16.mxu1 %v21657_v50  ;;  %v21727_v17 = vld [vmem:[#allocation8 + $0x2138] ss:$24 sps:$4 sm:$0xff]  }
 0x8f6   :  { %17395 = vmatprep.subr.bf16.mxu0 %v21660_v36  ;;  %v21730_v50 = vld [vmem:[#allocation8 + $0x15d0] ss:$24 sps:$4 sm:$0xff]   ;;  %v21735_v36 = vld [vmem:[#allocation8 + $0x216c] ss:$24 sps:$4 sm:$0xff]  }
 0x8f8   :  { %17046 = vmatpush1.bf16.msra.mxu1 %v21655_v29  ;;  %v21738_v29 = vld [vmem:[#allocation8 + $0x1604] ss:$24 sps:$4 sm:$0xff]  }
 0x8f9   :  { %17396 = vmatpush1.bf16.msra.mxu0 %v21658_v45  ;;  %17047 = vmatprep.subr.bf16.mxu1 %v21663_v10  ;;  %v21733_v45 = vld [vmem:[#allocation8 + $0x2168] ss:$24 sps:$4 sm:$0xff]  }
 0x8fa   :  { %17397 = vmatprep.subr.bf16.mxu0 %v21666_v63  ;;  %v21736_v10 = vld [vmem:[#allocation8 + $0x1600] ss:$24 sps:$4 sm:$0xff]   ;;  %v21741_v63 = vld [vmem:[#allocation8 + $0x219c] ss:$24 sps:$4 sm:$0xff]  }
 0x8fc   :  { %17048 = vmatpush1.bf16.msra.mxu1 %v21661_v8  ;;  %v21744_v8 = vld [vmem:[#allocation8 + $0x1634] ss:$24 sps:$4 sm:$0xff]  }
 0x8fd   :  { %17398 = vmatpush1.bf16.msra.mxu0 %v21664_v21  ;;  %17049 = vmatprep.subr.bf16.mxu1 %v21669_v16  ;;  %v21739_v21 = vld [vmem:[#allocation8 + $0x2198] ss:$24 sps:$4 sm:$0xff]  }
 0x8fe   :  { %17399 = vmatprep.subr.bf16.mxu0 %v21672_v52  ;;  %v21742_v16 = vld [vmem:[#allocation8 + $0x1630] ss:$24 sps:$4 sm:$0xff]   ;;  %v21747_v52 = vld [vmem:[#allocation8 + $0x21cc] ss:$24 sps:$4 sm:$0xff]  }
 0x900   :  { %17050 = vmatpush1.bf16.msra.mxu1 %v21667_v62  ;;  %v21750_v62 = vld [vmem:[#allocation8 + $0x1664] ss:$24 sps:$4 sm:$0xff]  }
 0x901   :  { %17400 = vmatpush1.bf16.msra.mxu0 %v21670_v35  ;;  %17051 = vmatprep.subr.bf16.mxu1 %v21675_v0  ;;  %v21745_v35 = vld [vmem:[#allocation8 + $0x21c8] ss:$24 sps:$4 sm:$0xff]  }
 0x902   :  { %17401 = vmatprep.subr.bf16.mxu0 %v21678_v4  ;;  %v21748_v0 = vld [vmem:[#allocation8 + $0x1660] ss:$24 sps:$4 sm:$0xff]   ;;  %v21753_v4 = vld [vmem:[#allocation8 + $0x21fc] ss:$24 sps:$4 sm:$0xff]  }
 0x904   :  { %17052 = vmatpush1.bf16.msra.mxu1 %v21673_v19  ;;  %v21756_v19 = vld [vmem:[#allocation8 + $0x1694] ss:$24 sps:$4 sm:$0xff]  }
 0x905   :  { %17402 = vmatpush1.bf16.msra.mxu0 %v21676_v12  ;;  %17053 = vmatprep.subr.bf16.mxu1 %v21681_v41  ;;  %v21751_v12 = vld [vmem:[#allocation8 + $0x21f8] ss:$24 sps:$4 sm:$0xff]  }
 0x906   :  { %17403 = vmatprep.subr.bf16.mxu0 %v21684_v20  ;;  %v21754_v41 = vld [vmem:[#allocation8 + $0x1690] ss:$24 sps:$4 sm:$0xff]   ;;  %v21759_v20 = vld [vmem:[#allocation8 + $0x222c] ss:$24 sps:$4 sm:$0xff]  }
 0x908   :  { %17054 = vmatpush1.bf16.msra.mxu1 %v21679_v30  ;;  %v21762_v30 = vld [vmem:[#allocation8 + $0x16c4] ss:$24 sps:$4 sm:$0xff]  }
 0x909   :  { %17404 = vmatpush1.bf16.msra.mxu0 %v21682_v32  ;;  %17055 = vmatprep.subr.bf16.mxu1 %v21687_v39  ;;  %v21757_v32 = vld [vmem:[#allocation8 + $0x2228] ss:$24 sps:$4 sm:$0xff]  }
 0x90a   :  { %17405 = vmatprep.subr.bf16.mxu0 %v21690_v54  ;;  %v21760_v39 = vld [vmem:[#allocation8 + $0x16c0] ss:$24 sps:$4 sm:$0xff]   ;;  %v21765_v54 = vld [vmem:[#allocation8 + $0x225c] ss:$24 sps:$4 sm:$0xff]  }
 0x90c   :  { %17056 = vmatpush1.bf16.msra.mxu1 %v21685_v15  ;;  %v21768_v15 = vld [vmem:[#allocation8 + $0x16f4] ss:$24 sps:$4 sm:$0xff]  }
 0x90d   :  { %17406 = vmatpush1.bf16.msra.mxu0 %v21688_v13  ;;  %17057 = vmatprep.subr.bf16.mxu1 %v21693_v43  ;;  %v21763_v13 = vld [vmem:[#allocation8 + $0x2258] ss:$24 sps:$4 sm:$0xff]  }
 0x90e   :  { %17407 = vmatprep.subr.bf16.mxu0 %v21696_v60  ;;  %v21766_v43 = vld [vmem:[#allocation8 + $0x16f0] ss:$24 sps:$4 sm:$0xff]   ;;  %v21771_v60 = vld [vmem:[#allocation8 + $0x228c] ss:$24 sps:$4 sm:$0xff]  }
 0x910   :  { %17058 = vmatpush1.bf16.msra.mxu1 %v21691_v42  ;;  %v21774_v42 = vld [vmem:[#allocation8 + $0x1724] ss:$24 sps:$4 sm:$0xff]  }
 0x911   :  { %17408 = vmatpush1.bf16.msra.mxu0 %v21694_v34  ;;  %17059 = vmatprep.subr.bf16.mxu1 %v21699_v1  ;;  %v21769_v34 = vld [vmem:[#allocation8 + $0x2288] ss:$24 sps:$4 sm:$0xff]  }
 0x912   :  { %17409 = vmatprep.subr.bf16.mxu0 %v21702_v28  ;;  %v21772_v1 = vld [vmem:[#allocation8 + $0x1720] ss:$24 sps:$4 sm:$0xff]   ;;  %v21777_v28 = vld [vmem:[#allocation8 + $0x22bc] ss:$24 sps:$4 sm:$0xff]  }
 0x914   :  { %17060 = vmatpush1.bf16.msra.mxu1 %v21697_v31  ;;  %v21780_v31 = vld [vmem:[#allocation8 + $0x1754] ss:$24 sps:$4 sm:$0xff]  }
 0x915   :  { %17410 = vmatpush1.bf16.msra.mxu0 %v21700_v51  ;;  %17061 = vmatprep.subr.bf16.mxu1 %v21705_v56  ;;  %v21775_v51 = vld [vmem:[#allocation8 + $0x22b8] ss:$24 sps:$4 sm:$0xff]  }
 0x916   :  { %17422 = vmatprep.subr.bf16.mxu0 %v21708_v59  ;;  %v21778_v56 = vld [vmem:[#allocation8 + $0x1750] ss:$24 sps:$4 sm:$0xff]   ;;  %v21783_v59 = vld [vmem:[#allocation8 + $0x22ec] ss:$24 sps:$4 sm:$0xff]  }
 0x918   :  { %17412 = vmatmul.mubr.bf16.vlgmr.msra.gmra.mrb[20].mxu0 %v22735_v7  ;;  %17062 = vmatpush1.bf16.msra.mxu1 %v21703_v2  ;;  %v21721_v7 = vld [vmem:[#allocation8 + $0x2108] ss:$24 sps:$4 sm:$0xff]   ;;  %v21786_v2 = vld [vmem:[#allocation8 + $0x1784] ss:$24 sps:$4 sm:$0xff]  }
 0x919   :  { %17423 = vmatpush1.bf16.msra.mxu0 %v21706_v44  ;;  %17454 = vmatprep.mubr.bf16.mxu0 %v23028_v5  ;;  %v21732_v5 = vld [vmem:[#allocation8 + $0x15d4] ss:$24 sps:$4 sm:$0xff]   ;;  %v21781_v44 = vld [vmem:[#allocation8 + $0x22e8] ss:$24 sps:$4 sm:$0xff]  }
 0x91a   :  { %17063 = vmatprep.subr.bf16.mxu1 %v21711_v49  ;;  %17424 = vmatprep.subr.bf16.mxu0 %v21714_v57  ;;  %v21784_v49 = vld [vmem:[#allocation8 + $0x1780] ss:$24 sps:$4 sm:$0xff]   ;;  %v21789_v57 = vld [vmem:[#allocation8 + $0x231c] ss:$24 sps:$4 sm:$0xff]  }
 0x91c   :  { %17064 = vmatpush1.bf16.msra.mxu1 %v21709_v61  ;;  %v21792_v61 = vld [vmem:[#allocation8 + $0x17b4] ss:$24 sps:$4 sm:$0xff]  }
 0x91d   :  { %17425 = vmatpush1.bf16.msra.mxu0 %v21712_v53  ;;  %17065 = vmatprep.subr.bf16.mxu1 %v21717_v48  ;;  %v21787_v53 = vld [vmem:[#allocation8 + $0x2318] ss:$24 sps:$4 sm:$0xff]  }
 0x91e   :  { %17426 = vmatprep.subr.bf16.mxu0 %v21720_v24  ;;  %v21790_v48 = vld [vmem:[#allocation8 + $0x17b0] ss:$24 sps:$4 sm:$0xff]   ;;  %v21795_v24 = vld [vmem:[#allocation8 + $0x234c] ss:$24 sps:$4 sm:$0xff]  }
 0x920   :  { %17066 = vmatpush1.bf16.msra.mxu1 %v21715_v38  ;;  %v21798_v38 = vld [vmem:[#allocation8 + $0x17e4] ss:$24 sps:$4 sm:$0xff]  }
 0x921   :  { %17427 = vmatpush1.bf16.msra.mxu0 %v21718_v14  ;;  %17078 = vmatprep.subr.bf16.mxu1 %v21723_v11  ;;  %v21793_v14 = vld [vmem:[#allocation8 + $0x2348] ss:$24 sps:$4 sm:$0xff]  }
 0x922   :  { %17428 = vmatprep.subr.bf16.mxu0 %v21726_v58  ;;  %v21796_v11 = vld [vmem:[#allocation8 + $0x17e0] ss:$24 sps:$4 sm:$0xff]   ;;  %v21801_v58 = vld [vmem:[#allocation8 + $0x237c] ss:$24 sps:$4 sm:$0xff]  }
 0x923   :  { %17068 = vmatmul.mubr.bf16.vlgmr.msra.gmra.mrb[32].mxu1 %v22933_v6 }
 0x924   :  { %17079 = vmatpush1.bf16.msra.mxu1 %v21721_v7  ;;  %17110 = vmatprep.mubr.bf16.mxu1 %v23080_v3  ;;  %v21804_v7 = vld [vmem:[#allocation8 + $0x1814] ss:$24 sps:$4 sm:$0xff]  }
 0x925   :  { %17429 = vmatpush1.bf16.msra.mxu0 %v21724_v22  ;;  %17080 = vmatprep.subr.bf16.mxu1 %v21729_v37  ;;  %v21799_v22 = vld [vmem:[#allocation8 + $0x2378] ss:$24 sps:$4 sm:$0xff]  }
 0x926   :  { %17430 = vmatprep.subr.bf16.mxu0 %v21732_v5  ;;  %v21802_v37 = vld [vmem:[#allocation8 + $0x1810] ss:$24 sps:$4 sm:$0xff]   ;;  %v21807_v5 = vld [vmem:[#allocation8 + $0x23ac] ss:$24 sps:$4 sm:$0xff]  }
 0x928   :  { %17081 = vmatpush1.bf16.msra.mxu1 %v21727_v17  ;;  %v21810_v17 = vld [vmem:[#allocation8 + $0x1844] ss:$24 sps:$4 sm:$0xff]  }
 0x929   :  { %17431 = vmatpush1.bf16.msra.mxu0 %v21730_v50  ;;  %17082 = vmatprep.subr.bf16.mxu1 %v21735_v36  ;;  %v21805_v50 = vld [vmem:[#allocation8 + $0x23a8] ss:$24 sps:$4 sm:$0xff]  }
 0x92a   :  { %17432 = vmatprep.subr.bf16.mxu0 %v21738_v29  ;;  %v21808_v36 = vld [vmem:[#allocation8 + $0x1840] ss:$24 sps:$4 sm:$0xff]   ;;  %v21813_v29 = vld [vmem:[#allocation8 + $0x23dc] ss:$24 sps:$4 sm:$0xff]  }
 0x92c   :  { %17083 = vmatpush1.bf16.msra.mxu1 %v21733_v45  ;;  %v21816_v45 = vld [vmem:[#allocation8 + $0x1874] ss:$24 sps:$4 sm:$0xff]  }
 0x92d   :  { %17433 = vmatpush1.bf16.msra.mxu0 %v21736_v10  ;;  %17084 = vmatprep.subr.bf16.mxu1 %v21741_v63  ;;  %v21811_v10 = vld [vmem:[#allocation8 + $0x23d8] ss:$24 sps:$4 sm:$0xff]  }
 0x92e   :  { %17434 = vmatprep.subr.bf16.mxu0 %v21744_v8  ;;  %v21814_v63 = vld [vmem:[#allocation8 + $0x1870] ss:$24 sps:$4 sm:$0xff]   ;;  %v21819_v8 = vld [vmem:[#allocation8 + $0x18a4] ss:$24 sps:$4 sm:$0xff]  }
 0x930   :  { %17085 = vmatpush1.bf16.msra.mxu1 %v21739_v21  ;;  %v21822_v21 = vld [vmem:[#allocation8 + $0x18d4] ss:$24 sps:$4 sm:$0xff]  }
 0x931   :  { %17435 = vmatpush1.bf16.msra.mxu0 %v21742_v16  ;;  %17086 = vmatprep.subr.bf16.mxu1 %v21747_v52  ;;  %v21825_v16 = vld [vmem:[#allocation8 + $0x1904] ss:$24 sps:$4 sm:$0xff]   ;;  %v21823_v52 = vld [vmem:[#allocation8 + $0x1900] ss:$24 sps:$4 sm:$0xff]  }
 0x932   :  { %17436 = vmatprep.subr.bf16.mxu0 %v21750_v62  ;;  %v21828_v62 = vld [vmem:[#allocation8 + $0x1934] ss:$24 sps:$4 sm:$0xff]  }
 0x934   :  { %17087 = vmatpush1.bf16.msra.mxu1 %v21745_v35  ;;  %v21826_v35 = vld [vmem:[#allocation8 + $0x1930] ss:$24 sps:$4 sm:$0xff]  }
 0x935   :  { %17437 = vmatpush1.bf16.msra.mxu0 %v21748_v0  ;;  %17088 = vmatprep.subr.bf16.mxu1 %v21753_v4  ;;  %v21831_v0 = vld [vmem:[#allocation8 + $0x1964] ss:$24 sps:$4 sm:$0xff]   ;;  %v21829_v4 = vld [vmem:[#allocation8 + $0x1960] ss:$24 sps:$4 sm:$0xff]  }
 0x936   :  { %17438 = vmatprep.subr.bf16.mxu0 %v21756_v19  ;;  %v21834_v19 = vld [vmem:[#allocation8 + $0x1994] ss:$24 sps:$4 sm:$0xff]  }
 0x938   :  { %17089 = vmatpush1.bf16.msra.mxu1 %v21751_v12  ;;  %v21832_v12 = vld [vmem:[#allocation8 + $0x1990] ss:$24 sps:$4 sm:$0xff]  }
 0x939   :  { %17439 = vmatpush1.bf16.msra.mxu0 %v21754_v41  ;;  %17090 = vmatprep.subr.bf16.mxu1 %v21759_v20  ;;  %v21837_v41 = vld [vmem:[#allocation8 + $0x19c4] ss:$24 sps:$4 sm:$0xff]   ;;  %v21835_v20 = vld [vmem:[#allocation8 + $0x19c0] ss:$24 sps:$4 sm:$0xff]  }
 0x93a   :  { %17440 = vmatprep.subr.bf16.mxu0 %v21762_v30  ;;  %v21840_v30 = vld [vmem:[#allocation8 + $0x19f4] ss:$24 sps:$4 sm:$0xff]  }
 0x93c   :  { %17091 = vmatpush1.bf16.msra.mxu1 %v21757_v32  ;;  %v21838_v32 = vld [vmem:[#allocation8 + $0x19f0] ss:$24 sps:$4 sm:$0xff]  }
 0x93d   :  { %17441 = vmatpush1.bf16.msra.mxu0 %v21760_v39  ;;  %17092 = vmatprep.subr.bf16.mxu1 %v21765_v54  ;;  %v21843_v39 = vld [vmem:[#allocation8 + $0x1a24] ss:$24 sps:$4 sm:$0xff]   ;;  %v21841_v54 = vld [vmem:[#allocation8 + $0x1a20] ss:$24 sps:$4 sm:$0xff]  }
 0x93e   :  { %17442 = vmatprep.subr.bf16.mxu0 %v21768_v15  ;;  %v21846_v15 = vld [vmem:[#allocation8 + $0x1a54] ss:$24 sps:$4 sm:$0xff]  }
 0x940   :  { %17093 = vmatpush1.bf16.msra.mxu1 %v21763_v13  ;;  %v21844_v13 = vld [vmem:[#allocation8 + $0x1a50] ss:$24 sps:$4 sm:$0xff]  }
 0x941   :  { %17443 = vmatpush1.bf16.msra.mxu0 %v21766_v43  ;;  %17094 = vmatprep.subr.bf16.mxu1 %v21771_v60  ;;  %v21849_v43 = vld [vmem:[#allocation8 + $0x1a84] ss:$24 sps:$4 sm:$0xff]   ;;  %v21847_v60 = vld [vmem:[#allocation8 + $0x1a80] ss:$24 sps:$4 sm:$0xff]  }
 0x942   :  { %17444 = vmatprep.subr.bf16.mxu0 %v21774_v42  ;;  %v21852_v42 = vld [vmem:[#allocation8 + $0x1ab4] ss:$24 sps:$4 sm:$0xff]  }
 0x944   :  { %17095 = vmatpush1.bf16.msra.mxu1 %v21769_v34  ;;  %v21850_v34 = vld [vmem:[#allocation8 + $0x1ab0] ss:$24 sps:$4 sm:$0xff]  }
 0x945   :  { %17445 = vmatpush1.bf16.msra.mxu0 %v21772_v1  ;;  %17096 = vmatprep.subr.bf16.mxu1 %v21777_v28  ;;  %v21855_v1 = vld [vmem:[#allocation8 + $0x1ae4] ss:$24 sps:$4 sm:$0xff]   ;;  %v21853_v28 = vld [vmem:[#allocation8 + $0x1ae0] ss:$24 sps:$4 sm:$0xff]  }
 0x946   :  { %17446 = vmatprep.subr.bf16.mxu0 %v21780_v31  ;;  %v21858_v31 = vld [vmem:[#allocation8 + $0x1b14] ss:$24 sps:$4 sm:$0xff]  }
 0x948   :  { %17097 = vmatpush1.bf16.msra.mxu1 %v21775_v51  ;;  %v21856_v51 = vld [vmem:[#allocation8 + $0x1b10] ss:$24 sps:$4 sm:$0xff]  }
 0x949   :  { %17447 = vmatpush1.bf16.msra.mxu0 %v21778_v56  ;;  %17098 = vmatprep.subr.bf16.mxu1 %v21783_v59  ;;  %v21861_v56 = vld [vmem:[#allocation8 + $0x1b44] ss:$24 sps:$4 sm:$0xff]   ;;  %v21859_v59 = vld [vmem:[#allocation8 + $0x1b40] ss:$24 sps:$4 sm:$0xff]  }
 0x94a   :  { %17448 = vmatprep.subr.bf16.mxu0 %v21786_v2  ;;  %v21864_v2 = vld [vmem:[#allocation8 + $0x1b74] ss:$24 sps:$4 sm:$0xff]  }
 0x94c   :  { %17099 = vmatpush1.bf16.msra.mxu1 %v21781_v44  ;;  %v21862_v44 = vld [vmem:[#allocation8 + $0x1b70] ss:$24 sps:$4 sm:$0xff]  }
 0x94d   :  { %17449 = vmatpush1.bf16.msra.mxu0 %v21784_v49  ;;  %17100 = vmatprep.subr.bf16.mxu1 %v21789_v57  ;;  %v21867_v49 = vld [vmem:[#allocation8 + $0x1ba4] ss:$24 sps:$4 sm:$0xff]   ;;  %v21865_v57 = vld [vmem:[#allocation8 + $0x1ba0] ss:$24 sps:$4 sm:$0xff]  }
 0x94e   :  { %17450 = vmatprep.subr.bf16.mxu0 %v21792_v61  ;;  %v21870_v61 = vld [vmem:[#allocation8 + $0x1bd4] ss:$24 sps:$4 sm:$0xff]  }
 0x950   :  { %17101 = vmatpush1.bf16.msra.mxu1 %v21787_v53  ;;  %v21868_v53 = vld [vmem:[#allocation8 + $0x1bd0] ss:$24 sps:$4 sm:$0xff]  }
 0x951   :  { %17451 = vmatpush1.bf16.msra.mxu0 %v21790_v48  ;;  %17102 = vmatprep.subr.bf16.mxu1 %v21795_v24  ;;  %v21873_v48 = vld [vmem:[#allocation8 + $0x1c04] ss:$24 sps:$4 sm:$0xff]   ;;  %v21876_v24 = vld [vmem:[#allocation8 + $0x1c34] ss:$24 sps:$4 sm:$0xff]  }
 0x952   :  { %17452 = vmatprep.subr.bf16.mxu0 %v21798_v38  ;;  %v21879_v38 = vld [vmem:[#allocation8 + $0x1c64] ss:$24 sps:$4 sm:$0xff]  }
 0x954   :  { %17103 = vmatpush1.bf16.msra.mxu1 %v21793_v14  ;;  %v21877_v14 = vld [vmem:[#allocation8 + $0x1c60] ss:$24 sps:$4 sm:$0xff]  }
 0x955   :  { %17453 = vmatpush1.bf16.msra.mxu0 %v21796_v11  ;;  %17104 = vmatprep.subr.bf16.mxu1 %v21801_v58  ;;  %v21882_v11 = vld [vmem:[#allocation8 + $0x1c94] ss:$24 sps:$4 sm:$0xff]   ;;  %v21880_v58 = vld [vmem:[#allocation8 + $0x1c90] ss:$24 sps:$4 sm:$0xff]  }
 0x956   :  { %17465 = vmatprep.subr.bf16.mxu0 %v21804_v7  ;;  %v21885_v7 = vld [vmem:[#allocation8 + $0x1cc4] ss:$24 sps:$4 sm:$0xff]  }
 0x958   :  { %17455 = vmatmul.mubr.bf16.vlgmr.msra.gmra.mrb[20].mxu0 %v23026_v33  ;;  %17105 = vmatpush1.bf16.msra.mxu1 %v21799_v22  ;;  %v21817_v33 = vld [vmem:[#allocation8 + $0x18a0] ss:$24 sps:$4 sm:$0xff]  }
 0x959   :  { %17466 = vmatpush1.bf16.msra.mxu0 %v21802_v37  ;;  %17497 = vmatprep.mubr.bf16.mxu0 %v22841_v47  ;;  %v21820_v47 = vld [vmem:[#allocation8 + $0x18d0] ss:$24 sps:$4 sm:$0xff]   ;;  %v21883_v22 = vld [vmem:[#allocation8 + $0x1cc0] ss:$24 sps:$4 sm:$0xff]   ;;  %v21888_v37 = vld [vmem:[#allocation8 + $0x1cf4] ss:$24 sps:$4 sm:$0xff]  }
 0x95a   :  { %17106 = vmatprep.subr.bf16.mxu1 %v21807_v5  ;;  %17467 = vmatprep.subr.bf16.mxu0 %v21810_v17  ;;  %v21886_v5 = vld [vmem:[#allocation8 + $0x1cf0] ss:$24 sps:$4 sm:$0xff]   ;;  %v21891_v17 = vld [vmem:[#allocation8 + $0x1d24] ss:$24 sps:$4 sm:$0xff]  }
 0x95c   :  { %17107 = vmatpush1.bf16.msra.mxu1 %v21805_v50  ;;  %v21889_v50 = vld [vmem:[#allocation8 + $0x1d20] ss:$24 sps:$4 sm:$0xff]  }
 0x95d   :  { %17468 = vmatpush1.bf16.msra.mxu0 %v21808_v36  ;;  %17108 = vmatprep.subr.bf16.mxu1 %v21813_v29  ;;  %v21894_v36 = vld [vmem:[#allocation8 + $0x1d54] ss:$24 sps:$4 sm:$0xff]   ;;  %v21892_v29 = vld [vmem:[#allocation8 + $0x1d50] ss:$24 sps:$4 sm:$0xff]  }
 0x95e   :  { %17469 = vmatprep.subr.bf16.mxu0 %v21816_v45  ;;  %v21897_v45 = vld [vmem:[#allocation8 + $0x1d84] ss:$24 sps:$4 sm:$0xff]  }
 0x960   :  { %17109 = vmatpush1.bf16.msra.mxu1 %v21811_v10  ;;  %v21895_v10 = vld [vmem:[#allocation8 + $0x1d80] ss:$24 sps:$4 sm:$0xff]  }
 0x961   :  { %17470 = vmatpush1.bf16.msra.mxu0 %v21814_v63  ;;  %v21900_v63 = vld [vmem:[#allocation8 + $0x1db4] ss:$24 sps:$4 sm:$0xff]  }
 0x962   :  { %17471 = vmatprep.subr.bf16.mxu0 %v21819_v8  ;;  %v21898_v8 = vld [vmem:[#allocation8 + $0x1db0] ss:$24 sps:$4 sm:$0xff]  }
 0x963   :  { %17111 = vmatmul.mubr.bf16.vlgmr.msra.gmra.mrb[32].mxu1 %v23078_v40 }
 0x965   :  { %17472 = vmatpush1.bf16.msra.mxu0 %v21817_v33  ;;  %v21903_v33 = vld [vmem:[#allocation8 + $0x1de4] ss:$24 sps:$4 sm:$0xff]  }
 0x966   :  { %17473 = vmatprep.subr.bf16.mxu0 %v21822_v21  ;;  %v21901_v21 = vld [vmem:[#allocation8 + $0x1de0] ss:$24 sps:$4 sm:$0xff]  }
 0x969   :  { %17474 = vmatpush1.bf16.msra.mxu0 %v21820_v47  ;;  %v21906_v47 = vld [vmem:[#allocation8 + $0x1e14] ss:$24 sps:$4 sm:$0xff]  }
 0x96a   :  { %17475 = vmatprep.subr.bf16.mxu0 %v21825_v16  ;;  %v21904_v16 = vld [vmem:[#allocation8 + $0x1e10] ss:$24 sps:$4 sm:$0xff]  }
 0x96d   :  { %17476 = vmatpush1.bf16.msra.mxu0 %v21823_v52  ;;  %v21909_v52 = vld [vmem:[#allocation8 + $0x1e44] ss:$24 sps:$4 sm:$0xff]  }
 0x96e   :  { %17477 = vmatprep.subr.bf16.mxu0 %v21828_v62  ;;  %v21907_v62 = vld [vmem:[#allocation8 + $0x1e40] ss:$24 sps:$4 sm:$0xff]  }
 0x971   :  { %17478 = vmatpush1.bf16.msra.mxu0 %v21826_v35  ;;  %v21912_v35 = vld [vmem:[#allocation8 + $0x1e74] ss:$24 sps:$4 sm:$0xff]  }
 0x972   :  { %17479 = vmatprep.subr.bf16.mxu0 %v21831_v0  ;;  %v21910_v0 = vld [vmem:[#allocation8 + $0x1e70] ss:$24 sps:$4 sm:$0xff]  }
 0x975   :  { %17480 = vmatpush1.bf16.msra.mxu0 %v21829_v4  ;;  %v21915_v4 = vld [vmem:[#allocation8 + $0x1ea4] ss:$24 sps:$4 sm:$0xff]  }
 0x976   :  { %17481 = vmatprep.subr.bf16.mxu0 %v21834_v19  ;;  %v21913_v19 = vld [vmem:[#allocation8 + $0x1ea0] ss:$24 sps:$4 sm:$0xff]  }
 0x979   :  { %17482 = vmatpush1.bf16.msra.mxu0 %v21832_v12  ;;  %v21918_v12 = vld [vmem:[#allocation8 + $0x1ed4] ss:$24 sps:$4 sm:$0xff]  }
 0x97a   :  { %17483 = vmatprep.subr.bf16.mxu0 %v21837_v41  ;;  %v21916_v41 = vld [vmem:[#allocation8 + $0x1ed0] ss:$24 sps:$4 sm:$0xff]  }
 0x97d   :  { %17484 = vmatpush1.bf16.msra.mxu0 %v21835_v20  ;;  %v21921_v20 = vld [vmem:[#allocation8 + $0x1f04] ss:$24 sps:$4 sm:$0xff]  }
 0x97e   :  { %17485 = vmatprep.subr.bf16.mxu0 %v21840_v30  ;;  %v21924_v30 = vld [vmem:[#allocation8 + $0x1f34] ss:$24 sps:$4 sm:$0xff]  }
 0x981   :  { %17486 = vmatpush1.bf16.msra.mxu0 %v21838_v32  ;;  %v21927_v32 = vld [vmem:[#allocation8 + $0x1f64] ss:$24 sps:$4 sm:$0xff]  }
 0x982   :  { %17487 = vmatprep.subr.bf16.mxu0 %v21843_v39  ;;  %v21925_v39 = vld [vmem:[#allocation8 + $0x1f60] ss:$24 sps:$4 sm:$0xff]  }
 0x985   :  { %17488 = vmatpush1.bf16.msra.mxu0 %v21841_v54  ;;  %v21930_v54 = vld [vmem:[#allocation8 + $0x1f94] ss:$24 sps:$4 sm:$0xff]  }
 0x986   :  { %17489 = vmatprep.subr.bf16.mxu0 %v21846_v15  ;;  %v21928_v15 = vld [vmem:[#allocation8 + $0x1f90] ss:$24 sps:$4 sm:$0xff]  }
 0x989   :  { %17490 = vmatpush1.bf16.msra.mxu0 %v21844_v13  ;;  %v21933_v13 = vld [vmem:[#allocation8 + $0x1fc4] ss:$24 sps:$4 sm:$0xff]  }
 0x98a   :  { %17491 = vmatprep.subr.bf16.mxu0 %v21849_v43  ;;  %v21931_v43 = vld [vmem:[#allocation8 + $0x1fc0] ss:$24 sps:$4 sm:$0xff]  }
 0x98d   :  { %17492 = vmatpush1.bf16.msra.mxu0 %v21847_v60  ;;  %v21936_v60 = vld [vmem:[#allocation8 + $0x1ff4] ss:$24 sps:$4 sm:$0xff]  }
 0x98e   :  { %17493 = vmatprep.subr.bf16.mxu0 %v21852_v42  ;;  %v21934_v42 = vld [vmem:[#allocation8 + $0x1ff0] ss:$24 sps:$4 sm:$0xff]  }
 0x991   :  { %17494 = vmatpush1.bf16.msra.mxu0 %v21850_v34  ;;  %v21939_v34 = vld [vmem:[#allocation8 + $0x2024] ss:$24 sps:$4 sm:$0xff]  }
 0x992   :  { %17495 = vmatprep.subr.bf16.mxu0 %v21855_v1  ;;  %v21937_v1 = vld [vmem:[#allocation8 + $0x2020] ss:$24 sps:$4 sm:$0xff]  }
 0x995   :  { %17496 = vmatpush1.bf16.msra.mxu0 %v21853_v28  ;;  %v21942_v28 = vld [vmem:[#allocation8 + $0x2054] ss:$24 sps:$4 sm:$0xff]  }
 0x996   :  { %17508 = vmatprep.subr.bf16.mxu0 %v21858_v31  ;;  %v21940_v31 = vld [vmem:[#allocation8 + $0x2050] ss:$24 sps:$4 sm:$0xff]  }
 0x998   :  { %17498 = vmatmul.mubr.bf16.vlgmr.msra.gmra.mrb[20].mxu0 %v22839_v55  ;;  %v21871_v55 = vld [vmem:[#allocation8 + $0x1c00] ss:$24 sps:$4 sm:$0xff]  }
 0x999   :  { %17509 = vmatpush1.bf16.msra.mxu0 %v21856_v51  ;;  %17540 = vmatprep.mubr.bf16.mxu0 %v23055_v27  ;;  %v21874_v27 = vld [vmem:[#allocation8 + $0x1c30] ss:$24 sps:$4 sm:$0xff]   ;;  %v21945_v51 = vld [vmem:[#allocation8 + $0x2084] ss:$24 sps:$4 sm:$0xff]  }
 0x99a   :  { %17510 = vmatprep.subr.bf16.mxu0 %v21861_v56  ;;  %v21943_v56 = vld [vmem:[#allocation8 + $0x2080] ss:$24 sps:$4 sm:$0xff]  }
 0x99d   :  { %17511 = vmatpush1.bf16.msra.mxu0 %v21859_v59  ;;  %v21948_v59 = vld [vmem:[#allocation8 + $0x20b4] ss:$24 sps:$4 sm:$0xff]  }
 0x99e   :  { %17512 = vmatprep.subr.bf16.mxu0 %v21864_v2  ;;  %v21946_v2 = vld [vmem:[#allocation8 + $0x20b0] ss:$24 sps:$4 sm:$0xff]  }
 0x9a1   :  { %17513 = vmatpush1.bf16.msra.mxu0 %v21862_v44  ;;  %v21951_v44 = vld [vmem:[#allocation8 + $0x20e4] ss:$24 sps:$4 sm:$0xff]  }
 0x9a2   :  { %17514 = vmatprep.subr.bf16.mxu0 %v21867_v49  ;;  %v21949_v49 = vld [vmem:[#allocation8 + $0x20e0] ss:$24 sps:$4 sm:$0xff]  }
 0x9a5   :  { %17515 = vmatpush1.bf16.msra.mxu0 %v21865_v57  ;;  %v21954_v57 = vld [vmem:[#allocation8 + $0x2114] ss:$24 sps:$4 sm:$0xff]  }
 0x9a6   :  { %17516 = vmatprep.subr.bf16.mxu0 %v21870_v61  ;;  %v21952_v61 = vld [vmem:[#allocation8 + $0x2110] ss:$24 sps:$4 sm:$0xff]  }
 0x9a9   :  { %17517 = vmatpush1.bf16.msra.mxu0 %v21868_v53  ;;  %v21957_v53 = vld [vmem:[#allocation8 + $0x2144] ss:$24 sps:$4 sm:$0xff]  }
 0x9aa   :  { %17518 = vmatprep.subr.bf16.mxu0 %v21873_v48  ;;  %v21955_v48 = vld [vmem:[#allocation8 + $0x2140] ss:$24 sps:$4 sm:$0xff]  }
 0x9ad   :  { %17519 = vmatpush1.bf16.msra.mxu0 %v21871_v55  ;;  %v21960_v55 = vld [vmem:[#allocation8 + $0x2174] ss:$24 sps:$4 sm:$0xff]  }
 0x9ae   :  { %17520 = vmatprep.subr.bf16.mxu0 %v21876_v24  ;;  %v21958_v24 = vld [vmem:[#allocation8 + $0x2170] ss:$24 sps:$4 sm:$0xff]  }
 0x9b1   :  { %17521 = vmatpush1.bf16.msra.mxu0 %v21874_v27  ;;  %v21963_v27 = vld [vmem:[#allocation8 + $0x21a4] ss:$24 sps:$4 sm:$0xff]  }
 0x9b2   :  { %17522 = vmatprep.subr.bf16.mxu0 %v21879_v38  ;;  %v21961_v38 = vld [vmem:[#allocation8 + $0x21a0] ss:$24 sps:$4 sm:$0xff]  }
 0x9b5   :  { %17523 = vmatpush1.bf16.msra.mxu0 %v21877_v14  ;;  %v21966_v14 = vld [vmem:[#allocation8 + $0x21d4] ss:$24 sps:$4 sm:$0xff]  }
 0x9b6   :  { %17524 = vmatprep.subr.bf16.mxu0 %v21882_v11  ;;  %v21964_v11 = vld [vmem:[#allocation8 + $0x21d0] ss:$24 sps:$4 sm:$0xff]  }
 0x9b9   :  { %17525 = vmatpush1.bf16.msra.mxu0 %v21880_v58  ;;  %v21969_v58 = vld [vmem:[#allocation8 + $0x2204] ss:$24 sps:$4 sm:$0xff]  }
 0x9ba   :  { %17526 = vmatprep.subr.bf16.mxu0 %v21885_v7  ;;  %v21972_v7 = vld [vmem:[#allocation8 + $0x2234] ss:$24 sps:$4 sm:$0xff]  }
 0x9bd   :  { %17527 = vmatpush1.bf16.msra.mxu0 %v21883_v22  ;;  %v21975_v22 = vld [vmem:[#allocation8 + $0x2264] ss:$24 sps:$4 sm:$0xff]  }
 0x9be   :  { %17528 = vmatprep.subr.bf16.mxu0 %v21888_v37  ;;  %v21973_v37 = vld [vmem:[#allocation8 + $0x2260] ss:$24 sps:$4 sm:$0xff]  }
 0x9c1   :  { %17529 = vmatpush1.bf16.msra.mxu0 %v21886_v5  ;;  %v21978_v5 = vld [vmem:[#allocation8 + $0x2294] ss:$24 sps:$4 sm:$0xff]  }
 0x9c2   :  { %17530 = vmatprep.subr.bf16.mxu0 %v21891_v17  ;;  %v22103_v17 = vld [vmem:[#allocation10] sm:$0x3f] }
 0x9c5   :  { %17531 = vmatpush1.bf16.msra.mxu0 %v21889_v50  ;;  %v10310_v50 = vrot.slane %v22103_v17, %v22568_v9  ;;  %v21984_v9 = vld [vmem:[#allocation8 + $0x22f4] ss:$24 sps:$4 sm:$0xff]  }
 0x9c6   :  { %17532 = vmatprep.subr.bf16.mxu0 %v21894_v36  ;;  %v10314_v36 = vrot.slane %v22103_v17, %v22571_v18  ;;  %v21982_v18 = vld [vmem:[#allocation8 + $0x22f0] ss:$24 sps:$4 sm:$0xff]  }
 0x9c9   :  { %17533 = vmatpush1.bf16.msra.mxu0 %v21892_v29  ;;  %v21976_v29 = vld [vmem:[#allocation8 + $0x2290] ss:$24 sps:$4 sm:$0xff]  }
 0x9ca   :  { %17534 = vmatprep.subr.bf16.mxu0 %v21897_v45 }
 0x9cd   :  { %17535 = vmatpush1.bf16.msra.mxu0 %v21895_v10  ;;  %v21981_v10 = vld [vmem:[#allocation8 + $0x22c4] ss:$24 sps:$4 sm:$0xff]  }
 0x9ce   :  { %17536 = vmatprep.subr.bf16.mxu0 %v21900_v63 }
 0x9d1   :  { %17537 = vmatpush1.bf16.msra.mxu0 %v21898_v8 }
 0x9d2   :  { %17538 = vmatprep.subr.bf16.mxu0 %v21903_v33 }
 0x9d5   :  { %17539 = vmatpush1.bf16.msra.mxu0 %v21901_v21 }
 0x9d6   :  { %17551 = vmatprep.subr.bf16.mxu0 %v21906_v47 }
 0x9d8   :  { %17541 = vmatmul.mubr.bf16.vlgmr.msra.gmra.mrb[20].mxu0 %v23053_v25  ;;  %v21919_v25 = vld [vmem:[#allocation8 + $0x1f00] ss:$24 sps:$4 sm:$0xff]  }
 0x9d9   :  { %17552 = vmatpush1.bf16.msra.mxu0 %v21904_v16  ;;  %17583 = vmatprep.mubr.bf16.mxu0 %v22935_v23  ;;  %v21922_v23 = vld [vmem:[#allocation8 + $0x1f30] ss:$24 sps:$4 sm:$0xff]  }
 0x9da   :  { %17553 = vmatprep.subr.bf16.mxu0 %v21909_v52  ;;  %v21979_v52 = vld [vmem:[#allocation8 + $0x22c0] ss:$24 sps:$4 sm:$0xff]  }
 0x9dd   :  { %17554 = vmatpush1.bf16.msra.mxu0 %v21907_v62 }
 0x9de   :  { %17555 = vmatprep.subr.bf16.mxu0 %v21912_v35  ;;  %v21987_v35 = vld [vmem:[#allocation8 + $0x2324] ss:$24 sps:$4 sm:$0xff]  }
 0x9e1   :  { %17556 = vmatpush1.bf16.msra.mxu0 %v21910_v0  ;;  %v21985_v0 = vld [vmem:[#allocation8 + $0x2320] ss:$24 sps:$4 sm:$0xff]  }
 0x9e2   :  { %17557 = vmatprep.subr.bf16.mxu0 %v21915_v4  ;;  %v21990_v4 = vld [vmem:[#allocation8 + $0x2354] ss:$24 sps:$4 sm:$0xff]  }
 0x9e5   :  { %17558 = vmatpush1.bf16.msra.mxu0 %v21913_v19  ;;  %v21988_v19 = vld [vmem:[#allocation8 + $0x2350] ss:$24 sps:$4 sm:$0xff]  }
 0x9e6   :  { %17559 = vmatprep.subr.bf16.mxu0 %v21918_v12  ;;  %v21993_v12 = vld [vmem:[#allocation8 + $0x2384] ss:$24 sps:$4 sm:$0xff]  }
 0x9e9   :  { %17560 = vmatpush1.bf16.msra.mxu0 %v21916_v41  ;;  %v21991_v41 = vld [vmem:[#allocation8 + $0x2380] ss:$24 sps:$4 sm:$0xff]  }
 0x9ea   :  { %17561 = vmatprep.subr.bf16.mxu0 %v21921_v20  ;;  %v21996_v20 = vld [vmem:[#allocation8 + $0x23b4] ss:$24 sps:$4 sm:$0xff]  }
 0x9ed   :  { %17562 = vmatpush1.bf16.msra.mxu0 %v21919_v25  ;;  %v21994_v25 = vld [vmem:[#allocation8 + $0x23b0] ss:$24 sps:$4 sm:$0xff]  }
 0x9ee   :  { %17563 = vmatprep.subr.bf16.mxu0 %v21924_v30  ;;  %v21999_v30 = vld [vmem:[#allocation8 + $0x23e4] ss:$24 sps:$4 sm:$0xff]  }
 0x9f1   :  { %17564 = vmatpush1.bf16.msra.mxu0 %v21922_v23  ;;  %v21997_v23 = vld [vmem:[#allocation8 + $0x23e0] ss:$24 sps:$4 sm:$0xff]  }
 0x9f2   :  { %17565 = vmatprep.subr.bf16.mxu0 %v21927_v32  ;;  %v10318_v32 = vrot.slane %v22103_v17, %v22578_v26 }
 0x9f5   :  { %17566 = vmatpush1.bf16.msra.mxu0 %v21925_v39  ;;  %v10322_v39 = vrot.slane %v22103_v17, %v22589_v46 }
 0x9f6   :  { %17567 = vmatprep.subr.bf16.mxu0 %v21930_v54 }
 0x9f9   :  { %17568 = vmatpush1.bf16.msra.mxu0 %v21928_v15 }
 0x9fa   :  { %17569 = vmatprep.subr.bf16.mxu0 %v21933_v13 }
 0x9fd   :  { %17570 = vmatpush1.bf16.msra.mxu0 %v21931_v43 }
 0x9fe   :  { %17571 = vmatprep.subr.bf16.mxu0 %v21936_v60 }
 0xa01   :  { %17572 = vmatpush1.bf16.msra.mxu0 %v21934_v42 }
 0xa02   :  { %17573 = vmatprep.subr.bf16.mxu0 %v21939_v34 }
 0xa05   :  { %17574 = vmatpush1.bf16.msra.mxu0 %v21937_v1 }
 0xa06   :  { %17575 = vmatprep.subr.bf16.mxu0 %v21942_v28 }
 0xa09   :  { %17576 = vmatpush1.bf16.msra.mxu0 %v21940_v31 }
 0xa0a   :  { %17577 = vmatprep.subr.bf16.mxu0 %v21945_v51 }
 0xa0d   :  { %17578 = vmatpush1.bf16.msra.mxu0 %v21943_v56 }
 0xa0e   :  { %17579 = vmatprep.subr.bf16.mxu0 %v21948_v59 }
 0xa11   :  { %17580 = vmatpush1.bf16.msra.mxu0 %v21946_v2 }
 0xa12   :  { %17581 = vmatprep.subr.bf16.mxu0 %v21951_v44 }
 0xa15   :  { %17582 = vmatpush1.bf16.msra.mxu0 %v21949_v49 }
 0xa16   :  { %17594 = vmatprep.subr.bf16.mxu0 %v21954_v57 }
 0xa18   :  { %17584 = vmatmul.mubr.bf16.vlgmr.msra.gmra.mrb[20].mxu0 %v22933_v6  ;;  %v21967_v6 = vld [vmem:[#allocation8 + $0x2200] ss:$24 sps:$4 sm:$0xff]  }
 0xa19   :  { %17595 = vmatpush1.bf16.msra.mxu0 %v21952_v61  ;;  %17626 = vmatprep.mubr.bf16.mxu0 %v23080_v3  ;;  %v21970_v3 = vld [vmem:[#allocation8 + $0x2230] ss:$24 sps:$4 sm:$0xff]  }
 0xa1a   :  { %17596 = vmatprep.subr.bf16.mxu0 %v21957_v53 }
 0xa1d   :  { %17597 = vmatpush1.bf16.msra.mxu0 %v21955_v48 }
 0xa1e   :  { %17598 = vmatprep.subr.bf16.mxu0 %v21960_v55 }
 0xa21   :  { %17599 = vmatpush1.bf16.msra.mxu0 %v21958_v24 }
 0xa22   :  { %17600 = vmatprep.subr.bf16.mxu0 %v21963_v27 }
 0xa25   :  { %17601 = vmatpush1.bf16.msra.mxu0 %v21961_v38 }
 0xa26   :  { %17602 = vmatprep.subr.bf16.mxu0 %v21966_v14 }
 0xa29   :  { %17603 = vmatpush1.bf16.msra.mxu0 %v21964_v11 }
 0xa2a   :  { %17604 = vmatprep.subr.bf16.mxu0 %v21969_v58 }
 0xa2d   :  { %17605 = vmatpush1.bf16.msra.mxu0 %v21967_v6 }
 0xa2e   :  { %17606 = vmatprep.subr.bf16.mxu0 %v21972_v7 }
 0xa31   :  { %17607 = vmatpush1.bf16.msra.mxu0 %v21970_v3 }
 0xa32   :  { %17608 = vmatprep.subr.bf16.mxu0 %v21975_v22 }
 0xa35   :  { %17609 = vmatpush1.bf16.msra.mxu0 %v21973_v37 }
 0xa36   :  { %v17112_v45 = vpop.f32.mrb[32].mxu1  ;;  %17610 = vmatprep.subr.bf16.mxu0 %v21978_v5 }
 0xa37   :  { %v20024_v63 = vadd.f32 %v17112_v45, %v10310_v50  ;;  %v17114_v8 = vpop.f32.mrb[33].mxu1 }
 0xa38   :  { %v20025_v33 = vadd.f32 %v17114_v8, %v10314_v36  ;;  %v17116_v21 = vpop.f32.mrb[34].mxu1 }
 0xa39   :  { %17639 = vst [vmem:[#allocation11 + $0x10] sm:$0xff] %v20024_v63  ;;  %v20026_v47 = vadd.f32 %v17116_v21, %v10310_v50  ;;  %17611 = vmatpush1.bf16.msra.mxu0 %v21976_v29  ;;  %v17118_v16 = vpop.f32.mrb[35].mxu1 }
 0xa3a   :  { %17640 = vst [vmem:[#allocation11 + $0x18] sm:$0xff] %v20025_v33  ;;  %v20027_v62 = vadd.f32 %v17118_v16, %v10314_v36  ;;  %17612 = vmatprep.subr.bf16.mxu0 %v21981_v10 }
 0xa3b   :  { %17645 = vst [vmem:[#allocation11 + $0x40] sm:$0xff] %v20026_v47 }
 0xa3c   :  { %17646 = vst [vmem:[#allocation11 + $0x48] sm:$0xff] %v20027_v62 }
 0xa3d   :  { %17613 = vmatpush1.bf16.msra.mxu0 %v21979_v52 }
 0xa3e   :  { %17614 = vmatprep.subr.bf16.mxu0 %v21984_v9 }
 0xa41   :  { %17615 = vmatpush1.bf16.msra.mxu0 %v21982_v18 }
 0xa42   :  { %17616 = vmatprep.subr.bf16.mxu0 %v21987_v35 }
 0xa45   :  { %17617 = vmatpush1.bf16.msra.mxu0 %v21985_v0 }
 0xa46   :  { %17618 = vmatprep.subr.bf16.mxu0 %v21990_v4 }
 0xa49   :  { %17619 = vmatpush1.bf16.msra.mxu0 %v21988_v19 }
 0xa4a   :  { %17620 = vmatprep.subr.bf16.mxu0 %v21993_v12 }
 0xa4d   :  { %17621 = vmatpush1.bf16.msra.mxu0 %v21991_v41 }
 0xa4e   :  { %17622 = vmatprep.subr.bf16.mxu0 %v21996_v20 }
 0xa51   :  { %17623 = vmatpush1.bf16.msra.mxu0 %v21994_v25 }
 0xa52   :  { %17624 = vmatprep.subr.bf16.mxu0 %v21999_v30 }
 0xa55   :  { %17625 = vmatpush1.bf16.msra.mxu0 %v21997_v23 }
 0xa58   :  { %17627 = vmatmul.mubr.bf16.vlgmr.msra.gmra.mrb[20].mxu0 %v23078_v40 }
 0xb2b   :  { %v17628_v54 = vpop.f32.mrb[20].mxu0 }
 0xb2c   :  { %v20028_v15 = vadd.f32 %v17628_v54, %v10318_v32  ;;  %v17630_v13 = vpop.f32.mrb[21].mxu0 }
 0xb2d   :  { %v20029_v43 = vadd.f32 %v17630_v13, %v10322_v39  ;;  %v17632_v60 = vpop.f32.mrb[22].mxu0 }
 0xb2e   :  { %17641 = vst [vmem:[#allocation11 + $0x20] sm:$0xff] %v20028_v15  ;;  %v20030_v42 = vadd.f32 %v17632_v60, %v10318_v32  ;;  %v17634_v34 = vpop.f32.mrb[23].mxu0 }
 0xb2f   :  { %17642 = vst [vmem:[#allocation11 + $0x28] sm:$0xff] %v20029_v43  ;;  %v20031_v1 = vadd.f32 %v17634_v34, %v10322_v39 }
 0xb30   :  { %17647 = vst [vmem:[#allocation11 + $0x50] sm:$0xff] %v20030_v42 }
 0xb31   :  { %17648 = vst [vmem:[#allocation11 + $0x58] sm:$0xff] %v20031_v1 }
 0xb32   :  { %22225 = shalt.err (!%p22222_p2)
}
 0xb33   :  { %s22226_s9 = scalar_lea.hbm %s23151_s5, 1536 }
 0xb34   :  { %p22227_p3 = scmp.ne.s32.totalorder %s23151_s5, %s22226_s9  ;;  %p22230_p4 = scmp.lt.u32.totalorder %s22226_s9, %s23151_s5 }
 0xb36   :  { %p22232_p5 = pnand %p22230_p4, %p22227_p3 }
 0xb38   :  { %22235 = shalt.err (!%p22232_p5)
}
 0xb39   :  { %17660 = dma.vmem_to_hbm [thread:$0]  %s17655_s29, 1536, %s23151_s5, [#allocation4], %s22251_s3, %s22251_s3, %s22252_s30  }
 0xb3a   :  { %22242 = dma.done.wait [#allocation4], 1536  }
 0xb3b   :  { %22243 = vsyncadd [#allocation4], 4294965760 }
 0xb3c   :  { %17664 = vsyncpa [#allocation3], 1 }
 0xb3d   :  { %17665 = vsyncpa [#allocation6], 1 }
 0xb3e   :  { %17666 = vsyncpa [#allocation9], 1 }
 0xb3f   :  { %17667 = vsyncpa [#allocation4], 1 }

</bundles_post_ra>
